<compile_context>
chip_gen: v7x
topology: tpu7x:2x2x1
jax: 0.10.0
libtpu: 0.0.40
codegen_flags: <defaults>
</compile_context>

<pallas_src>
import functools
import math

import jax
import jax.numpy as jnp
from jax import lax
from jax.experimental import pallas as pl
from jax.experimental.pallas import tpu as pltpu

F32 = jnp.float32
BF16 = jnp.bfloat16


# ----------------------------- fused Pallas kernel --------------------------

def _make_translator_kernel(num_layers, num_heads, d_model,
                            block_b, s_enc, s_dec, v_pad):
    H = num_heads
    dk = d_model // num_heads
    scale = 1.0 / math.sqrt(dk)

    def _ln(h, g, b):
        # LayerNorm(residual sum) in f32, eps=1e-5.
        mu = jnp.mean(h, axis=-1, keepdims=True)
        var = jnp.mean((h - mu) ** 2, axis=-1, keepdims=True)
        return (h - mu) * lax.rsqrt(var + 1e-5) * g + b

    def _attn_softmax(s):
        # Internal attention softmax: approx reciprocal goes to the EUP slot.
        m = jnp.max(s, axis=-1, keepdims=True)
        e = jnp.exp(s - m)
        return e * pl.reciprocal(jnp.sum(e, axis=-1, keepdims=True), approx=True)

    def _split_heads(x, s):
        # [block_b*s, D] -> [block_b*H, s, dk]  (head-major batch dim)
        x = x.reshape(block_b, s, H, dk)
        x = jnp.transpose(x, (0, 2, 1, 3))
        return x.reshape(block_b * H, s, dk)

    def _merge_heads(x, s):
        # [block_b*H, s, dk] -> [block_b*s, D]
        x = x.reshape(block_b, H, s, dk)
        x = jnp.transpose(x, (0, 2, 1, 3))
        return x.reshape(block_b * s, d_model)

    def _mha(xq_bf, xkv_bf, sq, sk, refs, l, bias):
        wq, wk, wv, bq, bk, bv, wo, bo = refs
        q = jnp.dot(xq_bf, wq[l], preferred_element_type=F32) + bq[l]
        k = jnp.dot(xkv_bf, wk[l], preferred_element_type=F32) + bk[l]
        v = jnp.dot(xkv_bf, wv[l], preferred_element_type=F32) + bv[l]
        qh = _split_heads(q, sq).astype(BF16)
        kh = _split_heads(k, sk).astype(BF16)
        vh = _split_heads(v, sk).astype(BF16)
        # One batched contraction over (batch*heads); contracts last dims
        # (no K transpose materialized).
        s = jnp.einsum('bqd,bkd->bqk', qh, kh,
                       preferred_element_type=F32) * scale
        if bias is not None:
            s = s + bias                      # (sq, sk) broadcast over b*H
        p = _attn_softmax(s)
        o = jnp.einsum('bqk,bkd->bqd', p.astype(BF16), vh,
                       preferred_element_type=F32)
        o = _merge_heads(o, sq).astype(BF16)
        return jnp.dot(o, wo[l], preferred_element_type=F32) + bo[l]

    def _ffn(x_bf, w1, b1, w2, b2, l):
        h = jnp.maximum(
            jnp.dot(x_bf, w1[l], preferred_element_type=F32) + b1[l], 0.0)
        return jnp.dot(h.astype(BF16), w2[l], preferred_element_type=F32) + b2[l]

    def kernel(xe_ref, xd_ref, *refs):
        o_ref = refs[-1]
        it = iter(refs[:-1])
        take = lambda n: [next(it) for _ in range(n)]
        e_mha = take(8); e_ln1 = take(2); e_ffn = take(4); e_ln2 = take(2)
        ds_mha = take(8); dc_mha = take(8); d_ffn = take(4)
        d_ln1 = take(2); d_ln2 = take(2); d_ln3 = take(2)
        f_w, f_b = take(2)

        # Additive causal bias computed once, reused by all decoder layers.
        row = lax.broadcasted_iota(jnp.int32, (s_dec, s_dec), 0)
        col = lax.broadcasted_iota(jnp.int32, (s_dec, s_dec), 1)
        causal_bias = jnp.where(col <= row, 0.0, -1e9).astype(F32)

        # ------------------------------ encoder -----------------------------
        x = xe_ref[...].reshape(block_b * s_enc, d_model)       # f32
        for l in range(num_layers):  # static unroll; num_layers is tiny here
            xb = x.astype(BF16)      # hoisted cast, shared by Q/K/V
            attn = _mha(xb, xb, s_enc, s_enc, e_mha, l, bias=None)
            x = _ln(x + attn, e_ln1[0][l], e_ln1[1][l])
            ff = _ffn(x.astype(BF16), *e_ffn, l)
            x = _ln(x + ff, e_ln2[0][l], e_ln2[1][l])
        ctx_bf = x.astype(BF16)

        # ------------------------------ decoder -----------------------------
        y = xd_ref[...].reshape(block_b * s_dec, d_model)
        for l in range(num_layers):
            yb = y.astype(BF16)
            sa = _mha(yb, yb, s_dec, s_dec, ds_mha, l, bias=causal_bias)
            y = _ln(y + sa, d_ln1[0][l], d_ln1[1][l])
            ca = _mha(y.astype(BF16), ctx_bf, s_dec, s_enc, dc_mha, l, bias=None)
            y = _ln(y + ca, d_ln2[0][l], d_ln2[1][l])
            ff = _ffn(y.astype(BF16), *d_ffn, l)
            y = _ln(y + ff, d_ln3[0][l], d_ln3[1][l])

        # ----------------- final linear + softmax (lane-dense) --------------
        logits = jnp.dot(y.astype(BF16), f_w[...],
                         preferred_element_type=F32) + f_b[...]  # [M, Vp]
        m = jnp.max(logits, axis=-1, keepdims=True)
        e = jnp.exp(logits - m)
        # EXACT normalization for the user-visible distribution.
        probs = e / jnp.sum(e, axis=-1, keepdims=True)
        o_ref[...] = probs.reshape(block_b, s_dec, v_pad)

    return kernel


# ------------------------------ model (glue) --------------------------------

def positional_encoding(length, depth):
    half = depth // 2
    positions = jnp.arange(length, dtype=F32)[:, None]
    depths = jnp.arange(half, dtype=F32)[None, :] / half
    angle_rates = 1.0 / (10000.0 ** depths)
    angle_rads = positions * angle_rates
    # TODO(synk): uses the TF-tutorial [sin | cos] concat convention; switch to
    # interleaved sin/cos if the reference Encoder/Decoder interleaves.
    return jnp.concatenate([jnp.sin(angle_rads), jnp.cos(angle_rads)], axis=-1)


def init_params(key, num_layers, d_model, num_heads, dff,
                input_vocab, target_vocab, v_pad):
    keys = iter(jax.random.split(key, 256))
    L, D, F = num_layers, d_model, dff

    def w(shape, scale=0.02):
        return (scale * jax.random.normal(next(keys), shape, dtype=F32)).astype(BF16)

    zeros = lambda shape: jnp.zeros(shape, F32)
    ones = lambda shape: jnp.ones(shape, F32)

    def mha():
        # Separate (not fused) Q/K/V weights -> every in-kernel weight load is
        # a full-block load (no sub-128-lane slicing of a [D, 3D] tensor).
        return [w((L, D, D)), w((L, D, D)), w((L, D, D)),
                zeros((L, 1, D)), zeros((L, 1, D)), zeros((L, 1, D)),
                w((L, D, D)), zeros((L, 1, D))]

    ffn = lambda: [w((L, D, F)), zeros((L, 1, F)), w((L, F, D)), zeros((L, 1, D))]
    ln = lambda: [ones((L, 1, D)), zeros((L, 1, D))]

    enc = mha() + ln() + ffn() + ln()
    dec = mha() + mha() + ffn() + ln() + ln() + ln()

    # Final projection, vocab padded to v_pad lanes: weight cols past
    # target_vocab are 0, bias is -1e9 there so softmax gives exactly 0.
    fw = jnp.zeros((D, v_pad), F32).at[:, :target_vocab].set(
        0.02 * jax.random.normal(next(keys), (D, target_vocab), dtype=F32)
    ).astype(BF16)
    fb = jnp.full((1, v_pad), -1e9, F32).at[:, :target_vocab].set(0.0)

    return dict(
        enc_emb=jax.random.normal(next(keys), (input_vocab, D), dtype=F32),
        dec_emb=jax.random.normal(next(keys), (target_vocab, D), dtype=F32),
        stacks=enc + dec + [fw, fb],
    )


def translator_forward(params, enc_tokens, dec_tokens, *,
                       num_heads, target_vocab, grid_steps=None):
    stacks = params["stacks"]
    B, S_enc = enc_tokens.shape
    _, S_dec = dec_tokens.shape
    D = params["enc_emb"].shape[1]
    L = stacks[0].shape[0]
    v_pad = stacks[-2].shape[-1]

    # v7x has 2 TensorCores per chip -> keep 2 grid steps so both get work.
    # On v5e / v6e (single TC) pass grid_steps=1 to fold the whole batch into
    # one step and maximize the matmul M dimension.
    if grid_steps is None:
        grid_steps = 2 if B >= 2 else 1
    block_b = pl.cdiv(B, grid_steps)
    n_blocks = pl.cdiv(B, block_b)
    assert B % block_b == 0, "batch must divide evenly into grid blocks"

    # TODO(synk): embedding gather + positional encoding kept in plain JAX
    # (data-dependent row gather; could be fused via scalar-prefetch + per-row
    # DMA once seq/batch are large enough for it to matter).
    xe = jnp.take(params["enc_emb"], enc_tokens, axis=0) * math.sqrt(D)
    xe = (xe + positional_encoding(S_enc, D)[None]).astype(F32)
    xd = jnp.take(params["dec_emb"], dec_tokens, axis=0) * math.sqrt(D)
    xd = (xd + positional_encoding(S_dec, D)[None]).astype(F32)

    def _full(a):
        nd = a.ndim
        return pl.BlockSpec(a.shape, lambda b, _nd=nd: (0,) * _nd)

    kernel = _make_translator_kernel(L, num_heads, D,
                                     block_b, S_enc, S_dec, v_pad)

    out = pl.pallas_call(
        kernel,
        out_shape=jax.ShapeDtypeStruct((B, S_dec, v_pad), F32),
        grid=(n_blocks,),
        in_specs=[pl.BlockSpec((block_b, S_enc, D), lambda b: (b, 0, 0)),
                  pl.BlockSpec((block_b, S_dec, D), lambda b: (b, 0, 0))]
                 + [_full(a) for a in stacks],
        out_specs=pl.BlockSpec((block_b, S_dec, v_pad), lambda b: (b, 0, 0)),
        compiler_params=pltpu.CompilerParams(
            dimension_semantics=("parallel",),
            vmem_limit_bytes=32 * 1024 * 1024),
    )(xe, xd, *stacks)

    return out[:, :, :target_vocab]


# ---------------------------------- main ------------------------------------

if __name__ == "__main__":
    num_layers, d_model, num_heads, dff = 2, 32, 4, 64
    input_vocab, target_vocab = 80, 96
    V_PAD = 128  # lane-dense padded vocab for the kernel's output store
    B, S_enc, S_dec = 2, 8, 8

    key = jax.random.PRNGKey(0)
    pkey, ekey, dkey = jax.random.split(key, 3)
    params = init_params(pkey, num_layers, d_model, num_heads, dff,
                         input_vocab, target_vocab, V_PAD)

    encoder_inputs = jax.random.randint(ekey, (B, S_enc), 0, input_vocab,
                                        dtype=jnp.int32)
    decoder_inputs = jax.random.randint(dkey, (B, S_dec), 0, target_vocab,
                                        dtype=jnp.int32)

    fwd = jax.jit(functools.partial(translator_forward,
                                    num_heads=num_heads,
                                    target_vocab=target_vocab))
    out = fwd(params, encoder_inputs, decoder_inputs)
    out = jax.block_until_ready(out)

    assert out.shape == (B, S_dec, target_vocab), out.shape
    assert bool(jnp.all(out >= 0.0))
    assert bool(jnp.allclose(jnp.sum(out, axis=-1), 1.0, atol=1e-3))
    print("KERNEL_OK")
</pallas_src>

<mosaic_0001>
module attributes {stable_mosaic.version = 11 : i64} {
  func.func @kernel(%arg0: i32, %arg1: memref<1x8x32xf32, #tpu.memory_space<vmem>>, %arg2: memref<1x8x32xf32, #tpu.memory_space<vmem>>, %arg3: memref<2x32x32xbf16, #tpu.memory_space<vmem>>, %arg4: memref<2x32x32xbf16, #tpu.memory_space<vmem>>, %arg5: memref<2x32x32xbf16, #tpu.memory_space<vmem>>, %arg6: memref<2x1x32xf32, #tpu.memory_space<vmem>>, %arg7: memref<2x1x32xf32, #tpu.memory_space<vmem>>, %arg8: memref<2x1x32xf32, #tpu.memory_space<vmem>>, %arg9: memref<2x32x32xbf16, #tpu.memory_space<vmem>>, %arg10: memref<2x1x32xf32, #tpu.memory_space<vmem>>, %arg11: memref<2x1x32xf32, #tpu.memory_space<vmem>>, %arg12: memref<2x1x32xf32, #tpu.memory_space<vmem>>, %arg13: memref<2x32x64xbf16, #tpu.memory_space<vmem>>, %arg14: memref<2x1x64xf32, #tpu.memory_space<vmem>>, %arg15: memref<2x64x32xbf16, #tpu.memory_space<vmem>>, %arg16: memref<2x1x32xf32, #tpu.memory_space<vmem>>, %arg17: memref<2x1x32xf32, #tpu.memory_space<vmem>>, %arg18: memref<2x1x32xf32, #tpu.memory_space<vmem>>, %arg19: memref<2x32x32xbf16, #tpu.memory_space<vmem>>, %arg20: memref<2x32x32xbf16, #tpu.memory_space<vmem>>, %arg21: memref<2x32x32xbf16, #tpu.memory_space<vmem>>, %arg22: memref<2x1x32xf32, #tpu.memory_space<vmem>>, %arg23: memref<2x1x32xf32, #tpu.memory_space<vmem>>, %arg24: memref<2x1x32xf32, #tpu.memory_space<vmem>>, %arg25: memref<2x32x32xbf16, #tpu.memory_space<vmem>>, %arg26: memref<2x1x32xf32, #tpu.memory_space<vmem>>, %arg27: memref<2x32x32xbf16, #tpu.memory_space<vmem>>, %arg28: memref<2x32x32xbf16, #tpu.memory_space<vmem>>, %arg29: memref<2x32x32xbf16, #tpu.memory_space<vmem>>, %arg30: memref<2x1x32xf32, #tpu.memory_space<vmem>>, %arg31: memref<2x1x32xf32, #tpu.memory_space<vmem>>, %arg32: memref<2x1x32xf32, #tpu.memory_space<vmem>>, %arg33: memref<2x32x32xbf16, #tpu.memory_space<vmem>>, %arg34: memref<2x1x32xf32, #tpu.memory_space<vmem>>, %arg35: memref<2x32x64xbf16, #tpu.memory_space<vmem>>, %arg36: memref<2x1x64xf32, #tpu.memory_space<vmem>>, %arg37: memref<2x64x32xbf16, #tpu.memory_space<vmem>>, %arg38: memref<2x1x32xf32, #tpu.memory_space<vmem>>, %arg39: memref<2x1x32xf32, #tpu.memory_space<vmem>>, %arg40: memref<2x1x32xf32, #tpu.memory_space<vmem>>, %arg41: memref<2x1x32xf32, #tpu.memory_space<vmem>>, %arg42: memref<2x1x32xf32, #tpu.memory_space<vmem>>, %arg43: memref<2x1x32xf32, #tpu.memory_space<vmem>>, %arg44: memref<2x1x32xf32, #tpu.memory_space<vmem>>, %arg45: memref<32x128xbf16, #tpu.memory_space<vmem>>, %arg46: memref<1x128xf32, #tpu.memory_space<vmem>>, %arg47: memref<1x8x128xf32, #tpu.memory_space<vmem>>) attributes {dimension_semantics = [#tpu.dimension_semantics<parallel>], iteration_bounds = array<i64: 2>, scalar_prefetch = 0 : i64, scratch_operands = 0 : i64, tpu.core_type = #tpu.core_type<tc>, window_params = [{transform_indices = @transform_0, window_bounds = array<i64: 1, 8, 32>}, {transform_indices = @transform_1, window_bounds = array<i64: 1, 8, 32>}, {pipeline_mode = #tpu.pipeline_mode<synchronous>, transform_indices = @transform_2, window_bounds = array<i64: 2, 32, 32>}, {pipeline_mode = #tpu.pipeline_mode<synchronous>, transform_indices = @transform_3, window_bounds = array<i64: 2, 32, 32>}, {pipeline_mode = #tpu.pipeline_mode<synchronous>, transform_indices = @transform_4, window_bounds = array<i64: 2, 32, 32>}, {pipeline_mode = #tpu.pipeline_mode<synchronous>, transform_indices = @transform_5, window_bounds = array<i64: 2, 1, 32>}, {pipeline_mode = #tpu.pipeline_mode<synchronous>, transform_indices = @transform_6, window_bounds = array<i64: 2, 1, 32>}, {pipeline_mode = #tpu.pipeline_mode<synchronous>, transform_indices = @transform_7, window_bounds = array<i64: 2, 1, 32>}, {pipeline_mode = #tpu.pipeline_mode<synchronous>, transform_indices = @transform_8, window_bounds = array<i64: 2, 32, 32>}, {pipeline_mode = #tpu.pipeline_mode<synchronous>, transform_indices = @transform_9, window_bounds = array<i64: 2, 1, 32>}, {pipeline_mode = #tpu.pipeline_mode<synchronous>, transform_indices = @transform_10, window_bounds = array<i64: 2, 1, 32>}, {pipeline_mode = #tpu.pipeline_mode<synchronous>, transform_indices = @transform_11, window_bounds = array<i64: 2, 1, 32>}, {pipeline_mode = #tpu.pipeline_mode<synchronous>, transform_indices = @transform_12, window_bounds = array<i64: 2, 32, 64>}, {pipeline_mode = #tpu.pipeline_mode<synchronous>, transform_indices = @transform_13, window_bounds = array<i64: 2, 1, 64>}, {pipeline_mode = #tpu.pipeline_mode<synchronous>, transform_indices = @transform_14, window_bounds = array<i64: 2, 64, 32>}, {pipeline_mode = #tpu.pipeline_mode<synchronous>, transform_indices = @transform_15, window_bounds = array<i64: 2, 1, 32>}, {pipeline_mode = #tpu.pipeline_mode<synchronous>, transform_indices = @transform_16, window_bounds = array<i64: 2, 1, 32>}, {pipeline_mode = #tpu.pipeline_mode<synchronous>, transform_indices = @transform_17, window_bounds = array<i64: 2, 1, 32>}, {pipeline_mode = #tpu.pipeline_mode<synchronous>, transform_indices = @transform_18, window_bounds = array<i64: 2, 32, 32>}, {pipeline_mode = #tpu.pipeline_mode<synchronous>, transform_indices = @transform_19, window_bounds = array<i64: 2, 32, 32>}, {pipeline_mode = #tpu.pipeline_mode<synchronous>, transform_indices = @transform_20, window_bounds = array<i64: 2, 32, 32>}, {pipeline_mode = #tpu.pipeline_mode<synchronous>, transform_indices = @transform_21, window_bounds = array<i64: 2, 1, 32>}, {pipeline_mode = #tpu.pipeline_mode<synchronous>, transform_indices = @transform_22, window_bounds = array<i64: 2, 1, 32>}, {pipeline_mode = #tpu.pipeline_mode<synchronous>, transform_indices = @transform_23, window_bounds = array<i64: 2, 1, 32>}, {pipeline_mode = #tpu.pipeline_mode<synchronous>, transform_indices = @transform_24, window_bounds = array<i64: 2, 32, 32>}, {pipeline_mode = #tpu.pipeline_mode<synchronous>, transform_indices = @transform_25, window_bounds = array<i64: 2, 1, 32>}, {pipeline_mode = #tpu.pipeline_mode<synchronous>, transform_indices = @transform_26, window_bounds = array<i64: 2, 32, 32>}, {pipeline_mode = #tpu.pipeline_mode<synchronous>, transform_indices = @transform_27, window_bounds = array<i64: 2, 32, 32>}, {pipeline_mode = #tpu.pipeline_mode<synchronous>, transform_indices = @transform_28, window_bounds = array<i64: 2, 32, 32>}, {pipeline_mode = #tpu.pipeline_mode<synchronous>, transform_indices = @transform_29, window_bounds = array<i64: 2, 1, 32>}, {pipeline_mode = #tpu.pipeline_mode<synchronous>, transform_indices = @transform_30, window_bounds = array<i64: 2, 1, 32>}, {pipeline_mode = #tpu.pipeline_mode<synchronous>, transform_indices = @transform_31, window_bounds = array<i64: 2, 1, 32>}, {pipeline_mode = #tpu.pipeline_mode<synchronous>, transform_indices = @transform_32, window_bounds = array<i64: 2, 32, 32>}, {pipeline_mode = #tpu.pipeline_mode<synchronous>, transform_indices = @transform_33, window_bounds = array<i64: 2, 1, 32>}, {pipeline_mode = #tpu.pipeline_mode<synchronous>, transform_indices = @transform_34, window_bounds = array<i64: 2, 32, 64>}, {pipeline_mode = #tpu.pipeline_mode<synchronous>, transform_indices = @transform_35, window_bounds = array<i64: 2, 1, 64>}, {pipeline_mode = #tpu.pipeline_mode<synchronous>, transform_indices = @transform_36, window_bounds = array<i64: 2, 64, 32>}, {pipeline_mode = #tpu.pipeline_mode<synchronous>, transform_indices = @transform_37, window_bounds = array<i64: 2, 1, 32>}, {pipeline_mode = #tpu.pipeline_mode<synchronous>, transform_indices = @transform_38, window_bounds = array<i64: 2, 1, 32>}, {pipeline_mode = #tpu.pipeline_mode<synchronous>, transform_indices = @transform_39, window_bounds = array<i64: 2, 1, 32>}, {pipeline_mode = #tpu.pipeline_mode<synchronous>, transform_indices = @transform_40, window_bounds = array<i64: 2, 1, 32>}, {pipeline_mode = #tpu.pipeline_mode<synchronous>, transform_indices = @transform_41, window_bounds = array<i64: 2, 1, 32>}, {pipeline_mode = #tpu.pipeline_mode<synchronous>, transform_indices = @transform_42, window_bounds = array<i64: 2, 1, 32>}, {pipeline_mode = #tpu.pipeline_mode<synchronous>, transform_indices = @transform_43, window_bounds = array<i64: 2, 1, 32>}, {pipeline_mode = #tpu.pipeline_mode<synchronous>, transform_indices = @transform_44, window_bounds = array<i64: 32, 128>}, {pipeline_mode = #tpu.pipeline_mode<synchronous>, transform_indices = @transform_45, window_bounds = array<i64: 1, 128>}, {transform_indices = @transform_46, window_bounds = array<i64: 1, 8, 128>}]} {
    %0 = tpu.iota {dimensions = array<i32: 0>} : vector<8x8xi32>
    %1 = tpu.iota {dimensions = array<i32: 1>} : vector<8x8xi32>
    %2 = arith.cmpi sle, %1, %0 : vector<8x8xi32>
    %cst = arith.constant 0.000000e+00 : f32
    %cst_0 = arith.constant -1.000000e+09 : f32
    %3 = vector.broadcast %cst : f32 to vector<8x8xf32>
    %4 = vector.broadcast %cst_0 : f32 to vector<8x8xf32>
    %5 = arith.select %2, %3, %4 : vector<8x8xi1>, vector<8x8xf32>
    %c0 = arith.constant 0 : index
    %c0_1 = arith.constant 0 : index
    %c0_2 = arith.constant 0 : index
    %6 = vector.load %arg1[%c0, %c0_1, %c0_2] : memref<1x8x32xf32, #tpu.memory_space<vmem>>, vector<1x8x32xf32>
    %7 = vector.shape_cast %6 : vector<1x8x32xf32> to vector<8x32xf32>
    %8 = arith.truncf %7 : vector<8x32xf32> to vector<8x32xbf16>
    %c0_3 = arith.constant 0 : index
    %c0_4 = arith.constant 0 : index
    %c0_5 = arith.constant 0 : index
    %9 = vector.load %arg3[%c0_3, %c0_4, %c0_5] : memref<2x32x32xbf16, #tpu.memory_space<vmem>>, vector<1x32x32xbf16>
    %10 = vector.shape_cast %9 : vector<1x32x32xbf16> to vector<32x32xbf16>
    %cst_6 = arith.constant dense<0.000000e+00> : vector<8x32xf32>
    %11 = tpu.matmul %8, %10, %cst_6 {dimension_numbers = #tpu.dot_dimension_numbers<[1], [0], [0], [1], [0, 0, 1, 1], [], []>} : vector<8x32xbf16>, vector<32x32xbf16>, vector<8x32xf32> -> vector<8x32xf32>
    %c0_7 = arith.constant 0 : index
    %c0_8 = arith.constant 0 : index
    %c0_9 = arith.constant 0 : index
    %12 = vector.load %arg6[%c0_7, %c0_8, %c0_9] : memref<2x1x32xf32, #tpu.memory_space<vmem>>, vector<1x1x32xf32>
    %13 = vector.shape_cast %12 : vector<1x1x32xf32> to vector<1x32xf32>
    %14 = vector.broadcast %13 : vector<1x32xf32> to vector<8x32xf32>
    %15 = arith.addf %11, %14 : vector<8x32xf32>
    %c0_10 = arith.constant 0 : index
    %c0_11 = arith.constant 0 : index
    %c0_12 = arith.constant 0 : index
    %16 = vector.load %arg4[%c0_10, %c0_11, %c0_12] : memref<2x32x32xbf16, #tpu.memory_space<vmem>>, vector<1x32x32xbf16>
    %17 = vector.shape_cast %16 : vector<1x32x32xbf16> to vector<32x32xbf16>
    %cst_13 = arith.constant dense<0.000000e+00> : vector<8x32xf32>
    %18 = tpu.matmul %8, %17, %cst_13 {dimension_numbers = #tpu.dot_dimension_numbers<[1], [0], [0], [1], [0, 0, 1, 1], [], []>} : vector<8x32xbf16>, vector<32x32xbf16>, vector<8x32xf32> -> vector<8x32xf32>
    %c0_14 = arith.constant 0 : index
    %c0_15 = arith.constant 0 : index
    %c0_16 = arith.constant 0 : index
    %19 = vector.load %arg7[%c0_14, %c0_15, %c0_16] : memref<2x1x32xf32, #tpu.memory_space<vmem>>, vector<1x1x32xf32>
    %20 = vector.shape_cast %19 : vector<1x1x32xf32> to vector<1x32xf32>
    %21 = vector.broadcast %20 : vector<1x32xf32> to vector<8x32xf32>
    %22 = arith.addf %18, %21 : vector<8x32xf32>
    %c0_17 = arith.constant 0 : index
    %c0_18 = arith.constant 0 : index
    %c0_19 = arith.constant 0 : index
    %23 = vector.load %arg5[%c0_17, %c0_18, %c0_19] : memref<2x32x32xbf16, #tpu.memory_space<vmem>>, vector<1x32x32xbf16>
    %24 = vector.shape_cast %23 : vector<1x32x32xbf16> to vector<32x32xbf16>
    %cst_20 = arith.constant dense<0.000000e+00> : vector<8x32xf32>
    %25 = tpu.matmul %8, %24, %cst_20 {dimension_numbers = #tpu.dot_dimension_numbers<[1], [0], [0], [1], [0, 0, 1, 1], [], []>} : vector<8x32xbf16>, vector<32x32xbf16>, vector<8x32xf32> -> vector<8x32xf32>
    %c0_21 = arith.constant 0 : index
    %c0_22 = arith.constant 0 : index
    %c0_23 = arith.constant 0 : index
    %26 = vector.load %arg8[%c0_21, %c0_22, %c0_23] : memref<2x1x32xf32, #tpu.memory_space<vmem>>, vector<1x1x32xf32>
    %27 = vector.shape_cast %26 : vector<1x1x32xf32> to vector<1x32xf32>
    %28 = vector.broadcast %27 : vector<1x32xf32> to vector<8x32xf32>
    %29 = arith.addf %25, %28 : vector<8x32xf32>
    %30 = vector.shape_cast %15 : vector<8x32xf32> to vector<1x8x4x8xf32>
    %31 = tpu.transpose %30, [0, 2, 1, 3] : vector<1x8x4x8xf32> -> vector<1x4x8x8xf32>
    %32 = vector.shape_cast %31 : vector<1x4x8x8xf32> to vector<4x8x8xf32>
    %33 = arith.truncf %32 : vector<4x8x8xf32> to vector<4x8x8xbf16>
    %34 = vector.shape_cast %22 : vector<8x32xf32> to vector<1x8x4x8xf32>
    %35 = tpu.transpose %34, [0, 2, 1, 3] : vector<1x8x4x8xf32> -> vector<1x4x8x8xf32>
    %36 = vector.shape_cast %35 : vector<1x4x8x8xf32> to vector<4x8x8xf32>
    %37 = arith.truncf %36 : vector<4x8x8xf32> to vector<4x8x8xbf16>
    %38 = vector.shape_cast %29 : vector<8x32xf32> to vector<1x8x4x8xf32>
    %39 = tpu.transpose %38, [0, 2, 1, 3] : vector<1x8x4x8xf32> -> vector<1x4x8x8xf32>
    %40 = vector.shape_cast %39 : vector<1x4x8x8xf32> to vector<4x8x8xf32>
    %41 = arith.truncf %40 : vector<4x8x8xf32> to vector<4x8x8xbf16>
    "tpu.trace_start"() <{level = 10 : i32, message = "bqd,bkd->bqk"}> : () -> ()
    %cst_24 = arith.constant dense<0.000000e+00> : vector<4x8x8xf32>
    %42 = tpu.matmul %33, %37, %cst_24 {dimension_numbers = #tpu.dot_dimension_numbers<[2], [2], [1], [1], [0, 0, 0, 1, 1, 1], [0], [0]>} : vector<4x8x8xbf16>, vector<4x8x8xbf16>, vector<4x8x8xf32> -> vector<4x8x8xf32>
    "tpu.trace_stop"() : () -> ()
    %cst_25 = arith.constant 0.353553385 : f32
    %43 = vector.broadcast %cst_25 : f32 to vector<4x8x8xf32>
    %44 = arith.mulf %42, %43 : vector<4x8x8xf32>
    %cst_26 = arith.constant dense<0xFF800000> : vector<4x8xf32>
    %45 = vector.multi_reduction <maximumf>, %44, %cst_26 [2] : vector<4x8x8xf32> to vector<4x8xf32>
    %46 = vector.shape_cast %45 : vector<4x8xf32> to vector<4x8x1xf32>
    %47 = vector.broadcast %46 : vector<4x8x1xf32> to vector<4x8x8xf32>
    %48 = arith.subf %44, %47 : vector<4x8x8xf32>
    %49 = math.exp %48 : vector<4x8x8xf32>
    %cst_27 = arith.constant dense<0.000000e+00> : vector<4x8xf32>
    %50 = vector.multi_reduction <add>, %49, %cst_27 [2] : vector<4x8x8xf32> to vector<4x8xf32>
    %51 = vector.shape_cast %50 : vector<4x8xf32> to vector<4x8x1xf32>
    %52 = tpu.reciprocal %51 {approx = true} : vector<4x8x1xf32> -> vector<4x8x1xf32>
    %53 = vector.broadcast %52 : vector<4x8x1xf32> to vector<4x8x8xf32>
    %54 = arith.mulf %49, %53 : vector<4x8x8xf32>
    %55 = arith.truncf %54 : vector<4x8x8xf32> to vector<4x8x8xbf16>
    "tpu.trace_start"() <{level = 10 : i32, message = "bqk,bkd->bqd"}> : () -> ()
    %cst_28 = arith.constant dense<0.000000e+00> : vector<4x8x8xf32>
    %56 = tpu.matmul %55, %41, %cst_28 {dimension_numbers = #tpu.dot_dimension_numbers<[2], [1], [1], [2], [0, 0, 0, 1, 1, 2], [0], [0]>} : vector<4x8x8xbf16>, vector<4x8x8xbf16>, vector<4x8x8xf32> -> vector<4x8x8xf32>
    "tpu.trace_stop"() : () -> ()
    %57 = vector.shape_cast %56 : vector<4x8x8xf32> to vector<1x4x8x8xf32>
    %58 = tpu.transpose %57, [0, 2, 1, 3] : vector<1x4x8x8xf32> -> vector<1x8x4x8xf32>
    %59 = vector.shape_cast %58 : vector<1x8x4x8xf32> to vector<8x32xf32>
    %60 = arith.truncf %59 : vector<8x32xf32> to vector<8x32xbf16>
    %c0_29 = arith.constant 0 : index
    %c0_30 = arith.constant 0 : index
    %c0_31 = arith.constant 0 : index
    %61 = vector.load %arg9[%c0_29, %c0_30, %c0_31] : memref<2x32x32xbf16, #tpu.memory_space<vmem>>, vector<1x32x32xbf16>
    %62 = vector.shape_cast %61 : vector<1x32x32xbf16> to vector<32x32xbf16>
    %cst_32 = arith.constant dense<0.000000e+00> : vector<8x32xf32>
    %63 = tpu.matmul %60, %62, %cst_32 {dimension_numbers = #tpu.dot_dimension_numbers<[1], [0], [0], [1], [0, 0, 1, 1], [], []>} : vector<8x32xbf16>, vector<32x32xbf16>, vector<8x32xf32> -> vector<8x32xf32>
    %c0_33 = arith.constant 0 : index
    %c0_34 = arith.constant 0 : index
    %c0_35 = arith.constant 0 : index
    %64 = vector.load %arg10[%c0_33, %c0_34, %c0_35] : memref<2x1x32xf32, #tpu.memory_space<vmem>>, vector<1x1x32xf32>
    %65 = vector.shape_cast %64 : vector<1x1x32xf32> to vector<1x32xf32>
    %66 = vector.broadcast %65 : vector<1x32xf32> to vector<8x32xf32>
    %67 = arith.addf %63, %66 : vector<8x32xf32>
    %68 = arith.addf %7, %67 : vector<8x32xf32>
    %c0_36 = arith.constant 0 : index
    %c0_37 = arith.constant 0 : index
    %c0_38 = arith.constant 0 : index
    %69 = vector.load %arg11[%c0_36, %c0_37, %c0_38] : memref<2x1x32xf32, #tpu.memory_space<vmem>>, vector<1x1x32xf32>
    %70 = vector.shape_cast %69 : vector<1x1x32xf32> to vector<1x32xf32>
    %c0_39 = arith.constant 0 : index
    %c0_40 = arith.constant 0 : index
    %c0_41 = arith.constant 0 : index
    %71 = vector.load %arg12[%c0_39, %c0_40, %c0_41] : memref<2x1x32xf32, #tpu.memory_space<vmem>>, vector<1x1x32xf32>
    %72 = vector.shape_cast %71 : vector<1x1x32xf32> to vector<1x32xf32>
    %cst_42 = arith.constant dense<0.000000e+00> : vector<8xf32>
    %73 = vector.multi_reduction <add>, %68, %cst_42 [1] : vector<8x32xf32> to vector<8xf32>
    %74 = vector.shape_cast %73 : vector<8xf32> to vector<8x1xf32>
    %cst_43 = arith.constant 3.200000e+01 : f32
    %75 = vector.broadcast %cst_43 : f32 to vector<8x1xf32>
    %76 = arith.divf %74, %75 : vector<8x1xf32>
    %77 = vector.broadcast %76 : vector<8x1xf32> to vector<8x32xf32>
    %78 = arith.subf %68, %77 : vector<8x32xf32>
    %79 = arith.mulf %78, %78 : vector<8x32xf32>
    %cst_44 = arith.constant dense<0.000000e+00> : vector<8xf32>
    %80 = vector.multi_reduction <add>, %79, %cst_44 [1] : vector<8x32xf32> to vector<8xf32>
    %81 = vector.shape_cast %80 : vector<8xf32> to vector<8x1xf32>
    %cst_45 = arith.constant 3.200000e+01 : f32
    %82 = vector.broadcast %cst_45 : f32 to vector<8x1xf32>
    %83 = arith.divf %81, %82 : vector<8x1xf32>
    %84 = vector.broadcast %76 : vector<8x1xf32> to vector<8x32xf32>
    %85 = arith.subf %68, %84 : vector<8x32xf32>
    %cst_46 = arith.constant 9.99999974E-6 : f32
    %86 = vector.broadcast %cst_46 : f32 to vector<8x1xf32>
    %87 = arith.addf %83, %86 : vector<8x1xf32>
    %88 = math.rsqrt %87 : vector<8x1xf32>
    %89 = vector.broadcast %88 : vector<8x1xf32> to vector<8x32xf32>
    %90 = arith.mulf %85, %89 : vector<8x32xf32>
    %91 = vector.broadcast %70 : vector<1x32xf32> to vector<8x32xf32>
    %92 = arith.mulf %90, %91 : vector<8x32xf32>
    %93 = vector.broadcast %72 : vector<1x32xf32> to vector<8x32xf32>
    %94 = arith.addf %92, %93 : vector<8x32xf32>
    %95 = arith.truncf %94 : vector<8x32xf32> to vector<8x32xbf16>
    %c0_47 = arith.constant 0 : index
    %c0_48 = arith.constant 0 : index
    %c0_49 = arith.constant 0 : index
    %96 = vector.load %arg13[%c0_47, %c0_48, %c0_49] : memref<2x32x64xbf16, #tpu.memory_space<vmem>>, vector<1x32x64xbf16>
    %97 = vector.shape_cast %96 : vector<1x32x64xbf16> to vector<32x64xbf16>
    %cst_50 = arith.constant dense<0.000000e+00> : vector<8x64xf32>
    %98 = tpu.matmul %95, %97, %cst_50 {dimension_numbers = #tpu.dot_dimension_numbers<[1], [0], [0], [1], [0, 0, 1, 1], [], []>} : vector<8x32xbf16>, vector<32x64xbf16>, vector<8x64xf32> -> vector<8x64xf32>
    %c0_51 = arith.constant 0 : index
    %c0_52 = arith.constant 0 : index
    %c0_53 = arith.constant 0 : index
    %99 = vector.load %arg14[%c0_51, %c0_52, %c0_53] : memref<2x1x64xf32, #tpu.memory_space<vmem>>, vector<1x1x64xf32>
    %100 = vector.shape_cast %99 : vector<1x1x64xf32> to vector<1x64xf32>
    %101 = vector.broadcast %100 : vector<1x64xf32> to vector<8x64xf32>
    %102 = arith.addf %98, %101 : vector<8x64xf32>
    %cst_54 = arith.constant 0.000000e+00 : f32
    %103 = vector.broadcast %cst_54 : f32 to vector<8x64xf32>
    %104 = arith.maximumf %102, %103 : vector<8x64xf32>
    %105 = arith.truncf %104 : vector<8x64xf32> to vector<8x64xbf16>
    %c0_55 = arith.constant 0 : index
    %c0_56 = arith.constant 0 : index
    %c0_57 = arith.constant 0 : index
    %106 = vector.load %arg15[%c0_55, %c0_56, %c0_57] : memref<2x64x32xbf16, #tpu.memory_space<vmem>>, vector<1x64x32xbf16>
    %107 = vector.shape_cast %106 : vector<1x64x32xbf16> to vector<64x32xbf16>
    %cst_58 = arith.constant dense<0.000000e+00> : vector<8x32xf32>
    %108 = tpu.matmul %105, %107, %cst_58 {dimension_numbers = #tpu.dot_dimension_numbers<[1], [0], [0], [1], [0, 0, 1, 1], [], []>} : vector<8x64xbf16>, vector<64x32xbf16>, vector<8x32xf32> -> vector<8x32xf32>
    %c0_59 = arith.constant 0 : index
    %c0_60 = arith.constant 0 : index
    %c0_61 = arith.constant 0 : index
    %109 = vector.load %arg16[%c0_59, %c0_60, %c0_61] : memref<2x1x32xf32, #tpu.memory_space<vmem>>, vector<1x1x32xf32>
    %110 = vector.shape_cast %109 : vector<1x1x32xf32> to vector<1x32xf32>
    %111 = vector.broadcast %110 : vector<1x32xf32> to vector<8x32xf32>
    %112 = arith.addf %108, %111 : vector<8x32xf32>
    %113 = arith.addf %94, %112 : vector<8x32xf32>
    %c0_62 = arith.constant 0 : index
    %c0_63 = arith.constant 0 : index
    %c0_64 = arith.constant 0 : index
    %114 = vector.load %arg17[%c0_62, %c0_63, %c0_64] : memref<2x1x32xf32, #tpu.memory_space<vmem>>, vector<1x1x32xf32>
    %115 = vector.shape_cast %114 : vector<1x1x32xf32> to vector<1x32xf32>
    %c0_65 = arith.constant 0 : index
    %c0_66 = arith.constant 0 : index
    %c0_67 = arith.constant 0 : index
    %116 = vector.load %arg18[%c0_65, %c0_66, %c0_67] : memref<2x1x32xf32, #tpu.memory_space<vmem>>, vector<1x1x32xf32>
    %117 = vector.shape_cast %116 : vector<1x1x32xf32> to vector<1x32xf32>
    %cst_68 = arith.constant dense<0.000000e+00> : vector<8xf32>
    %118 = vector.multi_reduction <add>, %113, %cst_68 [1] : vector<8x32xf32> to vector<8xf32>
    %119 = vector.shape_cast %118 : vector<8xf32> to vector<8x1xf32>
    %cst_69 = arith.constant 3.200000e+01 : f32
    %120 = vector.broadcast %cst_69 : f32 to vector<8x1xf32>
    %121 = arith.divf %119, %120 : vector<8x1xf32>
    %122 = vector.broadcast %121 : vector<8x1xf32> to vector<8x32xf32>
    %123 = arith.subf %113, %122 : vector<8x32xf32>
    %124 = arith.mulf %123, %123 : vector<8x32xf32>
    %cst_70 = arith.constant dense<0.000000e+00> : vector<8xf32>
    %125 = vector.multi_reduction <add>, %124, %cst_70 [1] : vector<8x32xf32> to vector<8xf32>
    %126 = vector.shape_cast %125 : vector<8xf32> to vector<8x1xf32>
    %cst_71 = arith.constant 3.200000e+01 : f32
    %127 = vector.broadcast %cst_71 : f32 to vector<8x1xf32>
    %128 = arith.divf %126, %127 : vector<8x1xf32>
    %129 = vector.broadcast %121 : vector<8x1xf32> to vector<8x32xf32>
    %130 = arith.subf %113, %129 : vector<8x32xf32>
    %cst_72 = arith.constant 9.99999974E-6 : f32
    %131 = vector.broadcast %cst_72 : f32 to vector<8x1xf32>
    %132 = arith.addf %128, %131 : vector<8x1xf32>
    %133 = math.rsqrt %132 : vector<8x1xf32>
    %134 = vector.broadcast %133 : vector<8x1xf32> to vector<8x32xf32>
    %135 = arith.mulf %130, %134 : vector<8x32xf32>
    %136 = vector.broadcast %115 : vector<1x32xf32> to vector<8x32xf32>
    %137 = arith.mulf %135, %136 : vector<8x32xf32>
    %138 = vector.broadcast %117 : vector<1x32xf32> to vector<8x32xf32>
    %139 = arith.addf %137, %138 : vector<8x32xf32>
    %140 = arith.truncf %139 : vector<8x32xf32> to vector<8x32xbf16>
    %c1 = arith.constant 1 : index
    %c0_73 = arith.constant 0 : index
    %c0_74 = arith.constant 0 : index
    %141 = vector.load %arg3[%c1, %c0_73, %c0_74] : memref<2x32x32xbf16, #tpu.memory_space<vmem>>, vector<1x32x32xbf16>
    %142 = vector.shape_cast %141 : vector<1x32x32xbf16> to vector<32x32xbf16>
    %cst_75 = arith.constant dense<0.000000e+00> : vector<8x32xf32>
    %143 = tpu.matmul %140, %142, %cst_75 {dimension_numbers = #tpu.dot_dimension_numbers<[1], [0], [0], [1], [0, 0, 1, 1], [], []>} : vector<8x32xbf16>, vector<32x32xbf16>, vector<8x32xf32> -> vector<8x32xf32>
    %c1_76 = arith.constant 1 : index
    %c0_77 = arith.constant 0 : index
    %c0_78 = arith.constant 0 : index
    %144 = vector.load %arg6[%c1_76, %c0_77, %c0_78] : memref<2x1x32xf32, #tpu.memory_space<vmem>>, vector<1x1x32xf32>
    %145 = vector.shape_cast %144 : vector<1x1x32xf32> to vector<1x32xf32>
    %146 = vector.broadcast %145 : vector<1x32xf32> to vector<8x32xf32>
    %147 = arith.addf %143, %146 : vector<8x32xf32>
    %c1_79 = arith.constant 1 : index
    %c0_80 = arith.constant 0 : index
    %c0_81 = arith.constant 0 : index
    %148 = vector.load %arg4[%c1_79, %c0_80, %c0_81] : memref<2x32x32xbf16, #tpu.memory_space<vmem>>, vector<1x32x32xbf16>
    %149 = vector.shape_cast %148 : vector<1x32x32xbf16> to vector<32x32xbf16>
    %cst_82 = arith.constant dense<0.000000e+00> : vector<8x32xf32>
    %150 = tpu.matmul %140, %149, %cst_82 {dimension_numbers = #tpu.dot_dimension_numbers<[1], [0], [0], [1], [0, 0, 1, 1], [], []>} : vector<8x32xbf16>, vector<32x32xbf16>, vector<8x32xf32> -> vector<8x32xf32>
    %c1_83 = arith.constant 1 : index
    %c0_84 = arith.constant 0 : index
    %c0_85 = arith.constant 0 : index
    %151 = vector.load %arg7[%c1_83, %c0_84, %c0_85] : memref<2x1x32xf32, #tpu.memory_space<vmem>>, vector<1x1x32xf32>
    %152 = vector.shape_cast %151 : vector<1x1x32xf32> to vector<1x32xf32>
    %153 = vector.broadcast %152 : vector<1x32xf32> to vector<8x32xf32>
    %154 = arith.addf %150, %153 : vector<8x32xf32>
    %c1_86 = arith.constant 1 : index
    %c0_87 = arith.constant 0 : index
    %c0_88 = arith.constant 0 : index
    %155 = vector.load %arg5[%c1_86, %c0_87, %c0_88] : memref<2x32x32xbf16, #tpu.memory_space<vmem>>, vector<1x32x32xbf16>
    %156 = vector.shape_cast %155 : vector<1x32x32xbf16> to vector<32x32xbf16>
    %cst_89 = arith.constant dense<0.000000e+00> : vector<8x32xf32>
    %157 = tpu.matmul %140, %156, %cst_89 {dimension_numbers = #tpu.dot_dimension_numbers<[1], [0], [0], [1], [0, 0, 1, 1], [], []>} : vector<8x32xbf16>, vector<32x32xbf16>, vector<8x32xf32> -> vector<8x32xf32>
    %c1_90 = arith.constant 1 : index
    %c0_91 = arith.constant 0 : index
    %c0_92 = arith.constant 0 : index
    %158 = vector.load %arg8[%c1_90, %c0_91, %c0_92] : memref<2x1x32xf32, #tpu.memory_space<vmem>>, vector<1x1x32xf32>
    %159 = vector.shape_cast %158 : vector<1x1x32xf32> to vector<1x32xf32>
    %160 = vector.broadcast %159 : vector<1x32xf32> to vector<8x32xf32>
    %161 = arith.addf %157, %160 : vector<8x32xf32>
    %162 = vector.shape_cast %147 : vector<8x32xf32> to vector<1x8x4x8xf32>
    %163 = tpu.transpose %162, [0, 2, 1, 3] : vector<1x8x4x8xf32> -> vector<1x4x8x8xf32>
    %164 = vector.shape_cast %163 : vector<1x4x8x8xf32> to vector<4x8x8xf32>
    %165 = arith.truncf %164 : vector<4x8x8xf32> to vector<4x8x8xbf16>
    %166 = vector.shape_cast %154 : vector<8x32xf32> to vector<1x8x4x8xf32>
    %167 = tpu.transpose %166, [0, 2, 1, 3] : vector<1x8x4x8xf32> -> vector<1x4x8x8xf32>
    %168 = vector.shape_cast %167 : vector<1x4x8x8xf32> to vector<4x8x8xf32>
    %169 = arith.truncf %168 : vector<4x8x8xf32> to vector<4x8x8xbf16>
    %170 = vector.shape_cast %161 : vector<8x32xf32> to vector<1x8x4x8xf32>
    %171 = tpu.transpose %170, [0, 2, 1, 3] : vector<1x8x4x8xf32> -> vector<1x4x8x8xf32>
    %172 = vector.shape_cast %171 : vector<1x4x8x8xf32> to vector<4x8x8xf32>
    %173 = arith.truncf %172 : vector<4x8x8xf32> to vector<4x8x8xbf16>
    "tpu.trace_start"() <{level = 10 : i32, message = "bqd,bkd->bqk"}> : () -> ()
    %cst_93 = arith.constant dense<0.000000e+00> : vector<4x8x8xf32>
    %174 = tpu.matmul %165, %169, %cst_93 {dimension_numbers = #tpu.dot_dimension_numbers<[2], [2], [1], [1], [0, 0, 0, 1, 1, 1], [0], [0]>} : vector<4x8x8xbf16>, vector<4x8x8xbf16>, vector<4x8x8xf32> -> vector<4x8x8xf32>
    "tpu.trace_stop"() : () -> ()
    %cst_94 = arith.constant 0.353553385 : f32
    %175 = vector.broadcast %cst_94 : f32 to vector<4x8x8xf32>
    %176 = arith.mulf %174, %175 : vector<4x8x8xf32>
    %cst_95 = arith.constant dense<0xFF800000> : vector<4x8xf32>
    %177 = vector.multi_reduction <maximumf>, %176, %cst_95 [2] : vector<4x8x8xf32> to vector<4x8xf32>
    %178 = vector.shape_cast %177 : vector<4x8xf32> to vector<4x8x1xf32>
    %179 = vector.broadcast %178 : vector<4x8x1xf32> to vector<4x8x8xf32>
    %180 = arith.subf %176, %179 : vector<4x8x8xf32>
    %181 = math.exp %180 : vector<4x8x8xf32>
    %cst_96 = arith.constant dense<0.000000e+00> : vector<4x8xf32>
    %182 = vector.multi_reduction <add>, %181, %cst_96 [2] : vector<4x8x8xf32> to vector<4x8xf32>
    %183 = vector.shape_cast %182 : vector<4x8xf32> to vector<4x8x1xf32>
    %184 = tpu.reciprocal %183 {approx = true} : vector<4x8x1xf32> -> vector<4x8x1xf32>
    %185 = vector.broadcast %184 : vector<4x8x1xf32> to vector<4x8x8xf32>
    %186 = arith.mulf %181, %185 : vector<4x8x8xf32>
    %187 = arith.truncf %186 : vector<4x8x8xf32> to vector<4x8x8xbf16>
    "tpu.trace_start"() <{level = 10 : i32, message = "bqk,bkd->bqd"}> : () -> ()
    %cst_97 = arith.constant dense<0.000000e+00> : vector<4x8x8xf32>
    %188 = tpu.matmul %187, %173, %cst_97 {dimension_numbers = #tpu.dot_dimension_numbers<[2], [1], [1], [2], [0, 0, 0, 1, 1, 2], [0], [0]>} : vector<4x8x8xbf16>, vector<4x8x8xbf16>, vector<4x8x8xf32> -> vector<4x8x8xf32>
    "tpu.trace_stop"() : () -> ()
    %189 = vector.shape_cast %188 : vector<4x8x8xf32> to vector<1x4x8x8xf32>
    %190 = tpu.transpose %189, [0, 2, 1, 3] : vector<1x4x8x8xf32> -> vector<1x8x4x8xf32>
    %191 = vector.shape_cast %190 : vector<1x8x4x8xf32> to vector<8x32xf32>
    %192 = arith.truncf %191 : vector<8x32xf32> to vector<8x32xbf16>
    %c1_98 = arith.constant 1 : index
    %c0_99 = arith.constant 0 : index
    %c0_100 = arith.constant 0 : index
    %193 = vector.load %arg9[%c1_98, %c0_99, %c0_100] : memref<2x32x32xbf16, #tpu.memory_space<vmem>>, vector<1x32x32xbf16>
    %194 = vector.shape_cast %193 : vector<1x32x32xbf16> to vector<32x32xbf16>
    %cst_101 = arith.constant dense<0.000000e+00> : vector<8x32xf32>
    %195 = tpu.matmul %192, %194, %cst_101 {dimension_numbers = #tpu.dot_dimension_numbers<[1], [0], [0], [1], [0, 0, 1, 1], [], []>} : vector<8x32xbf16>, vector<32x32xbf16>, vector<8x32xf32> -> vector<8x32xf32>
    %c1_102 = arith.constant 1 : index
    %c0_103 = arith.constant 0 : index
    %c0_104 = arith.constant 0 : index
    %196 = vector.load %arg10[%c1_102, %c0_103, %c0_104] : memref<2x1x32xf32, #tpu.memory_space<vmem>>, vector<1x1x32xf32>
    %197 = vector.shape_cast %196 : vector<1x1x32xf32> to vector<1x32xf32>
    %198 = vector.broadcast %197 : vector<1x32xf32> to vector<8x32xf32>
    %199 = arith.addf %195, %198 : vector<8x32xf32>
    %200 = arith.addf %139, %199 : vector<8x32xf32>
    %c1_105 = arith.constant 1 : index
    %c0_106 = arith.constant 0 : index
    %c0_107 = arith.constant 0 : index
    %201 = vector.load %arg11[%c1_105, %c0_106, %c0_107] : memref<2x1x32xf32, #tpu.memory_space<vmem>>, vector<1x1x32xf32>
    %202 = vector.shape_cast %201 : vector<1x1x32xf32> to vector<1x32xf32>
    %c1_108 = arith.constant 1 : index
    %c0_109 = arith.constant 0 : index
    %c0_110 = arith.constant 0 : index
    %203 = vector.load %arg12[%c1_108, %c0_109, %c0_110] : memref<2x1x32xf32, #tpu.memory_space<vmem>>, vector<1x1x32xf32>
    %204 = vector.shape_cast %203 : vector<1x1x32xf32> to vector<1x32xf32>
    %cst_111 = arith.constant dense<0.000000e+00> : vector<8xf32>
    %205 = vector.multi_reduction <add>, %200, %cst_111 [1] : vector<8x32xf32> to vector<8xf32>
    %206 = vector.shape_cast %205 : vector<8xf32> to vector<8x1xf32>
    %cst_112 = arith.constant 3.200000e+01 : f32
    %207 = vector.broadcast %cst_112 : f32 to vector<8x1xf32>
    %208 = arith.divf %206, %207 : vector<8x1xf32>
    %209 = vector.broadcast %208 : vector<8x1xf32> to vector<8x32xf32>
    %210 = arith.subf %200, %209 : vector<8x32xf32>
    %211 = arith.mulf %210, %210 : vector<8x32xf32>
    %cst_113 = arith.constant dense<0.000000e+00> : vector<8xf32>
    %212 = vector.multi_reduction <add>, %211, %cst_113 [1] : vector<8x32xf32> to vector<8xf32>
    %213 = vector.shape_cast %212 : vector<8xf32> to vector<8x1xf32>
    %cst_114 = arith.constant 3.200000e+01 : f32
    %214 = vector.broadcast %cst_114 : f32 to vector<8x1xf32>
    %215 = arith.divf %213, %214 : vector<8x1xf32>
    %216 = vector.broadcast %208 : vector<8x1xf32> to vector<8x32xf32>
    %217 = arith.subf %200, %216 : vector<8x32xf32>
    %cst_115 = arith.constant 9.99999974E-6 : f32
    %218 = vector.broadcast %cst_115 : f32 to vector<8x1xf32>
    %219 = arith.addf %215, %218 : vector<8x1xf32>
    %220 = math.rsqrt %219 : vector<8x1xf32>
    %221 = vector.broadcast %220 : vector<8x1xf32> to vector<8x32xf32>
    %222 = arith.mulf %217, %221 : vector<8x32xf32>
    %223 = vector.broadcast %202 : vector<1x32xf32> to vector<8x32xf32>
    %224 = arith.mulf %222, %223 : vector<8x32xf32>
    %225 = vector.broadcast %204 : vector<1x32xf32> to vector<8x32xf32>
    %226 = arith.addf %224, %225 : vector<8x32xf32>
    %227 = arith.truncf %226 : vector<8x32xf32> to vector<8x32xbf16>
    %c1_116 = arith.constant 1 : index
    %c0_117 = arith.constant 0 : index
    %c0_118 = arith.constant 0 : index
    %228 = vector.load %arg13[%c1_116, %c0_117, %c0_118] : memref<2x32x64xbf16, #tpu.memory_space<vmem>>, vector<1x32x64xbf16>
    %229 = vector.shape_cast %228 : vector<1x32x64xbf16> to vector<32x64xbf16>
    %cst_119 = arith.constant dense<0.000000e+00> : vector<8x64xf32>
    %230 = tpu.matmul %227, %229, %cst_119 {dimension_numbers = #tpu.dot_dimension_numbers<[1], [0], [0], [1], [0, 0, 1, 1], [], []>} : vector<8x32xbf16>, vector<32x64xbf16>, vector<8x64xf32> -> vector<8x64xf32>
    %c1_120 = arith.constant 1 : index
    %c0_121 = arith.constant 0 : index
    %c0_122 = arith.constant 0 : index
    %231 = vector.load %arg14[%c1_120, %c0_121, %c0_122] : memref<2x1x64xf32, #tpu.memory_space<vmem>>, vector<1x1x64xf32>
    %232 = vector.shape_cast %231 : vector<1x1x64xf32> to vector<1x64xf32>
    %233 = vector.broadcast %232 : vector<1x64xf32> to vector<8x64xf32>
    %234 = arith.addf %230, %233 : vector<8x64xf32>
    %cst_123 = arith.constant 0.000000e+00 : f32
    %235 = vector.broadcast %cst_123 : f32 to vector<8x64xf32>
    %236 = arith.maximumf %234, %235 : vector<8x64xf32>
    %237 = arith.truncf %236 : vector<8x64xf32> to vector<8x64xbf16>
    %c1_124 = arith.constant 1 : index
    %c0_125 = arith.constant 0 : index
    %c0_126 = arith.constant 0 : index
    %238 = vector.load %arg15[%c1_124, %c0_125, %c0_126] : memref<2x64x32xbf16, #tpu.memory_space<vmem>>, vector<1x64x32xbf16>
    %239 = vector.shape_cast %238 : vector<1x64x32xbf16> to vector<64x32xbf16>
    %cst_127 = arith.constant dense<0.000000e+00> : vector<8x32xf32>
    %240 = tpu.matmul %237, %239, %cst_127 {dimension_numbers = #tpu.dot_dimension_numbers<[1], [0], [0], [1], [0, 0, 1, 1], [], []>} : vector<8x64xbf16>, vector<64x32xbf16>, vector<8x32xf32> -> vector<8x32xf32>
    %c1_128 = arith.constant 1 : index
    %c0_129 = arith.constant 0 : index
    %c0_130 = arith.constant 0 : index
    %241 = vector.load %arg16[%c1_128, %c0_129, %c0_130] : memref<2x1x32xf32, #tpu.memory_space<vmem>>, vector<1x1x32xf32>
    %242 = vector.shape_cast %241 : vector<1x1x32xf32> to vector<1x32xf32>
    %243 = vector.broadcast %242 : vector<1x32xf32> to vector<8x32xf32>
    %244 = arith.addf %240, %243 : vector<8x32xf32>
    %245 = arith.addf %226, %244 : vector<8x32xf32>
    %c1_131 = arith.constant 1 : index
    %c0_132 = arith.constant 0 : index
    %c0_133 = arith.constant 0 : index
    %246 = vector.load %arg17[%c1_131, %c0_132, %c0_133] : memref<2x1x32xf32, #tpu.memory_space<vmem>>, vector<1x1x32xf32>
    %247 = vector.shape_cast %246 : vector<1x1x32xf32> to vector<1x32xf32>
    %c1_134 = arith.constant 1 : index
    %c0_135 = arith.constant 0 : index
    %c0_136 = arith.constant 0 : index
    %248 = vector.load %arg18[%c1_134, %c0_135, %c0_136] : memref<2x1x32xf32, #tpu.memory_space<vmem>>, vector<1x1x32xf32>
    %249 = vector.shape_cast %248 : vector<1x1x32xf32> to vector<1x32xf32>
    %cst_137 = arith.constant dense<0.000000e+00> : vector<8xf32>
    %250 = vector.multi_reduction <add>, %245, %cst_137 [1] : vector<8x32xf32> to vector<8xf32>
    %251 = vector.shape_cast %250 : vector<8xf32> to vector<8x1xf32>
    %cst_138 = arith.constant 3.200000e+01 : f32
    %252 = vector.broadcast %cst_138 : f32 to vector<8x1xf32>
    %253 = arith.divf %251, %252 : vector<8x1xf32>
    %254 = vector.broadcast %253 : vector<8x1xf32> to vector<8x32xf32>
    %255 = arith.subf %245, %254 : vector<8x32xf32>
    %256 = arith.mulf %255, %255 : vector<8x32xf32>
    %cst_139 = arith.constant dense<0.000000e+00> : vector<8xf32>
    %257 = vector.multi_reduction <add>, %256, %cst_139 [1] : vector<8x32xf32> to vector<8xf32>
    %258 = vector.shape_cast %257 : vector<8xf32> to vector<8x1xf32>
    %cst_140 = arith.constant 3.200000e+01 : f32
    %259 = vector.broadcast %cst_140 : f32 to vector<8x1xf32>
    %260 = arith.divf %258, %259 : vector<8x1xf32>
    %261 = vector.broadcast %253 : vector<8x1xf32> to vector<8x32xf32>
    %262 = arith.subf %245, %261 : vector<8x32xf32>
    %cst_141 = arith.constant 9.99999974E-6 : f32
    %263 = vector.broadcast %cst_141 : f32 to vector<8x1xf32>
    %264 = arith.addf %260, %263 : vector<8x1xf32>
    %265 = math.rsqrt %264 : vector<8x1xf32>
    %266 = vector.broadcast %265 : vector<8x1xf32> to vector<8x32xf32>
    %267 = arith.mulf %262, %266 : vector<8x32xf32>
    %268 = vector.broadcast %247 : vector<1x32xf32> to vector<8x32xf32>
    %269 = arith.mulf %267, %268 : vector<8x32xf32>
    %270 = vector.broadcast %249 : vector<1x32xf32> to vector<8x32xf32>
    %271 = arith.addf %269, %270 : vector<8x32xf32>
    %272 = arith.truncf %271 : vector<8x32xf32> to vector<8x32xbf16>
    %c0_142 = arith.constant 0 : index
    %c0_143 = arith.constant 0 : index
    %c0_144 = arith.constant 0 : index
    %273 = vector.load %arg2[%c0_142, %c0_143, %c0_144] : memref<1x8x32xf32, #tpu.memory_space<vmem>>, vector<1x8x32xf32>
    %274 = vector.shape_cast %273 : vector<1x8x32xf32> to vector<8x32xf32>
    %275 = arith.truncf %274 : vector<8x32xf32> to vector<8x32xbf16>
    %c0_145 = arith.constant 0 : index
    %c0_146 = arith.constant 0 : index
    %c0_147 = arith.constant 0 : index
    %276 = vector.load %arg19[%c0_145, %c0_146, %c0_147] : memref<2x32x32xbf16, #tpu.memory_space<vmem>>, vector<1x32x32xbf16>
    %277 = vector.shape_cast %276 : vector<1x32x32xbf16> to vector<32x32xbf16>
    %cst_148 = arith.constant dense<0.000000e+00> : vector<8x32xf32>
    %278 = tpu.matmul %275, %277, %cst_148 {dimension_numbers = #tpu.dot_dimension_numbers<[1], [0], [0], [1], [0, 0, 1, 1], [], []>} : vector<8x32xbf16>, vector<32x32xbf16>, vector<8x32xf32> -> vector<8x32xf32>
    %c0_149 = arith.constant 0 : index
    %c0_150 = arith.constant 0 : index
    %c0_151 = arith.constant 0 : index
    %279 = vector.load %arg22[%c0_149, %c0_150, %c0_151] : memref<2x1x32xf32, #tpu.memory_space<vmem>>, vector<1x1x32xf32>
    %280 = vector.shape_cast %279 : vector<1x1x32xf32> to vector<1x32xf32>
    %281 = vector.broadcast %280 : vector<1x32xf32> to vector<8x32xf32>
    %282 = arith.addf %278, %281 : vector<8x32xf32>
    %c0_152 = arith.constant 0 : index
    %c0_153 = arith.constant 0 : index
    %c0_154 = arith.constant 0 : index
    %283 = vector.load %arg20[%c0_152, %c0_153, %c0_154] : memref<2x32x32xbf16, #tpu.memory_space<vmem>>, vector<1x32x32xbf16>
    %284 = vector.shape_cast %283 : vector<1x32x32xbf16> to vector<32x32xbf16>
    %cst_155 = arith.constant dense<0.000000e+00> : vector<8x32xf32>
    %285 = tpu.matmul %275, %284, %cst_155 {dimension_numbers = #tpu.dot_dimension_numbers<[1], [0], [0], [1], [0, 0, 1, 1], [], []>} : vector<8x32xbf16>, vector<32x32xbf16>, vector<8x32xf32> -> vector<8x32xf32>
    %c0_156 = arith.constant 0 : index
    %c0_157 = arith.constant 0 : index
    %c0_158 = arith.constant 0 : index
    %286 = vector.load %arg23[%c0_156, %c0_157, %c0_158] : memref<2x1x32xf32, #tpu.memory_space<vmem>>, vector<1x1x32xf32>
    %287 = vector.shape_cast %286 : vector<1x1x32xf32> to vector<1x32xf32>
    %288 = vector.broadcast %287 : vector<1x32xf32> to vector<8x32xf32>
    %289 = arith.addf %285, %288 : vector<8x32xf32>
    %c0_159 = arith.constant 0 : index
    %c0_160 = arith.constant 0 : index
    %c0_161 = arith.constant 0 : index
    %290 = vector.load %arg21[%c0_159, %c0_160, %c0_161] : memref<2x32x32xbf16, #tpu.memory_space<vmem>>, vector<1x32x32xbf16>
    %291 = vector.shape_cast %290 : vector<1x32x32xbf16> to vector<32x32xbf16>
    %cst_162 = arith.constant dense<0.000000e+00> : vector<8x32xf32>
    %292 = tpu.matmul %275, %291, %cst_162 {dimension_numbers = #tpu.dot_dimension_numbers<[1], [0], [0], [1], [0, 0, 1, 1], [], []>} : vector<8x32xbf16>, vector<32x32xbf16>, vector<8x32xf32> -> vector<8x32xf32>
    %c0_163 = arith.constant 0 : index
    %c0_164 = arith.constant 0 : index
    %c0_165 = arith.constant 0 : index
    %293 = vector.load %arg24[%c0_163, %c0_164, %c0_165] : memref<2x1x32xf32, #tpu.memory_space<vmem>>, vector<1x1x32xf32>
    %294 = vector.shape_cast %293 : vector<1x1x32xf32> to vector<1x32xf32>
    %295 = vector.broadcast %294 : vector<1x32xf32> to vector<8x32xf32>
    %296 = arith.addf %292, %295 : vector<8x32xf32>
    %297 = vector.shape_cast %282 : vector<8x32xf32> to vector<1x8x4x8xf32>
    %298 = tpu.transpose %297, [0, 2, 1, 3] : vector<1x8x4x8xf32> -> vector<1x4x8x8xf32>
    %299 = vector.shape_cast %298 : vector<1x4x8x8xf32> to vector<4x8x8xf32>
    %300 = arith.truncf %299 : vector<4x8x8xf32> to vector<4x8x8xbf16>
    %301 = vector.shape_cast %289 : vector<8x32xf32> to vector<1x8x4x8xf32>
    %302 = tpu.transpose %301, [0, 2, 1, 3] : vector<1x8x4x8xf32> -> vector<1x4x8x8xf32>
    %303 = vector.shape_cast %302 : vector<1x4x8x8xf32> to vector<4x8x8xf32>
    %304 = arith.truncf %303 : vector<4x8x8xf32> to vector<4x8x8xbf16>
    %305 = vector.shape_cast %296 : vector<8x32xf32> to vector<1x8x4x8xf32>
    %306 = tpu.transpose %305, [0, 2, 1, 3] : vector<1x8x4x8xf32> -> vector<1x4x8x8xf32>
    %307 = vector.shape_cast %306 : vector<1x4x8x8xf32> to vector<4x8x8xf32>
    %308 = arith.truncf %307 : vector<4x8x8xf32> to vector<4x8x8xbf16>
    "tpu.trace_start"() <{level = 10 : i32, message = "bqd,bkd->bqk"}> : () -> ()
    %cst_166 = arith.constant dense<0.000000e+00> : vector<4x8x8xf32>
    %309 = tpu.matmul %300, %304, %cst_166 {dimension_numbers = #tpu.dot_dimension_numbers<[2], [2], [1], [1], [0, 0, 0, 1, 1, 1], [0], [0]>} : vector<4x8x8xbf16>, vector<4x8x8xbf16>, vector<4x8x8xf32> -> vector<4x8x8xf32>
    "tpu.trace_stop"() : () -> ()
    %cst_167 = arith.constant 0.353553385 : f32
    %310 = vector.broadcast %cst_167 : f32 to vector<4x8x8xf32>
    %311 = arith.mulf %309, %310 : vector<4x8x8xf32>
    %312 = vector.shape_cast %5 : vector<8x8xf32> to vector<1x8x8xf32>
    %313 = vector.broadcast %312 : vector<1x8x8xf32> to vector<4x8x8xf32>
    %314 = arith.addf %311, %313 : vector<4x8x8xf32>
    %cst_168 = arith.constant dense<0xFF800000> : vector<4x8xf32>
    %315 = vector.multi_reduction <maximumf>, %314, %cst_168 [2] : vector<4x8x8xf32> to vector<4x8xf32>
    %316 = vector.shape_cast %315 : vector<4x8xf32> to vector<4x8x1xf32>
    %317 = vector.broadcast %316 : vector<4x8x1xf32> to vector<4x8x8xf32>
    %318 = arith.subf %314, %317 : vector<4x8x8xf32>
    %319 = math.exp %318 : vector<4x8x8xf32>
    %cst_169 = arith.constant dense<0.000000e+00> : vector<4x8xf32>
    %320 = vector.multi_reduction <add>, %319, %cst_169 [2] : vector<4x8x8xf32> to vector<4x8xf32>
    %321 = vector.shape_cast %320 : vector<4x8xf32> to vector<4x8x1xf32>
    %322 = tpu.reciprocal %321 {approx = true} : vector<4x8x1xf32> -> vector<4x8x1xf32>
    %323 = vector.broadcast %322 : vector<4x8x1xf32> to vector<4x8x8xf32>
    %324 = arith.mulf %319, %323 : vector<4x8x8xf32>
    %325 = arith.truncf %324 : vector<4x8x8xf32> to vector<4x8x8xbf16>
    "tpu.trace_start"() <{level = 10 : i32, message = "bqk,bkd->bqd"}> : () -> ()
    %cst_170 = arith.constant dense<0.000000e+00> : vector<4x8x8xf32>
    %326 = tpu.matmul %325, %308, %cst_170 {dimension_numbers = #tpu.dot_dimension_numbers<[2], [1], [1], [2], [0, 0, 0, 1, 1, 2], [0], [0]>} : vector<4x8x8xbf16>, vector<4x8x8xbf16>, vector<4x8x8xf32> -> vector<4x8x8xf32>
    "tpu.trace_stop"() : () -> ()
    %327 = vector.shape_cast %326 : vector<4x8x8xf32> to vector<1x4x8x8xf32>
    %328 = tpu.transpose %327, [0, 2, 1, 3] : vector<1x4x8x8xf32> -> vector<1x8x4x8xf32>
    %329 = vector.shape_cast %328 : vector<1x8x4x8xf32> to vector<8x32xf32>
    %330 = arith.truncf %329 : vector<8x32xf32> to vector<8x32xbf16>
    %c0_171 = arith.constant 0 : index
    %c0_172 = arith.constant 0 : index
    %c0_173 = arith.constant 0 : index
    %331 = vector.load %arg25[%c0_171, %c0_172, %c0_173] : memref<2x32x32xbf16, #tpu.memory_space<vmem>>, vector<1x32x32xbf16>
    %332 = vector.shape_cast %331 : vector<1x32x32xbf16> to vector<32x32xbf16>
    %cst_174 = arith.constant dense<0.000000e+00> : vector<8x32xf32>
    %333 = tpu.matmul %330, %332, %cst_174 {dimension_numbers = #tpu.dot_dimension_numbers<[1], [0], [0], [1], [0, 0, 1, 1], [], []>} : vector<8x32xbf16>, vector<32x32xbf16>, vector<8x32xf32> -> vector<8x32xf32>
    %c0_175 = arith.constant 0 : index
    %c0_176 = arith.constant 0 : index
    %c0_177 = arith.constant 0 : index
    %334 = vector.load %arg26[%c0_175, %c0_176, %c0_177] : memref<2x1x32xf32, #tpu.memory_space<vmem>>, vector<1x1x32xf32>
    %335 = vector.shape_cast %334 : vector<1x1x32xf32> to vector<1x32xf32>
    %336 = vector.broadcast %335 : vector<1x32xf32> to vector<8x32xf32>
    %337 = arith.addf %333, %336 : vector<8x32xf32>
    %338 = arith.addf %274, %337 : vector<8x32xf32>
    %c0_178 = arith.constant 0 : index
    %c0_179 = arith.constant 0 : index
    %c0_180 = arith.constant 0 : index
    %339 = vector.load %arg39[%c0_178, %c0_179, %c0_180] : memref<2x1x32xf32, #tpu.memory_space<vmem>>, vector<1x1x32xf32>
    %340 = vector.shape_cast %339 : vector<1x1x32xf32> to vector<1x32xf32>
    %c0_181 = arith.constant 0 : index
    %c0_182 = arith.constant 0 : index
    %c0_183 = arith.constant 0 : index
    %341 = vector.load %arg40[%c0_181, %c0_182, %c0_183] : memref<2x1x32xf32, #tpu.memory_space<vmem>>, vector<1x1x32xf32>
    %342 = vector.shape_cast %341 : vector<1x1x32xf32> to vector<1x32xf32>
    %cst_184 = arith.constant dense<0.000000e+00> : vector<8xf32>
    %343 = vector.multi_reduction <add>, %338, %cst_184 [1] : vector<8x32xf32> to vector<8xf32>
    %344 = vector.shape_cast %343 : vector<8xf32> to vector<8x1xf32>
    %cst_185 = arith.constant 3.200000e+01 : f32
    %345 = vector.broadcast %cst_185 : f32 to vector<8x1xf32>
    %346 = arith.divf %344, %345 : vector<8x1xf32>
    %347 = vector.broadcast %346 : vector<8x1xf32> to vector<8x32xf32>
    %348 = arith.subf %338, %347 : vector<8x32xf32>
    %349 = arith.mulf %348, %348 : vector<8x32xf32>
    %cst_186 = arith.constant dense<0.000000e+00> : vector<8xf32>
    %350 = vector.multi_reduction <add>, %349, %cst_186 [1] : vector<8x32xf32> to vector<8xf32>
    %351 = vector.shape_cast %350 : vector<8xf32> to vector<8x1xf32>
    %cst_187 = arith.constant 3.200000e+01 : f32
    %352 = vector.broadcast %cst_187 : f32 to vector<8x1xf32>
    %353 = arith.divf %351, %352 : vector<8x1xf32>
    %354 = vector.broadcast %346 : vector<8x1xf32> to vector<8x32xf32>
    %355 = arith.subf %338, %354 : vector<8x32xf32>
    %cst_188 = arith.constant 9.99999974E-6 : f32
    %356 = vector.broadcast %cst_188 : f32 to vector<8x1xf32>
    %357 = arith.addf %353, %356 : vector<8x1xf32>
    %358 = math.rsqrt %357 : vector<8x1xf32>
    %359 = vector.broadcast %358 : vector<8x1xf32> to vector<8x32xf32>
    %360 = arith.mulf %355, %359 : vector<8x32xf32>
    %361 = vector.broadcast %340 : vector<1x32xf32> to vector<8x32xf32>
    %362 = arith.mulf %360, %361 : vector<8x32xf32>
    %363 = vector.broadcast %342 : vector<1x32xf32> to vector<8x32xf32>
    %364 = arith.addf %362, %363 : vector<8x32xf32>
    %365 = arith.truncf %364 : vector<8x32xf32> to vector<8x32xbf16>
    %c0_189 = arith.constant 0 : index
    %c0_190 = arith.constant 0 : index
    %c0_191 = arith.constant 0 : index
    %366 = vector.load %arg27[%c0_189, %c0_190, %c0_191] : memref<2x32x32xbf16, #tpu.memory_space<vmem>>, vector<1x32x32xbf16>
    %367 = vector.shape_cast %366 : vector<1x32x32xbf16> to vector<32x32xbf16>
    %cst_192 = arith.constant dense<0.000000e+00> : vector<8x32xf32>
    %368 = tpu.matmul %365, %367, %cst_192 {dimension_numbers = #tpu.dot_dimension_numbers<[1], [0], [0], [1], [0, 0, 1, 1], [], []>} : vector<8x32xbf16>, vector<32x32xbf16>, vector<8x32xf32> -> vector<8x32xf32>
    %c0_193 = arith.constant 0 : index
    %c0_194 = arith.constant 0 : index
    %c0_195 = arith.constant 0 : index
    %369 = vector.load %arg30[%c0_193, %c0_194, %c0_195] : memref<2x1x32xf32, #tpu.memory_space<vmem>>, vector<1x1x32xf32>
    %370 = vector.shape_cast %369 : vector<1x1x32xf32> to vector<1x32xf32>
    %371 = vector.broadcast %370 : vector<1x32xf32> to vector<8x32xf32>
    %372 = arith.addf %368, %371 : vector<8x32xf32>
    %c0_196 = arith.constant 0 : index
    %c0_197 = arith.constant 0 : index
    %c0_198 = arith.constant 0 : index
    %373 = vector.load %arg28[%c0_196, %c0_197, %c0_198] : memref<2x32x32xbf16, #tpu.memory_space<vmem>>, vector<1x32x32xbf16>
    %374 = vector.shape_cast %373 : vector<1x32x32xbf16> to vector<32x32xbf16>
    %cst_199 = arith.constant dense<0.000000e+00> : vector<8x32xf32>
    %375 = tpu.matmul %272, %374, %cst_199 {dimension_numbers = #tpu.dot_dimension_numbers<[1], [0], [0], [1], [0, 0, 1, 1], [], []>} : vector<8x32xbf16>, vector<32x32xbf16>, vector<8x32xf32> -> vector<8x32xf32>
    %c0_200 = arith.constant 0 : index
    %c0_201 = arith.constant 0 : index
    %c0_202 = arith.constant 0 : index
    %376 = vector.load %arg31[%c0_200, %c0_201, %c0_202] : memref<2x1x32xf32, #tpu.memory_space<vmem>>, vector<1x1x32xf32>
    %377 = vector.shape_cast %376 : vector<1x1x32xf32> to vector<1x32xf32>
    %378 = vector.broadcast %377 : vector<1x32xf32> to vector<8x32xf32>
    %379 = arith.addf %375, %378 : vector<8x32xf32>
    %c0_203 = arith.constant 0 : index
    %c0_204 = arith.constant 0 : index
    %c0_205 = arith.constant 0 : index
    %380 = vector.load %arg29[%c0_203, %c0_204, %c0_205] : memref<2x32x32xbf16, #tpu.memory_space<vmem>>, vector<1x32x32xbf16>
    %381 = vector.shape_cast %380 : vector<1x32x32xbf16> to vector<32x32xbf16>
    %cst_206 = arith.constant dense<0.000000e+00> : vector<8x32xf32>
    %382 = tpu.matmul %272, %381, %cst_206 {dimension_numbers = #tpu.dot_dimension_numbers<[1], [0], [0], [1], [0, 0, 1, 1], [], []>} : vector<8x32xbf16>, vector<32x32xbf16>, vector<8x32xf32> -> vector<8x32xf32>
    %c0_207 = arith.constant 0 : index
    %c0_208 = arith.constant 0 : index
    %c0_209 = arith.constant 0 : index
    %383 = vector.load %arg32[%c0_207, %c0_208, %c0_209] : memref<2x1x32xf32, #tpu.memory_space<vmem>>, vector<1x1x32xf32>
    %384 = vector.shape_cast %383 : vector<1x1x32xf32> to vector<1x32xf32>
    %385 = vector.broadcast %384 : vector<1x32xf32> to vector<8x32xf32>
    %386 = arith.addf %382, %385 : vector<8x32xf32>
    %387 = vector.shape_cast %372 : vector<8x32xf32> to vector<1x8x4x8xf32>
    %388 = tpu.transpose %387, [0, 2, 1, 3] : vector<1x8x4x8xf32> -> vector<1x4x8x8xf32>
    %389 = vector.shape_cast %388 : vector<1x4x8x8xf32> to vector<4x8x8xf32>
    %390 = arith.truncf %389 : vector<4x8x8xf32> to vector<4x8x8xbf16>
    %391 = vector.shape_cast %379 : vector<8x32xf32> to vector<1x8x4x8xf32>
    %392 = tpu.transpose %391, [0, 2, 1, 3] : vector<1x8x4x8xf32> -> vector<1x4x8x8xf32>
    %393 = vector.shape_cast %392 : vector<1x4x8x8xf32> to vector<4x8x8xf32>
    %394 = arith.truncf %393 : vector<4x8x8xf32> to vector<4x8x8xbf16>
    %395 = vector.shape_cast %386 : vector<8x32xf32> to vector<1x8x4x8xf32>
    %396 = tpu.transpose %395, [0, 2, 1, 3] : vector<1x8x4x8xf32> -> vector<1x4x8x8xf32>
    %397 = vector.shape_cast %396 : vector<1x4x8x8xf32> to vector<4x8x8xf32>
    %398 = arith.truncf %397 : vector<4x8x8xf32> to vector<4x8x8xbf16>
    "tpu.trace_start"() <{level = 10 : i32, message = "bqd,bkd->bqk"}> : () -> ()
    %cst_210 = arith.constant dense<0.000000e+00> : vector<4x8x8xf32>
    %399 = tpu.matmul %390, %394, %cst_210 {dimension_numbers = #tpu.dot_dimension_numbers<[2], [2], [1], [1], [0, 0, 0, 1, 1, 1], [0], [0]>} : vector<4x8x8xbf16>, vector<4x8x8xbf16>, vector<4x8x8xf32> -> vector<4x8x8xf32>
    "tpu.trace_stop"() : () -> ()
    %cst_211 = arith.constant 0.353553385 : f32
    %400 = vector.broadcast %cst_211 : f32 to vector<4x8x8xf32>
    %401 = arith.mulf %399, %400 : vector<4x8x8xf32>
    %cst_212 = arith.constant dense<0xFF800000> : vector<4x8xf32>
    %402 = vector.multi_reduction <maximumf>, %401, %cst_212 [2] : vector<4x8x8xf32> to vector<4x8xf32>
    %403 = vector.shape_cast %402 : vector<4x8xf32> to vector<4x8x1xf32>
    %404 = vector.broadcast %403 : vector<4x8x1xf32> to vector<4x8x8xf32>
    %405 = arith.subf %401, %404 : vector<4x8x8xf32>
    %406 = math.exp %405 : vector<4x8x8xf32>
    %cst_213 = arith.constant dense<0.000000e+00> : vector<4x8xf32>
    %407 = vector.multi_reduction <add>, %406, %cst_213 [2] : vector<4x8x8xf32> to vector<4x8xf32>
    %408 = vector.shape_cast %407 : vector<4x8xf32> to vector<4x8x1xf32>
    %409 = tpu.reciprocal %408 {approx = true} : vector<4x8x1xf32> -> vector<4x8x1xf32>
    %410 = vector.broadcast %409 : vector<4x8x1xf32> to vector<4x8x8xf32>
    %411 = arith.mulf %406, %410 : vector<4x8x8xf32>
    %412 = arith.truncf %411 : vector<4x8x8xf32> to vector<4x8x8xbf16>
    "tpu.trace_start"() <{level = 10 : i32, message = "bqk,bkd->bqd"}> : () -> ()
    %cst_214 = arith.constant dense<0.000000e+00> : vector<4x8x8xf32>
    %413 = tpu.matmul %412, %398, %cst_214 {dimension_numbers = #tpu.dot_dimension_numbers<[2], [1], [1], [2], [0, 0, 0, 1, 1, 2], [0], [0]>} : vector<4x8x8xbf16>, vector<4x8x8xbf16>, vector<4x8x8xf32> -> vector<4x8x8xf32>
    "tpu.trace_stop"() : () -> ()
    %414 = vector.shape_cast %413 : vector<4x8x8xf32> to vector<1x4x8x8xf32>
    %415 = tpu.transpose %414, [0, 2, 1, 3] : vector<1x4x8x8xf32> -> vector<1x8x4x8xf32>
    %416 = vector.shape_cast %415 : vector<1x8x4x8xf32> to vector<8x32xf32>
    %417 = arith.truncf %416 : vector<8x32xf32> to vector<8x32xbf16>
    %c0_215 = arith.constant 0 : index
    %c0_216 = arith.constant 0 : index
    %c0_217 = arith.constant 0 : index
    %418 = vector.load %arg33[%c0_215, %c0_216, %c0_217] : memref<2x32x32xbf16, #tpu.memory_space<vmem>>, vector<1x32x32xbf16>
    %419 = vector.shape_cast %418 : vector<1x32x32xbf16> to vector<32x32xbf16>
    %cst_218 = arith.constant dense<0.000000e+00> : vector<8x32xf32>
    %420 = tpu.matmul %417, %419, %cst_218 {dimension_numbers = #tpu.dot_dimension_numbers<[1], [0], [0], [1], [0, 0, 1, 1], [], []>} : vector<8x32xbf16>, vector<32x32xbf16>, vector<8x32xf32> -> vector<8x32xf32>
    %c0_219 = arith.constant 0 : index
    %c0_220 = arith.constant 0 : index
    %c0_221 = arith.constant 0 : index
    %421 = vector.load %arg34[%c0_219, %c0_220, %c0_221] : memref<2x1x32xf32, #tpu.memory_space<vmem>>, vector<1x1x32xf32>
    %422 = vector.shape_cast %421 : vector<1x1x32xf32> to vector<1x32xf32>
    %423 = vector.broadcast %422 : vector<1x32xf32> to vector<8x32xf32>
    %424 = arith.addf %420, %423 : vector<8x32xf32>
    %425 = arith.addf %364, %424 : vector<8x32xf32>
    %c0_222 = arith.constant 0 : index
    %c0_223 = arith.constant 0 : index
    %c0_224 = arith.constant 0 : index
    %426 = vector.load %arg41[%c0_222, %c0_223, %c0_224] : memref<2x1x32xf32, #tpu.memory_space<vmem>>, vector<1x1x32xf32>
    %427 = vector.shape_cast %426 : vector<1x1x32xf32> to vector<1x32xf32>
    %c0_225 = arith.constant 0 : index
    %c0_226 = arith.constant 0 : index
    %c0_227 = arith.constant 0 : index
    %428 = vector.load %arg42[%c0_225, %c0_226, %c0_227] : memref<2x1x32xf32, #tpu.memory_space<vmem>>, vector<1x1x32xf32>
    %429 = vector.shape_cast %428 : vector<1x1x32xf32> to vector<1x32xf32>
    %cst_228 = arith.constant dense<0.000000e+00> : vector<8xf32>
    %430 = vector.multi_reduction <add>, %425, %cst_228 [1] : vector<8x32xf32> to vector<8xf32>
    %431 = vector.shape_cast %430 : vector<8xf32> to vector<8x1xf32>
    %cst_229 = arith.constant 3.200000e+01 : f32
    %432 = vector.broadcast %cst_229 : f32 to vector<8x1xf32>
    %433 = arith.divf %431, %432 : vector<8x1xf32>
    %434 = vector.broadcast %433 : vector<8x1xf32> to vector<8x32xf32>
    %435 = arith.subf %425, %434 : vector<8x32xf32>
    %436 = arith.mulf %435, %435 : vector<8x32xf32>
    %cst_230 = arith.constant dense<0.000000e+00> : vector<8xf32>
    %437 = vector.multi_reduction <add>, %436, %cst_230 [1] : vector<8x32xf32> to vector<8xf32>
    %438 = vector.shape_cast %437 : vector<8xf32> to vector<8x1xf32>
    %cst_231 = arith.constant 3.200000e+01 : f32
    %439 = vector.broadcast %cst_231 : f32 to vector<8x1xf32>
    %440 = arith.divf %438, %439 : vector<8x1xf32>
    %441 = vector.broadcast %433 : vector<8x1xf32> to vector<8x32xf32>
    %442 = arith.subf %425, %441 : vector<8x32xf32>
    %cst_232 = arith.constant 9.99999974E-6 : f32
    %443 = vector.broadcast %cst_232 : f32 to vector<8x1xf32>
    %444 = arith.addf %440, %443 : vector<8x1xf32>
    %445 = math.rsqrt %444 : vector<8x1xf32>
    %446 = vector.broadcast %445 : vector<8x1xf32> to vector<8x32xf32>
    %447 = arith.mulf %442, %446 : vector<8x32xf32>
    %448 = vector.broadcast %427 : vector<1x32xf32> to vector<8x32xf32>
    %449 = arith.mulf %447, %448 : vector<8x32xf32>
    %450 = vector.broadcast %429 : vector<1x32xf32> to vector<8x32xf32>
    %451 = arith.addf %449, %450 : vector<8x32xf32>
    %452 = arith.truncf %451 : vector<8x32xf32> to vector<8x32xbf16>
    %c0_233 = arith.constant 0 : index
    %c0_234 = arith.constant 0 : index
    %c0_235 = arith.constant 0 : index
    %453 = vector.load %arg35[%c0_233, %c0_234, %c0_235] : memref<2x32x64xbf16, #tpu.memory_space<vmem>>, vector<1x32x64xbf16>
    %454 = vector.shape_cast %453 : vector<1x32x64xbf16> to vector<32x64xbf16>
    %cst_236 = arith.constant dense<0.000000e+00> : vector<8x64xf32>
    %455 = tpu.matmul %452, %454, %cst_236 {dimension_numbers = #tpu.dot_dimension_numbers<[1], [0], [0], [1], [0, 0, 1, 1], [], []>} : vector<8x32xbf16>, vector<32x64xbf16>, vector<8x64xf32> -> vector<8x64xf32>
    %c0_237 = arith.constant 0 : index
    %c0_238 = arith.constant 0 : index
    %c0_239 = arith.constant 0 : index
    %456 = vector.load %arg36[%c0_237, %c0_238, %c0_239] : memref<2x1x64xf32, #tpu.memory_space<vmem>>, vector<1x1x64xf32>
    %457 = vector.shape_cast %456 : vector<1x1x64xf32> to vector<1x64xf32>
    %458 = vector.broadcast %457 : vector<1x64xf32> to vector<8x64xf32>
    %459 = arith.addf %455, %458 : vector<8x64xf32>
    %cst_240 = arith.constant 0.000000e+00 : f32
    %460 = vector.broadcast %cst_240 : f32 to vector<8x64xf32>
    %461 = arith.maximumf %459, %460 : vector<8x64xf32>
    %462 = arith.truncf %461 : vector<8x64xf32> to vector<8x64xbf16>
    %c0_241 = arith.constant 0 : index
    %c0_242 = arith.constant 0 : index
    %c0_243 = arith.constant 0 : index
    %463 = vector.load %arg37[%c0_241, %c0_242, %c0_243] : memref<2x64x32xbf16, #tpu.memory_space<vmem>>, vector<1x64x32xbf16>
    %464 = vector.shape_cast %463 : vector<1x64x32xbf16> to vector<64x32xbf16>
    %cst_244 = arith.constant dense<0.000000e+00> : vector<8x32xf32>
    %465 = tpu.matmul %462, %464, %cst_244 {dimension_numbers = #tpu.dot_dimension_numbers<[1], [0], [0], [1], [0, 0, 1, 1], [], []>} : vector<8x64xbf16>, vector<64x32xbf16>, vector<8x32xf32> -> vector<8x32xf32>
    %c0_245 = arith.constant 0 : index
    %c0_246 = arith.constant 0 : index
    %c0_247 = arith.constant 0 : index
    %466 = vector.load %arg38[%c0_245, %c0_246, %c0_247] : memref<2x1x32xf32, #tpu.memory_space<vmem>>, vector<1x1x32xf32>
    %467 = vector.shape_cast %466 : vector<1x1x32xf32> to vector<1x32xf32>
    %468 = vector.broadcast %467 : vector<1x32xf32> to vector<8x32xf32>
    %469 = arith.addf %465, %468 : vector<8x32xf32>
    %470 = arith.addf %451, %469 : vector<8x32xf32>
    %c0_248 = arith.constant 0 : index
    %c0_249 = arith.constant 0 : index
    %c0_250 = arith.constant 0 : index
    %471 = vector.load %arg43[%c0_248, %c0_249, %c0_250] : memref<2x1x32xf32, #tpu.memory_space<vmem>>, vector<1x1x32xf32>
    %472 = vector.shape_cast %471 : vector<1x1x32xf32> to vector<1x32xf32>
    %c0_251 = arith.constant 0 : index
    %c0_252 = arith.constant 0 : index
    %c0_253 = arith.constant 0 : index
    %473 = vector.load %arg44[%c0_251, %c0_252, %c0_253] : memref<2x1x32xf32, #tpu.memory_space<vmem>>, vector<1x1x32xf32>
    %474 = vector.shape_cast %473 : vector<1x1x32xf32> to vector<1x32xf32>
    %cst_254 = arith.constant dense<0.000000e+00> : vector<8xf32>
    %475 = vector.multi_reduction <add>, %470, %cst_254 [1] : vector<8x32xf32> to vector<8xf32>
    %476 = vector.shape_cast %475 : vector<8xf32> to vector<8x1xf32>
    %cst_255 = arith.constant 3.200000e+01 : f32
    %477 = vector.broadcast %cst_255 : f32 to vector<8x1xf32>
    %478 = arith.divf %476, %477 : vector<8x1xf32>
    %479 = vector.broadcast %478 : vector<8x1xf32> to vector<8x32xf32>
    %480 = arith.subf %470, %479 : vector<8x32xf32>
    %481 = arith.mulf %480, %480 : vector<8x32xf32>
    %cst_256 = arith.constant dense<0.000000e+00> : vector<8xf32>
    %482 = vector.multi_reduction <add>, %481, %cst_256 [1] : vector<8x32xf32> to vector<8xf32>
    %483 = vector.shape_cast %482 : vector<8xf32> to vector<8x1xf32>
    %cst_257 = arith.constant 3.200000e+01 : f32
    %484 = vector.broadcast %cst_257 : f32 to vector<8x1xf32>
    %485 = arith.divf %483, %484 : vector<8x1xf32>
    %486 = vector.broadcast %478 : vector<8x1xf32> to vector<8x32xf32>
    %487 = arith.subf %470, %486 : vector<8x32xf32>
    %cst_258 = arith.constant 9.99999974E-6 : f32
    %488 = vector.broadcast %cst_258 : f32 to vector<8x1xf32>
    %489 = arith.addf %485, %488 : vector<8x1xf32>
    %490 = math.rsqrt %489 : vector<8x1xf32>
    %491 = vector.broadcast %490 : vector<8x1xf32> to vector<8x32xf32>
    %492 = arith.mulf %487, %491 : vector<8x32xf32>
    %493 = vector.broadcast %472 : vector<1x32xf32> to vector<8x32xf32>
    %494 = arith.mulf %492, %493 : vector<8x32xf32>
    %495 = vector.broadcast %474 : vector<1x32xf32> to vector<8x32xf32>
    %496 = arith.addf %494, %495 : vector<8x32xf32>
    %497 = arith.truncf %496 : vector<8x32xf32> to vector<8x32xbf16>
    %c1_259 = arith.constant 1 : index
    %c0_260 = arith.constant 0 : index
    %c0_261 = arith.constant 0 : index
    %498 = vector.load %arg19[%c1_259, %c0_260, %c0_261] : memref<2x32x32xbf16, #tpu.memory_space<vmem>>, vector<1x32x32xbf16>
    %499 = vector.shape_cast %498 : vector<1x32x32xbf16> to vector<32x32xbf16>
    %cst_262 = arith.constant dense<0.000000e+00> : vector<8x32xf32>
    %500 = tpu.matmul %497, %499, %cst_262 {dimension_numbers = #tpu.dot_dimension_numbers<[1], [0], [0], [1], [0, 0, 1, 1], [], []>} : vector<8x32xbf16>, vector<32x32xbf16>, vector<8x32xf32> -> vector<8x32xf32>
    %c1_263 = arith.constant 1 : index
    %c0_264 = arith.constant 0 : index
    %c0_265 = arith.constant 0 : index
    %501 = vector.load %arg22[%c1_263, %c0_264, %c0_265] : memref<2x1x32xf32, #tpu.memory_space<vmem>>, vector<1x1x32xf32>
    %502 = vector.shape_cast %501 : vector<1x1x32xf32> to vector<1x32xf32>
    %503 = vector.broadcast %502 : vector<1x32xf32> to vector<8x32xf32>
    %504 = arith.addf %500, %503 : vector<8x32xf32>
    %c1_266 = arith.constant 1 : index
    %c0_267 = arith.constant 0 : index
    %c0_268 = arith.constant 0 : index
    %505 = vector.load %arg20[%c1_266, %c0_267, %c0_268] : memref<2x32x32xbf16, #tpu.memory_space<vmem>>, vector<1x32x32xbf16>
    %506 = vector.shape_cast %505 : vector<1x32x32xbf16> to vector<32x32xbf16>
    %cst_269 = arith.constant dense<0.000000e+00> : vector<8x32xf32>
    %507 = tpu.matmul %497, %506, %cst_269 {dimension_numbers = #tpu.dot_dimension_numbers<[1], [0], [0], [1], [0, 0, 1, 1], [], []>} : vector<8x32xbf16>, vector<32x32xbf16>, vector<8x32xf32> -> vector<8x32xf32>
    %c1_270 = arith.constant 1 : index
    %c0_271 = arith.constant 0 : index
    %c0_272 = arith.constant 0 : index
    %508 = vector.load %arg23[%c1_270, %c0_271, %c0_272] : memref<2x1x32xf32, #tpu.memory_space<vmem>>, vector<1x1x32xf32>
    %509 = vector.shape_cast %508 : vector<1x1x32xf32> to vector<1x32xf32>
    %510 = vector.broadcast %509 : vector<1x32xf32> to vector<8x32xf32>
    %511 = arith.addf %507, %510 : vector<8x32xf32>
    %c1_273 = arith.constant 1 : index
    %c0_274 = arith.constant 0 : index
    %c0_275 = arith.constant 0 : index
    %512 = vector.load %arg21[%c1_273, %c0_274, %c0_275] : memref<2x32x32xbf16, #tpu.memory_space<vmem>>, vector<1x32x32xbf16>
    %513 = vector.shape_cast %512 : vector<1x32x32xbf16> to vector<32x32xbf16>
    %cst_276 = arith.constant dense<0.000000e+00> : vector<8x32xf32>
    %514 = tpu.matmul %497, %513, %cst_276 {dimension_numbers = #tpu.dot_dimension_numbers<[1], [0], [0], [1], [0, 0, 1, 1], [], []>} : vector<8x32xbf16>, vector<32x32xbf16>, vector<8x32xf32> -> vector<8x32xf32>
    %c1_277 = arith.constant 1 : index
    %c0_278 = arith.constant 0 : index
    %c0_279 = arith.constant 0 : index
    %515 = vector.load %arg24[%c1_277, %c0_278, %c0_279] : memref<2x1x32xf32, #tpu.memory_space<vmem>>, vector<1x1x32xf32>
    %516 = vector.shape_cast %515 : vector<1x1x32xf32> to vector<1x32xf32>
    %517 = vector.broadcast %516 : vector<1x32xf32> to vector<8x32xf32>
    %518 = arith.addf %514, %517 : vector<8x32xf32>
    %519 = vector.shape_cast %504 : vector<8x32xf32> to vector<1x8x4x8xf32>
    %520 = tpu.transpose %519, [0, 2, 1, 3] : vector<1x8x4x8xf32> -> vector<1x4x8x8xf32>
    %521 = vector.shape_cast %520 : vector<1x4x8x8xf32> to vector<4x8x8xf32>
    %522 = arith.truncf %521 : vector<4x8x8xf32> to vector<4x8x8xbf16>
    %523 = vector.shape_cast %511 : vector<8x32xf32> to vector<1x8x4x8xf32>
    %524 = tpu.transpose %523, [0, 2, 1, 3] : vector<1x8x4x8xf32> -> vector<1x4x8x8xf32>
    %525 = vector.shape_cast %524 : vector<1x4x8x8xf32> to vector<4x8x8xf32>
    %526 = arith.truncf %525 : vector<4x8x8xf32> to vector<4x8x8xbf16>
    %527 = vector.shape_cast %518 : vector<8x32xf32> to vector<1x8x4x8xf32>
    %528 = tpu.transpose %527, [0, 2, 1, 3] : vector<1x8x4x8xf32> -> vector<1x4x8x8xf32>
    %529 = vector.shape_cast %528 : vector<1x4x8x8xf32> to vector<4x8x8xf32>
    %530 = arith.truncf %529 : vector<4x8x8xf32> to vector<4x8x8xbf16>
    "tpu.trace_start"() <{level = 10 : i32, message = "bqd,bkd->bqk"}> : () -> ()
    %cst_280 = arith.constant dense<0.000000e+00> : vector<4x8x8xf32>
    %531 = tpu.matmul %522, %526, %cst_280 {dimension_numbers = #tpu.dot_dimension_numbers<[2], [2], [1], [1], [0, 0, 0, 1, 1, 1], [0], [0]>} : vector<4x8x8xbf16>, vector<4x8x8xbf16>, vector<4x8x8xf32> -> vector<4x8x8xf32>
    "tpu.trace_stop"() : () -> ()
    %cst_281 = arith.constant 0.353553385 : f32
    %532 = vector.broadcast %cst_281 : f32 to vector<4x8x8xf32>
    %533 = arith.mulf %531, %532 : vector<4x8x8xf32>
    %534 = vector.shape_cast %5 : vector<8x8xf32> to vector<1x8x8xf32>
    %535 = vector.broadcast %534 : vector<1x8x8xf32> to vector<4x8x8xf32>
    %536 = arith.addf %533, %535 : vector<4x8x8xf32>
    %cst_282 = arith.constant dense<0xFF800000> : vector<4x8xf32>
    %537 = vector.multi_reduction <maximumf>, %536, %cst_282 [2] : vector<4x8x8xf32> to vector<4x8xf32>
    %538 = vector.shape_cast %537 : vector<4x8xf32> to vector<4x8x1xf32>
    %539 = vector.broadcast %538 : vector<4x8x1xf32> to vector<4x8x8xf32>
    %540 = arith.subf %536, %539 : vector<4x8x8xf32>
    %541 = math.exp %540 : vector<4x8x8xf32>
    %cst_283 = arith.constant dense<0.000000e+00> : vector<4x8xf32>
    %542 = vector.multi_reduction <add>, %541, %cst_283 [2] : vector<4x8x8xf32> to vector<4x8xf32>
    %543 = vector.shape_cast %542 : vector<4x8xf32> to vector<4x8x1xf32>
    %544 = tpu.reciprocal %543 {approx = true} : vector<4x8x1xf32> -> vector<4x8x1xf32>
    %545 = vector.broadcast %544 : vector<4x8x1xf32> to vector<4x8x8xf32>
    %546 = arith.mulf %541, %545 : vector<4x8x8xf32>
    %547 = arith.truncf %546 : vector<4x8x8xf32> to vector<4x8x8xbf16>
    "tpu.trace_start"() <{level = 10 : i32, message = "bqk,bkd->bqd"}> : () -> ()
    %cst_284 = arith.constant dense<0.000000e+00> : vector<4x8x8xf32>
    %548 = tpu.matmul %547, %530, %cst_284 {dimension_numbers = #tpu.dot_dimension_numbers<[2], [1], [1], [2], [0, 0, 0, 1, 1, 2], [0], [0]>} : vector<4x8x8xbf16>, vector<4x8x8xbf16>, vector<4x8x8xf32> -> vector<4x8x8xf32>
    "tpu.trace_stop"() : () -> ()
    %549 = vector.shape_cast %548 : vector<4x8x8xf32> to vector<1x4x8x8xf32>
    %550 = tpu.transpose %549, [0, 2, 1, 3] : vector<1x4x8x8xf32> -> vector<1x8x4x8xf32>
    %551 = vector.shape_cast %550 : vector<1x8x4x8xf32> to vector<8x32xf32>
    %552 = arith.truncf %551 : vector<8x32xf32> to vector<8x32xbf16>
    %c1_285 = arith.constant 1 : index
    %c0_286 = arith.constant 0 : index
    %c0_287 = arith.constant 0 : index
    %553 = vector.load %arg25[%c1_285, %c0_286, %c0_287] : memref<2x32x32xbf16, #tpu.memory_space<vmem>>, vector<1x32x32xbf16>
    %554 = vector.shape_cast %553 : vector<1x32x32xbf16> to vector<32x32xbf16>
    %cst_288 = arith.constant dense<0.000000e+00> : vector<8x32xf32>
    %555 = tpu.matmul %552, %554, %cst_288 {dimension_numbers = #tpu.dot_dimension_numbers<[1], [0], [0], [1], [0, 0, 1, 1], [], []>} : vector<8x32xbf16>, vector<32x32xbf16>, vector<8x32xf32> -> vector<8x32xf32>
    %c1_289 = arith.constant 1 : index
    %c0_290 = arith.constant 0 : index
    %c0_291 = arith.constant 0 : index
    %556 = vector.load %arg26[%c1_289, %c0_290, %c0_291] : memref<2x1x32xf32, #tpu.memory_space<vmem>>, vector<1x1x32xf32>
    %557 = vector.shape_cast %556 : vector<1x1x32xf32> to vector<1x32xf32>
    %558 = vector.broadcast %557 : vector<1x32xf32> to vector<8x32xf32>
    %559 = arith.addf %555, %558 : vector<8x32xf32>
    %560 = arith.addf %496, %559 : vector<8x32xf32>
    %c1_292 = arith.constant 1 : index
    %c0_293 = arith.constant 0 : index
    %c0_294 = arith.constant 0 : index
    %561 = vector.load %arg39[%c1_292, %c0_293, %c0_294] : memref<2x1x32xf32, #tpu.memory_space<vmem>>, vector<1x1x32xf32>
    %562 = vector.shape_cast %561 : vector<1x1x32xf32> to vector<1x32xf32>
    %c1_295 = arith.constant 1 : index
    %c0_296 = arith.constant 0 : index
    %c0_297 = arith.constant 0 : index
    %563 = vector.load %arg40[%c1_295, %c0_296, %c0_297] : memref<2x1x32xf32, #tpu.memory_space<vmem>>, vector<1x1x32xf32>
    %564 = vector.shape_cast %563 : vector<1x1x32xf32> to vector<1x32xf32>
    %cst_298 = arith.constant dense<0.000000e+00> : vector<8xf32>
    %565 = vector.multi_reduction <add>, %560, %cst_298 [1] : vector<8x32xf32> to vector<8xf32>
    %566 = vector.shape_cast %565 : vector<8xf32> to vector<8x1xf32>
    %cst_299 = arith.constant 3.200000e+01 : f32
    %567 = vector.broadcast %cst_299 : f32 to vector<8x1xf32>
    %568 = arith.divf %566, %567 : vector<8x1xf32>
    %569 = vector.broadcast %568 : vector<8x1xf32> to vector<8x32xf32>
    %570 = arith.subf %560, %569 : vector<8x32xf32>
    %571 = arith.mulf %570, %570 : vector<8x32xf32>
    %cst_300 = arith.constant dense<0.000000e+00> : vector<8xf32>
    %572 = vector.multi_reduction <add>, %571, %cst_300 [1] : vector<8x32xf32> to vector<8xf32>
    %573 = vector.shape_cast %572 : vector<8xf32> to vector<8x1xf32>
    %cst_301 = arith.constant 3.200000e+01 : f32
    %574 = vector.broadcast %cst_301 : f32 to vector<8x1xf32>
    %575 = arith.divf %573, %574 : vector<8x1xf32>
    %576 = vector.broadcast %568 : vector<8x1xf32> to vector<8x32xf32>
    %577 = arith.subf %560, %576 : vector<8x32xf32>
    %cst_302 = arith.constant 9.99999974E-6 : f32
    %578 = vector.broadcast %cst_302 : f32 to vector<8x1xf32>
    %579 = arith.addf %575, %578 : vector<8x1xf32>
    %580 = math.rsqrt %579 : vector<8x1xf32>
    %581 = vector.broadcast %580 : vector<8x1xf32> to vector<8x32xf32>
    %582 = arith.mulf %577, %581 : vector<8x32xf32>
    %583 = vector.broadcast %562 : vector<1x32xf32> to vector<8x32xf32>
    %584 = arith.mulf %582, %583 : vector<8x32xf32>
    %585 = vector.broadcast %564 : vector<1x32xf32> to vector<8x32xf32>
    %586 = arith.addf %584, %585 : vector<8x32xf32>
    %587 = arith.truncf %586 : vector<8x32xf32> to vector<8x32xbf16>
    %c1_303 = arith.constant 1 : index
    %c0_304 = arith.constant 0 : index
    %c0_305 = arith.constant 0 : index
    %588 = vector.load %arg27[%c1_303, %c0_304, %c0_305] : memref<2x32x32xbf16, #tpu.memory_space<vmem>>, vector<1x32x32xbf16>
    %589 = vector.shape_cast %588 : vector<1x32x32xbf16> to vector<32x32xbf16>
    %cst_306 = arith.constant dense<0.000000e+00> : vector<8x32xf32>
    %590 = tpu.matmul %587, %589, %cst_306 {dimension_numbers = #tpu.dot_dimension_numbers<[1], [0], [0], [1], [0, 0, 1, 1], [], []>} : vector<8x32xbf16>, vector<32x32xbf16>, vector<8x32xf32> -> vector<8x32xf32>
    %c1_307 = arith.constant 1 : index
    %c0_308 = arith.constant 0 : index
    %c0_309 = arith.constant 0 : index
    %591 = vector.load %arg30[%c1_307, %c0_308, %c0_309] : memref<2x1x32xf32, #tpu.memory_space<vmem>>, vector<1x1x32xf32>
    %592 = vector.shape_cast %591 : vector<1x1x32xf32> to vector<1x32xf32>
    %593 = vector.broadcast %592 : vector<1x32xf32> to vector<8x32xf32>
    %594 = arith.addf %590, %593 : vector<8x32xf32>
    %c1_310 = arith.constant 1 : index
    %c0_311 = arith.constant 0 : index
    %c0_312 = arith.constant 0 : index
    %595 = vector.load %arg28[%c1_310, %c0_311, %c0_312] : memref<2x32x32xbf16, #tpu.memory_space<vmem>>, vector<1x32x32xbf16>
    %596 = vector.shape_cast %595 : vector<1x32x32xbf16> to vector<32x32xbf16>
    %cst_313 = arith.constant dense<0.000000e+00> : vector<8x32xf32>
    %597 = tpu.matmul %272, %596, %cst_313 {dimension_numbers = #tpu.dot_dimension_numbers<[1], [0], [0], [1], [0, 0, 1, 1], [], []>} : vector<8x32xbf16>, vector<32x32xbf16>, vector<8x32xf32> -> vector<8x32xf32>
    %c1_314 = arith.constant 1 : index
    %c0_315 = arith.constant 0 : index
    %c0_316 = arith.constant 0 : index
    %598 = vector.load %arg31[%c1_314, %c0_315, %c0_316] : memref<2x1x32xf32, #tpu.memory_space<vmem>>, vector<1x1x32xf32>
    %599 = vector.shape_cast %598 : vector<1x1x32xf32> to vector<1x32xf32>
    %600 = vector.broadcast %599 : vector<1x32xf32> to vector<8x32xf32>
    %601 = arith.addf %597, %600 : vector<8x32xf32>
    %c1_317 = arith.constant 1 : index
    %c0_318 = arith.constant 0 : index
    %c0_319 = arith.constant 0 : index
    %602 = vector.load %arg29[%c1_317, %c0_318, %c0_319] : memref<2x32x32xbf16, #tpu.memory_space<vmem>>, vector<1x32x32xbf16>
    %603 = vector.shape_cast %602 : vector<1x32x32xbf16> to vector<32x32xbf16>
    %cst_320 = arith.constant dense<0.000000e+00> : vector<8x32xf32>
    %604 = tpu.matmul %272, %603, %cst_320 {dimension_numbers = #tpu.dot_dimension_numbers<[1], [0], [0], [1], [0, 0, 1, 1], [], []>} : vector<8x32xbf16>, vector<32x32xbf16>, vector<8x32xf32> -> vector<8x32xf32>
    %c1_321 = arith.constant 1 : index
    %c0_322 = arith.constant 0 : index
    %c0_323 = arith.constant 0 : index
    %605 = vector.load %arg32[%c1_321, %c0_322, %c0_323] : memref<2x1x32xf32, #tpu.memory_space<vmem>>, vector<1x1x32xf32>
    %606 = vector.shape_cast %605 : vector<1x1x32xf32> to vector<1x32xf32>
    %607 = vector.broadcast %606 : vector<1x32xf32> to vector<8x32xf32>
    %608 = arith.addf %604, %607 : vector<8x32xf32>
    %609 = vector.shape_cast %594 : vector<8x32xf32> to vector<1x8x4x8xf32>
    %610 = tpu.transpose %609, [0, 2, 1, 3] : vector<1x8x4x8xf32> -> vector<1x4x8x8xf32>
    %611 = vector.shape_cast %610 : vector<1x4x8x8xf32> to vector<4x8x8xf32>
    %612 = arith.truncf %611 : vector<4x8x8xf32> to vector<4x8x8xbf16>
    %613 = vector.shape_cast %601 : vector<8x32xf32> to vector<1x8x4x8xf32>
    %614 = tpu.transpose %613, [0, 2, 1, 3] : vector<1x8x4x8xf32> -> vector<1x4x8x8xf32>
    %615 = vector.shape_cast %614 : vector<1x4x8x8xf32> to vector<4x8x8xf32>
    %616 = arith.truncf %615 : vector<4x8x8xf32> to vector<4x8x8xbf16>
    %617 = vector.shape_cast %608 : vector<8x32xf32> to vector<1x8x4x8xf32>
    %618 = tpu.transpose %617, [0, 2, 1, 3] : vector<1x8x4x8xf32> -> vector<1x4x8x8xf32>
    %619 = vector.shape_cast %618 : vector<1x4x8x8xf32> to vector<4x8x8xf32>
    %620 = arith.truncf %619 : vector<4x8x8xf32> to vector<4x8x8xbf16>
    "tpu.trace_start"() <{level = 10 : i32, message = "bqd,bkd->bqk"}> : () -> ()
    %cst_324 = arith.constant dense<0.000000e+00> : vector<4x8x8xf32>
    %621 = tpu.matmul %612, %616, %cst_324 {dimension_numbers = #tpu.dot_dimension_numbers<[2], [2], [1], [1], [0, 0, 0, 1, 1, 1], [0], [0]>} : vector<4x8x8xbf16>, vector<4x8x8xbf16>, vector<4x8x8xf32> -> vector<4x8x8xf32>
    "tpu.trace_stop"() : () -> ()
    %cst_325 = arith.constant 0.353553385 : f32
    %622 = vector.broadcast %cst_325 : f32 to vector<4x8x8xf32>
    %623 = arith.mulf %621, %622 : vector<4x8x8xf32>
    %cst_326 = arith.constant dense<0xFF800000> : vector<4x8xf32>
    %624 = vector.multi_reduction <maximumf>, %623, %cst_326 [2] : vector<4x8x8xf32> to vector<4x8xf32>
    %625 = vector.shape_cast %624 : vector<4x8xf32> to vector<4x8x1xf32>
    %626 = vector.broadcast %625 : vector<4x8x1xf32> to vector<4x8x8xf32>
    %627 = arith.subf %623, %626 : vector<4x8x8xf32>
    %628 = math.exp %627 : vector<4x8x8xf32>
    %cst_327 = arith.constant dense<0.000000e+00> : vector<4x8xf32>
    %629 = vector.multi_reduction <add>, %628, %cst_327 [2] : vector<4x8x8xf32> to vector<4x8xf32>
    %630 = vector.shape_cast %629 : vector<4x8xf32> to vector<4x8x1xf32>
    %631 = tpu.reciprocal %630 {approx = true} : vector<4x8x1xf32> -> vector<4x8x1xf32>
    %632 = vector.broadcast %631 : vector<4x8x1xf32> to vector<4x8x8xf32>
    %633 = arith.mulf %628, %632 : vector<4x8x8xf32>
    %634 = arith.truncf %633 : vector<4x8x8xf32> to vector<4x8x8xbf16>
    "tpu.trace_start"() <{level = 10 : i32, message = "bqk,bkd->bqd"}> : () -> ()
    %cst_328 = arith.constant dense<0.000000e+00> : vector<4x8x8xf32>
    %635 = tpu.matmul %634, %620, %cst_328 {dimension_numbers = #tpu.dot_dimension_numbers<[2], [1], [1], [2], [0, 0, 0, 1, 1, 2], [0], [0]>} : vector<4x8x8xbf16>, vector<4x8x8xbf16>, vector<4x8x8xf32> -> vector<4x8x8xf32>
    "tpu.trace_stop"() : () -> ()
    %636 = vector.shape_cast %635 : vector<4x8x8xf32> to vector<1x4x8x8xf32>
    %637 = tpu.transpose %636, [0, 2, 1, 3] : vector<1x4x8x8xf32> -> vector<1x8x4x8xf32>
    %638 = vector.shape_cast %637 : vector<1x8x4x8xf32> to vector<8x32xf32>
    %639 = arith.truncf %638 : vector<8x32xf32> to vector<8x32xbf16>
    %c1_329 = arith.constant 1 : index
    %c0_330 = arith.constant 0 : index
    %c0_331 = arith.constant 0 : index
    %640 = vector.load %arg33[%c1_329, %c0_330, %c0_331] : memref<2x32x32xbf16, #tpu.memory_space<vmem>>, vector<1x32x32xbf16>
    %641 = vector.shape_cast %640 : vector<1x32x32xbf16> to vector<32x32xbf16>
    %cst_332 = arith.constant dense<0.000000e+00> : vector<8x32xf32>
    %642 = tpu.matmul %639, %641, %cst_332 {dimension_numbers = #tpu.dot_dimension_numbers<[1], [0], [0], [1], [0, 0, 1, 1], [], []>} : vector<8x32xbf16>, vector<32x32xbf16>, vector<8x32xf32> -> vector<8x32xf32>
    %c1_333 = arith.constant 1 : index
    %c0_334 = arith.constant 0 : index
    %c0_335 = arith.constant 0 : index
    %643 = vector.load %arg34[%c1_333, %c0_334, %c0_335] : memref<2x1x32xf32, #tpu.memory_space<vmem>>, vector<1x1x32xf32>
    %644 = vector.shape_cast %643 : vector<1x1x32xf32> to vector<1x32xf32>
    %645 = vector.broadcast %644 : vector<1x32xf32> to vector<8x32xf32>
    %646 = arith.addf %642, %645 : vector<8x32xf32>
    %647 = arith.addf %586, %646 : vector<8x32xf32>
    %c1_336 = arith.constant 1 : index
    %c0_337 = arith.constant 0 : index
    %c0_338 = arith.constant 0 : index
    %648 = vector.load %arg41[%c1_336, %c0_337, %c0_338] : memref<2x1x32xf32, #tpu.memory_space<vmem>>, vector<1x1x32xf32>
    %649 = vector.shape_cast %648 : vector<1x1x32xf32> to vector<1x32xf32>
    %c1_339 = arith.constant 1 : index
    %c0_340 = arith.constant 0 : index
    %c0_341 = arith.constant 0 : index
    %650 = vector.load %arg42[%c1_339, %c0_340, %c0_341] : memref<2x1x32xf32, #tpu.memory_space<vmem>>, vector<1x1x32xf32>
    %651 = vector.shape_cast %650 : vector<1x1x32xf32> to vector<1x32xf32>
    %cst_342 = arith.constant dense<0.000000e+00> : vector<8xf32>
    %652 = vector.multi_reduction <add>, %647, %cst_342 [1] : vector<8x32xf32> to vector<8xf32>
    %653 = vector.shape_cast %652 : vector<8xf32> to vector<8x1xf32>
    %cst_343 = arith.constant 3.200000e+01 : f32
    %654 = vector.broadcast %cst_343 : f32 to vector<8x1xf32>
    %655 = arith.divf %653, %654 : vector<8x1xf32>
    %656 = vector.broadcast %655 : vector<8x1xf32> to vector<8x32xf32>
    %657 = arith.subf %647, %656 : vector<8x32xf32>
    %658 = arith.mulf %657, %657 : vector<8x32xf32>
    %cst_344 = arith.constant dense<0.000000e+00> : vector<8xf32>
    %659 = vector.multi_reduction <add>, %658, %cst_344 [1] : vector<8x32xf32> to vector<8xf32>
    %660 = vector.shape_cast %659 : vector<8xf32> to vector<8x1xf32>
    %cst_345 = arith.constant 3.200000e+01 : f32
    %661 = vector.broadcast %cst_345 : f32 to vector<8x1xf32>
    %662 = arith.divf %660, %661 : vector<8x1xf32>
    %663 = vector.broadcast %655 : vector<8x1xf32> to vector<8x32xf32>
    %664 = arith.subf %647, %663 : vector<8x32xf32>
    %cst_346 = arith.constant 9.99999974E-6 : f32
    %665 = vector.broadcast %cst_346 : f32 to vector<8x1xf32>
    %666 = arith.addf %662, %665 : vector<8x1xf32>
    %667 = math.rsqrt %666 : vector<8x1xf32>
    %668 = vector.broadcast %667 : vector<8x1xf32> to vector<8x32xf32>
    %669 = arith.mulf %664, %668 : vector<8x32xf32>
    %670 = vector.broadcast %649 : vector<1x32xf32> to vector<8x32xf32>
    %671 = arith.mulf %669, %670 : vector<8x32xf32>
    %672 = vector.broadcast %651 : vector<1x32xf32> to vector<8x32xf32>
    %673 = arith.addf %671, %672 : vector<8x32xf32>
    %674 = arith.truncf %673 : vector<8x32xf32> to vector<8x32xbf16>
    %c1_347 = arith.constant 1 : index
    %c0_348 = arith.constant 0 : index
    %c0_349 = arith.constant 0 : index
    %675 = vector.load %arg35[%c1_347, %c0_348, %c0_349] : memref<2x32x64xbf16, #tpu.memory_space<vmem>>, vector<1x32x64xbf16>
    %676 = vector.shape_cast %675 : vector<1x32x64xbf16> to vector<32x64xbf16>
    %cst_350 = arith.constant dense<0.000000e+00> : vector<8x64xf32>
    %677 = tpu.matmul %674, %676, %cst_350 {dimension_numbers = #tpu.dot_dimension_numbers<[1], [0], [0], [1], [0, 0, 1, 1], [], []>} : vector<8x32xbf16>, vector<32x64xbf16>, vector<8x64xf32> -> vector<8x64xf32>
    %c1_351 = arith.constant 1 : index
    %c0_352 = arith.constant 0 : index
    %c0_353 = arith.constant 0 : index
    %678 = vector.load %arg36[%c1_351, %c0_352, %c0_353] : memref<2x1x64xf32, #tpu.memory_space<vmem>>, vector<1x1x64xf32>
    %679 = vector.shape_cast %678 : vector<1x1x64xf32> to vector<1x64xf32>
    %680 = vector.broadcast %679 : vector<1x64xf32> to vector<8x64xf32>
    %681 = arith.addf %677, %680 : vector<8x64xf32>
    %cst_354 = arith.constant 0.000000e+00 : f32
    %682 = vector.broadcast %cst_354 : f32 to vector<8x64xf32>
    %683 = arith.maximumf %681, %682 : vector<8x64xf32>
    %684 = arith.truncf %683 : vector<8x64xf32> to vector<8x64xbf16>
    %c1_355 = arith.constant 1 : index
    %c0_356 = arith.constant 0 : index
    %c0_357 = arith.constant 0 : index
    %685 = vector.load %arg37[%c1_355, %c0_356, %c0_357] : memref<2x64x32xbf16, #tpu.memory_space<vmem>>, vector<1x64x32xbf16>
    %686 = vector.shape_cast %685 : vector<1x64x32xbf16> to vector<64x32xbf16>
    %cst_358 = arith.constant dense<0.000000e+00> : vector<8x32xf32>
    %687 = tpu.matmul %684, %686, %cst_358 {dimension_numbers = #tpu.dot_dimension_numbers<[1], [0], [0], [1], [0, 0, 1, 1], [], []>} : vector<8x64xbf16>, vector<64x32xbf16>, vector<8x32xf32> -> vector<8x32xf32>
    %c1_359 = arith.constant 1 : index
    %c0_360 = arith.constant 0 : index
    %c0_361 = arith.constant 0 : index
    %688 = vector.load %arg38[%c1_359, %c0_360, %c0_361] : memref<2x1x32xf32, #tpu.memory_space<vmem>>, vector<1x1x32xf32>
    %689 = vector.shape_cast %688 : vector<1x1x32xf32> to vector<1x32xf32>
    %690 = vector.broadcast %689 : vector<1x32xf32> to vector<8x32xf32>
    %691 = arith.addf %687, %690 : vector<8x32xf32>
    %692 = arith.addf %673, %691 : vector<8x32xf32>
    %c1_362 = arith.constant 1 : index
    %c0_363 = arith.constant 0 : index
    %c0_364 = arith.constant 0 : index
    %693 = vector.load %arg43[%c1_362, %c0_363, %c0_364] : memref<2x1x32xf32, #tpu.memory_space<vmem>>, vector<1x1x32xf32>
    %694 = vector.shape_cast %693 : vector<1x1x32xf32> to vector<1x32xf32>
    %c1_365 = arith.constant 1 : index
    %c0_366 = arith.constant 0 : index
    %c0_367 = arith.constant 0 : index
    %695 = vector.load %arg44[%c1_365, %c0_366, %c0_367] : memref<2x1x32xf32, #tpu.memory_space<vmem>>, vector<1x1x32xf32>
    %696 = vector.shape_cast %695 : vector<1x1x32xf32> to vector<1x32xf32>
    %cst_368 = arith.constant dense<0.000000e+00> : vector<8xf32>
    %697 = vector.multi_reduction <add>, %692, %cst_368 [1] : vector<8x32xf32> to vector<8xf32>
    %698 = vector.shape_cast %697 : vector<8xf32> to vector<8x1xf32>
    %cst_369 = arith.constant 3.200000e+01 : f32
    %699 = vector.broadcast %cst_369 : f32 to vector<8x1xf32>
    %700 = arith.divf %698, %699 : vector<8x1xf32>
    %701 = vector.broadcast %700 : vector<8x1xf32> to vector<8x32xf32>
    %702 = arith.subf %692, %701 : vector<8x32xf32>
    %703 = arith.mulf %702, %702 : vector<8x32xf32>
    %cst_370 = arith.constant dense<0.000000e+00> : vector<8xf32>
    %704 = vector.multi_reduction <add>, %703, %cst_370 [1] : vector<8x32xf32> to vector<8xf32>
    %705 = vector.shape_cast %704 : vector<8xf32> to vector<8x1xf32>
    %cst_371 = arith.constant 3.200000e+01 : f32
    %706 = vector.broadcast %cst_371 : f32 to vector<8x1xf32>
    %707 = arith.divf %705, %706 : vector<8x1xf32>
    %708 = vector.broadcast %700 : vector<8x1xf32> to vector<8x32xf32>
    %709 = arith.subf %692, %708 : vector<8x32xf32>
    %cst_372 = arith.constant 9.99999974E-6 : f32
    %710 = vector.broadcast %cst_372 : f32 to vector<8x1xf32>
    %711 = arith.addf %707, %710 : vector<8x1xf32>
    %712 = math.rsqrt %711 : vector<8x1xf32>
    %713 = vector.broadcast %712 : vector<8x1xf32> to vector<8x32xf32>
    %714 = arith.mulf %709, %713 : vector<8x32xf32>
    %715 = vector.broadcast %694 : vector<1x32xf32> to vector<8x32xf32>
    %716 = arith.mulf %714, %715 : vector<8x32xf32>
    %717 = vector.broadcast %696 : vector<1x32xf32> to vector<8x32xf32>
    %718 = arith.addf %716, %717 : vector<8x32xf32>
    %719 = arith.truncf %718 : vector<8x32xf32> to vector<8x32xbf16>
    %c0_373 = arith.constant 0 : index
    %c0_374 = arith.constant 0 : index
    %720 = vector.load %arg45[%c0_373, %c0_374] : memref<32x128xbf16, #tpu.memory_space<vmem>>, vector<32x128xbf16>
    %cst_375 = arith.constant dense<0.000000e+00> : vector<8x128xf32>
    %721 = tpu.matmul %719, %720, %cst_375 {dimension_numbers = #tpu.dot_dimension_numbers<[1], [0], [0], [1], [0, 0, 1, 1], [], []>} : vector<8x32xbf16>, vector<32x128xbf16>, vector<8x128xf32> -> vector<8x128xf32>
    %c0_376 = arith.constant 0 : index
    %c0_377 = arith.constant 0 : index
    %722 = vector.load %arg46[%c0_376, %c0_377] : memref<1x128xf32, #tpu.memory_space<vmem>>, vector<1x128xf32>
    %723 = vector.broadcast %722 : vector<1x128xf32> to vector<8x128xf32>
    %724 = arith.addf %721, %723 : vector<8x128xf32>
    %cst_378 = arith.constant dense<0xFF800000> : vector<8xf32>
    %725 = vector.multi_reduction <maximumf>, %724, %cst_378 [1] : vector<8x128xf32> to vector<8xf32>
    %726 = vector.shape_cast %725 : vector<8xf32> to vector<8x1xf32>
    %727 = vector.broadcast %726 : vector<8x1xf32> to vector<8x128xf32>
    %728 = arith.subf %724, %727 : vector<8x128xf32>
    %729 = math.exp %728 : vector<8x128xf32>
    %cst_379 = arith.constant dense<0.000000e+00> : vector<8xf32>
    %730 = vector.multi_reduction <add>, %729, %cst_379 [1] : vector<8x128xf32> to vector<8xf32>
    %731 = vector.shape_cast %730 : vector<8xf32> to vector<8x1xf32>
    %732 = vector.broadcast %731 : vector<8x1xf32> to vector<8x128xf32>
    %733 = arith.divf %729, %732 : vector<8x128xf32>
    %734 = vector.shape_cast %733 : vector<8x128xf32> to vector<1x8x128xf32>
    %c0_380 = arith.constant 0 : index
    %c0_381 = arith.constant 0 : index
    %c0_382 = arith.constant 0 : index
    %735 = vector.load %arg47[%c0_380, %c0_381, %c0_382] : memref<1x8x128xf32, #tpu.memory_space<vmem>>, vector<1x8x128xf32>
    tpu.vector_store %arg47[%c0_380, %c0_381, %c0_382], %734 {strides = array<i32>} : memref<1x8x128xf32, #tpu.memory_space<vmem>>, vector<1x8x128xf32>,
    return
  }
  func.func @transform_0(%arg0: i32) -> (i32, i32, i32) {
    %c0_i32 = arith.constant 0 : i32
    %c0_i32_0 = arith.constant 0 : i32
    %c0_i32_1 = arith.constant 0 : i32
    return %arg0, %c0_i32, %c0_i32_0 : i32, i32, i32
  }
  func.func @transform_1(%arg0: i32) -> (i32, i32, i32) {
    %c0_i32 = arith.constant 0 : i32
    %c0_i32_0 = arith.constant 0 : i32
    %c0_i32_1 = arith.constant 0 : i32
    return %arg0, %c0_i32, %c0_i32_0 : i32, i32, i32
  }
  func.func @transform_2(%arg0: i32) -> (i32, i32, i32) {
    %c0_i32 = arith.constant 0 : i32
    %c0_i32_0 = arith.constant 0 : i32
    %c0_i32_1 = arith.constant 0 : i32
    %c0_i32_2 = arith.constant 0 : i32
    return %c0_i32, %c0_i32_0, %c0_i32_1 : i32, i32, i32
  }
  func.func @transform_3(%arg0: i32) -> (i32, i32, i32) {
    %c0_i32 = arith.constant 0 : i32
    %c0_i32_0 = arith.constant 0 : i32
    %c0_i32_1 = arith.constant 0 : i32
    %c0_i32_2 = arith.constant 0 : i32
    return %c0_i32, %c0_i32_0, %c0_i32_1 : i32, i32, i32
  }
  func.func @transform_4(%arg0: i32) -> (i32, i32, i32) {
    %c0_i32 = arith.constant 0 : i32
    %c0_i32_0 = arith.constant 0 : i32
    %c0_i32_1 = arith.constant 0 : i32
    %c0_i32_2 = arith.constant 0 : i32
    return %c0_i32, %c0_i32_0, %c0_i32_1 : i32, i32, i32
  }
  func.func @transform_5(%arg0: i32) -> (i32, i32, i32) {
    %c0_i32 = arith.constant 0 : i32
    %c0_i32_0 = arith.constant 0 : i32
    %c0_i32_1 = arith.constant 0 : i32
    %c0_i32_2 = arith.constant 0 : i32
    return %c0_i32, %c0_i32_0, %c0_i32_1 : i32, i32, i32
  }
  func.func @transform_6(%arg0: i32) -> (i32, i32, i32) {
    %c0_i32 = arith.constant 0 : i32
    %c0_i32_0 = arith.constant 0 : i32
    %c0_i32_1 = arith.constant 0 : i32
    %c0_i32_2 = arith.constant 0 : i32
    return %c0_i32, %c0_i32_0, %c0_i32_1 : i32, i32, i32
  }
  func.func @transform_7(%arg0: i32) -> (i32, i32, i32) {
    %c0_i32 = arith.constant 0 : i32
    %c0_i32_0 = arith.constant 0 : i32
    %c0_i32_1 = arith.constant 0 : i32
    %c0_i32_2 = arith.constant 0 : i32
    return %c0_i32, %c0_i32_0, %c0_i32_1 : i32, i32, i32
  }
  func.func @transform_8(%arg0: i32) -> (i32, i32, i32) {
    %c0_i32 = arith.constant 0 : i32
    %c0_i32_0 = arith.constant 0 : i32
    %c0_i32_1 = arith.constant 0 : i32
    %c0_i32_2 = arith.constant 0 : i32
    return %c0_i32, %c0_i32_0, %c0_i32_1 : i32, i32, i32
  }
  func.func @transform_9(%arg0: i32) -> (i32, i32, i32) {
    %c0_i32 = arith.constant 0 : i32
    %c0_i32_0 = arith.constant 0 : i32
    %c0_i32_1 = arith.constant 0 : i32
    %c0_i32_2 = arith.constant 0 : i32
    return %c0_i32, %c0_i32_0, %c0_i32_1 : i32, i32, i32
  }
  func.func @transform_10(%arg0: i32) -> (i32, i32, i32) {
    %c0_i32 = arith.constant 0 : i32
    %c0_i32_0 = arith.constant 0 : i32
    %c0_i32_1 = arith.constant 0 : i32
    %c0_i32_2 = arith.constant 0 : i32
    return %c0_i32, %c0_i32_0, %c0_i32_1 : i32, i32, i32
  }
  func.func @transform_11(%arg0: i32) -> (i32, i32, i32) {
    %c0_i32 = arith.constant 0 : i32
    %c0_i32_0 = arith.constant 0 : i32
    %c0_i32_1 = arith.constant 0 : i32
    %c0_i32_2 = arith.constant 0 : i32
    return %c0_i32, %c0_i32_0, %c0_i32_1 : i32, i32, i32
  }
  func.func @transform_12(%arg0: i32) -> (i32, i32, i32) {
    %c0_i32 = arith.constant 0 : i32
    %c0_i32_0 = arith.constant 0 : i32
    %c0_i32_1 = arith.constant 0 : i32
    %c0_i32_2 = arith.constant 0 : i32
    return %c0_i32, %c0_i32_0, %c0_i32_1 : i32, i32, i32
  }
  func.func @transform_13(%arg0: i32) -> (i32, i32, i32) {
    %c0_i32 = arith.constant 0 : i32
    %c0_i32_0 = arith.constant 0 : i32
    %c0_i32_1 = arith.constant 0 : i32
    %c0_i32_2 = arith.constant 0 : i32
    return %c0_i32, %c0_i32_0, %c0_i32_1 : i32, i32, i32
  }
  func.func @transform_14(%arg0: i32) -> (i32, i32, i32) {
    %c0_i32 = arith.constant 0 : i32
    %c0_i32_0 = arith.constant 0 : i32
    %c0_i32_1 = arith.constant 0 : i32
    %c0_i32_2 = arith.constant 0 : i32
    return %c0_i32, %c0_i32_0, %c0_i32_1 : i32, i32, i32
  }
  func.func @transform_15(%arg0: i32) -> (i32, i32, i32) {
    %c0_i32 = arith.constant 0 : i32
    %c0_i32_0 = arith.constant 0 : i32
    %c0_i32_1 = arith.constant 0 : i32
    %c0_i32_2 = arith.constant 0 : i32
    return %c0_i32, %c0_i32_0, %c0_i32_1 : i32, i32, i32
  }
  func.func @transform_16(%arg0: i32) -> (i32, i32, i32) {
    %c0_i32 = arith.constant 0 : i32
    %c0_i32_0 = arith.constant 0 : i32
    %c0_i32_1 = arith.constant 0 : i32
    %c0_i32_2 = arith.constant 0 : i32
    return %c0_i32, %c0_i32_0, %c0_i32_1 : i32, i32, i32
  }
  func.func @transform_17(%arg0: i32) -> (i32, i32, i32) {
    %c0_i32 = arith.constant 0 : i32
    %c0_i32_0 = arith.constant 0 : i32
    %c0_i32_1 = arith.constant 0 : i32
    %c0_i32_2 = arith.constant 0 : i32
    return %c0_i32, %c0_i32_0, %c0_i32_1 : i32, i32, i32
  }
  func.func @transform_18(%arg0: i32) -> (i32, i32, i32) {
    %c0_i32 = arith.constant 0 : i32
    %c0_i32_0 = arith.constant 0 : i32
    %c0_i32_1 = arith.constant 0 : i32
    %c0_i32_2 = arith.constant 0 : i32
    return %c0_i32, %c0_i32_0, %c0_i32_1 : i32, i32, i32
  }
  func.func @transform_19(%arg0: i32) -> (i32, i32, i32) {
    %c0_i32 = arith.constant 0 : i32
    %c0_i32_0 = arith.constant 0 : i32
    %c0_i32_1 = arith.constant 0 : i32
    %c0_i32_2 = arith.constant 0 : i32
    return %c0_i32, %c0_i32_0, %c0_i32_1 : i32, i32, i32
  }
  func.func @transform_20(%arg0: i32) -> (i32, i32, i32) {
    %c0_i32 = arith.constant 0 : i32
    %c0_i32_0 = arith.constant 0 : i32
    %c0_i32_1 = arith.constant 0 : i32
    %c0_i32_2 = arith.constant 0 : i32
    return %c0_i32, %c0_i32_0, %c0_i32_1 : i32, i32, i32
  }
  func.func @transform_21(%arg0: i32) -> (i32, i32, i32) {
    %c0_i32 = arith.constant 0 : i32
    %c0_i32_0 = arith.constant 0 : i32
    %c0_i32_1 = arith.constant 0 : i32
    %c0_i32_2 = arith.constant 0 : i32
    return %c0_i32, %c0_i32_0, %c0_i32_1 : i32, i32, i32
  }
  func.func @transform_22(%arg0: i32) -> (i32, i32, i32) {
    %c0_i32 = arith.constant 0 : i32
    %c0_i32_0 = arith.constant 0 : i32
    %c0_i32_1 = arith.constant 0 : i32
    %c0_i32_2 = arith.constant 0 : i32
    return %c0_i32, %c0_i32_0, %c0_i32_1 : i32, i32, i32
  }
  func.func @transform_23(%arg0: i32) -> (i32, i32, i32) {
    %c0_i32 = arith.constant 0 : i32
    %c0_i32_0 = arith.constant 0 : i32
    %c0_i32_1 = arith.constant 0 : i32
    %c0_i32_2 = arith.constant 0 : i32
    return %c0_i32, %c0_i32_0, %c0_i32_1 : i32, i32, i32
  }
  func.func @transform_24(%arg0: i32) -> (i32, i32, i32) {
    %c0_i32 = arith.constant 0 : i32
    %c0_i32_0 = arith.constant 0 : i32
    %c0_i32_1 = arith.constant 0 : i32
    %c0_i32_2 = arith.constant 0 : i32
    return %c0_i32, %c0_i32_0, %c0_i32_1 : i32, i32, i32
  }
  func.func @transform_25(%arg0: i32) -> (i32, i32, i32) {
    %c0_i32 = arith.constant 0 : i32
    %c0_i32_0 = arith.constant 0 : i32
    %c0_i32_1 = arith.constant 0 : i32
    %c0_i32_2 = arith.constant 0 : i32
    return %c0_i32, %c0_i32_0, %c0_i32_1 : i32, i32, i32
  }
  func.func @transform_26(%arg0: i32) -> (i32, i32, i32) {
    %c0_i32 = arith.constant 0 : i32
    %c0_i32_0 = arith.constant 0 : i32
    %c0_i32_1 = arith.constant 0 : i32
    %c0_i32_2 = arith.constant 0 : i32
    return %c0_i32, %c0_i32_0, %c0_i32_1 : i32, i32, i32
  }
  func.func @transform_27(%arg0: i32) -> (i32, i32, i32) {
    %c0_i32 = arith.constant 0 : i32
    %c0_i32_0 = arith.constant 0 : i32
    %c0_i32_1 = arith.constant 0 : i32
    %c0_i32_2 = arith.constant 0 : i32
    return %c0_i32, %c0_i32_0, %c0_i32_1 : i32, i32, i32
  }
  func.func @transform_28(%arg0: i32) -> (i32, i32, i32) {
    %c0_i32 = arith.constant 0 : i32
    %c0_i32_0 = arith.constant 0 : i32
    %c0_i32_1 = arith.constant 0 : i32
    %c0_i32_2 = arith.constant 0 : i32
    return %c0_i32, %c0_i32_0, %c0_i32_1 : i32, i32, i32
  }
  func.func @transform_29(%arg0: i32) -> (i32, i32, i32) {
    %c0_i32 = arith.constant 0 : i32
    %c0_i32_0 = arith.constant 0 : i32
    %c0_i32_1 = arith.constant 0 : i32
    %c0_i32_2 = arith.constant 0 : i32
    return %c0_i32, %c0_i32_0, %c0_i32_1 : i32, i32, i32
  }
  func.func @transform_30(%arg0: i32) -> (i32, i32, i32) {
    %c0_i32 = arith.constant 0 : i32
    %c0_i32_0 = arith.constant 0 : i32
    %c0_i32_1 = arith.constant 0 : i32
    %c0_i32_2 = arith.constant 0 : i32
    return %c0_i32, %c0_i32_0, %c0_i32_1 : i32, i32, i32
  }
  func.func @transform_31(%arg0: i32) -> (i32, i32, i32) {
    %c0_i32 = arith.constant 0 : i32
    %c0_i32_0 = arith.constant 0 : i32
    %c0_i32_1 = arith.constant 0 : i32
    %c0_i32_2 = arith.constant 0 : i32
    return %c0_i32, %c0_i32_0, %c0_i32_1 : i32, i32, i32
  }
  func.func @transform_32(%arg0: i32) -> (i32, i32, i32) {
    %c0_i32 = arith.constant 0 : i32
    %c0_i32_0 = arith.constant 0 : i32
    %c0_i32_1 = arith.constant 0 : i32
    %c0_i32_2 = arith.constant 0 : i32
    return %c0_i32, %c0_i32_0, %c0_i32_1 : i32, i32, i32
  }
  func.func @transform_33(%arg0: i32) -> (i32, i32, i32) {
    %c0_i32 = arith.constant 0 : i32
    %c0_i32_0 = arith.constant 0 : i32
    %c0_i32_1 = arith.constant 0 : i32
    %c0_i32_2 = arith.constant 0 : i32
    return %c0_i32, %c0_i32_0, %c0_i32_1 : i32, i32, i32
  }
  func.func @transform_34(%arg0: i32) -> (i32, i32, i32) {
    %c0_i32 = arith.constant 0 : i32
    %c0_i32_0 = arith.constant 0 : i32
    %c0_i32_1 = arith.constant 0 : i32
    %c0_i32_2 = arith.constant 0 : i32
    return %c0_i32, %c0_i32_0, %c0_i32_1 : i32, i32, i32
  }
  func.func @transform_35(%arg0: i32) -> (i32, i32, i32) {
    %c0_i32 = arith.constant 0 : i32
    %c0_i32_0 = arith.constant 0 : i32
    %c0_i32_1 = arith.constant 0 : i32
    %c0_i32_2 = arith.constant 0 : i32
    return %c0_i32, %c0_i32_0, %c0_i32_1 : i32, i32, i32
  }
  func.func @transform_36(%arg0: i32) -> (i32, i32, i32) {
    %c0_i32 = arith.constant 0 : i32
    %c0_i32_0 = arith.constant 0 : i32
    %c0_i32_1 = arith.constant 0 : i32
    %c0_i32_2 = arith.constant 0 : i32
    return %c0_i32, %c0_i32_0, %c0_i32_1 : i32, i32, i32
  }
  func.func @transform_37(%arg0: i32) -> (i32, i32, i32) {
    %c0_i32 = arith.constant 0 : i32
    %c0_i32_0 = arith.constant 0 : i32
    %c0_i32_1 = arith.constant 0 : i32
    %c0_i32_2 = arith.constant 0 : i32
    return %c0_i32, %c0_i32_0, %c0_i32_1 : i32, i32, i32
  }
  func.func @transform_38(%arg0: i32) -> (i32, i32, i32) {
    %c0_i32 = arith.constant 0 : i32
    %c0_i32_0 = arith.constant 0 : i32
    %c0_i32_1 = arith.constant 0 : i32
    %c0_i32_2 = arith.constant 0 : i32
    return %c0_i32, %c0_i32_0, %c0_i32_1 : i32, i32, i32
  }
  func.func @transform_39(%arg0: i32) -> (i32, i32, i32) {
    %c0_i32 = arith.constant 0 : i32
    %c0_i32_0 = arith.constant 0 : i32
    %c0_i32_1 = arith.constant 0 : i32
    %c0_i32_2 = arith.constant 0 : i32
    return %c0_i32, %c0_i32_0, %c0_i32_1 : i32, i32, i32
  }
  func.func @transform_40(%arg0: i32) -> (i32, i32, i32) {
    %c0_i32 = arith.constant 0 : i32
    %c0_i32_0 = arith.constant 0 : i32
    %c0_i32_1 = arith.constant 0 : i32
    %c0_i32_2 = arith.constant 0 : i32
    return %c0_i32, %c0_i32_0, %c0_i32_1 : i32, i32, i32
  }
  func.func @transform_41(%arg0: i32) -> (i32, i32, i32) {
    %c0_i32 = arith.constant 0 : i32
    %c0_i32_0 = arith.constant 0 : i32
    %c0_i32_1 = arith.constant 0 : i32
    %c0_i32_2 = arith.constant 0 : i32
    return %c0_i32, %c0_i32_0, %c0_i32_1 : i32, i32, i32
  }
  func.func @transform_42(%arg0: i32) -> (i32, i32, i32) {
    %c0_i32 = arith.constant 0 : i32
    %c0_i32_0 = arith.constant 0 : i32
    %c0_i32_1 = arith.constant 0 : i32
    %c0_i32_2 = arith.constant 0 : i32
    return %c0_i32, %c0_i32_0, %c0_i32_1 : i32, i32, i32
  }
  func.func @transform_43(%arg0: i32) -> (i32, i32, i32) {
    %c0_i32 = arith.constant 0 : i32
    %c0_i32_0 = arith.constant 0 : i32
    %c0_i32_1 = arith.constant 0 : i32
    %c0_i32_2 = arith.constant 0 : i32
    return %c0_i32, %c0_i32_0, %c0_i32_1 : i32, i32, i32
  }
  func.func @transform_44(%arg0: i32) -> (i32, i32) {
    %c0_i32 = arith.constant 0 : i32
    %c0_i32_0 = arith.constant 0 : i32
    %c0_i32_1 = arith.constant 0 : i32
    return %c0_i32, %c0_i32_0 : i32, i32
  }
  func.func @transform_45(%arg0: i32) -> (i32, i32) {
    %c0_i32 = arith.constant 0 : i32
    %c0_i32_0 = arith.constant 0 : i32
    %c0_i32_1 = arith.constant 0 : i32
    return %c0_i32, %c0_i32_0 : i32, i32
  }
  func.func @transform_46(%arg0: i32) -> (i32, i32, i32) {
    %c0_i32 = arith.constant 0 : i32
    %c0_i32_0 = arith.constant 0 : i32
    %c0_i32_1 = arith.constant 0 : i32
    return %arg0, %c0_i32, %c0_i32_0 : i32, i32, i32
  }
}

</mosaic_0001>

<bundles_post_ra>
// kernel: translator_forward.1
= control target key start
LH: loop header
LB: loop body
LE: loop exit
PB: predicated region body
PF: predicated region fallthrough
CT: control target
= control target key end

     0   :  { %s12082_s6 = smov 1   ;;  %s12083_s10 = smov 2   ;;  %s13860_s0 = inlined_call_operand.smem [shape: u32[47], index: -1, kind: input, shape index: {}] }
   0x1   :  { %s12155_s5 = sld [smem:[%s13860_s0]]   ;;  %s12084_s14 = smov 3  }
   0x2   :  { %s12160_s9 = sld [smem:[%s13860_s0 + %s12082_s6]]   ;;  %s12085_s18 = smov 4  }
   0x3   :  { %s12165_s13 = sld [smem:[%s13860_s0 + %s12083_s10]]   ;;  %s12086_s22 = smov 5  }
   0x4   :  { %s12170_s17 = sld [smem:[%s13860_s0 + %s12084_s14]]   ;;  %s12087_s26 = smov 6  }
   0x5   :  { %s12175_s21 = sld [smem:[%s13860_s0 + %s12085_s18]]   ;;  %s12088_s30 = smov 7  }
   0x6   :  { %s12180_s25 = sld [smem:[%s13860_s0 + %s12086_s22]]   ;;  %s12089_s4 = smov 8  }
   0x7   :  { %13940 = sst [smem:[#allocation16_spill]] %s12155_s5  ;;  %s12090_s10 = smov 9  }
   0x8   :  { %13941 = sst [smem:[#allocation17_spill]] %s12160_s9  ;;  %s12091_s15 = smov 10  }
   0x9   :  { %13942 = sst [smem:[#allocation18_spill]] %s12165_s13  ;;  %s12092_s20 = smov 11  }
   0xa   :  { %13943 = sst [smem:[#allocation19_spill]] %s12170_s17  ;;  %s12094_s1 = smov 13  }
   0xb   :  { %13944 = sst [smem:[#allocation20_spill]] %s12175_s21  ;;  %s12095_s7 = smov 14  }
   0xc   :  { %13945 = sst [smem:[#allocation21_spill]] %s12180_s25  ;;  %s12097_s22 = smov 16  }
   0xd   :  { %s12185_s29 = sld [smem:[%s13860_s0 + %s12087_s26]]   ;;  %s12093_s26 = smov 12  }
   0xe   :  { %s12190_s3 = sld [smem:[%s13860_s0 + %s12088_s30]]   ;;  %s12098_s28 = smov 17  }
   0xf   :  { %s12195_s8 = sld [smem:[%s13860_s0 + %s12089_s4]]  }
  0x10   :  { %s12200_s14 = sld [smem:[%s13860_s0 + %s12090_s10]]  }
  0x11   :  { %s12205_s19 = sld [smem:[%s13860_s0 + %s12091_s15]]   ;;  %s12096_s15 = smov 15  }
  0x12   :  { %s12210_s24 = sld [smem:[%s13860_s0 + %s12092_s20]]  }
  0x13   :  { %13946 = sst [smem:[#allocation22_spill]] %s12185_s29 }
  0x14   :  { %13947 = sst [smem:[#allocation23_spill]] %s12190_s3 }
  0x15   :  { %13948 = sst [smem:[#allocation24_spill]] %s12195_s8 }
  0x16   :  { %13949 = sst [smem:[#allocation25_spill]] %s12200_s14 }
  0x17   :  { %13950 = sst [smem:[#allocation26_spill]] %s12205_s19 }
  0x18   :  { %13951 = sst [smem:[#allocation27_spill]] %s12210_s24 }
  0x19   :  { %s12215_s30 = sld [smem:[%s13860_s0 + %s12093_s26]]  }
  0x1a   :  { %s12220_s6 = sld [smem:[%s13860_s0 + %s12094_s1]]  }
  0x1b   :  { %s12225_s12 = sld [smem:[%s13860_s0 + %s12095_s7]]   ;;  %s12099_s7 = smov 18  }
  0x1c   :  { %s12230_s20 = sld [smem:[%s13860_s0 + %s12096_s15]]   ;;  %s12100_s15 = smov 19  }
  0x1d   :  { %s12235_s27 = sld [smem:[%s13860_s0 + %s12097_s22]]   ;;  %s12101_s22 = smov 20  }
  0x1e   :  { %s12240_s4 = sld [smem:[%s13860_s0 + %s12098_s28]]   ;;  %s12102_s28 = smov 21  }
  0x1f   :  { %13952 = sst [smem:[#allocation28_spill]] %s12215_s30 }
  0x20   :  { %13953 = sst [smem:[#allocation29_spill]] %s12220_s6 }
  0x21   :  { %13954 = sst [smem:[#allocation30_spill]] %s12225_s12 }
  0x22   :  { %13955 = sst [smem:[#allocation31_spill]] %s12230_s20 }
  0x23   :  { %13956 = sst [smem:[#allocation32_spill]] %s12235_s27 }
  0x24   :  { %13957 = sst [smem:[#allocation33_spill]] %s12240_s4 }
  0x25   :  { %s12245_s9 = sld [smem:[%s13860_s0 + %s12099_s7]]   ;;  %s12103_s7 = smov 22  }
  0x26   :  { %s12250_s20 = sld [smem:[%s13860_s0 + %s12100_s15]]   ;;  %s12104_s15 = smov 23  }
  0x27   :  { %s12255_s27 = sld [smem:[%s13860_s0 + %s12101_s22]]   ;;  %s12105_s22 = smov 24  }
  0x28   :  { %s12260_s4 = sld [smem:[%s13860_s0 + %s12102_s28]]   ;;  %s12106_s28 = smov 25  }
  0x2b   :  { %13958 = sst [smem:[#allocation34_spill]] %s12245_s9 }
  0x2c   :  { %13959 = sst [smem:[#allocation35_spill]] %s12250_s20 }
  0x2d   :  { %13960 = sst [smem:[#allocation36_spill]] %s12255_s27 }
  0x2e   :  { %13961 = sst [smem:[#allocation37_spill]] %s12260_s4 }
  0x2f   :  { %s12265_s9 = sld [smem:[%s13860_s0 + %s12103_s7]]   ;;  %s12107_s7 = smov 26  }
  0x30   :  { %s12270_s20 = sld [smem:[%s13860_s0 + %s12104_s15]]   ;;  %s12108_s15 = smov 27  }
  0x31   :  { %s12275_s27 = sld [smem:[%s13860_s0 + %s12105_s22]]   ;;  %s12109_s22 = smov 28  }
  0x32   :  { %s12280_s4 = sld [smem:[%s13860_s0 + %s12106_s28]]   ;;  %s12110_s28 = smov 29  }
  0x35   :  { %13962 = sst [smem:[#allocation38_spill]] %s12265_s9 }
  0x36   :  { %13963 = sst [smem:[#allocation39_spill]] %s12270_s20 }
  0x37   :  { %13964 = sst [smem:[#allocation40_spill]] %s12275_s27 }
  0x38   :  { %13965 = sst [smem:[#allocation41_spill]] %s12280_s4 }
  0x39   :  { %s12285_s9 = sld [smem:[%s13860_s0 + %s12107_s7]]   ;;  %s12111_s7 = smov 30  }
  0x3a   :  { %s12290_s20 = sld [smem:[%s13860_s0 + %s12108_s15]]   ;;  %s12112_s15 = smov 31  }
  0x3b   :  { %s12295_s27 = sld [smem:[%s13860_s0 + %s12109_s22]]   ;;  %s12113_s22 = smov 32  }
  0x3c   :  { %s12300_s4 = sld [smem:[%s13860_s0 + %s12110_s28]]   ;;  %s12114_s28 = smov 33  }
  0x3f   :  { %13966 = sst [smem:[#allocation42_spill]] %s12285_s9 }
  0x40   :  { %13967 = sst [smem:[#allocation43_spill]] %s12290_s20 }
  0x41   :  { %13968 = sst [smem:[#allocation44_spill]] %s12295_s27 }
  0x42   :  { %13969 = sst [smem:[#allocation45_spill]] %s12300_s4 }
  0x43   :  { %s12305_s9 = sld [smem:[%s13860_s0 + %s12111_s7]]   ;;  %s12115_s7 = smov 34  }
  0x44   :  { %s12310_s20 = sld [smem:[%s13860_s0 + %s12112_s15]]   ;;  %s12116_s15 = smov 35  }
  0x45   :  { %s12315_s27 = sld [smem:[%s13860_s0 + %s12113_s22]]   ;;  %s12117_s22 = smov 36  }
  0x46   :  { %s12320_s4 = sld [smem:[%s13860_s0 + %s12114_s28]]   ;;  %s12118_s28 = smov 37  }
  0x49   :  { %13970 = sst [smem:[#allocation46_spill]] %s12305_s9 }
  0x4a   :  { %13971 = sst [smem:[#allocation47_spill]] %s12310_s20 }
  0x4b   :  { %13972 = sst [smem:[#allocation48_spill]] %s12315_s27 }
  0x4c   :  { %13973 = sst [smem:[#allocation49_spill]] %s12320_s4 }
  0x4d   :  { %s12325_s9 = sld [smem:[%s13860_s0 + %s12115_s7]]   ;;  %s12119_s7 = smov 38  }
  0x4e   :  { %s12330_s20 = sld [smem:[%s13860_s0 + %s12116_s15]]   ;;  %s12120_s15 = smov 39  }
  0x4f   :  { %s12335_s27 = sld [smem:[%s13860_s0 + %s12117_s22]]   ;;  %s12121_s22 = smov 40  }
  0x50   :  { %s12340_s4 = sld [smem:[%s13860_s0 + %s12118_s28]]   ;;  %s12122_s28 = smov 41  }
  0x53   :  { %13974 = sst [smem:[#allocation50_spill]] %s12325_s9 }
  0x54   :  { %13975 = sst [smem:[#allocation51_spill]] %s12330_s20 }
  0x55   :  { %13976 = sst [smem:[#allocation52_spill]] %s12335_s27 }
  0x56   :  { %13977 = sst [smem:[#allocation53_spill]] %s12340_s4 }
  0x57   :  { %s12345_s9 = sld [smem:[%s13860_s0 + %s12119_s7]]   ;;  %s12123_s7 = smov 42  }
  0x58   :  { %s12350_s20 = sld [smem:[%s13860_s0 + %s12120_s15]]   ;;  %s12124_s15 = smov 43  }
  0x59   :  { %s12355_s27 = sld [smem:[%s13860_s0 + %s12121_s22]]   ;;  %s12125_s22 = smov 44  }
  0x5a   :  { %s12360_s4 = sld [smem:[%s13860_s0 + %s12122_s28]]   ;;  %s12126_s28 = smov 45  }
  0x5b   :  { %s12375_s6 = sld [smem:[%s13860_s0 + %s12125_s22]]  }
  0x5c   :  { %s12380_s24 = sld [smem:[%s13860_s0 + %s12126_s28]]  }
  0x5d   :  { %13978 = sst [smem:[#allocation54_spill]] %s12345_s9 }
  0x5e   :  { %13979 = sst [smem:[#allocation55_spill]] %s12350_s20 }
  0x5f   :  { %13980 = sst [smem:[#allocation56_spill]] %s12355_s27 }
  0x60   :  { %13981 = sst [smem:[#allocation57_spill]] %s12360_s4 }
  0x61   :  { %s12365_s9 = sld [smem:[%s13860_s0 + %s12123_s7]]   ;;  %s12127_s7 = smov 46  }
  0x62   :  { %s12370_s20 = sld [smem:[%s13860_s0 + %s12124_s15]]  }
  0x63   :  { %13984 = sst [smem:[#allocation60_spill]] %s12375_s6 }
  0x64   :  { %13985 = sst [smem:[#allocation61_spill]] %s12380_s24 }
  0x65   :  { %s12385_s19 = sld [smem:[%s13860_s0 + %s12127_s7]]  }
  0x67   :  { %13982 = sst [smem:[#allocation58_spill]] %s12365_s9 }
  0x68   :  { %13983 = sst [smem:[#allocation59_spill]] %s12370_s20 }
  0x6b   :  { %13986 = sst [smem:[#allocation62_spill]] %s12385_s19 }
  0x6c   :  { %98 = vsyncpa [#allocation3], 0 }
  0x6d   :  { %99 = vsyncpa [#allocation6], 0 }
  0x6e   :  { %100 = vsyncpa [#allocation9], 0 }
  0x6f   :  { %101 = vsyncpa [#allocation4], 0 }
  0x70   :  { %103 = vsyncpa [#allocation4 + $0x1], 0  ;;  %s12387_s15 = smov 0   ;;  %s12389_s16 = smov 0  }
  0x71   :  { %s12391_s18 = smov 0   ;;  %s12393_s22 = smov 0  }
  0x72 LB: > { %s13987_s6 = sld [smem:[#allocation60_spill]]  ;;  %s13989_s29 = sld [smem:[#allocation22_spill]]  ;;  %s12080_s22 = sphi %s12393_s22, %s14069_s22   ;;  %s12076_s18 = sphi %s12391_s18, %s14071_s18   ;;  %s12072_s16 = sphi %s12389_s16, %s14073_s16   ;;  %s12068_s15 = sphi %s12387_s15, %s14072_s15  }
  0x73   : > { %s13988_s30 = sld [smem:[#allocation28_spill]]  ;;  %s13990_s27 = sld [smem:[#allocation56_spill]] }
  0x74   : > { %s13991_s25 = sld [smem:[#allocation21_spill]]  ;;  %s13993_s21 = sld [smem:[#allocation20_spill]] }
  0x75   : > { %s13992_s24 = sld [smem:[#allocation61_spill]]  ;;  %s13994_s17 = sld [smem:[#allocation19_spill]] }
  0x76   : > { %s13995_s14 = sld [smem:[#allocation25_spill]]  ;;  %s13996_s13 = sld [smem:[#allocation18_spill]] }
  0x77   : > { %s13997_s12 = sld [smem:[#allocation30_spill]]  ;;  %s13998_s9 = sld [smem:[#allocation58_spill]] }
  0x78   : > { %s13999_s8 = sld [smem:[#allocation24_spill]]  ;;  %s14000_s3 = sld [smem:[#allocation23_spill]] }
  0x79   : > { %s14001_s20 = sld [smem:[#allocation59_spill]]  ;;  %s14002_s4 = sld [smem:[#allocation57_spill]] }
  0x7a   : > { %14003 = sst [smem:[#allocation63_spill]] %s12068_s15  ;;  %s12408_s0 = sadd.s32 4294967295, %s12080_s22  }
  0x7b   : > { %14004 = sst [smem:[#allocation64_spill]] %s12076_s18  ;;  %s10380_s23 = sadd.s32 4294967294, %s12080_s22  }
  0x7c   : > { %14005 = sst [smem:[#allocation65_spill]] %s12080_s22  ;;  %s12412_s26 = sadd.s32 1, %s12080_s22  }
  0x7d   : > { %14006 = sst [smem:[#allocation66_spill]] %s12412_s26  ;;  %s1092_s28 = sadd.s32 1, %s12076_s18 }
  0x7e   : > { %s1089_s1 = ssub.s32 %s12080_s22, %s12412_s26  ;;  %p1102_p0 = scmp.ne.s32.totalorder %s12076_s18, %s12072_s16 }
  0x7f   : > { %p1090_p1 = scmp.eq.s32.totalorder %s1089_s1, 0  ;;  %p1103_p2 = scmp.eq.s32.totalorder %s12408_s0, 1 }
  0x80   : > { %p1108_p3 = scmp.ne.s32.totalorder %s12072_s16, %s12068_s15  ;;  %p1109_p4 = scmp.eq.s32.totalorder %s10380_s23, 1 }
  0x81   : > { %s12423_s2 = scalar_select %p1090_p1, %s12076_s18, %s1092_s28  }
  0x82   : > { %p12425_p5 = por %p1103_p2, %p1102_p0  ;;  %p12429_p6 = por %p1109_p4, %p1108_p3 }
  0x83   : > { %14007 = sst [smem:[#allocation67_spill]] %s12423_s2  ;;  %p10381_p7 = scmp.ge.s32.totalorder %s12080_s22, 1 }
  0x84   : > { %s14008_s7 = scalar_select %p12425_p5, 1, 0 }
  0x85   : > { %s14010_s10 = scalar_select %p12429_p6, 1, 0 }
  0x86   : > { %14009 = sst [smem:[#allocation68_spill]] %s14008_s7  ;;  %p1116_p8 = scmp.lt.s32.totalorder %s12080_s22, 3 }
  0x87   : > { %14011 = sst [smem:[#allocation69_spill]] %s14010_s10  ;;  %p13894_p9 = scmp.eq.s32.totalorder %s12408_s0, 0 }
  0x88   : > { %p12436_p10 = pnand %p10381_p7, %p1116_p8  ;;  %s12128_s23 = smov [#allocation5]  }
  0x89   : > { %s1255_s28 = sshll.u32 %s12128_s23, 4  ;;  %s12129_s2 = smov [#allocation8]   ;;  %s12442_s28 = int_to_ptr.vmem [resolvable:$true] %s1255_s28 }
  0x8a   : > { %s14012_s11 = scalar_select %p12436_p10, 1, 0 }
  0x8b   : > { %p11544_p11 = pneg %p12436_p10  ;;  %s1281_s18 = sshll.u32 %s12129_s2, 4  ;;  %s12450_s18 = int_to_ptr.vmem [resolvable:$true] %s1281_s18 }
  0x8c   : > { %s12130_s26 = smov [#allocation2]   ;;  %s11866_s15 = scalar_lea.hbm %s14002_s4, 32 }
  0x8d   : > { %p12446_p12 = pnand %p13894_p9, %p11544_p11  ;;  %s12452_s10 = sshll.u32 %s12130_s26, 4  ;;  %s1243_s10 = int_to_ptr.vmem [resolvable:$true] %s12452_s10 }
  0x8e   : > { %p11867_p13 = scmp.ne.s32.totalorder %s14002_s4, %s11866_s15  ;;  %p11873_p3 = scmp.lt.u32.totalorder %s11866_s15, %s14002_s4 }
  0x8f   : > { %p12458_p0 = pneg %p12446_p12 }
  0x91   : > { %p11869_p1 = pnand %p12458_p0, %p11867_p13 }
  0x93   : > { %p11870_p2 = pneg %p11869_p1 }
  0x95   : > { %p11875_p4 = pnand %p11873_p3, %p11870_p2 }
  0x97   : > { %11878 = shalt.err (!%p11875_p4)
}
  0x98   : > { %s11879_s26 = scalar_lea.vmem %s12442_s28, 32  ;;  %p11887_p9 = scmp.lt.s32.totalorder %s12442_s28, %s12442_s28 }
  0x99   : > { %p11880_p7 = scmp.ne.s32.totalorder %s12442_s28, %s11879_s26  ;;  %p11888_p6 = scmp.lt.s32.totalorder %s11879_s26, %s11879_s26 }
  0x9b   : > { %p11882_p8 = pnand %p11880_p7, %p12458_p0  ;;  %p11889_p5 = por %p11888_p6, %p11887_p9 }
  0x9d   : > { %p11883_p11 = pneg %p11882_p8 }
  0x9f   : > { %p11890_p10 = pnand %p11889_p5, %p11883_p11 }
  0xa1   : > { %11893 = shalt.err (!%p11890_p10)
}
  0xa2   : > { %s12131_s2 = smov 16   ;;  %s12132_s15 = smov 1  }
  0xa3   : > { %11550 = dma.hbm_to_vmem [thread:$0]  (!%p12446_p12), %s14002_s4, 32, %s12442_s28, [#allocation6], %s12131_s2, %s12131_s2, %s12132_s15  }
  0xa4   : > { %s11894_s22 = scalar_lea.hbm %s14001_s20, 32 }
  0xa5   : > { %p11895_p13 = scmp.ne.s32.totalorder %s14001_s20, %s11894_s22  ;;  %p11901_p9 = scmp.lt.u32.totalorder %s11894_s22, %s14001_s20 }
  0xa7   : > { %p11897_p6 = pnand %p11895_p13, %p12458_p0 }
  0xa9   : > { %p11898_p5 = pneg %p11897_p6 }
  0xab   : > { %p11903_p10 = pnand %p11901_p9, %p11898_p5 }
  0xad   : > { %11906 = shalt.err (!%p11903_p10)
}
  0xae   : > { %s11907_s26 = scalar_lea.vmem %s12450_s18, 32  ;;  %p11915_p4 = scmp.lt.s32.totalorder %s12450_s18, %s12450_s18 }
  0xaf   : > { %p11908_p1 = scmp.ne.s32.totalorder %s12450_s18, %s11907_s26  ;;  %p11916_p7 = scmp.lt.s32.totalorder %s11907_s26, %s11907_s26 }
  0xb1   : > { %p11910_p2 = pnand %p11908_p1, %p12458_p0  ;;  %p11917_p8 = por %p11916_p7, %p11915_p4 }
  0xb3   : > { %p11911_p3 = pneg %p11910_p2 }
  0xb5   : > { %p11918_p11 = pnand %p11917_p8, %p11911_p3 }
  0xb7   : > { %11921 = shalt.err (!%p11918_p11)
}
  0xb8   : > { %11556 = dma.hbm_to_vmem [thread:$0]  (!%p12446_p12), %s14001_s20, 32, %s12450_s18, [#allocation9], %s12131_s2, %s12131_s2, %s12132_s15  }
  0xb9   : > { %s11922_s22 = scalar_lea.hbm %s13990_s27, 32 }
  0xba   : > { %p11923_p13 = scmp.ne.s32.totalorder %s13990_s27, %s11922_s22  ;;  %p11929_p9 = scmp.lt.u32.totalorder %s11922_s22, %s13990_s27 }
  0xbc   : > { %p11925_p6 = pnand %p11923_p13, %p12458_p0 }
  0xbe   : > { %p11926_p5 = pneg %p11925_p6 }
  0xc0   : > { %p11931_p10 = pnand %p11929_p9, %p11926_p5 }
  0xc2   : > { %11934 = shalt.err (!%p11931_p10)
}
  0xc3   : > { %s11935_s28 = scalar_lea.vmem %s1243_s10, 32  ;;  %p11943_p4 = scmp.lt.s32.totalorder %s1243_s10, %s1243_s10 }
  0xc4   : > { %p11936_p1 = scmp.ne.s32.totalorder %s1243_s10, %s11935_s28  ;;  %p11944_p7 = scmp.lt.s32.totalorder %s11935_s28, %s11935_s28 }
  0xc6   : > { %p11938_p2 = pnand %p11936_p1, %p12458_p0  ;;  %p11945_p8 = por %p11944_p7, %p11943_p4 }
  0xc8   : > { %p11939_p3 = pneg %p11938_p2 }
  0xca   : > { %p11946_p11 = pnand %p11945_p8, %p11939_p3 }
  0xcc   : > { %11949 = shalt.err (!%p11946_p11)
}
  0xcd   : > { %11547 = dma.hbm_to_vmem [thread:$0]  (!%p12446_p12), %s13990_s27, 32, %s1243_s10, [#allocation3], %s12131_s2, %s12131_s2, %s12132_s15  }
  0xce   : > { %s12133_s18 = smov [#allocation7]   ;;  %s12134_s22 = smov [#allocation10]  }
  0xcf   : > { %s1268_s26 = sshll.u32 %s12133_s18, 4  ;;  %s1298_s4 = sshll.u32 %s12134_s22, 4  ;;  %s1269_s26 = int_to_ptr.vmem [resolvable:$true] %s1268_s26  ;;  %s1299_s4 = int_to_ptr.vmem [resolvable:$true] %s1298_s4 }
  0xd0   : > { %s11950_s28 = scalar_lea.hbm %s13998_s9, 32 }
  0xd1   : > { %p11951_p13 = scmp.ne.s32.totalorder %s13998_s9, %s11950_s28  ;;  %p11957_p9 = scmp.lt.u32.totalorder %s11950_s28, %s13998_s9 }
  0xd3   : > { %p11953_p6 = pnand %p11951_p13, %p12458_p0 }
  0xd5   : > { %p11954_p5 = pneg %p11953_p6 }
  0xd7   : > { %p11959_p10 = pnand %p11957_p9, %p11954_p5 }
  0xd9   : > { %11962 = shalt.err (!%p11959_p10)
}
  0xda   : > { %s11963_s20 = scalar_lea.vmem %s1269_s26, 32  ;;  %p11971_p4 = scmp.lt.s32.totalorder %s1269_s26, %s1269_s26 }
  0xdb   : > { %p11964_p1 = scmp.ne.s32.totalorder %s1269_s26, %s11963_s20  ;;  %p11972_p7 = scmp.lt.s32.totalorder %s11963_s20, %s11963_s20 }
  0xdd   : > { %p11966_p2 = pnand %p11964_p1, %p12458_p0  ;;  %p11973_p8 = por %p11972_p7, %p11971_p4 }
  0xdf   : > { %p11967_p3 = pneg %p11966_p2 }
  0xe1   : > { %p11974_p11 = pnand %p11973_p8, %p11967_p3 }
  0xe3   : > { %11977 = shalt.err (!%p11974_p11)
}
  0xe4   : > { %11553 = dma.hbm_to_vmem [thread:$0]  (!%p12446_p12), %s13998_s9, 32, %s1269_s26, [#allocation6], %s12131_s2, %s12131_s2, %s12132_s15  }
  0xe5   : > { %s11978_s10 = scalar_lea.hbm %s13992_s24, 16 }
  0xe6   : > { %p11979_p13 = scmp.ne.s32.totalorder %s13992_s24, %s11978_s10  ;;  %p11985_p9 = scmp.lt.u32.totalorder %s11978_s10, %s13992_s24 }
  0xe8   : > { %p11981_p6 = pnand %p11979_p13, %p12458_p0 }
  0xea   : > { %p11982_p5 = pneg %p11981_p6 }
  0xec   : > { %p11987_p10 = pnand %p11985_p9, %p11982_p5 }
  0xee   : > { %11990 = shalt.err (!%p11987_p10)
}
  0xef   : > { %s11991_s20 = scalar_lea.vmem %s1299_s4, 16  ;;  %s11998_s18 = scalar_lea.vmem %s1299_s4, 32 }
  0xf0   : > { %p11992_p1 = scmp.ne.s32.totalorder %s1299_s4, %s11991_s20  ;;  %p11999_p4 = scmp.lt.s32.totalorder %s1299_s4, %s1299_s4 }
  0xf1   : > { %p12000_p7 = scmp.lt.s32.totalorder %s11998_s18, %s11991_s20 }
  0xf2   : > { %p11994_p2 = pnand %p11992_p1, %p12458_p0 }
  0xf3   : > { %p12001_p8 = por %p12000_p7, %p11999_p4 }
  0xf4   : > { %p11995_p3 = pneg %p11994_p2 }
  0xf6   : > { %p12002_p11 = pnand %p12001_p8, %p11995_p3 }
  0xf8   : > { %12005 = shalt.err (!%p12002_p11)
}
  0xf9   : > { %11559 = dma.hbm_to_vmem [thread:$0]  (!%p12446_p12), %s13992_s24, 16, %s1299_s4, [#allocation9]  }
  0xfa   : > { %p14015_p13 = scmp.ne.s32.totalorder %s14012_s11, 0 }
  0xfb   : > { %p14016_p6 = scmp.eq.s32.totalorder (!%p14015_p13), %s12408_s0, 0 }
  0xfc   : > { %1325 = sbr.rel (%p14015_p13) target bundleno = 14054 (0x36e6), region = 204 }
 0x103   : > { %12051 = dma.done.wait (%p14016_p6), [#allocation3], 32   ;;  %p14017_p5 = pmov %p14016_p6 }
 0x105   : > { %12053 = vsyncadd (%p14017_p5), [#allocation3], 4294967264  ;;  %p14018_p0 = pmov %p14017_p5 }
 0x107   : > { %12055 = dma.done.wait (%p14018_p0), [#allocation6], 64   ;;  %p14019_p9 = pmov %p14018_p0 }
 0x108   : > { %p14020_p10 = pmov %p14018_p0 }
 0x109   : > { %12057 = vsyncadd (%p14019_p9), [#allocation6], 4294967232 }
 0x10a   : > { %12059 = dma.done.wait (%p14020_p10), [#allocation9], 48   ;;  %p14021_p12 = pmov %p14018_p0 }
 0x10b   : > { %s14022_s5 = sld [smem:[#allocation16_spill]]  ;;  %p1454_p1 = scmp.lt.s32.totalorder %s12408_s0, 1  ;;  %v12135_v0 = vmov 0.0   ;;  %vm12136_vm0 = vmmov 0   ;;  %v11671_v1 = vld [vmem:[%s13994_s17] sm:$0xff]   ;;  %v11673_v3 = vld [vmem:[%s13994_s17 + $0x8] sm:$0xff]   ;;  %v1463_v21 = vlaneseq }
 0x10c   : > { %12061 = vsyncadd (%p14021_p12), [#allocation9], 4294967248  ;;  %10962 = vmatprep.subr.bf16.mxu1 %v12135_v0  ;;  %10954 = vmatprep.subr.bf16.mxu0 %v12135_v0  ;;  %v11672_v2 = vld [vmem:[%s13996_s13] sm:$0xff]   ;;  %vm1494_vm1 = vcmask 261120   ;;  %v11674_v5 = vld [vmem:[%s13996_s13 + $0x8] sm:$0xff]   ;;  %s13907_s23 = smov 104  }
 0x10d   : > { %10966 = vmatprep.mubr.msk.bf16.mxu1 %vm12136_vm0, %v12135_v0  ;;  %s12553_s4 = scalar_select %p1454_p1, %s12408_s0, 1  ;;  %10958 = vmatprep.mubr.msk.bf16.mxu0 %vm12136_vm0, %v12135_v0  ;;  %v10401_v7 = vld [vmem:[%s13989_s29] ss:$0 sm:$0xff]  ;;  %v11676_v20 = vld [vmem:[%s13993_s21 + $0x8] sm:$0xff]   ;;  %v12140_v22 = vmov 1983009808  }
 0x10e   : > { %10963 = vmatpush3.bf16.msra.mxu1 %v11671_v1  ;;  %10955 = vmatpush3.bf16.msra.mxu0 %v11672_v2  ;;  %v10397_v9 = vld [vmem:[%s13991_s25] ss:$0 sm:$0xff]  ;;  %s13909_s2 = smov 120   ;;  %s13911_s15 = smov 112   ;;  %v1677_v23 = vunpack.c.l.s4 %v12140_v22  ;;  %v12141_v24 = vmov 1934713408  }
 0x10f   : > { %s13900_s11 = sshll.u32 %s12553_s4, 3  ;;  %10964 = vmatprep.subr.bf16.mxu1 %v12135_v0  ;;  %10956 = vmatprep.subr.bf16.mxu0 %v12135_v0  ;;  %v11675_v13 = vld [vmem:[%s13993_s21] sm:$0xff]   ;;  %v1709_v25 = vunpack.c.l.s4 %v12141_v24  ;;  %v12594_v26 = vshrl.u32 %v1463_v21, 7  ;;  %vm2114_vm2 = vcmask 64512   ;;  %vm2354_vm3 = vcmask 1043456   ;;  %s13905_s26 = smov 16  }
 0x110   : > { %v1678_v27 = vunpack.c.0.s8 %v1677_v23  ;;  %s13903_s22 = smov 8   ;;  %s13901_s28 = smov 24   ;;  %vm2685_vm4 = vcmask 130048   ;;  %vm2687_vm5 = vcmask 195584   ;;  %vm2895_vm6 = vcmask 523264  }
 0x111   : > { %s12562_s1 = scalar_lea.vmem %s14022_s5, %s13900_s11  ;;  %v1710_v30 = vunpack.c.0.s8 %v1709_v25  ;;  %s14023_s10 = sld [smem:[#allocation26_spill]] }
 0x112   : > { %v1469_v4 = vld [vmem:[%s12562_s1] sm:$0xff]  ;;  %10965 = vmatpush3.bf16.msra.mxu1 %v11673_v3  ;;  %10957 = vmatpush3.bf16.msra.mxu0 %v11674_v5  ;;  %v12597_v31 = vsub.s32 %v1678_v27, %v12594_v26  ;;  %s14024_s20 = sld [smem:[#allocation27_spill]]  ;;  %s14025_s18 = sld [smem:[#allocation29_spill]] }
 0x113   : > { %v1470_v6 = vpack.c.bf16 %v1469_v4, %v1469_v4  ;;  %10978 = vmatprep.subr.bf16.mxu1 %v12135_v0  ;;  %10970 = vmatprep.subr.bf16.mxu0 %v12135_v0  ;;  %v12600_v38 = vsub.s32 %v1710_v30, %v12594_v26  ;;  %s14027_s11 = sld [smem:[#allocation31_spill]]  ;;  %s14038_s5 = sshll.u32 %s12553_s4, 3 }
 0x114   : > { %s14041_s4 = sld [smem:[#allocation37_spill]]  ;;  %s14044_s9 = smov 104  }
 0x115   : > { %10967 = vmatmul.mubr.msk.bf16.vlgmr.msra.gmra.mrb[0].mxu1 %vm1494_vm1, %v1470_v6  ;;  %10959 = vmatmul.mubr.msk.bf16.vlgmr.msra.gmra.mrb[0].mxu0 %vm1494_vm1, %v1470_v6  ;;  %s14053_s24 = sld [smem:[#allocation44_spill]]  ;;  %s14056_s27 = sld [smem:[#allocation48_spill]] }
 0x116   : > { %10980 = vmatprep.mubr.msk.bf16.mxu1 %vm12136_vm0, %v12135_v0  ;;  %10974 = vmatprep.mubr.msk.bf16.mxu0 %vm12136_vm0, %v12135_v0  ;;  %s14060_s7 = sld [smem:[#allocation51_spill]]  ;;  %s14061_s19 = sld [smem:[#allocation53_spill]] }
 0x117   : > { %10971 = vmatpush3.bf16.msra.mxu0 %v11675_v13 }
 0x118   : > { %10972 = vmatprep.subr.bf16.mxu0 %v12135_v0 }
 0x11b   : > { %10973 = vmatpush3.bf16.msra.mxu0 %v11676_v20 }
 0x11c   : > { %10984 = vmatprep.subr.bf16.mxu0 %v12135_v0 }
 0x11e   : > { %10975 = vmatmul.mubr.msk.bf16.vlgmr.msra.gmra.mrb[4].mxu0 %vm1494_vm1, %v1470_v6 }
 0x11f   : > { %10986 = vmatprep.mubr.msk.bf16.mxu0 %vm12136_vm0, %v12135_v0 }
 0x1e8   : > { %v1595_v8 = vpop.f32.mrb[0].mxu1  ;;  %v1532_v12 = vpop.f32.mrb[0].mxu0 }
 0x1e9   : > { %v1596_v10 = vadd.f32 %v10401_v7, %v1595_v8  ;;  %v10968_v11 = vpop.f32.mrb[1].mxu1  ;;  %v10960_v15 = vpop.f32.mrb[1].mxu0  ;;  %v1533_v17 = vadd.f32 %v10397_v9, %v1532_v12 }
 0x1ea   : > { %v1598_v14 = vpop.f32.mrb[2].mxu1  ;;  %v1535_v18 = vpop.f32.mrb[2].mxu0 }
 0x1eb   : > { %1821 = vrot.lane.b32.xlu1 %v1596_v10, %s13907_s23  ;;  %1815 = vrot.lane.b32.xlu0 %v1596_v10, %s13909_s2  ;;  %v10969_v16 = vpop.f32.mrb[3].mxu1  ;;  %v10961_v19 = vpop.f32.mrb[3].mxu0 }
 0x1ef   : > { %1818 = vrot.lane.b32.xlu0 %v1596_v10, %s13911_s15  ;;  %1665 = vrot.lane.b32.xlu1 %v1533_v17, %s13909_s2 }
 0x1f3   : > { %1668 = vrot.lane.b32.xlu0 %v1533_v17, %s13911_s15  ;;  %1671 = vrot.lane.b32.xlu1 %v1533_v17, %s13907_s23 }
 0x25d   : > { %v1822_v28 = vpop.permute.xlu1 %1821  ;;  %v1816_v29 = vpop.permute.xlu0 %1815 }
 0x25e   : > { %v1840_v32 = vcombine.low %v1816_v29, %v1822_v28  ;;  %v1841_v33 = vcombine.high %v1816_v29, %v1822_v28 }
 0x260   : > { %v1848_v39 = vrot.slane %v1840_v32, %v12597_v31  ;;  %v1855_v40 = vrot.slane %v1841_v33, %v12597_v31 }
 0x261   : > { %v1819_v34 = vpop.permute.xlu0 %1818  ;;  %v1666_v35 = vpop.permute.xlu1 %1665 }
 0x262   : > { %v1824_v36 = vcombine.low %v1596_v10, %v1819_v34  ;;  %v1825_v37 = vcombine.high %v1596_v10, %v1819_v34 }
 0x264   : > { %v1832_v41 = vrot.slane %v1824_v36, %v12597_v31  ;;  %v1839_v42 = vrot.slane %v1825_v37, %v12597_v31 }
 0x265   : > { %v1669_v43 = vpop.permute.xlu0 %1668  ;;  %v1672_v44 = vpop.permute.xlu1 %1671 }
 0x266   : > { %v1856_v45 = vcombine.low %v1832_v41, %v1848_v39  ;;  %v1857_v46 = vcombine.high %v1832_v41, %v1848_v39  ;;  %v1872_v47 = vcombine.low %v1839_v42, %v1855_v40  ;;  %v1873_v48 = vcombine.high %v1839_v42, %v1855_v40 }
 0x267   : > { %v1674_v49 = vcombine.low %v1533_v17, %v1669_v43  ;;  %v1675_v50 = vcombine.high %v1533_v17, %v1669_v43  ;;  %v1690_v51 = vcombine.low %v1666_v35, %v1672_v44  ;;  %v1691_v52 = vcombine.high %v1666_v35, %v1672_v44 }
 0x268   : > { %v1864_v53 = vrot.slane %v1856_v45, %v12600_v38  ;;  %v1871_v54 = vrot.slane %v1857_v46, %v12600_v38  ;;  %v1880_v55 = vrot.slane %v1872_v47, %v12600_v38  ;;  %v1887_v56 = vrot.slane %v1873_v48, %v12600_v38 }
 0x269   : > { %v1682_v57 = vrot.slane %v1674_v49, %v12597_v31  ;;  %v1689_v58 = vrot.slane %v1675_v50, %v12597_v31  ;;  %v1698_v59 = vrot.slane %v1690_v51, %v12597_v31  ;;  %v1705_v60 = vrot.slane %v1691_v52, %v12597_v31 }
 0x26a   : > { %v1892_v61 = vcombine.low %v1864_v53, %v1871_v54  ;;  %v10411_v62 = vcombine.high %v1864_v53, %v1871_v54  ;;  %v1908_v63 = vcombine.low %v1880_v55, %v1887_v56  ;;  %v10412_v1 = vcombine.high %v1880_v55, %v1887_v56 }
 0x26b   : > { %v1706_v2 = vcombine.low %v1682_v57, %v1698_v59  ;;  %v1707_v3 = vcombine.high %v1682_v57, %v1698_v59  ;;  %v1722_v4 = vcombine.low %v1689_v58, %v1705_v60  ;;  %v1723_v5 = vcombine.high %v1689_v58, %v1705_v60 }
 0x26c   : > { %v1899_v6 = vrot.slane %v1892_v61, %v12597_v31  ;;  %v1907_v7 = vrot.slane %v10411_v62, %v12597_v31  ;;  %v1915_v8 = vrot.slane %v1908_v63, %v12597_v31  ;;  %v1923_v9 = vrot.slane %v10412_v1, %v12597_v31  ;;  %v1658_v62 = vpop.f32.mrb[4].mxu0 }
 0x26d   : > { %v1714_v10 = vrot.slane %v1706_v2, %v12600_v38  ;;  %v1721_v11 = vrot.slane %v1707_v3, %v12600_v38  ;;  %v1730_v12 = vrot.slane %v1722_v4, %v12600_v38  ;;  %v1737_v13 = vrot.slane %v1723_v5, %v12600_v38  ;;  %v10976_v63 = vpop.f32.mrb[5].mxu0 }
 0x26e   : > { %v1924_v14 = vcombine.low %v1899_v6, %v1907_v7  ;;  %v1940_v15 = vcombine.low %v1915_v8, %v1923_v9  ;;  %v1925_v16 = vcombine.high %v1899_v6, %v1907_v7  ;;  %v1941_v17 = vcombine.high %v1915_v8, %v1923_v9  ;;  %v1661_v1 = vpop.f32.mrb[6].mxu0 }
 0x26f   : > { %v1742_v18 = vcombine.low %v1714_v10, %v1721_v11  ;;  %v10409_v19 = vcombine.high %v1714_v10, %v1721_v11  ;;  %v1758_v20 = vcombine.low %v1730_v12, %v1737_v13  ;;  %v10410_v22 = vcombine.high %v1730_v12, %v1737_v13  ;;  %v10977_v2 = vpop.f32.mrb[7].mxu0 }
 0x270   : > { %v1932_v23 = vrot.slane %v1924_v14, %v12600_v38  ;;  %v1948_v24 = vrot.slane %v1940_v15, %v12600_v38  ;;  %v1939_v33 = vrot.slane %v1925_v16, %v12600_v38  ;;  %v1955_v34 = vrot.slane %v1941_v17, %v12600_v38 }
 0x271   : > { %v1749_v25 = vrot.slane %v1742_v18, %v12597_v31  ;;  %v1757_v27 = vrot.slane %v10409_v19, %v12597_v31  ;;  %v1765_v28 = vrot.slane %v1758_v20, %v12597_v31  ;;  %v1773_v29 = vrot.slane %v10410_v22, %v12597_v31 }
 0x272   : > { %v1956_v30 = vcombine.low %v1932_v23, %v1948_v24  ;;  %v1957_v32 = vcombine.high %v1932_v23, %v1948_v24  ;;  %v1958_v44 = vcombine.low %v1939_v33, %v1955_v34  ;;  %v1959_v45 = vcombine.high %v1939_v33, %v1955_v34 }
 0x273   : > { %v1774_v35 = vcombine.low %v1749_v25, %v1757_v27  ;;  %v1790_v36 = vcombine.low %v1765_v28, %v1773_v29  ;;  %v1775_v46 = vcombine.high %v1749_v25, %v1757_v27  ;;  %v1791_v47 = vcombine.high %v1765_v28, %v1773_v29  ;;  %v10405_v29 = vld [vmem:[%s14000_s3] ss:$0 sm:$0xff] }
 0x274   : > { %v1960_v37 = vpack.c.bf16 %v1956_v30, %v1956_v30  ;;  %v1961_v39 = vpack.c.bf16 %v1957_v32, %v1957_v32  ;;  %v1962_v50 = vpack.c.bf16 %v1958_v44, %v1958_v44  ;;  %v1963_v51 = vpack.c.bf16 %v1959_v45, %v1959_v45 }
 0x275   : > { %v1782_v40 = vrot.slane %v1774_v35, %v12600_v38  ;;  %v1798_v41 = vrot.slane %v1790_v36, %v12600_v38  ;;  %v1789_v54 = vrot.slane %v1775_v46, %v12600_v38  ;;  %v1805_v55 = vrot.slane %v1791_v47, %v12600_v38 }
 0x276   : > { %v2119_v42 = vsel %vm2114_vm2, %v1960_v37, 0  ;;  %v2165_v43 = vsel %vm2114_vm2, %v1961_v39, 0  ;;  %v2211_v56 = vsel %vm2114_vm2, %v1962_v50, 0  ;;  %v2257_v57 = vsel %vm2114_vm2, %v1963_v51, 0 }
 0x277   : > { %10979 = vmatpush3.bf16.xpose.msra.mxu1 %v2119_v42  ;;  %10985 = vmatpush3.bf16.xpose.msra.mxu0 %v2165_v43  ;;  %v1806_v48 = vcombine.low %v1782_v40, %v1798_v41  ;;  %v1807_v49 = vcombine.high %v1782_v40, %v1798_v41  ;;  %v1808_v58 = vcombine.low %v1789_v54, %v1805_v55 }
 0x278   : > { %10990 = vmatprep.subr.bf16.mxu1 %v12135_v0  ;;  %10996 = vmatprep.subr.bf16.mxu0 %v12135_v0  ;;  %v1809_v59 = vcombine.high %v1789_v54, %v1805_v55  ;;  %v1659_v30 = vadd.f32 %v10405_v29, %v1658_v62 }
 0x279   : > { %v1810_v52 = vpack.c.bf16 %v1806_v48, %v1806_v48  ;;  %v1811_v53 = vpack.c.bf16 %v1807_v49, %v1807_v49  ;;  %v1812_v60 = vpack.c.bf16 %v1808_v58, %v1808_v58 }
 0x27a   : > { %v1813_v61 = vpack.c.bf16 %v1809_v59, %v1809_v59 }
 0x27e   : > { %10981 = vmatmul.mubr.msk.bf16.vlgmr.msra.gmra.mrb[4].mxu1 %vm2114_vm2, %v1810_v52  ;;  %10987 = vmatmul.mubr.msk.bf16.vlgmr.msra.gmra.mrb[8].mxu0 %vm2114_vm2, %v1811_v53 }
 0x27f   : > { %10991 = vmatpush3.bf16.xpose.msra.mxu1 %v2211_v56  ;;  %10997 = vmatpush3.bf16.xpose.msra.mxu0 %v2257_v57 }
 0x280   : > { %10992 = vmatprep.mubr.msk.bf16.mxu1 %vm12136_vm0, %v12135_v0  ;;  %10998 = vmatprep.mubr.msk.bf16.mxu0 %vm12136_vm0, %v12135_v0 }
 0x281   : > { %11002 = vmatprep.subr.bf16.mxu1 %v12135_v0  ;;  %11008 = vmatprep.subr.bf16.mxu0 %v12135_v0 }
 0x286   : > { %10993 = vmatmul.mubr.msk.bf16.vlgmr.msra.gmra.mrb[8].mxu1 %vm2114_vm2, %v1812_v60  ;;  %10999 = vmatmul.mubr.msk.bf16.vlgmr.msra.gmra.mrb[12].mxu0 %vm2114_vm2, %v1813_v61 }
 0x287   : > { %11004 = vmatprep.mubr.msk.bf16.mxu1 %vm12136_vm0, %v12135_v0  ;;  %11010 = vmatprep.mubr.msk.bf16.mxu0 %vm12136_vm0, %v12135_v0 }
 0x351   : > { %v2155_v3 = vpop.f32.mrb[4].mxu1  ;;  %v2201_v4 = vpop.f32.mrb[8].mxu0 }
 0x352   : > { %v2299_v5 = vmul.f32 0.35355338, %v2155_v3  ;;  %v2300_v6 = vmul.f32 0.35355338, %v2201_v4  ;;  %v10982_v7 = vpop.f32.mrb[5].mxu1  ;;  %v10988_v8 = vpop.f32.mrb[9].mxu0 }
 0x353   : > { %v2158_v9 = vpop.f32.mrb[6].mxu1  ;;  %v2204_v10 = vpop.f32.mrb[10].mxu0 }
 0x354   : > { %v10983_v11 = vpop.f32.mrb[7].mxu1  ;;  %v10989_v12 = vpop.f32.mrb[11].mxu0  ;;  %v2303_v13 = vsel %vm2114_vm2, %v2299_v5, -inf  ;;  %v2306_v14 = vsel %vm2114_vm2, %v2300_v6, -inf }
 0x355   : > { %2304 = vmax.xlane.f32.xlu0 %v2303_v13  ;;  %2307 = vmax.xlane.f32.xlu1 %v2306_v14 }
 0x359   : > { %v2247_v15 = vpop.f32.mrb[8].mxu1  ;;  %v2293_v16 = vpop.f32.mrb[12].mxu0 }
 0x35a   : > { %v2301_v17 = vmul.f32 0.35355338, %v2247_v15  ;;  %v10994_v18 = vpop.f32.mrb[9].mxu1  ;;  %v11000_v19 = vpop.f32.mrb[13].mxu0  ;;  %v2302_v23 = vmul.f32 0.35355338, %v2293_v16 }
 0x35b   : > { %v2250_v20 = vpop.f32.mrb[10].mxu1  ;;  %v2296_v22 = vpop.f32.mrb[14].mxu0 }
 0x35c   : > { %v10995_v24 = vpop.f32.mrb[11].mxu1  ;;  %v11001_v25 = vpop.f32.mrb[15].mxu0  ;;  %v2309_v27 = vsel %vm2114_vm2, %v2301_v17, -inf  ;;  %v2312_v28 = vsel %vm2114_vm2, %v2302_v23, -inf }
 0x35d   : > { %2310 = vmax.xlane.f32.xlu0 %v2309_v27 }
 0x361   : > { %2313 = vmax.xlane.f32.xlu0 %v2312_v28 }
 0x366   : > { %1965 = vrot.lane.b32.xlu1 %v1659_v30, %s13909_s2 }
 0x3e2   : > { %v2305_v32 = vpop.xlane.xlu0 %2304  ;;  %v2308_v33 = vpop.xlane.xlu1 %2307 }
 0x3e3   : > { %v2315_v34 = vsub.f32 %v2299_v5, %v2305_v32  ;;  %v2316_v35 = vsub.f32 %v2300_v6, %v2308_v33 }
 0x3e5   : > { %v2319_v36 = vmul.f32 1.442695, %v2315_v34  ;;  %v2321_v37 = vmul.f32 1.442695, %v2316_v35 }
 0x3e6   : > { %v1966_v53 = vpop.permute.xlu1 %1965 }
 0x3e7   : > { %11745 = vpow2.f32 %v2319_v36 }
 0x3e8   : > { %11747 = vpow2.f32 %v2321_v37 }
 0x3ea   : > { %v2311_v43 = vpop.xlane.xlu0 %2310 }
 0x3eb   : > { %v2317_v45 = vsub.f32 %v2301_v17, %v2311_v43 }
 0x3ed   : > { %v2323_v47 = vmul.f32 1.442695, %v2317_v45 }
 0x3ee   : > { %v2314_v44 = vpop.xlane.xlu0 %2313 }
 0x3ef   : > { %v2318_v46 = vsub.f32 %v2302_v23, %v2314_v44  ;;  %11749 = vpow2.f32 %v2323_v47 }
 0x3f1   : > { %v12660_v39 = vpop.eup %11745  ;;  %v2325_v48 = vmul.f32 1.442695, %v2318_v46 }
 0x3f2   : > { %v12662_v40 = vpop.eup %11747  ;;  %v2327_v41 = vsel %vm2114_vm2, %v12660_v39, 0.0 }
 0x3f3   : > { %2328 = vadd.xlane.f32.xlu1 %v2327_v41  ;;  %v2330_v42 = vsel %vm2114_vm2, %v12662_v40, 0.0  ;;  %11751 = vpow2.f32 %v2325_v48 }
 0x3f4   : > { %2331 = vadd.xlane.f32.xlu0 %v2330_v42 }
 0x3f9   : > { %v12670_v49 = vpop.eup %11749 }
 0x3fa   : > { %v2333_v51 = vsel %vm2114_vm2, %v12670_v49, 0.0 }
 0x3fd   : > { %v12672_v50 = vpop.eup %11751 }
 0x3fe   : > { %v2336_v52 = vsel %vm2114_vm2, %v12672_v50, 0.0 }
 0x404   : > { %1971 = vrot.lane.b32.xlu1 %v1659_v30, %s13907_s23 }
 0x40a   : > { %1968 = vrot.lane.b32.xlu0 %v1659_v30, %s13911_s15 }
 0x428   : > { %2334 = vadd.xlane.f32.xlu1 %v2333_v51 }
 0x429   : > { %2337 = vadd.xlane.f32.xlu0 %v2336_v52 }
 0x480   : > { %v2329_v54 = vpop.xlane.xlu1 %2328 }
 0x481   : > { %v2332_v55 = vpop.xlane.xlu0 %2331  ;;  %11753 = vrcp.f32 %v2329_v54 }
 0x482   : > { %11755 = vrcp.f32 %v2332_v55 }
 0x484   : > { %v1972_v56 = vpop.permute.xlu1 %1971 }
 0x485   : > { %v1990_v57 = vcombine.low %v1966_v53, %v1972_v56  ;;  %v1991_v58 = vcombine.high %v1966_v53, %v1972_v56  ;;  %v1969_v59 = vpop.permute.xlu0 %1968 }
 0x486   : > { %v1974_v60 = vcombine.low %v1659_v30, %v1969_v59  ;;  %v1975_v61 = vcombine.high %v1659_v30, %v1969_v59 }
 0x487   : > { %v1998_v62 = vrot.slane %v1990_v57, %v12597_v31  ;;  %v2005_v63 = vrot.slane %v1991_v58, %v12597_v31 }
 0x488   : > { %v1982_v1 = vrot.slane %v1974_v60, %v12597_v31  ;;  %v1989_v2 = vrot.slane %v1975_v61, %v12597_v31 }
 0x48a   : > { %v2006_v3 = vcombine.low %v1982_v1, %v1998_v62  ;;  %v2007_v4 = vcombine.high %v1982_v1, %v1998_v62  ;;  %v2022_v5 = vcombine.low %v1989_v2, %v2005_v63  ;;  %v2023_v6 = vcombine.high %v1989_v2, %v2005_v63 }
 0x48b   : > { %v11754_v24 = vpop.eup %11753 }
 0x48c   : > { %v2014_v7 = vrot.slane %v2006_v3, %v12600_v38  ;;  %v2021_v8 = vrot.slane %v2007_v4, %v12600_v38  ;;  %v2030_v9 = vrot.slane %v2022_v5, %v12600_v38  ;;  %v2037_v10 = vrot.slane %v2023_v6, %v12600_v38  ;;  %v11756_v30 = vpop.eup %11755 }
 0x48d   : > { %v2343_v41 = vmul.f32 %v11754_v24, %v12660_v39  ;;  %v2344_v42 = vmul.f32 %v11756_v30, %v12662_v40 }
 0x48e   : > { %v2042_v11 = vcombine.low %v2014_v7, %v2021_v8  ;;  %v10413_v12 = vcombine.high %v2014_v7, %v2021_v8  ;;  %v2058_v13 = vcombine.low %v2030_v9, %v2037_v10  ;;  %v10414_v14 = vcombine.high %v2030_v9, %v2037_v10 }
 0x48f   : > { %v2347_v47 = vpack.c.bf16 %v2343_v41, %v2343_v41  ;;  %v2348_v48 = vpack.c.bf16 %v2344_v42, %v2344_v42 }
 0x490   : > { %v2049_v15 = vrot.slane %v2042_v11, %v12597_v31  ;;  %v2057_v16 = vrot.slane %v10413_v12, %v12597_v31  ;;  %v2065_v17 = vrot.slane %v2058_v13, %v12597_v31  ;;  %v2073_v18 = vrot.slane %v10414_v14, %v12597_v31 }
 0x492   : > { %v2074_v19 = vcombine.low %v2049_v15, %v2057_v16  ;;  %v2090_v20 = vcombine.low %v2065_v17, %v2073_v18  ;;  %v2075_v22 = vcombine.high %v2049_v15, %v2057_v16  ;;  %v2091_v23 = vcombine.high %v2065_v17, %v2073_v18 }
 0x494   : > { %v2082_v25 = vrot.slane %v2074_v19, %v12600_v38  ;;  %v2098_v27 = vrot.slane %v2090_v20, %v12600_v38  ;;  %v2089_v28 = vrot.slane %v2075_v22, %v12600_v38  ;;  %v2105_v29 = vrot.slane %v2091_v23, %v12600_v38  ;;  %v11677_v23 = vld [vmem:[%s13999_s8] sm:$0xff]  }
 0x496   : > { %v2106_v32 = vcombine.low %v2082_v25, %v2098_v27  ;;  %v2107_v33 = vcombine.high %v2082_v25, %v2098_v27  ;;  %v2108_v34 = vcombine.low %v2089_v28, %v2105_v29  ;;  %v2109_v35 = vcombine.high %v2089_v28, %v2105_v29 }
 0x498   : > { %v2110_v36 = vpack.c.bf16 %v2106_v32, %v2106_v32  ;;  %v2111_v37 = vpack.c.bf16 %v2107_v33, %v2107_v33  ;;  %v2112_v45 = vpack.c.bf16 %v2108_v34, %v2108_v34  ;;  %v2113_v46 = vpack.c.bf16 %v2109_v35, %v2109_v35  ;;  %v11678_v34 = vld [vmem:[%s13999_s8 + $0x8] sm:$0xff]  }
 0x49a   : > { %v2356_v43 = vsel %vm2354_vm3, %v2110_v36, 0  ;;  %v2402_v44 = vsel %vm2354_vm3, %v2111_v37, 0  ;;  %v2448_v39 = vsel %vm2354_vm3, %v2112_v45, 0  ;;  %v2494_v40 = vsel %vm2354_vm3, %v2113_v46, 0 }
 0x49b   : > { %11003 = vmatpush3.bf16.msra.mxu1 %v2356_v43  ;;  %11009 = vmatpush3.bf16.msra.mxu0 %v2402_v44 }
 0x49c   : > { %11014 = vmatprep.subr.bf16.mxu1 %v12135_v0  ;;  %11020 = vmatprep.subr.bf16.mxu0 %v12135_v0 }
 0x49e   : > { %11005 = vmatmul.mubr.msk.bf16.vlgmr.msra.gmra.mrb[12].mxu1 %vm2114_vm2, %v2347_v47  ;;  %11011 = vmatmul.mubr.msk.bf16.vlgmr.msra.gmra.mrb[16].mxu0 %vm2114_vm2, %v2348_v48 }
 0x49f   : > { %11015 = vmatpush3.bf16.msra.mxu1 %v2448_v39  ;;  %11021 = vmatpush3.bf16.msra.mxu0 %v2494_v40 }
 0x4a0   : > { %11016 = vmatprep.mubr.msk.bf16.mxu1 %vm12136_vm0, %v12135_v0  ;;  %11022 = vmatprep.mubr.msk.bf16.mxu0 %vm12136_vm0, %v12135_v0 }
 0x4a1   : > { %11026 = vmatprep.subr.bf16.mxu1 %v12135_v0  ;;  %11034 = vmatprep.subr.bf16.mxu0 %v12135_v0 }
 0x4b5   : > { %v2335_v51 = vpop.xlane.xlu1 %2334 }
 0x4b6   : > { %11757 = vrcp.f32 %v2335_v51  ;;  %v2338_v52 = vpop.xlane.xlu0 %2337 }
 0x4b7   : > { %11759 = vrcp.f32 %v2338_v52 }
 0x4c0   : > { %v11758_v53 = vpop.eup %11757 }
 0x4c1   : > { %v11760_v54 = vpop.eup %11759  ;;  %v2345_v55 = vmul.f32 %v11758_v53, %v12670_v49 }
 0x4c2   : > { %v2346_v56 = vmul.f32 %v11760_v54, %v12672_v50 }
 0x4c3   : > { %v2349_v57 = vpack.c.bf16 %v2345_v55, %v2345_v55 }
 0x4c4   : > { %v2350_v58 = vpack.c.bf16 %v2346_v56, %v2346_v56 }
 0x4c5   : > { %11017 = vmatmul.mubr.msk.bf16.vlgmr.msra.gmra.mrb[16].mxu1 %vm2114_vm2, %v2349_v57 }
 0x4c6   : > { %11023 = vmatmul.mubr.msk.bf16.vlgmr.msra.gmra.mrb[20].mxu0 %vm2114_vm2, %v2350_v58  ;;  %11030 = vmatprep.mubr.msk.bf16.mxu1 %vm12136_vm0, %v12135_v0 }
 0x4c7   : > { %11038 = vmatprep.mubr.msk.bf16.mxu0 %vm12136_vm0, %v12135_v0  ;;  %11027 = vmatpush3.bf16.msra.mxu1 %v11677_v23 }
 0x4c8   : > { %11028 = vmatprep.subr.bf16.mxu1 %v12135_v0 }
 0x4cb   : > { %11029 = vmatpush3.bf16.msra.mxu1 %v11678_v34 }
 0x4cc   : > { %11042 = vmatprep.subr.bf16.mxu1 %v12135_v0 }
 0x571   : > { %v2392_v59 = vpop.f32.mrb[12].mxu1  ;;  %v2438_v60 = vpop.f32.mrb[16].mxu0 }
 0x572   : > { %v11006_v61 = vpop.f32.mrb[13].mxu1  ;;  %v11012_v62 = vpop.f32.mrb[17].mxu0 }
 0x573   : > { %v2395_v63 = vpop.f32.mrb[14].mxu1  ;;  %v2441_v49 = vpop.f32.mrb[18].mxu0  ;;  %v10425_v61 = vld [vmem:[%s13995_s14] ss:$0 sm:$0xff] }
 0x574   : > { %v11007_v1 = vpop.f32.mrb[15].mxu1  ;;  %v11013_v50 = vpop.f32.mrb[19].mxu0 }
 0x598   : > { %v2484_v2 = vpop.f32.mrb[16].mxu1 }
 0x599   : > { %v2536_v3 = vcombine.low %v2392_v59, %v2484_v2  ;;  %v2537_v4 = vcombine.high %v2392_v59, %v2484_v2  ;;  %v2530_v5 = vpop.f32.mrb[20].mxu0  ;;  %v11018_v6 = vpop.f32.mrb[17].mxu1  ;;  %v11865_v2 = vld [vmem:[%s12562_s1] sm:$0xff]  ;;  %s14026_s1 = smov %s14025_s18 }
 0x59a   : > { %v2552_v7 = vcombine.low %v2438_v60, %v2530_v5  ;;  %v2553_v8 = vcombine.high %v2438_v60, %v2530_v5  ;;  %v11024_v9 = vpop.f32.mrb[21].mxu0  ;;  %v2487_v10 = vpop.f32.mrb[18].mxu1 }
 0x59b   : > { %v2544_v11 = vrot.slane %v2536_v3, %v12597_v31  ;;  %v2551_v12 = vrot.slane %v2537_v4, %v12597_v31  ;;  %v2533_v13 = vpop.f32.mrb[22].mxu0  ;;  %v11019_v14 = vpop.f32.mrb[19].mxu1  ;;  %v11679_v10 = vld [vmem:[%s13988_s30] sm:$0xff]  }
 0x59c   : > { %v2560_v15 = vrot.slane %v2552_v7, %v12597_v31  ;;  %v2567_v16 = vrot.slane %v2553_v8, %v12597_v31  ;;  %v11025_v17 = vpop.f32.mrb[23].mxu0  ;;  %11035 = vmatpush3.bf16.msra.mxu0 %v11679_v10  ;;  %v11682_v13 = vld [vmem:[%s13997_s12 + $0x8] sm:$0xff]  }
 0x59d   : > { %11036 = vmatprep.subr.bf16.mxu0 %v12135_v0 }
 0x59e   : > { %v2568_v18 = vcombine.low %v2544_v11, %v2560_v15  ;;  %v2569_v19 = vcombine.high %v2544_v11, %v2560_v15  ;;  %v2584_v20 = vcombine.low %v2551_v12, %v2567_v16  ;;  %v2585_v22 = vcombine.high %v2551_v12, %v2567_v16  ;;  %v11680_v11 = vld [vmem:[%s13988_s30 + $0x8] sm:$0xff]   ;;  %v11681_v12 = vld [vmem:[%s13997_s12] sm:$0xff]  }
 0x5a0   : > { %v2576_v24 = vrot.slane %v2568_v18, %v12600_v38  ;;  %v2583_v25 = vrot.slane %v2569_v19, %v12600_v38  ;;  %v2592_v27 = vrot.slane %v2584_v20, %v12600_v38  ;;  %v2599_v28 = vrot.slane %v2585_v22, %v12600_v38  ;;  %11037 = vmatpush3.bf16.msra.mxu0 %v11680_v11  ;;  %v10429_v18 = vld [vmem:[%s14023_s10] ss:$0 sm:$0xff] }
 0x5a1   : > { %11054 = vmatprep.subr.bf16.mxu0 %v12135_v0  ;;  %v10430_v20 = vld [vmem:[%s14024_s20] ss:$0 sm:$0xff] }
 0x5a2   : > { %v2604_v29 = vcombine.low %v2576_v24, %v2583_v25  ;;  %v10423_v30 = vcombine.high %v2576_v24, %v2583_v25  ;;  %v2620_v32 = vcombine.low %v2592_v27, %v2599_v28  ;;  %v10424_v33 = vcombine.high %v2592_v27, %v2599_v28  ;;  %v11683_v25 = vld [vmem:[%s13997_s12 + $0x10] sm:$0xff]   ;;  %v11684_v27 = vld [vmem:[%s13997_s12 + $0x18] sm:$0xff]   ;;  %v10431_v28 = vld [vmem:[%s14025_s18] ss:$0 sm:$0xff]  ;;  %s14028_s18 = sld [smem:[#allocation32_spill]] }
 0x5a4   : > { %v2611_v35 = vrot.slane %v2604_v29, %v12597_v31  ;;  %v2619_v36 = vrot.slane %v10423_v30, %v12597_v31  ;;  %v2627_v37 = vrot.slane %v2620_v32, %v12597_v31  ;;  %v2635_v41 = vrot.slane %v10424_v33, %v12597_v31 }
 0x5a6   : > { %v2637_v42 = vcombine.high %v2611_v35, %v2619_v36  ;;  %v2653_v43 = vcombine.high %v2627_v37, %v2635_v41  ;;  %v2636_v44 = vcombine.low %v2611_v35, %v2619_v36  ;;  %v2652_v45 = vcombine.low %v2627_v37, %v2635_v41  ;;  %v10435_v37 = vld [vmem:[%s14027_s11] ss:$0 sm:$0xff] }
 0x5a8   : > { %v2651_v46 = vrot.slane %v2637_v42, %v12600_v38  ;;  %v2667_v47 = vrot.slane %v2653_v43, %v12600_v38  ;;  %v2644_v48 = vrot.slane %v2636_v44, %v12600_v38  ;;  %v2660_v39 = vrot.slane %v2652_v45, %v12600_v38 }
 0x5aa   : > { %v2670_v40 = vcombine.low %v2651_v46, %v2667_v47  ;;  %v2669_v51 = vcombine.high %v2644_v48, %v2660_v39  ;;  %v2671_v52 = vcombine.high %v2651_v46, %v2667_v47  ;;  %v2668_v53 = vcombine.low %v2644_v48, %v2660_v39 }
 0x5ac   : > { %2677 = vrot.lane.b32.xlu1 %v2670_v40, %s13905_s26  ;;  %2673 = vrot.lane.b32.xlu0 %v2669_v51, %s13903_s22  ;;  %s14030_s22 = sld [smem:[#allocation33_spill]] }
 0x5b0   : > { %2681 = vrot.lane.b32.xlu1 %v2671_v52, %s13901_s28  ;;  %s14029_s28 = smov %s14028_s18 }
 0x5b2   : > { %s14031_s26 = smov %s14030_s22 }
 0x61e   : > { %v2678_v54 = vpop.permute.xlu1 %2677  ;;  %v2674_v55 = vpop.permute.xlu0 %2673 }
 0x61f   : > { %v2684_v56 = vsel %vm2114_vm2, %v2668_v53, %v2674_v55  ;;  %v11685_v53 = vld [vmem:[%s13996_s13 + $0x10] sm:$0xff]   ;;  %v11687_v55 = vld [vmem:[%s13996_s13 + $0x18] sm:$0xff]   ;;  %s14047_s13 = sld [smem:[#allocation43_spill]] }
 0x620   : > { %v2686_v58 = vsel %vm2685_vm4, %v2684_v56, %v2678_v54  ;;  %v11686_v54 = vld [vmem:[%s13993_s21 + $0x10] sm:$0xff]   ;;  %v11688_v56 = vld [vmem:[%s13993_s21 + $0x18] sm:$0xff]   ;;  %s14052_s21 = sld [smem:[#allocation55_spill]] }
 0x622   : > { %v2682_v57 = vpop.permute.xlu1 %2681 }
 0x623   : > { %v2688_v59 = vsel %vm2687_vm5, %v2686_v58, %v2682_v57 }
 0x624   : > { %v2689_v60 = vpack.c.bf16 %v2688_v59, %v2688_v59 }
 0x626   : > { %11031 = vmatmul.mubr.msk.bf16.vlgmr.msra.gmra.mrb[20].mxu1 %vm1494_vm1, %v2689_v60 }
 0x627   : > { %11050 = vmatprep.mubr.msk.bf16.mxu1 %vm12136_vm0, %v12135_v0  ;;  %11043 = vmatpush3.bf16.msra.mxu1 %v11681_v12  ;;  %v10457_v12 = vld [vmem:[%s13989_s29 + $0x1] ss:$0 sm:$0xff]  ;;  %s14058_s29 = sld [smem:[#allocation50_spill]] }
 0x628   : > { %11044 = vmatprep.subr.bf16.mxu1 %v12135_v0 }
 0x62b   : > { %11045 = vmatpush3.bf16.msra.mxu1 %v11682_v13 }
 0x62c   : > { %11046 = vmatprep.subr.bf16.mxu1 %v12135_v0 }
 0x62f   : > { %11047 = vmatpush3.bf16.msra.mxu1 %v11683_v25 }
 0x630   : > { %11048 = vmatprep.subr.bf16.mxu1 %v12135_v0 }
 0x633   : > { %11049 = vmatpush3.bf16.msra.mxu1 %v11684_v27 }
 0x634   : > { %11070 = vmatprep.subr.bf16.mxu1 %v12135_v0 }
 0x6f9   : > { %v2750_v62 = vpop.f32.mrb[20].mxu1 }
 0x6fa   : > { %v2751_v63 = vadd.f32 %v10425_v61, %v2750_v62  ;;  %v11032_v49 = vpop.f32.mrb[21].mxu1  ;;  %v10441_v61 = vld [vmem:[%s14028_s18] ss:$0 sm:$0xff]  ;;  %s14033_s18 = smov 8  }
 0x6fb   : > { %v2753_v1 = vpop.f32.mrb[22].mxu1 }
 0x6fc   : > { %v11033_v50 = vpop.f32.mrb[23].mxu1  ;;  %v2756_v3 = vadd.f32 %v11865_v2, %v2751_v63  ;;  %v10442_v63 = vld [vmem:[%s14030_s22] ss:$0 sm:$0xff]  ;;  %s14032_s22 = smov 16  }
 0x6fd   : > { %v11689_v50 = vld [vmem:[%s13994_s17 + $0x10] sm:$0xff]  }
 0x6fe   : > { %v2759_v4 = vsel %vm1494_vm1, %v2756_v3, 0.0 }
 0x6ff   : > { %2760 = vadd.xlane.f32.xlu0 %v2759_v4 }
 0x78c   : > { %v2761_v5 = vpop.xlane.xlu0 %2760 }
 0x78d   : > { %v2763_v6 = vmul.f32 0.03125, %v2761_v5 }
 0x78f   : > { %v2764_v7 = vsub.f32 %v2756_v3, %v2763_v6  ;;  %v11690_v3 = vld [vmem:[%s13994_s17 + $0x18] sm:$0xff]   ;;  %s14050_s17 = sld [smem:[#allocation46_spill]] }
 0x791   : > { %v2765_v8 = vmul.f32 %v2764_v7, %v2764_v7 }
 0x793   : > { %v2766_v9 = vsel %vm1494_vm1, %v2765_v8, 0.0 }
 0x794   : > { %2767 = vadd.xlane.f32.xlu1 %v2766_v9 }
 0x821   : > { %v2768_v14 = vpop.xlane.xlu1 %2767 }
 0x822   : > { %v2769_v15 = vmul.f32 0.03125, %v2768_v14 }
 0x824   : > { %v2770_v16 = vadd.f32 1e-05, %v2769_v15 }
 0x826   : > { %11761 = vrsqrt.f32 %v2770_v16  ;;  %v10448_v16 = vld [vmem:[%s13991_s25 + $0x1] ss:$0 sm:$0xff]  ;;  %s14054_s25 = sld [smem:[#allocation45_spill]] }
 0x830   : > { %v11762_v17 = vpop.eup %11761 }
 0x831   : > { %v2772_v19 = vmul.f32 %v11762_v17, %v2764_v7 }
 0x833   : > { %v2779_v22 = vmul.f32 %v10429_v18, %v2772_v19 }
 0x835   : > { %v2786_v23 = vadd.f32 %v10430_v20, %v2779_v22 }
 0x837   : > { %v2787_v24 = vpack.c.bf16 %v2786_v23, %v2786_v23 }
 0x839   : > { %11039 = vmatmul.mubr.msk.bf16.vlgmr.msra.gmra.mrb[24].mxu0 %vm1494_vm1, %v2787_v24 }
 0x83a   : > { %11058 = vmatprep.mubr.msk.bf16.mxu0 %vm12136_vm0, %v12135_v0  ;;  %11055 = vmatpush3.bf16.msra.mxu0 %v11685_v53 }
 0x83b   : > { %11056 = vmatprep.subr.bf16.mxu0 %v12135_v0 }
 0x83e   : > { %11057 = vmatpush3.bf16.msra.mxu0 %v11687_v55 }
 0x83f   : > { %11062 = vmatprep.subr.bf16.mxu0 %v12135_v0 }
 0x90c   : > { %v2848_v29 = vpop.f32.mrb[24].mxu0 }
 0x90d   : > { %v2849_v30 = vadd.f32 %v10431_v28, %v2848_v29  ;;  %v11040_v32 = vpop.f32.mrb[25].mxu0 }
 0x90e   : > { %v2851_v33 = vpop.f32.mrb[26].mxu0 }
 0x90f   : > { %v2854_v34 = vmax.f32 %v2849_v30, 0.0  ;;  %v11041_v35 = vpop.f32.mrb[27].mxu0 }
 0x911   : > { %v2855_v36 = vpack.c.bf16 %v2854_v34, %v2854_v34 }
 0x913   : > { %11051 = vmatmul.mubr.msk.bf16.vlgmr.msra.gmra.mrb[24].mxu1 %vm2895_vm6, %v2855_v36 }
 0x914   : > { %11074 = vmatprep.mubr.msk.bf16.mxu1 %vm12136_vm0, %v12135_v0  ;;  %11071 = vmatpush3.bf16.msra.mxu1 %v11686_v54 }
 0x915   : > { %11072 = vmatprep.subr.bf16.mxu1 %v12135_v0 }
 0x918   : > { %11073 = vmatpush3.bf16.msra.mxu1 %v11688_v56 }
 0x919   : > { %11084 = vmatprep.subr.bf16.mxu1 %v12135_v0 }
 0x9e6   : > { %v2933_v41 = vpop.f32.mrb[24].mxu1 }
 0x9e7   : > { %v2934_v42 = vadd.f32 %v10435_v37, %v2933_v41  ;;  %v11052_v43 = vpop.f32.mrb[25].mxu1 }
 0x9e8   : > { %v2936_v44 = vpop.f32.mrb[26].mxu1 }
 0x9e9   : > { %v11053_v45 = vpop.f32.mrb[27].mxu1  ;;  %v2939_v46 = vadd.f32 %v2934_v42, %v2786_v23 }
 0x9eb   : > { %v2942_v47 = vsel %vm1494_vm1, %v2939_v46, 0.0 }
 0x9ec   : > { %2943 = vadd.xlane.f32.xlu0 %v2942_v47 }
 0xa79   : > { %v2944_v48 = vpop.xlane.xlu0 %2943 }
 0xa7a   : > { %v2945_v39 = vmul.f32 0.03125, %v2944_v48 }
 0xa7c   : > { %v2946_v40 = vsub.f32 %v2939_v46, %v2945_v39 }
 0xa7e   : > { %v2947_v51 = vmul.f32 %v2946_v40, %v2946_v40 }
 0xa80   : > { %v2948_v52 = vsel %vm1494_vm1, %v2947_v51, 0.0 }
 0xa81   : > { %2949 = vadd.xlane.f32.xlu0 %v2948_v52 }
 0xb0e   : > { %v2950_v57 = vpop.xlane.xlu0 %2949 }
 0xb0f   : > { %v2951_v58 = vmul.f32 0.03125, %v2950_v57 }
 0xb11   : > { %v2952_v59 = vadd.f32 1e-05, %v2951_v58 }
 0xb13   : > { %11763 = vrsqrt.f32 %v2952_v59 }
 0xb1d   : > { %v11764_v60 = vpop.eup %11763 }
 0xb1e   : > { %v2954_v62 = vmul.f32 %v11764_v60, %v2946_v40 }
 0xb20   : > { %v2961_v49 = vmul.f32 %v10441_v61, %v2954_v62 }
 0xb22   : > { %v12785_v1 = vadd.f32 %v10442_v63, %v2961_v49 }
 0xb24   : > { %v2969_v2 = vpack.c.bf16 %v12785_v1, %v12785_v1 }
 0xb26   : > { %11059 = vmatmul.mubr.msk.bf16.vlgmr.msra.gmra.mrb[28].mxu0 %vm1494_vm1, %v2969_v2  ;;  %11075 = vmatmul.mubr.msk.bf16.vlgmr.msra.gmra.mrb[28].mxu1 %vm1494_vm1, %v2969_v2 }
 0xb27   : > { %11063 = vmatpush3.bf16.msra.mxu0 %v11689_v50  ;;  %11066 = vmatprep.mubr.msk.bf16.mxu0 %vm12136_vm0, %v12135_v0 }
 0xb28   : > { %11064 = vmatprep.subr.bf16.mxu0 %v12135_v0  ;;  %11086 = vmatprep.mubr.msk.bf16.mxu1 %vm12136_vm0, %v12135_v0 }
 0xb2b   : > { %11065 = vmatpush3.bf16.msra.mxu0 %v11690_v3 }
 0xb2c   : > { %11078 = vmatprep.subr.bf16.mxu0 %v12135_v0 }
 0xb2e   : > { %11067 = vmatmul.mubr.msk.bf16.vlgmr.msra.gmra.mrb[32].mxu0 %vm1494_vm1, %v2969_v2 }
 0xb2f   : > { %11080 = vmatprep.mubr.msk.bf16.mxu0 %vm12136_vm0, %v12135_v0 }
 0xbf9   : > { %v3032_v4 = vpop.f32.mrb[28].mxu0  ;;  %v12802_v5 = vpop.f32.mrb[28].mxu1 }
 0xbfa   : > { %v11060_v6 = vpop.f32.mrb[29].mxu0  ;;  %v11076_v7 = vpop.f32.mrb[29].mxu1  ;;  %v3033_v19 = vadd.f32 %v10448_v16, %v3032_v4 }
 0xbfb   : > { %v3035_v8 = vpop.f32.mrb[30].mxu0  ;;  %v3165_v9 = vpop.f32.mrb[30].mxu1 }
 0xbfc   : > { %v11061_v10 = vpop.f32.mrb[31].mxu0  ;;  %v11077_v11 = vpop.f32.mrb[31].mxu1 }
 0xc01   : > { %v3097_v13 = vpop.f32.mrb[32].mxu0 }
 0xc02   : > { %v3098_v14 = vadd.f32 %v10457_v12, %v3097_v13  ;;  %v11068_v15 = vpop.f32.mrb[33].mxu0 }
 0xc03   : > { %v3100_v17 = vpop.f32.mrb[34].mxu0 }
 0xc04   : > { %3322 = vrot.lane.b32.xlu0 %v3098_v14, %s13911_s15  ;;  %3319 = vrot.lane.b32.xlu1 %v3098_v14, %s13909_s2  ;;  %v11069_v18 = vpop.f32.mrb[35].mxu0 }
 0xc08   : > { %3172 = vrot.lane.b32.xlu0 %v3033_v19, %s13911_s15  ;;  %3325 = vrot.lane.b32.xlu1 %v3098_v14, %s13907_s23 }
 0xc0c   : > { %3169 = vrot.lane.b32.xlu1 %v3033_v19, %s13909_s2 }
 0xc10   : > { %3175 = vrot.lane.b32.xlu1 %v3033_v19, %s13907_s23 }
 0xc76   : > { %v3323_v20 = vpop.permute.xlu0 %3322  ;;  %v3320_v22 = vpop.permute.xlu1 %3319 }
 0xc77   : > { %v3328_v23 = vcombine.low %v3098_v14, %v3323_v20  ;;  %v3329_v24 = vcombine.high %v3098_v14, %v3323_v20 }
 0xc79   : > { %v3336_v29 = vrot.slane %v3328_v23, %v12597_v31  ;;  %v3343_v30 = vrot.slane %v3329_v24, %v12597_v31 }
 0xc7a   : > { %v3326_v25 = vpop.permute.xlu1 %3325  ;;  %v3173_v35 = vpop.permute.xlu0 %3172 }
 0xc7b   : > { %v3344_v27 = vcombine.low %v3320_v22, %v3326_v25  ;;  %v3345_v28 = vcombine.high %v3320_v22, %v3326_v25  ;;  %v3178_v47 = vcombine.low %v3033_v19, %v3173_v35  ;;  %v3179_v48 = vcombine.high %v3033_v19, %v3173_v35 }
 0xc7d   : > { %v3352_v32 = vrot.slane %v3344_v27, %v12597_v31  ;;  %v3359_v33 = vrot.slane %v3345_v28, %v12597_v31  ;;  %v3186_v60 = vrot.slane %v3178_v47, %v12597_v31  ;;  %v3193_v61 = vrot.slane %v3179_v48, %v12597_v31 }
 0xc7e   : > { %v3170_v34 = vpop.permute.xlu1 %3169 }
 0xc7f   : > { %v3360_v36 = vcombine.low %v3336_v29, %v3352_v32  ;;  %v3361_v37 = vcombine.high %v3336_v29, %v3352_v32  ;;  %v3376_v41 = vcombine.low %v3343_v30, %v3359_v33  ;;  %v3377_v42 = vcombine.high %v3343_v30, %v3359_v33 }
 0xc81   : > { %v3368_v43 = vrot.slane %v3360_v36, %v12600_v38  ;;  %v3375_v44 = vrot.slane %v3361_v37, %v12600_v38  ;;  %v3384_v45 = vrot.slane %v3376_v41, %v12600_v38  ;;  %v3391_v46 = vrot.slane %v3377_v42, %v12600_v38 }
 0xc82   : > { %v3176_v39 = vpop.permute.xlu1 %3175 }
 0xc83   : > { %v3396_v40 = vcombine.low %v3368_v43, %v3375_v44  ;;  %v10472_v51 = vcombine.high %v3368_v43, %v3375_v44  ;;  %v3412_v52 = vcombine.low %v3384_v45, %v3391_v46  ;;  %v10473_v53 = vcombine.high %v3384_v45, %v3391_v46 }
 0xc84   : > { %v3194_v54 = vcombine.low %v3170_v34, %v3176_v39  ;;  %v3195_v55 = vcombine.high %v3170_v34, %v3176_v39 }
 0xc85   : > { %v3403_v56 = vrot.slane %v3396_v40, %v12597_v31  ;;  %v3411_v57 = vrot.slane %v10472_v51, %v12597_v31  ;;  %v3419_v58 = vrot.slane %v3412_v52, %v12597_v31  ;;  %v3427_v59 = vrot.slane %v10473_v53, %v12597_v31 }
 0xc86   : > { %v3202_v62 = vrot.slane %v3194_v54, %v12597_v31  ;;  %v3209_v63 = vrot.slane %v3195_v55, %v12597_v31 }
 0xc87   : > { %v3428_v49 = vcombine.low %v3403_v56, %v3411_v57  ;;  %v3444_v50 = vcombine.low %v3419_v58, %v3427_v59  ;;  %v3429_v2 = vcombine.high %v3403_v56, %v3411_v57  ;;  %v3445_v3 = vcombine.high %v3419_v58, %v3427_v59 }
 0xc88   : > { %v3210_v4 = vcombine.low %v3186_v60, %v3202_v62  ;;  %v3211_v6 = vcombine.high %v3186_v60, %v3202_v62  ;;  %v3226_v7 = vcombine.low %v3193_v61, %v3209_v63  ;;  %v3227_v8 = vcombine.high %v3193_v61, %v3209_v63 }
 0xc89   : > { %v3436_v9 = vrot.slane %v3428_v49, %v12600_v38  ;;  %v3452_v10 = vrot.slane %v3444_v50, %v12600_v38  ;;  %v3443_v17 = vrot.slane %v3429_v2, %v12600_v38  ;;  %v3459_v18 = vrot.slane %v3445_v3, %v12600_v38 }
 0xc8a   : > { %v3218_v11 = vrot.slane %v3210_v4, %v12600_v38  ;;  %v3225_v12 = vrot.slane %v3211_v6, %v12600_v38  ;;  %v3234_v13 = vrot.slane %v3226_v7, %v12600_v38  ;;  %v3241_v14 = vrot.slane %v3227_v8, %v12600_v38 }
 0xc8b   : > { %v3460_v15 = vcombine.low %v3436_v9, %v3452_v10  ;;  %v3461_v16 = vcombine.high %v3436_v9, %v3452_v10  ;;  %v3462_v36 = vcombine.low %v3443_v17, %v3459_v18  ;;  %v3463_v37 = vcombine.high %v3443_v17, %v3459_v18 }
 0xc8c   : > { %v3246_v19 = vcombine.low %v3218_v11, %v3225_v12  ;;  %v10470_v20 = vcombine.high %v3218_v11, %v3225_v12  ;;  %v3262_v22 = vcombine.low %v3234_v13, %v3241_v14  ;;  %v10471_v23 = vcombine.high %v3234_v13, %v3241_v14 }
 0xc8d   : > { %v3464_v24 = vpack.c.bf16 %v3460_v15, %v3460_v15  ;;  %v3465_v25 = vpack.c.bf16 %v3461_v16, %v3461_v16  ;;  %v3466_v47 = vpack.c.bf16 %v3462_v36, %v3462_v36  ;;  %v3467_v48 = vpack.c.bf16 %v3463_v37, %v3463_v37 }
 0xc8e   : > { %v3253_v27 = vrot.slane %v3246_v19, %v12597_v31  ;;  %v3261_v28 = vrot.slane %v10470_v20, %v12597_v31  ;;  %v3269_v29 = vrot.slane %v3262_v22, %v12597_v31  ;;  %v3277_v30 = vrot.slane %v10471_v23, %v12597_v31  ;;  %v10466_v20 = vld [vmem:[%s14000_s3 + $0x1] ss:$0 sm:$0xff]  ;;  %s14037_s3 = sld [smem:[#allocation35_spill]] }
 0xc8f   : > { %v3622_v32 = vsel %vm2114_vm2, %v3464_v24, 0  ;;  %v3668_v33 = vsel %vm2114_vm2, %v3465_v25, 0  ;;  %v3714_v53 = vsel %vm2114_vm2, %v3466_v47, 0  ;;  %v3760_v54 = vsel %vm2114_vm2, %v3467_v48, 0 }
 0xc90   : > { %v3278_v34 = vcombine.low %v3253_v27, %v3261_v28  ;;  %v3294_v35 = vcombine.low %v3269_v29, %v3277_v30  ;;  %11079 = vmatpush3.bf16.xpose.msra.mxu0 %v3622_v32  ;;  %11085 = vmatpush3.bf16.xpose.msra.mxu1 %v3668_v33  ;;  %v3279_v41 = vcombine.high %v3253_v27, %v3261_v28 }
 0xc91   : > { %11090 = vmatprep.subr.bf16.mxu0 %v12135_v0  ;;  %v3295_v42 = vcombine.high %v3269_v29, %v3277_v30  ;;  %11096 = vmatprep.subr.bf16.mxu1 %v12135_v0  ;;  %v3163_v22 = vadd.f32 %v10466_v20, %v12802_v5 }
 0xc92   : > { %v3286_v43 = vrot.slane %v3278_v34, %v12600_v38  ;;  %v3302_v44 = vrot.slane %v3294_v35, %v12600_v38  ;;  %v3293_v51 = vrot.slane %v3279_v41, %v12600_v38 }
 0xc93   : > { %v3309_v52 = vrot.slane %v3295_v42, %v12600_v38 }
 0xc94   : > { %v3310_v45 = vcombine.low %v3286_v43, %v3302_v44  ;;  %v3311_v46 = vcombine.high %v3286_v43, %v3302_v44 }
 0xc95   : > { %v3312_v55 = vcombine.low %v3293_v51, %v3309_v52  ;;  %v3313_v56 = vcombine.high %v3293_v51, %v3309_v52 }
 0xc96   : > { %v3314_v39 = vpack.c.bf16 %v3310_v45, %v3310_v45  ;;  %v3315_v40 = vpack.c.bf16 %v3311_v46, %v3311_v46 }
 0xc97   : > { %v3316_v57 = vpack.c.bf16 %v3312_v55, %v3312_v55  ;;  %v3317_v58 = vpack.c.bf16 %v3313_v56, %v3313_v56 }
 0xc98   : > { %11081 = vmatmul.mubr.msk.bf16.vlgmr.msra.gmra.mrb[36].mxu0 %vm2114_vm2, %v3314_v39  ;;  %11087 = vmatmul.mubr.msk.bf16.vlgmr.msra.gmra.mrb[32].mxu1 %vm2114_vm2, %v3315_v40 }
 0xc99   : > { %11091 = vmatpush3.bf16.xpose.msra.mxu0 %v3714_v53  ;;  %11097 = vmatpush3.bf16.xpose.msra.mxu1 %v3760_v54 }
 0xc9a   : > { %11092 = vmatprep.mubr.msk.bf16.mxu0 %vm12136_vm0, %v12135_v0  ;;  %11098 = vmatprep.mubr.msk.bf16.mxu1 %vm12136_vm0, %v12135_v0 }
 0xc9b   : > { %11102 = vmatprep.subr.bf16.mxu0 %v12135_v0  ;;  %11108 = vmatprep.subr.bf16.mxu1 %v12135_v0 }
 0xca0   : > { %11093 = vmatmul.mubr.msk.bf16.vlgmr.msra.gmra.mrb[40].mxu0 %vm2114_vm2, %v3316_v57  ;;  %11099 = vmatmul.mubr.msk.bf16.vlgmr.msra.gmra.mrb[36].mxu1 %vm2114_vm2, %v3317_v58 }
 0xca1   : > { %11104 = vmatprep.mubr.msk.bf16.mxu0 %vm12136_vm0, %v12135_v0  ;;  %11110 = vmatprep.mubr.msk.bf16.mxu1 %vm12136_vm0, %v12135_v0 }
 0xd6b   : > { %v3658_v59 = vpop.f32.mrb[36].mxu0  ;;  %v3704_v60 = vpop.f32.mrb[32].mxu1 }
 0xd6c   : > { %v3802_v61 = vmul.f32 0.35355338, %v3658_v59  ;;  %v3803_v62 = vmul.f32 0.35355338, %v3704_v60  ;;  %v11082_v63 = vpop.f32.mrb[37].mxu0  ;;  %v11088_v49 = vpop.f32.mrb[33].mxu1 }
 0xd6d   : > { %v3661_v50 = vpop.f32.mrb[38].mxu0  ;;  %v3707_v2 = vpop.f32.mrb[34].mxu1 }
 0xd6e   : > { %v11083_v3 = vpop.f32.mrb[39].mxu0  ;;  %v11089_v4 = vpop.f32.mrb[35].mxu1  ;;  %v3809_v6 = vsel %vm2114_vm2, %v3803_v62, -inf  ;;  %v3806_v7 = vsel %vm2114_vm2, %v3802_v61, -inf }
 0xd6f   : > { %3810 = vmax.xlane.f32.xlu1 %v3809_v6  ;;  %3807 = vmax.xlane.f32.xlu0 %v3806_v7 }
 0xd73   : > { %v3750_v8 = vpop.f32.mrb[40].mxu0  ;;  %v3796_v9 = vpop.f32.mrb[36].mxu1 }
 0xd74   : > { %v3804_v10 = vmul.f32 0.35355338, %v3750_v8  ;;  %v11094_v11 = vpop.f32.mrb[41].mxu0  ;;  %v11100_v12 = vpop.f32.mrb[37].mxu1  ;;  %v3805_v15 = vmul.f32 0.35355338, %v3796_v9 }
 0xd75   : > { %v3753_v13 = vpop.f32.mrb[42].mxu0  ;;  %v3799_v14 = vpop.f32.mrb[38].mxu1 }
 0xd76   : > { %v11095_v16 = vpop.f32.mrb[43].mxu0  ;;  %v11101_v17 = vpop.f32.mrb[39].mxu1  ;;  %v3812_v18 = vsel %vm2114_vm2, %v3804_v10, -inf  ;;  %v3815_v19 = vsel %vm2114_vm2, %v3805_v15, -inf }
 0xd77   : > { %3813 = vmax.xlane.f32.xlu0 %v3812_v18 }
 0xd7b   : > { %3816 = vmax.xlane.f32.xlu0 %v3815_v19 }
 0xd80   : > { %3469 = vrot.lane.b32.xlu1 %v3163_v22, %s13909_s2  ;;  %s14035_s2 = sld [smem:[#allocation34_spill]] }
 0xdfc   : > { %v3811_v23 = vpop.xlane.xlu1 %3810  ;;  %v3808_v24 = vpop.xlane.xlu0 %3807 }
 0xdfd   : > { %v3819_v25 = vsub.f32 %v3803_v62, %v3811_v23  ;;  %v3818_v27 = vsub.f32 %v3802_v61, %v3808_v24 }
 0xdff   : > { %v3824_v28 = vmul.f32 1.442695, %v3819_v25  ;;  %v3822_v29 = vmul.f32 1.442695, %v3818_v27 }
 0xe00   : > { %v3470_v47 = vpop.permute.xlu1 %3469 }
 0xe01   : > { %11765 = vpow2.f32 %v3824_v28 }
 0xe02   : > { %11767 = vpow2.f32 %v3822_v29 }
 0xe04   : > { %v3814_v34 = vpop.xlane.xlu0 %3813 }
 0xe05   : > { %v3820_v37 = vsub.f32 %v3804_v10, %v3814_v34 }
 0xe07   : > { %v3826_v42 = vmul.f32 1.442695, %v3820_v37 }
 0xe08   : > { %v3817_v35 = vpop.xlane.xlu0 %3816 }
 0xe09   : > { %v3821_v36 = vsub.f32 %v3805_v15, %v3817_v35 }
 0xe0b   : > { %v12871_v30 = vpop.eup %11765  ;;  %v3828_v41 = vmul.f32 1.442695, %v3821_v36 }
 0xe0c   : > { %v12873_v32 = vpop.eup %11767  ;;  %v3833_v33 = vsel %vm2114_vm2, %v12871_v30, 0.0 }
 0xe0d   : > { %v3830_v5 = vsel %vm2114_vm2, %v12873_v32, 0.0  ;;  %3834 = vadd.xlane.f32.xlu0 %v3833_v33  ;;  %11769 = vpow2.f32 %v3828_v41 }
 0xe0e   : > { %3831 = vadd.xlane.f32.xlu1 %v3830_v5  ;;  %11771 = vpow2.f32 %v3826_v42 }
 0xe17   : > { %v12881_v43 = vpop.eup %11769 }
 0xe18   : > { %v12883_v44 = vpop.eup %11771  ;;  %v3839_v45 = vsel %vm2114_vm2, %v12881_v43, 0.0 }
 0xe19   : > { %v3836_v46 = vsel %vm2114_vm2, %v12883_v44, 0.0 }
 0xe1f   : > { %3475 = vrot.lane.b32.xlu1 %v3163_v22, %s13907_s23  ;;  %s14034_s23 = smov 24  }
 0xe23   : > { %3472 = vrot.lane.b32.xlu0 %v3163_v22, %s13911_s15  ;;  %s14036_s15 = sld [smem:[#allocation17_spill]] }
 0xe42   : > { %3840 = vadd.xlane.f32.xlu0 %v3839_v45 }
 0xe43   : > { %3837 = vadd.xlane.f32.xlu1 %v3836_v46 }
 0xe9a   : > { %v3835_v48 = vpop.xlane.xlu0 %3834 }
 0xe9b   : > { %v3832_v39 = vpop.xlane.xlu1 %3831  ;;  %11773 = vrcp.f32 %v3835_v48 }
 0xe9c   : > { %11775 = vrcp.f32 %v3832_v39 }
 0xe9e   : > { %v3473_v40 = vpop.permute.xlu0 %3472 }
 0xe9f   : > { %v3476_v51 = vpop.permute.xlu1 %3475  ;;  %v3478_v52 = vcombine.low %v3163_v22, %v3473_v40  ;;  %v3479_v53 = vcombine.high %v3163_v22, %v3473_v40 }
 0xea0   : > { %v3494_v54 = vcombine.low %v3470_v47, %v3476_v51  ;;  %v3495_v55 = vcombine.high %v3470_v47, %v3476_v51 }
 0xea1   : > { %v3486_v56 = vrot.slane %v3478_v52, %v12597_v31  ;;  %v3493_v57 = vrot.slane %v3479_v53, %v12597_v31 }
 0xea2   : > { %v3502_v58 = vrot.slane %v3494_v54, %v12597_v31  ;;  %v3509_v59 = vrot.slane %v3495_v55, %v12597_v31 }
 0xea4   : > { %v3510_v60 = vcombine.low %v3486_v56, %v3502_v58  ;;  %v3511_v61 = vcombine.high %v3486_v56, %v3502_v58  ;;  %v3526_v62 = vcombine.low %v3493_v57, %v3509_v59  ;;  %v3527_v63 = vcombine.high %v3493_v57, %v3509_v59 }
 0xea5   : > { %v11774_v17 = vpop.eup %11773 }
 0xea6   : > { %v3518_v49 = vrot.slane %v3510_v60, %v12600_v38  ;;  %v3525_v50 = vrot.slane %v3511_v61, %v12600_v38  ;;  %v3534_v2 = vrot.slane %v3526_v62, %v12600_v38  ;;  %v3541_v3 = vrot.slane %v3527_v63, %v12600_v38  ;;  %v11776_v23 = vpop.eup %11775 }
 0xea7   : > { %v3846_v5 = vmul.f32 %v11776_v23, %v12873_v32  ;;  %v3847_v34 = vmul.f32 %v11774_v17, %v12871_v30  ;;  %v11692_v23 = vld [vmem:[%s13999_s8 + $0x18] sm:$0xff]  }
 0xea8   : > { %v3546_v4 = vcombine.low %v3518_v49, %v3525_v50  ;;  %v10474_v6 = vcombine.high %v3518_v49, %v3525_v50  ;;  %v3562_v7 = vcombine.low %v3534_v2, %v3541_v3  ;;  %v10475_v8 = vcombine.high %v3534_v2, %v3541_v3 }
 0xea9   : > { %v3850_v42 = vpack.c.bf16 %v3846_v5, %v3846_v5  ;;  %v3851_v45 = vpack.c.bf16 %v3847_v34, %v3847_v34 }
 0xeaa   : > { %v3553_v9 = vrot.slane %v3546_v4, %v12597_v31  ;;  %v3561_v10 = vrot.slane %v10474_v6, %v12597_v31  ;;  %v3569_v11 = vrot.slane %v3562_v7, %v12597_v31  ;;  %v3577_v12 = vrot.slane %v10475_v8, %v12597_v31 }
 0xeac   : > { %v3578_v13 = vcombine.low %v3553_v9, %v3561_v10  ;;  %v3594_v14 = vcombine.low %v3569_v11, %v3577_v12  ;;  %v3579_v15 = vcombine.high %v3553_v9, %v3561_v10  ;;  %v3595_v16 = vcombine.high %v3569_v11, %v3577_v12 }
 0xeae   : > { %v3586_v18 = vrot.slane %v3578_v13, %v12600_v38  ;;  %v3602_v19 = vrot.slane %v3594_v14, %v12600_v38  ;;  %v3593_v20 = vrot.slane %v3579_v15, %v12600_v38  ;;  %v3609_v22 = vrot.slane %v3595_v16, %v12600_v38  ;;  %v11691_v13 = vld [vmem:[%s13999_s8 + $0x10] sm:$0xff]   ;;  %s1461_s8 = scalar_lea.vmem %s14036_s15, %s14038_s5  ;;  %s14039_s5 = sld [smem:[#allocation38_spill]] }
 0xeaf   : > { %s14042_s15 = smov 112  }
 0xeb0   : > { %v3610_v24 = vcombine.low %v3586_v18, %v3602_v19  ;;  %v3611_v25 = vcombine.high %v3586_v18, %v3602_v19  ;;  %v3612_v27 = vcombine.low %v3593_v20, %v3609_v22  ;;  %v3613_v28 = vcombine.high %v3593_v20, %v3609_v22 }
 0xeb2   : > { %v3614_v29 = vpack.c.bf16 %v3610_v24, %v3610_v24  ;;  %v3615_v33 = vpack.c.bf16 %v3611_v25, %v3611_v25  ;;  %v3616_v37 = vpack.c.bf16 %v3612_v27, %v3612_v27  ;;  %v3617_v41 = vpack.c.bf16 %v3613_v28, %v3613_v28 }
 0xeb4   : > { %v3858_v35 = vsel %vm2354_vm3, %v3614_v29, 0  ;;  %v3904_v36 = vsel %vm2354_vm3, %v3615_v33, 0  ;;  %v3950_v30 = vsel %vm2354_vm3, %v3616_v37, 0  ;;  %v3996_v32 = vsel %vm2354_vm3, %v3617_v41, 0 }
 0xeb5   : > { %11103 = vmatpush3.bf16.msra.mxu0 %v3858_v35  ;;  %11109 = vmatpush3.bf16.msra.mxu1 %v3904_v36 }
 0xeb6   : > { %11114 = vmatprep.subr.bf16.mxu0 %v12135_v0  ;;  %11120 = vmatprep.subr.bf16.mxu1 %v12135_v0 }
 0xeb8   : > { %11105 = vmatmul.mubr.msk.bf16.vlgmr.msra.gmra.mrb[44].mxu0 %vm2114_vm2, %v3850_v42  ;;  %11111 = vmatmul.mubr.msk.bf16.vlgmr.msra.gmra.mrb[40].mxu1 %vm2114_vm2, %v3851_v45 }
 0xeb9   : > { %11115 = vmatpush3.bf16.msra.mxu0 %v3950_v30  ;;  %11121 = vmatpush3.bf16.msra.mxu1 %v3996_v32 }
 0xeba   : > { %11116 = vmatprep.mubr.msk.bf16.mxu0 %vm12136_vm0, %v12135_v0  ;;  %11122 = vmatprep.mubr.msk.bf16.mxu1 %vm12136_vm0, %v12135_v0 }
 0xebb   : > { %11126 = vmatprep.subr.bf16.mxu0 %v12135_v0  ;;  %11134 = vmatprep.subr.bf16.mxu1 %v12135_v0 }
 0xecf   : > { %v3841_v46 = vpop.xlane.xlu0 %3840 }
 0xed0   : > { %v3838_v47 = vpop.xlane.xlu1 %3837  ;;  %11777 = vrcp.f32 %v3841_v46 }
 0xed1   : > { %11779 = vrcp.f32 %v3838_v47 }
 0xeda   : > { %v11778_v48 = vpop.eup %11777 }
 0xedb   : > { %v11780_v39 = vpop.eup %11779  ;;  %v3849_v40 = vmul.f32 %v11778_v48, %v12881_v43 }
 0xedc   : > { %v3848_v51 = vmul.f32 %v11780_v39, %v12883_v44 }
 0xedd   : > { %v3853_v52 = vpack.c.bf16 %v3849_v40, %v3849_v40 }
 0xede   : > { %v3852_v53 = vpack.c.bf16 %v3848_v51, %v3848_v51 }
 0xedf   : > { %11123 = vmatmul.mubr.msk.bf16.vlgmr.msra.gmra.mrb[44].mxu1 %vm2114_vm2, %v3853_v52 }
 0xee0   : > { %11117 = vmatmul.mubr.msk.bf16.vlgmr.msra.gmra.mrb[48].mxu0 %vm2114_vm2, %v3852_v53  ;;  %11138 = vmatprep.mubr.msk.bf16.mxu1 %vm12136_vm0, %v12135_v0 }
 0xee1   : > { %11130 = vmatprep.mubr.msk.bf16.mxu0 %vm12136_vm0, %v12135_v0  ;;  %11127 = vmatpush3.bf16.msra.mxu0 %v11691_v13 }
 0xee2   : > { %11128 = vmatprep.subr.bf16.mxu0 %v12135_v0 }
 0xee5   : > { %11129 = vmatpush3.bf16.msra.mxu0 %v11692_v23  ;;  %v11697_v23 = vld [vmem:[%s14037_s3] sm:$0xff]  }
 0xee6   : > { %11142 = vmatprep.subr.bf16.mxu0 %v12135_v0 }
 0xf8b   : > { %v3894_v54 = vpop.f32.mrb[44].mxu0  ;;  %v3940_v55 = vpop.f32.mrb[40].mxu1 }
 0xf8c   : > { %v11106_v56 = vpop.f32.mrb[45].mxu0  ;;  %v11112_v57 = vpop.f32.mrb[41].mxu1 }
 0xf8d   : > { %v3897_v58 = vpop.f32.mrb[46].mxu0  ;;  %v3943_v43 = vpop.f32.mrb[42].mxu1  ;;  %v10491_v57 = vld [vmem:[%s13995_s14 + $0x1] ss:$0 sm:$0xff]  ;;  %s14049_s14 = sld [smem:[#allocation42_spill]] }
 0xf8e   : > { %v11107_v59 = vpop.f32.mrb[47].mxu0  ;;  %v11113_v44 = vpop.f32.mrb[43].mxu1 }
 0xfb2   : > { %v4032_v60 = vpop.f32.mrb[44].mxu1 }
 0xfb3   : > { %v3986_v61 = vpop.f32.mrb[48].mxu0  ;;  %v4054_v62 = vcombine.low %v3940_v55, %v4032_v60  ;;  %v4055_v63 = vcombine.high %v3940_v55, %v4032_v60  ;;  %v11124_v49 = vpop.f32.mrb[45].mxu1 }
 0xfb4   : > { %v4038_v50 = vcombine.low %v3894_v54, %v3986_v61  ;;  %v4039_v2 = vcombine.high %v3894_v54, %v3986_v61  ;;  %v11118_v3 = vpop.f32.mrb[49].mxu0  ;;  %v4035_v4 = vpop.f32.mrb[46].mxu1 }
 0xfb5   : > { %v4062_v6 = vrot.slane %v4054_v62, %v12597_v31  ;;  %v4069_v7 = vrot.slane %v4055_v63, %v12597_v31  ;;  %v3989_v8 = vpop.f32.mrb[50].mxu0  ;;  %v11125_v9 = vpop.f32.mrb[47].mxu1  ;;  %v11693_v4 = vld [vmem:[%s13988_s30 + $0x10] sm:$0xff]  }
 0xfb6   : > { %v4046_v10 = vrot.slane %v4038_v50, %v12597_v31  ;;  %v4053_v11 = vrot.slane %v4039_v2, %v12597_v31  ;;  %v11119_v12 = vpop.f32.mrb[51].mxu0  ;;  %11135 = vmatpush3.bf16.msra.mxu1 %v11693_v4 }
 0xfb7   : > { %11136 = vmatprep.subr.bf16.mxu1 %v12135_v0  ;;  %v10497_v12 = vld [vmem:[%s14023_s10 + $0x1] ss:$0 sm:$0xff]  ;;  %s14045_s10 = sld [smem:[#allocation39_spill]] }
 0xfb8   : > { %v4070_v14 = vcombine.low %v4046_v10, %v4062_v6  ;;  %v4071_v15 = vcombine.high %v4046_v10, %v4062_v6  ;;  %v4086_v16 = vcombine.low %v4053_v11, %v4069_v7  ;;  %v4087_v17 = vcombine.high %v4053_v11, %v4069_v7  ;;  %v11694_v6 = vld [vmem:[%s13988_s30 + $0x18] sm:$0xff]   ;;  %v11700_v7 = vld [vmem:[%s13997_s12 + $0x28] sm:$0xff]   ;;  %s14059_s30 = sld [smem:[#allocation52_spill]] }
 0xfba   : > { %v4078_v18 = vrot.slane %v4070_v14, %v12600_v38  ;;  %v4085_v19 = vrot.slane %v4071_v15, %v12600_v38  ;;  %v4094_v20 = vrot.slane %v4086_v16, %v12600_v38  ;;  %v4101_v22 = vrot.slane %v4087_v17, %v12600_v38  ;;  %11137 = vmatpush3.bf16.msra.mxu1 %v11694_v6  ;;  %v10498_v14 = vld [vmem:[%s14024_s20 + $0x1] ss:$0 sm:$0xff]  ;;  %s14051_s20 = sld [smem:[#allocation54_spill]] }
 0xfbb   : > { %11154 = vmatprep.subr.bf16.mxu1 %v12135_v0  ;;  %v11695_v17 = vld [vmem:[%s14035_s2] sm:$0xff]  }
 0xfbc   : > { %v4106_v24 = vcombine.low %v4078_v18, %v4085_v19  ;;  %v10484_v25 = vcombine.high %v4078_v18, %v4085_v19  ;;  %v4122_v27 = vcombine.low %v4094_v20, %v4101_v22  ;;  %v10485_v28 = vcombine.high %v4094_v20, %v4101_v22  ;;  %v12981_v19 = vld [vmem:[%s1461_s8] sm:$0xff]  ;;  %v11696_v20 = vld [vmem:[%s14035_s2 + $0x8] sm:$0xff]   ;;  %s14040_s8 = sld [smem:[#allocation36_spill]] }
 0xfbd   : > { %v4479_v22 = vpack.c.bf16 %v12981_v19, %v12981_v19 }
 0xfbe   : > { %v4113_v29 = vrot.slane %v4106_v24, %v12597_v31  ;;  %v4121_v33 = vrot.slane %v10484_v25, %v12597_v31  ;;  %v4129_v5 = vrot.slane %v4122_v27, %v12597_v31  ;;  %v4137_v34 = vrot.slane %v10485_v28, %v12597_v31  ;;  %v11698_v24 = vld [vmem:[%s14037_s3 + $0x8] sm:$0xff]   ;;  %v11701_v25 = vld [vmem:[%s13997_s12 + $0x30] sm:$0xff]   ;;  %v11702_v27 = vld [vmem:[%s13997_s12 + $0x38] sm:$0xff]  }
 0xfbf   : > { %v10504_v28 = vld [vmem:[%s14026_s1 + $0x1] ss:$0 sm:$0xff]  ;;  %s14043_s1 = smov 120  }
 0xfc0   : > { %v4139_v35 = vcombine.high %v4113_v29, %v4121_v33  ;;  %v4155_v36 = vcombine.high %v4129_v5, %v4137_v34  ;;  %v4138_v37 = vcombine.low %v4113_v29, %v4121_v33  ;;  %v4154_v41 = vcombine.low %v4129_v5, %v4137_v34 }
 0xfc2   : > { %v4153_v42 = vrot.slane %v4139_v35, %v12600_v38  ;;  %v4169_v45 = vrot.slane %v4155_v36, %v12600_v38  ;;  %v4146_v30 = vrot.slane %v4138_v37, %v12600_v38  ;;  %v4162_v32 = vrot.slane %v4154_v41, %v12600_v38 }
 0xfc4   : > { %v4172_v46 = vcombine.low %v4153_v42, %v4169_v45  ;;  %v4171_v47 = vcombine.high %v4146_v30, %v4162_v32  ;;  %v4173_v48 = vcombine.high %v4153_v42, %v4169_v45  ;;  %v4170_v39 = vcombine.low %v4146_v30, %v4162_v32  ;;  %v10531_v32 = vld [vmem:[%s14039_s5] ss:$0 sm:$0xff] }
 0xfc6   : > { %4179 = vrot.lane.b32.xlu1 %v4172_v46, %s14032_s22  ;;  %4175 = vrot.lane.b32.xlu0 %v4171_v47, %s14033_s18 }
 0xfca   : > { %4183 = vrot.lane.b32.xlu1 %v4173_v48, %s14034_s23 }
0x1038   : > { %v4180_v40 = vpop.permute.xlu1 %4179  ;;  %v4176_v51 = vpop.permute.xlu0 %4175 }
0x1039   : > { %v4186_v52 = vsel %vm2114_vm2, %v4170_v39, %v4176_v51  ;;  %v11703_v39 = vld [vmem:[%s14040_s8] sm:$0xff]  }
0x103a   : > { %v4187_v54 = vsel %vm2685_vm4, %v4186_v52, %v4180_v40  ;;  %v10527_v40 = vld [vmem:[%s14041_s4] ss:$0 sm:$0xff] }
0x103c   : > { %v4184_v53 = vpop.permute.xlu1 %4183 }
0x103d   : > { %v4188_v55 = vsel %vm2687_vm5, %v4187_v54, %v4184_v53  ;;  %v11704_v54 = vld [vmem:[%s14040_s8 + $0x8] sm:$0xff]  }
0x103e   : > { %v4189_v56 = vpack.c.bf16 %v4188_v55, %v4188_v55 }
0x1040   : > { %11131 = vmatmul.mubr.msk.bf16.vlgmr.msra.gmra.mrb[52].mxu0 %vm1494_vm1, %v4189_v56 }
0x1041   : > { %11150 = vmatprep.mubr.msk.bf16.mxu0 %vm12136_vm0, %v12135_v0 }
0x1113   : > { %v4252_v58 = vpop.f32.mrb[52].mxu0 }
0x1114   : > { %v4253_v43 = vadd.f32 %v10491_v57, %v4252_v58  ;;  %v11132_v59 = vpop.f32.mrb[53].mxu0 }
0x1115   : > { %v4255_v44 = vpop.f32.mrb[54].mxu0 }
0x1116   : > { %v11133_v60 = vpop.f32.mrb[55].mxu0  ;;  %v4258_v61 = vadd.f32 %v4253_v43, %v12785_v1  ;;  %v11699_v1 = vld [vmem:[%s13997_s12 + $0x20] sm:$0xff]   ;;  %s14046_s12 = sld [smem:[#allocation40_spill]] }
0x1117   : > { %11143 = vmatpush3.bf16.msra.mxu0 %v11699_v1 }
0x1118   : > { %v4263_v62 = vsel %vm1494_vm1, %v4258_v61, 0.0  ;;  %11144 = vmatprep.subr.bf16.mxu0 %v12135_v0 }
0x1119   : > { %4264 = vadd.xlane.f32.xlu0 %v4263_v62 }
0x111b   : > { %11145 = vmatpush3.bf16.msra.mxu0 %v11700_v7 }
0x111c   : > { %11146 = vmatprep.subr.bf16.mxu0 %v12135_v0 }
0x111f   : > { %11147 = vmatpush3.bf16.msra.mxu0 %v11701_v25 }
0x1120   : > { %11148 = vmatprep.subr.bf16.mxu0 %v12135_v0 }
0x1123   : > { %11149 = vmatpush3.bf16.msra.mxu0 %v11702_v27 }
0x1124   : > { %11170 = vmatprep.subr.bf16.mxu0 %v12135_v0 }
0x11a6   : > { %v4265_v63 = vpop.xlane.xlu0 %4264 }
0x11a7   : > { %v4266_v49 = vmul.f32 0.03125, %v4265_v63 }
0x11a9   : > { %v4267_v50 = vsub.f32 %v4258_v61, %v4266_v49 }
0x11ab   : > { %v4268_v2 = vmul.f32 %v4267_v50, %v4267_v50 }
0x11ad   : > { %v4269_v3 = vsel %vm1494_vm1, %v4268_v2, 0.0 }
0x11ae   : > { %4270 = vadd.xlane.f32.xlu1 %v4269_v3 }
0x123b   : > { %v4271_v8 = vpop.xlane.xlu1 %4270 }
0x123c   : > { %v4272_v9 = vmul.f32 0.03125, %v4271_v8 }
0x123e   : > { %v4273_v10 = vadd.f32 1e-05, %v4272_v9 }
0x1240   : > { %11781 = vrsqrt.f32 %v4273_v10 }
0x124a   : > { %v11782_v11 = vpop.eup %11781 }
0x124b   : > { %v4275_v13 = vmul.f32 %v11782_v11, %v4267_v50 }
0x124d   : > { %v4282_v15 = vmul.f32 %v10497_v12, %v4275_v13 }
0x124f   : > { %v12972_v16 = vadd.f32 %v10498_v14, %v4282_v15 }
0x1251   : > { %v4290_v18 = vpack.c.bf16 %v12972_v16, %v12972_v16 }
0x1253   : > { %11139 = vmatmul.mubr.msk.bf16.vlgmr.msra.gmra.mrb[48].mxu1 %vm1494_vm1, %v4290_v18 }
0x1254   : > { %11155 = vmatpush3.bf16.msra.mxu1 %v11695_v17  ;;  %11158 = vmatprep.mubr.msk.bf16.mxu1 %vm12136_vm0, %v12135_v0 }
0x1255   : > { %11156 = vmatprep.subr.bf16.mxu1 %v12135_v0 }
0x1258   : > { %11157 = vmatpush3.bf16.msra.mxu1 %v11696_v20 }
0x1259   : > { %11162 = vmatprep.subr.bf16.mxu1 %v12135_v0 }
0x125b   : > { %11159 = vmatmul.mubr.msk.bf16.vlgmr.msra.gmra.mrb[52].mxu1 %vm1494_vm1, %v4479_v22 }
0x125c   : > { %11163 = vmatpush3.bf16.msra.mxu1 %v11697_v23  ;;  %11166 = vmatprep.mubr.msk.bf16.mxu1 %vm12136_vm0, %v12135_v0 }
0x125d   : > { %11164 = vmatprep.subr.bf16.mxu1 %v12135_v0 }
0x1260   : > { %11165 = vmatpush3.bf16.msra.mxu1 %v11698_v24 }
0x1261   : > { %11178 = vmatprep.subr.bf16.mxu1 %v12135_v0 }
0x1263   : > { %11167 = vmatmul.mubr.msk.bf16.vlgmr.msra.gmra.mrb[56].mxu1 %vm1494_vm1, %v4479_v22 }
0x1264   : > { %11180 = vmatprep.mubr.msk.bf16.mxu1 %vm12136_vm0, %v12135_v0 }
0x1326   : > { %v4353_v29 = vpop.f32.mrb[48].mxu1 }
0x1327   : > { %v4354_v33 = vadd.f32 %v10504_v28, %v4353_v29  ;;  %v11140_v5 = vpop.f32.mrb[49].mxu1 }
0x1328   : > { %v4356_v34 = vpop.f32.mrb[50].mxu1 }
0x1329   : > { %v4359_v35 = vmax.f32 %v4354_v33, 0.0  ;;  %v11141_v36 = vpop.f32.mrb[51].mxu1 }
0x132b   : > { %v4360_v37 = vpack.c.bf16 %v4359_v35, %v4359_v35 }
0x132d   : > { %11151 = vmatmul.mubr.msk.bf16.vlgmr.msra.gmra.mrb[56].mxu0 %vm2895_vm6, %v4360_v37 }
0x132e   : > { %v4540_v41 = vpop.f32.mrb[52].mxu1  ;;  %11174 = vmatprep.mubr.msk.bf16.mxu0 %vm12136_vm0, %v12135_v0  ;;  %11171 = vmatpush3.bf16.msra.mxu0 %v11703_v39 }
0x132f   : > { %v11160_v42 = vpop.f32.mrb[53].mxu1  ;;  %v4541_v53 = vadd.f32 %v10527_v40, %v4540_v41  ;;  %11172 = vmatprep.subr.bf16.mxu0 %v12135_v0 }
0x1330   : > { %v4543_v45 = vpop.f32.mrb[54].mxu1 }
0x1331   : > { %v11161_v30 = vpop.f32.mrb[55].mxu1 }
0x1332   : > { %11173 = vmatpush3.bf16.msra.mxu0 %v11704_v54 }
0x1333   : > { %11184 = vmatprep.subr.bf16.mxu0 %v12135_v0 }
0x1335   : > { %11175 = vmatmul.mubr.msk.bf16.vlgmr.msra.gmra.mrb[60].mxu0 %vm1494_vm1, %v4479_v22 }
0x1336   : > { %v4603_v46 = vpop.f32.mrb[56].mxu1  ;;  %11186 = vmatprep.mubr.msk.bf16.mxu0 %vm12136_vm0, %v12135_v0 }
0x1337   : > { %v4604_v47 = vadd.f32 %v10531_v32, %v4603_v46  ;;  %v11168_v48 = vpop.f32.mrb[57].mxu1 }
0x1338   : > { %v4606_v51 = vpop.f32.mrb[58].mxu1 }
0x1339   : > { %4826 = vrot.lane.b32.xlu1 %v4604_v47, %s14042_s15  ;;  %4823 = vrot.lane.b32.xlu0 %v4604_v47, %s14043_s1  ;;  %v11169_v52 = vpop.f32.mrb[59].mxu1 }
0x133d   : > { %4673 = vrot.lane.b32.xlu1 %v4541_v53, %s14043_s1  ;;  %4829 = vrot.lane.b32.xlu0 %v4604_v47, %s14044_s9 }
0x1341   : > { %4679 = vrot.lane.b32.xlu1 %v4541_v53, %s14044_s9  ;;  %4676 = vrot.lane.b32.xlu0 %v4541_v53, %s14042_s15 }
0x13ab   : > { %v4827_v55 = vpop.permute.xlu1 %4826  ;;  %v4824_v56 = vpop.permute.xlu0 %4823 }
0x13ac   : > { %v4832_v57 = vcombine.low %v4604_v47, %v4827_v55  ;;  %v4833_v58 = vcombine.high %v4604_v47, %v4827_v55 }
0x13ae   : > { %v4840_v61 = vrot.slane %v4832_v57, %v12597_v31  ;;  %v4847_v62 = vrot.slane %v4833_v58, %v12597_v31 }
0x13af   : > { %v4674_v43 = vpop.permute.xlu1 %4673  ;;  %v4830_v59 = vpop.permute.xlu0 %4829 }
0x13b0   : > { %v4848_v44 = vcombine.low %v4824_v56, %v4830_v59  ;;  %v4849_v60 = vcombine.high %v4824_v56, %v4830_v59 }
0x13b2   : > { %v4856_v63 = vrot.slane %v4848_v44, %v12597_v31  ;;  %v4863_v49 = vrot.slane %v4849_v60, %v12597_v31 }
0x13b3   : > { %v4680_v50 = vpop.permute.xlu1 %4679  ;;  %v4677_v2 = vpop.permute.xlu0 %4676 }
0x13b4   : > { %v4864_v3 = vcombine.low %v4840_v61, %v4856_v63  ;;  %v4865_v4 = vcombine.high %v4840_v61, %v4856_v63  ;;  %v4880_v6 = vcombine.low %v4847_v62, %v4863_v49  ;;  %v4881_v1 = vcombine.high %v4847_v62, %v4863_v49 }
0x13b5   : > { %v4698_v7 = vcombine.low %v4674_v43, %v4680_v50  ;;  %v4699_v8 = vcombine.high %v4674_v43, %v4680_v50  ;;  %v4682_v9 = vcombine.low %v4541_v53, %v4677_v2  ;;  %v4683_v10 = vcombine.high %v4541_v53, %v4677_v2 }
0x13b6   : > { %v4872_v11 = vrot.slane %v4864_v3, %v12600_v38  ;;  %v4879_v12 = vrot.slane %v4865_v4, %v12600_v38  ;;  %v4888_v13 = vrot.slane %v4880_v6, %v12600_v38  ;;  %v4895_v14 = vrot.slane %v4881_v1, %v12600_v38 }
0x13b7   : > { %v4706_v15 = vrot.slane %v4698_v7, %v12597_v31  ;;  %v4713_v17 = vrot.slane %v4699_v8, %v12597_v31  ;;  %v4690_v18 = vrot.slane %v4682_v9, %v12597_v31  ;;  %v4697_v20 = vrot.slane %v4683_v10, %v12597_v31 }
0x13b8   : > { %v4900_v22 = vcombine.low %v4872_v11, %v4879_v12  ;;  %v10541_v23 = vcombine.high %v4872_v11, %v4879_v12  ;;  %v4916_v24 = vcombine.low %v4888_v13, %v4895_v14  ;;  %v10542_v25 = vcombine.high %v4888_v13, %v4895_v14 }
0x13b9   : > { %v4714_v27 = vcombine.low %v4690_v18, %v4706_v15  ;;  %v4715_v28 = vcombine.high %v4690_v18, %v4706_v15  ;;  %v4730_v29 = vcombine.low %v4697_v20, %v4713_v17  ;;  %v4731_v33 = vcombine.high %v4697_v20, %v4713_v17 }
0x13ba   : > { %v4907_v5 = vrot.slane %v4900_v22, %v12597_v31  ;;  %v4915_v34 = vrot.slane %v10541_v23, %v12597_v31  ;;  %v4923_v35 = vrot.slane %v4916_v24, %v12597_v31  ;;  %v4931_v36 = vrot.slane %v10542_v25, %v12597_v31 }
0x13bb   : > { %v4722_v37 = vrot.slane %v4714_v27, %v12600_v38  ;;  %v4729_v41 = vrot.slane %v4715_v28, %v12600_v38  ;;  %v4738_v42 = vrot.slane %v4730_v29, %v12600_v38  ;;  %v4745_v45 = vrot.slane %v4731_v33, %v12600_v38 }
0x13bc   : > { %v4932_v30 = vcombine.low %v4907_v5, %v4915_v34  ;;  %v4948_v32 = vcombine.low %v4923_v35, %v4931_v36  ;;  %v4933_v46 = vcombine.high %v4907_v5, %v4915_v34  ;;  %v4949_v47 = vcombine.high %v4923_v35, %v4931_v36 }
0x13bd   : > { %v4750_v48 = vcombine.low %v4722_v37, %v4729_v41  ;;  %v10539_v39 = vcombine.high %v4722_v37, %v4729_v41  ;;  %v4766_v40 = vcombine.low %v4738_v42, %v4745_v45  ;;  %v10540_v51 = vcombine.high %v4738_v42, %v4745_v45 }
0x13be   : > { %v4940_v52 = vrot.slane %v4932_v30, %v12600_v38  ;;  %v4956_v53 = vrot.slane %v4948_v32, %v12600_v38  ;;  %v4947_v59 = vrot.slane %v4933_v46, %v12600_v38  ;;  %v4963_v44 = vrot.slane %v4949_v47, %v12600_v38 }
0x13bf   : > { %v4757_v54 = vrot.slane %v4750_v48, %v12597_v31  ;;  %v4765_v55 = vrot.slane %v10539_v39, %v12597_v31  ;;  %v4773_v56 = vrot.slane %v4766_v40, %v12597_v31  ;;  %v4781_v57 = vrot.slane %v10540_v51, %v12597_v31 }
0x13c0   : > { %v4964_v58 = vcombine.low %v4940_v52, %v4956_v53  ;;  %v4965_v43 = vcombine.high %v4940_v52, %v4956_v53  ;;  %v4966_v4 = vcombine.low %v4947_v59, %v4963_v44  ;;  %v4967_v6 = vcombine.high %v4947_v59, %v4963_v44 }
0x13c1   : > { %v4782_v60 = vcombine.low %v4757_v54, %v4765_v55  ;;  %v4798_v61 = vcombine.low %v4773_v56, %v4781_v57  ;;  %v4783_v1 = vcombine.high %v4757_v54, %v4765_v55  ;;  %v4799_v7 = vcombine.high %v4773_v56, %v4781_v57 }
0x13c2   : > { %v4968_v62 = vpack.c.bf16 %v4964_v58, %v4964_v58  ;;  %v4969_v63 = vpack.c.bf16 %v4965_v43, %v4965_v43  ;;  %v4970_v10 = vpack.c.bf16 %v4966_v4, %v4966_v4  ;;  %v4971_v11 = vpack.c.bf16 %v4967_v6, %v4967_v6 }
0x13c3   : > { %v4790_v49 = vrot.slane %v4782_v60, %v12600_v38  ;;  %v4806_v50 = vrot.slane %v4798_v61, %v12600_v38  ;;  %v4797_v14 = vrot.slane %v4783_v1, %v12600_v38  ;;  %v4813_v15 = vrot.slane %v4799_v7, %v12600_v38 }
0x13c4   : > { %v5126_v2 = vsel %vm2114_vm2, %v4968_v62, 0  ;;  %v5172_v3 = vsel %vm2114_vm2, %v4969_v63, 0  ;;  %v5218_v17 = vsel %vm2114_vm2, %v4970_v10, 0  ;;  %v5264_v18 = vsel %vm2114_vm2, %v4971_v11, 0 }
0x13c5   : > { %11179 = vmatpush3.bf16.xpose.msra.mxu1 %v5126_v2  ;;  %11185 = vmatpush3.bf16.xpose.msra.mxu0 %v5172_v3  ;;  %v4814_v8 = vcombine.low %v4790_v49, %v4806_v50  ;;  %v4815_v9 = vcombine.high %v4790_v49, %v4806_v50  ;;  %v4816_v20 = vcombine.low %v4797_v14, %v4813_v15  ;;  %v1466_v36 = vand.u32 127, %v1463_v21  ;;  %v10535_v2 = vld [vmem:[%s14045_s10] ss:$0 sm:$0xff] }
0x13c6   : > { %11190 = vmatprep.subr.bf16.mxu1 %v12135_v0  ;;  %11196 = vmatprep.subr.bf16.mxu0 %v12135_v0  ;;  %v4817_v22 = vcombine.high %v4797_v14, %v4813_v15  ;;  %v12145_v42 = vmov -1e+09  }
0x13c7   : > { %v4818_v12 = vpack.c.bf16 %v4814_v8, %v4814_v8  ;;  %v4819_v13 = vpack.c.bf16 %v4815_v9, %v4815_v9  ;;  %v4820_v23 = vpack.c.bf16 %v4816_v20, %v4816_v20  ;;  %vm1467_vm7 = vcmp.le.s32.totalorder %v1466_v36, %v12594_v26 }
0x13c8   : > { %v4821_v24 = vpack.c.bf16 %v4817_v22, %v4817_v22  ;;  %v13079_v45 = vsel %vm1467_vm7, 0.0, %v12145_v42 }
0x13cc   : > { %11181 = vmatmul.mubr.msk.bf16.vlgmr.msra.gmra.mrb[60].mxu1 %vm2114_vm2, %v4818_v12  ;;  %11187 = vmatmul.mubr.msk.bf16.vlgmr.msra.gmra.mrb[64].mxu0 %vm2114_vm2, %v4819_v13 }
0x13cd   : > { %11191 = vmatpush3.bf16.xpose.msra.mxu1 %v5218_v17  ;;  %11197 = vmatpush3.bf16.xpose.msra.mxu0 %v5264_v18 }
0x13ce   : > { %11192 = vmatprep.mubr.msk.bf16.mxu1 %vm12136_vm0, %v12135_v0  ;;  %11198 = vmatprep.mubr.msk.bf16.mxu0 %vm12136_vm0, %v12135_v0 }
0x13cf   : > { %11202 = vmatprep.subr.bf16.mxu1 %v12135_v0  ;;  %11208 = vmatprep.subr.bf16.mxu0 %v12135_v0 }
0x13d4   : > { %11193 = vmatmul.mubr.msk.bf16.vlgmr.msra.gmra.mrb[64].mxu1 %vm2114_vm2, %v4820_v23  ;;  %11199 = vmatmul.mubr.msk.bf16.vlgmr.msra.gmra.mrb[68].mxu0 %vm2114_vm2, %v4821_v24 }
0x13d5   : > { %11204 = vmatprep.mubr.msk.bf16.mxu1 %vm12136_vm0, %v12135_v0  ;;  %11210 = vmatprep.mubr.msk.bf16.mxu0 %vm12136_vm0, %v12135_v0 }
0x1400   : > { %v13075_v25 = vpop.f32.mrb[56].mxu0 }
0x1401   : > { %v11152_v27 = vpop.f32.mrb[57].mxu0 }
0x1402   : > { %v4442_v28 = vpop.f32.mrb[58].mxu0 }
0x1403   : > { %v11153_v29 = vpop.f32.mrb[59].mxu0 }
0x1408   : > { %v4666_v33 = vpop.f32.mrb[60].mxu0 }
0x1409   : > { %v11176_v5 = vpop.f32.mrb[61].mxu0  ;;  %v4667_v3 = vadd.f32 %v10535_v2, %v4666_v33 }
0x140a   : > { %v4669_v34 = vpop.f32.mrb[62].mxu0 }
0x140b   : > { %v11177_v35 = vpop.f32.mrb[63].mxu0 }
0x149f   : > { %v5162_v37 = vpop.f32.mrb[60].mxu1  ;;  %v5208_v41 = vpop.f32.mrb[64].mxu0 }
0x14a0   : > { %v5306_v30 = vmul.f32 0.35355338, %v5162_v37  ;;  %v5307_v32 = vmul.f32 0.35355338, %v5208_v41  ;;  %v11182_v46 = vpop.f32.mrb[61].mxu1  ;;  %v11188_v47 = vpop.f32.mrb[65].mxu0 }
0x14a1   : > { %v5165_v48 = vpop.f32.mrb[62].mxu1  ;;  %v5211_v39 = vpop.f32.mrb[66].mxu0 }
0x14a2   : > { %v11183_v40 = vpop.f32.mrb[63].mxu1  ;;  %v11189_v51 = vpop.f32.mrb[67].mxu0  ;;  %v5310_v52 = vadd.f32 %v5306_v30, %v13079_v45  ;;  %v5311_v53 = vadd.f32 %v5307_v32, %v13079_v45 }
0x14a4   : > { %v5314_v21 = vsel %vm2114_vm2, %v5310_v52, -inf  ;;  %v5317_v26 = vsel %vm2114_vm2, %v5311_v53, -inf }
0x14a5   : > { %5315 = vmax.xlane.f32.xlu0 %v5314_v21  ;;  %5318 = vmax.xlane.f32.xlu1 %v5317_v26 }
0x14a7   : > { %v5254_v54 = vpop.f32.mrb[64].mxu1  ;;  %v5300_v55 = vpop.f32.mrb[68].mxu0 }
0x14a8   : > { %v5308_v56 = vmul.f32 0.35355338, %v5254_v54  ;;  %v5309_v57 = vmul.f32 0.35355338, %v5300_v55  ;;  %v11194_v58 = vpop.f32.mrb[65].mxu1  ;;  %v11200_v43 = vpop.f32.mrb[69].mxu0 }
0x14a9   : > { %v5257_v59 = vpop.f32.mrb[66].mxu1  ;;  %v5303_v44 = vpop.f32.mrb[70].mxu0 }
0x14aa   : > { %v11195_v60 = vpop.f32.mrb[67].mxu1  ;;  %v11201_v61 = vpop.f32.mrb[71].mxu0  ;;  %v5312_v62 = vadd.f32 %v5308_v56, %v13079_v45  ;;  %v5313_v49 = vadd.f32 %v5309_v57, %v13079_v45 }
0x14ac   : > { %v5320_v63 = vsel %vm2114_vm2, %v5312_v62, -inf  ;;  %v5323_v50 = vsel %vm2114_vm2, %v5313_v49, -inf }
0x14ad   : > { %5321 = vmax.xlane.f32.xlu0 %v5320_v63 }
0x14b1   : > { %5324 = vmax.xlane.f32.xlu0 %v5323_v50 }
0x14b6   : > { %4973 = vrot.lane.b32.xlu1 %v4667_v3, %s14043_s1 }
0x1532   : > { %v5316_v4 = vpop.xlane.xlu0 %5315  ;;  %v5319_v6 = vpop.xlane.xlu1 %5318 }
0x1533   : > { %v5326_v1 = vsub.f32 %v5310_v52, %v5316_v4  ;;  %v5327_v7 = vsub.f32 %v5311_v53, %v5319_v6 }
0x1535   : > { %v5330_v8 = vmul.f32 1.442695, %v5326_v1  ;;  %v5332_v9 = vmul.f32 1.442695, %v5327_v7 }
0x1536   : > { %v4974_v29 = vpop.permute.xlu1 %4973 }
0x1537   : > { %11783 = vpow2.f32 %v5330_v8 }
0x1538   : > { %11785 = vpow2.f32 %v5332_v9 }
0x153a   : > { %v5322_v14 = vpop.xlane.xlu0 %5321 }
0x153b   : > { %v5328_v17 = vsub.f32 %v5312_v62, %v5322_v14 }
0x153d   : > { %v5334_v20 = vmul.f32 1.442695, %v5328_v17 }
0x153e   : > { %v5325_v15 = vpop.xlane.xlu0 %5324 }
0x153f   : > { %v5329_v18 = vsub.f32 %v5313_v49, %v5325_v15  ;;  %11787 = vpow2.f32 %v5334_v20 }
0x1541   : > { %v13091_v10 = vpop.eup %11783  ;;  %v5336_v22 = vmul.f32 1.442695, %v5329_v18 }
0x1542   : > { %v13093_v11 = vpop.eup %11785  ;;  %v5338_v12 = vsel %vm2114_vm2, %v13091_v10, 0.0 }
0x1543   : > { %5339 = vadd.xlane.f32.xlu1 %v5338_v12  ;;  %v5341_v13 = vsel %vm2114_vm2, %v13093_v11, 0.0  ;;  %11789 = vpow2.f32 %v5336_v22 }
0x1544   : > { %5342 = vadd.xlane.f32.xlu0 %v5341_v13 }
0x1549   : > { %v13101_v23 = vpop.eup %11787 }
0x154a   : > { %v5344_v27 = vsel %vm2114_vm2, %v13101_v23, 0.0 }
0x154d   : > { %v13103_v24 = vpop.eup %11789 }
0x154e   : > { %v5347_v28 = vsel %vm2114_vm2, %v13103_v24, 0.0 }
0x1554   : > { %4979 = vrot.lane.b32.xlu1 %v4667_v3, %s14044_s9 }
0x155a   : > { %4976 = vrot.lane.b32.xlu0 %v4667_v3, %s14042_s15 }
0x1578   : > { %5345 = vadd.xlane.f32.xlu1 %v5344_v27 }
0x1579   : > { %5348 = vadd.xlane.f32.xlu0 %v5347_v28 }
0x15d0   : > { %v5340_v33 = vpop.xlane.xlu1 %5339 }
0x15d1   : > { %v5343_v5 = vpop.xlane.xlu0 %5342  ;;  %11791 = vrcp.f32 %v5340_v33 }
0x15d2   : > { %11793 = vrcp.f32 %v5343_v5 }
0x15d4   : > { %v4980_v34 = vpop.permute.xlu1 %4979 }
0x15d5   : > { %v4998_v35 = vcombine.low %v4974_v29, %v4980_v34  ;;  %v4999_v36 = vcombine.high %v4974_v29, %v4980_v34  ;;  %v4977_v37 = vpop.permute.xlu0 %4976 }
0x15d6   : > { %v4982_v41 = vcombine.low %v4667_v3, %v4977_v37  ;;  %v4983_v42 = vcombine.high %v4667_v3, %v4977_v37 }
0x15d7   : > { %v5006_v30 = vrot.slane %v4998_v35, %v12597_v31  ;;  %v5013_v32 = vrot.slane %v4999_v36, %v12597_v31 }
0x15d8   : > { %v4990_v46 = vrot.slane %v4982_v41, %v12597_v31  ;;  %v4997_v47 = vrot.slane %v4983_v42, %v12597_v31 }
0x15da   : > { %v5014_v48 = vcombine.low %v4990_v46, %v5006_v30  ;;  %v5015_v39 = vcombine.high %v4990_v46, %v5006_v30  ;;  %v5030_v40 = vcombine.low %v4997_v47, %v5013_v32  ;;  %v5031_v51 = vcombine.high %v4997_v47, %v5013_v32 }
0x15db   : > { %v11792_v2 = vpop.eup %11791 }
0x15dc   : > { %v5022_v52 = vrot.slane %v5014_v48, %v12600_v38  ;;  %v5029_v53 = vrot.slane %v5015_v39, %v12600_v38  ;;  %v5038_v21 = vrot.slane %v5030_v40, %v12600_v38  ;;  %v5045_v26 = vrot.slane %v5031_v51, %v12600_v38  ;;  %v11794_v6 = vpop.eup %11793 }
0x15dd   : > { %v5354_v12 = vmul.f32 %v11792_v2, %v13091_v10  ;;  %v5355_v13 = vmul.f32 %v11794_v6, %v13093_v11 }
0x15de   : > { %v5050_v54 = vcombine.low %v5022_v52, %v5029_v53  ;;  %v10543_v55 = vcombine.high %v5022_v52, %v5029_v53  ;;  %v5066_v56 = vcombine.low %v5038_v21, %v5045_v26  ;;  %v10544_v57 = vcombine.high %v5038_v21, %v5045_v26 }
0x15df   : > { %v5358_v27 = vpack.c.bf16 %v5354_v12, %v5354_v12  ;;  %v5359_v28 = vpack.c.bf16 %v5355_v13, %v5355_v13  ;;  %v11706_v12 = vld [vmem:[%s14046_s12 + $0x8] sm:$0xff]  }
0x15e0   : > { %v5057_v58 = vrot.slane %v5050_v54, %v12597_v31  ;;  %v5065_v43 = vrot.slane %v10543_v55, %v12597_v31  ;;  %v5073_v59 = vrot.slane %v5066_v56, %v12597_v31  ;;  %v5081_v44 = vrot.slane %v10544_v57, %v12597_v31 }
0x15e2   : > { %v5082_v60 = vcombine.low %v5057_v58, %v5065_v43  ;;  %v5083_v61 = vcombine.high %v5057_v58, %v5065_v43  ;;  %v5098_v62 = vcombine.low %v5073_v59, %v5081_v44  ;;  %v5099_v63 = vcombine.high %v5073_v59, %v5081_v44 }
0x15e4   : > { %v5090_v49 = vrot.slane %v5082_v60, %v12600_v38  ;;  %v5097_v50 = vrot.slane %v5083_v61, %v12600_v38  ;;  %v5106_v3 = vrot.slane %v5098_v62, %v12600_v38  ;;  %v5113_v4 = vrot.slane %v5099_v63, %v12600_v38 }
0x15e6   : > { %v5114_v1 = vcombine.low %v5090_v49, %v5106_v3  ;;  %v5115_v7 = vcombine.high %v5090_v49, %v5106_v3  ;;  %v5116_v8 = vcombine.low %v5097_v50, %v5113_v4  ;;  %v5117_v9 = vcombine.high %v5097_v50, %v5113_v4  ;;  %v11705_v50 = vld [vmem:[%s14046_s12] sm:$0xff]  }
0x15e8   : > { %v5118_v14 = vpack.c.bf16 %v5114_v1, %v5114_v1  ;;  %v5119_v15 = vpack.c.bf16 %v5115_v7, %v5115_v7  ;;  %v5120_v20 = vpack.c.bf16 %v5116_v8, %v5116_v8  ;;  %v5121_v22 = vpack.c.bf16 %v5117_v9, %v5117_v9 }
0x15ea   : > { %v5366_v17 = vsel %vm2354_vm3, %v5118_v14, 0  ;;  %v5412_v18 = vsel %vm2354_vm3, %v5119_v15, 0  ;;  %v5458_v10 = vsel %vm2354_vm3, %v5120_v20, 0  ;;  %v5504_v11 = vsel %vm2354_vm3, %v5121_v22, 0 }
0x15eb   : > { %11203 = vmatpush3.bf16.msra.mxu1 %v5366_v17  ;;  %11209 = vmatpush3.bf16.msra.mxu0 %v5412_v18 }
0x15ec   : > { %11214 = vmatprep.subr.bf16.mxu1 %v12135_v0  ;;  %11220 = vmatprep.subr.bf16.mxu0 %v12135_v0 }
0x15ee   : > { %11205 = vmatmul.mubr.msk.bf16.vlgmr.msra.gmra.mrb[68].mxu1 %vm2114_vm2, %v5358_v27  ;;  %11211 = vmatmul.mubr.msk.bf16.vlgmr.msra.gmra.mrb[72].mxu0 %vm2114_vm2, %v5359_v28 }
0x15ef   : > { %11215 = vmatpush3.bf16.msra.mxu1 %v5458_v10  ;;  %11221 = vmatpush3.bf16.msra.mxu0 %v5504_v11 }
0x15f0   : > { %11216 = vmatprep.mubr.msk.bf16.mxu1 %vm12136_vm0, %v12135_v0  ;;  %11222 = vmatprep.mubr.msk.bf16.mxu0 %vm12136_vm0, %v12135_v0 }
0x15f1   : > { %11226 = vmatprep.subr.bf16.mxu1 %v12135_v0  ;;  %11234 = vmatprep.subr.bf16.mxu0 %v12135_v0 }
0x1605   : > { %v5346_v29 = vpop.xlane.xlu1 %5345 }
0x1606   : > { %11795 = vrcp.f32 %v5346_v29  ;;  %v5349_v33 = vpop.xlane.xlu0 %5348 }
0x1607   : > { %11797 = vrcp.f32 %v5349_v33 }
0x1610   : > { %v11796_v5 = vpop.eup %11795 }
0x1611   : > { %v11798_v34 = vpop.eup %11797  ;;  %v5356_v35 = vmul.f32 %v11796_v5, %v13101_v23 }
0x1612   : > { %v5357_v36 = vmul.f32 %v11798_v34, %v13103_v24 }
0x1613   : > { %v5360_v37 = vpack.c.bf16 %v5356_v35, %v5356_v35 }
0x1614   : > { %v5361_v41 = vpack.c.bf16 %v5357_v36, %v5357_v36  ;;  %v10517_v36 = vld [vmem:[%s14027_s11 + $0x1] ss:$0 sm:$0xff]  ;;  %s14048_s11 = sld [smem:[#allocation41_spill]] }
0x1615   : > { %11217 = vmatmul.mubr.msk.bf16.vlgmr.msra.gmra.mrb[72].mxu1 %vm2114_vm2, %v5360_v37  ;;  %v4440_v37 = vadd.f32 %v10517_v36, %v13075_v25  ;;  %v11712_v36 = vld [vmem:[%s14053_s24 + $0x8] sm:$0xff]  }
0x1616   : > { %11223 = vmatmul.mubr.msk.bf16.vlgmr.msra.gmra.mrb[76].mxu0 %vm2114_vm2, %v5361_v41  ;;  %11230 = vmatprep.mubr.msk.bf16.mxu1 %vm12136_vm0, %v12135_v0 }
0x1617   : > { %11238 = vmatprep.mubr.msk.bf16.mxu0 %vm12136_vm0, %v12135_v0  ;;  %11227 = vmatpush3.bf16.msra.mxu1 %v11705_v50  ;;  %v4445_v41 = vadd.f32 %v4440_v37, %v12972_v16 }
0x1618   : > { %11228 = vmatprep.subr.bf16.mxu1 %v12135_v0 }
0x161b   : > { %11229 = vmatpush3.bf16.msra.mxu1 %v11706_v12  ;;  %v10565_v12 = vld [vmem:[%s14050_s17] ss:$0 sm:$0xff] }
0x161c   : > { %11242 = vmatprep.subr.bf16.mxu1 %v12135_v0 }
0x16c1   : > { %v5402_v42 = vpop.f32.mrb[68].mxu1  ;;  %v5448_v30 = vpop.f32.mrb[72].mxu0 }
0x16c2   : > { %v11206_v32 = vpop.f32.mrb[69].mxu1  ;;  %v11212_v46 = vpop.f32.mrb[73].mxu0 }
0x16c3   : > { %v5405_v47 = vpop.f32.mrb[70].mxu1  ;;  %v5451_v23 = vpop.f32.mrb[74].mxu0 }
0x16c4   : > { %v11207_v48 = vpop.f32.mrb[71].mxu1  ;;  %v11213_v24 = vpop.f32.mrb[75].mxu0 }
0x16e8   : > { %v5494_v39 = vpop.f32.mrb[72].mxu1 }
0x16e9   : > { %v5546_v40 = vcombine.low %v5402_v42, %v5494_v39  ;;  %v5547_v51 = vcombine.high %v5402_v42, %v5494_v39  ;;  %v5540_v52 = vpop.f32.mrb[76].mxu0  ;;  %v11218_v53 = vpop.f32.mrb[73].mxu1  ;;  %v4450_v42 = vsel %vm1494_vm1, %v4445_v41, 0.0 }
0x16ea   : > { %v5562_v21 = vcombine.low %v5448_v30, %v5540_v52  ;;  %v5563_v26 = vcombine.high %v5448_v30, %v5540_v52  ;;  %v11224_v54 = vpop.f32.mrb[77].mxu0  ;;  %v5497_v55 = vpop.f32.mrb[74].mxu1  ;;  %v11707_v52 = vld [vmem:[%s14047_s13] sm:$0xff]   ;;  %v11708_v53 = vld [vmem:[%s14047_s13 + $0x8] sm:$0xff]  }
0x16eb   : > { %v5554_v56 = vrot.slane %v5546_v40, %v12597_v31  ;;  %v5561_v57 = vrot.slane %v5547_v51, %v12597_v31  ;;  %v5543_v58 = vpop.f32.mrb[78].mxu0  ;;  %v11219_v43 = vpop.f32.mrb[75].mxu1  ;;  %v10555_v55 = vld [vmem:[%s14048_s11] ss:$0 sm:$0xff] }
0x16ec   : > { %v5570_v59 = vrot.slane %v5562_v21, %v12597_v31  ;;  %v5577_v44 = vrot.slane %v5563_v26, %v12597_v31  ;;  %v11225_v60 = vpop.f32.mrb[79].mxu0 }
0x16ee   : > { %v5578_v61 = vcombine.low %v5554_v56, %v5570_v59  ;;  %v5579_v62 = vcombine.high %v5554_v56, %v5570_v59  ;;  %v5594_v63 = vcombine.low %v5561_v57, %v5577_v44  ;;  %v5595_v49 = vcombine.high %v5561_v57, %v5577_v44 }
0x16f0   : > { %v5586_v2 = vrot.slane %v5578_v61, %v12600_v38  ;;  %v5593_v3 = vrot.slane %v5579_v62, %v12600_v38  ;;  %v5602_v4 = vrot.slane %v5594_v63, %v12600_v38  ;;  %v5609_v6 = vrot.slane %v5595_v49, %v12600_v38  ;;  %v10525_v61 = vld [vmem:[%s14029_s28 + $0x1] ss:$0 sm:$0xff]  ;;  %s14057_s28 = sld [smem:[#allocation49_spill]] }
0x16f1   : > { %v10526_v49 = vld [vmem:[%s14031_s26 + $0x1] ss:$0 sm:$0xff]  ;;  %s14055_s26 = sld [smem:[#allocation47_spill]] }
0x16f2   : > { %v5614_v1 = vcombine.low %v5586_v2, %v5593_v3  ;;  %v10553_v7 = vcombine.high %v5586_v2, %v5593_v3  ;;  %v5630_v8 = vcombine.low %v5602_v4, %v5609_v6  ;;  %v10554_v9 = vcombine.high %v5602_v4, %v5609_v6 }
0x16f4   : > { %v5621_v13 = vrot.slane %v5614_v1, %v12597_v31  ;;  %v5629_v14 = vrot.slane %v10553_v7, %v12597_v31  ;;  %v5637_v15 = vrot.slane %v5630_v8, %v12597_v31  ;;  %v5645_v17 = vrot.slane %v10554_v9, %v12597_v31  ;;  %v11709_v8 = vld [vmem:[%s14049_s14] sm:$0xff]   ;;  %v11710_v9 = vld [vmem:[%s14049_s14 + $0x8] sm:$0xff]  }
0x16f5   : > { %11235 = vmatpush3.bf16.msra.mxu0 %v11709_v8 }
0x16f6   : > { %v5647_v18 = vcombine.high %v5621_v13, %v5629_v14  ;;  %v5663_v20 = vcombine.high %v5637_v15, %v5645_v17  ;;  %v5646_v22 = vcombine.low %v5621_v13, %v5629_v14  ;;  %v5662_v27 = vcombine.low %v5637_v15, %v5645_v17  ;;  %11236 = vmatprep.subr.bf16.mxu0 %v12135_v0 }
0x16f8   : > { %v5661_v28 = vrot.slane %v5647_v18, %v12600_v38  ;;  %v5677_v10 = vrot.slane %v5663_v20, %v12600_v38  ;;  %v5654_v11 = vrot.slane %v5646_v22, %v12600_v38  ;;  %v5670_v29 = vrot.slane %v5662_v27, %v12600_v38 }
0x16f9   : > { %11237 = vmatpush3.bf16.msra.mxu0 %v11710_v9 }
0x16fa   : > { %v5680_v33 = vcombine.low %v5661_v28, %v5677_v10  ;;  %v5679_v5 = vcombine.high %v5654_v11, %v5670_v29  ;;  %v5681_v34 = vcombine.high %v5661_v28, %v5677_v10  ;;  %v5678_v35 = vcombine.low %v5654_v11, %v5670_v29  ;;  %11250 = vmatprep.subr.bf16.mxu0 %v12135_v0  ;;  %v10559_v10 = vld [vmem:[%s14051_s20] ss:$0 sm:$0xff] }
0x16fb   : > { %v10560_v29 = vld [vmem:[%s14052_s21] ss:$0 sm:$0xff] }
0x16fc   : > { %5687 = vrot.lane.b32.xlu1 %v5680_v33, %s14032_s22  ;;  %5683 = vrot.lane.b32.xlu0 %v5679_v5, %s14033_s18 }
0x1700   : > { %5691 = vrot.lane.b32.xlu1 %v5681_v34, %s14034_s23  ;;  %v11711_v34 = vld [vmem:[%s14053_s24] sm:$0xff]  }
0x171b   : > { %4451 = vadd.xlane.f32.xlu0 %v4450_v42 }
0x176e   : > { %v5688_v30 = vpop.permute.xlu1 %5687  ;;  %v5684_v32 = vpop.permute.xlu0 %5683 }
0x176f   : > { %v5694_v46 = vsel %vm2114_vm2, %v5678_v35, %v5684_v32 }
0x1770   : > { %v5695_v23 = vsel %vm2685_vm4, %v5694_v46, %v5688_v30 }
0x1772   : > { %v5692_v47 = vpop.permute.xlu1 %5691 }
0x1773   : > { %v5696_v48 = vsel %vm2687_vm5, %v5695_v23, %v5692_v47 }
0x1774   : > { %v5697_v24 = vpack.c.bf16 %v5696_v48, %v5696_v48 }
0x1776   : > { %11231 = vmatmul.mubr.msk.bf16.vlgmr.msra.gmra.mrb[76].mxu1 %vm1494_vm1, %v5697_v24 }
0x1777   : > { %11246 = vmatprep.mubr.msk.bf16.mxu1 %vm12136_vm0, %v12135_v0  ;;  %11243 = vmatpush3.bf16.msra.mxu1 %v11707_v52 }
0x1778   : > { %11244 = vmatprep.subr.bf16.mxu1 %v12135_v0 }
0x177b   : > { %11245 = vmatpush3.bf16.msra.mxu1 %v11708_v53 }
0x177c   : > { %11258 = vmatprep.subr.bf16.mxu1 %v12135_v0 }
0x17a8   : > { %v4452_v16 = vpop.xlane.xlu0 %4451 }
0x17a9   : > { %v4453_v25 = vmul.f32 0.03125, %v4452_v16 }
0x17ab   : > { %v4454_v39 = vsub.f32 %v4445_v41, %v4453_v25 }
0x17ad   : > { %v4455_v40 = vmul.f32 %v4454_v39, %v4454_v39 }
0x17af   : > { %v4456_v51 = vsel %vm1494_vm1, %v4455_v40, 0.0 }
0x17b0   : > { %4457 = vadd.xlane.f32.xlu0 %v4456_v51 }
0x183d   : > { %v4458_v21 = vpop.xlane.xlu0 %4457 }
0x183e   : > { %v4459_v26 = vmul.f32 0.03125, %v4458_v21 }
0x1840   : > { %v4460_v54 = vadd.f32 1e-05, %v4459_v26 }
0x1842   : > { %11799 = vrsqrt.f32 %v4460_v54 }
0x1849   : > { %v5758_v56 = vpop.f32.mrb[76].mxu1 }
0x184a   : > { %v5759_v57 = vadd.f32 %v10555_v55, %v5758_v56  ;;  %v11232_v58 = vpop.f32.mrb[77].mxu1 }
0x184b   : > { %v5761_v43 = vpop.f32.mrb[78].mxu1 }
0x184c   : > { %v11800_v59 = vpop.eup %11799  ;;  %v11233_v44 = vpop.f32.mrb[79].mxu1  ;;  %v5764_v60 = vadd.f32 %v5759_v57, %v12981_v19 }
0x184d   : > { %v4462_v62 = vmul.f32 %v11800_v59, %v4454_v39 }
0x184e   : > { %v5767_v63 = vsel %vm1494_vm1, %v5764_v60, 0.0 }
0x184f   : > { %5768 = vadd.xlane.f32.xlu1 %v5767_v63  ;;  %v4469_v50 = vmul.f32 %v10525_v61, %v4462_v62 }
0x1851   : > { %v4476_v2 = vadd.f32 %v10526_v49, %v4469_v50 }
0x1853   : > { %v13192_v3 = vpack.c.bf16 %v4476_v2, %v4476_v2 }
0x1855   : > { %11247 = vmatmul.mubr.msk.bf16.vlgmr.msra.gmra.mrb[80].mxu1 %vm1494_vm1, %v13192_v3 }
0x1856   : > { %11260 = vmatprep.mubr.msk.bf16.mxu1 %vm12136_vm0, %v12135_v0 }
0x18dc   : > { %v5769_v19 = vpop.xlane.xlu1 %5768 }
0x18dd   : > { %v5770_v4 = vmul.f32 0.03125, %v5769_v19 }
0x18df   : > { %v5771_v6 = vsub.f32 %v5764_v60, %v5770_v4 }
0x18e1   : > { %v5772_v1 = vmul.f32 %v5771_v6, %v5771_v6 }
0x18e3   : > { %v5773_v7 = vsel %vm1494_vm1, %v5772_v1, 0.0 }
0x18e4   : > { %5774 = vadd.xlane.f32.xlu0 %v5773_v7 }
0x1928   : > { %v5921_v13 = vpop.f32.mrb[80].mxu1 }
0x1929   : > { %v5922_v14 = vadd.f32 %v10565_v12, %v5921_v13  ;;  %v11248_v15 = vpop.f32.mrb[81].mxu1 }
0x192a   : > { %v5924_v17 = vpop.f32.mrb[82].mxu1 }
0x192b   : > { %6144 = vrot.lane.b32.xlu0 %v5922_v14, %s14042_s15  ;;  %6141 = vrot.lane.b32.xlu1 %v5922_v14, %s14043_s1  ;;  %v11249_v18 = vpop.f32.mrb[83].mxu1 }
0x192f   : > { %6147 = vrot.lane.b32.xlu1 %v5922_v14, %s14044_s9 }
0x1971   : > { %v5775_v20 = vpop.xlane.xlu0 %5774 }
0x1972   : > { %v5776_v22 = vmul.f32 0.03125, %v5775_v20 }
0x1974   : > { %v5777_v27 = vadd.f32 1e-05, %v5776_v22 }
0x1976   : > { %11801 = vrsqrt.f32 %v5777_v27 }
0x1980   : > { %v11802_v28 = vpop.eup %11801 }
0x1981   : > { %v5779_v11 = vmul.f32 %v11802_v28, %v5771_v6 }
0x1983   : > { %v5786_v33 = vmul.f32 %v10559_v10, %v5779_v11 }
0x1985   : > { %v13209_v5 = vadd.f32 %v10560_v29, %v5786_v33 }
0x1987   : > { %v5794_v35 = vpack.c.bf16 %v13209_v5, %v13209_v5 }
0x1989   : > { %11239 = vmatmul.mubr.msk.bf16.vlgmr.msra.gmra.mrb[80].mxu0 %vm1494_vm1, %v5794_v35 }
0x198a   : > { %11251 = vmatpush3.bf16.msra.mxu0 %v11711_v34  ;;  %11254 = vmatprep.mubr.msk.bf16.mxu0 %vm12136_vm0, %v12135_v0 }
0x198b   : > { %11252 = vmatprep.subr.bf16.mxu0 %v12135_v0 }
0x198e   : > { %11253 = vmatpush3.bf16.msra.mxu0 %v11712_v36 }
0x198f   : > { %11264 = vmatprep.subr.bf16.mxu0 %v12135_v0 }
0x1991   : > { %11255 = vmatmul.mubr.msk.bf16.vlgmr.msra.gmra.mrb[84].mxu0 %vm1494_vm1, %v13192_v3 }
0x1992   : > { %11266 = vmatprep.mubr.msk.bf16.mxu0 %vm12136_vm0, %v12135_v0 }
0x199d   : > { %v6145_v37 = vpop.permute.xlu0 %6144  ;;  %v6142_v41 = vpop.permute.xlu1 %6141 }
0x199e   : > { %v6150_v42 = vcombine.low %v5922_v14, %v6145_v37  ;;  %v6151_v30 = vcombine.high %v5922_v14, %v6145_v37  ;;  %v10561_v14 = vld [vmem:[%s14054_s25] ss:$0 sm:$0xff] }
0x19a0   : > { %v6158_v23 = vrot.slane %v6150_v42, %v12597_v31  ;;  %v6165_v48 = vrot.slane %v6151_v30, %v12597_v31 }
0x19a1   : > { %v6148_v32 = vpop.permute.xlu1 %6147 }
0x19a2   : > { %v6166_v46 = vcombine.low %v6142_v41, %v6148_v32  ;;  %v6167_v47 = vcombine.high %v6142_v41, %v6148_v32 }
0x19a4   : > { %v6174_v24 = vrot.slane %v6166_v46, %v12597_v31  ;;  %v6181_v16 = vrot.slane %v6167_v47, %v12597_v31 }
0x19a6   : > { %v6182_v25 = vcombine.low %v6158_v23, %v6174_v24  ;;  %v6183_v39 = vcombine.high %v6158_v23, %v6174_v24  ;;  %v6198_v40 = vcombine.low %v6165_v48, %v6181_v16  ;;  %v6199_v51 = vcombine.high %v6165_v48, %v6181_v16 }
0x19a8   : > { %v6190_v52 = vrot.slane %v6182_v25, %v12600_v38  ;;  %v6197_v53 = vrot.slane %v6183_v39, %v12600_v38  ;;  %v6206_v21 = vrot.slane %v6198_v40, %v12600_v38  ;;  %v6213_v26 = vrot.slane %v6199_v51, %v12600_v38 }
0x19aa   : > { %v6218_v54 = vcombine.low %v6190_v52, %v6197_v53  ;;  %v10575_v55 = vcombine.high %v6190_v52, %v6197_v53  ;;  %v6234_v56 = vcombine.low %v6206_v21, %v6213_v26  ;;  %v10576_v57 = vcombine.high %v6206_v21, %v6213_v26 }
0x19ac   : > { %v6225_v58 = vrot.slane %v6218_v54, %v12597_v31  ;;  %v6233_v43 = vrot.slane %v10575_v55, %v12597_v31  ;;  %v6241_v59 = vrot.slane %v6234_v56, %v12597_v31  ;;  %v6249_v44 = vrot.slane %v10576_v57, %v12597_v31 }
0x19ae   : > { %v6250_v60 = vcombine.low %v6225_v58, %v6233_v43  ;;  %v6266_v61 = vcombine.low %v6241_v59, %v6249_v44  ;;  %v6251_v62 = vcombine.high %v6225_v58, %v6233_v43  ;;  %v6267_v63 = vcombine.high %v6241_v59, %v6249_v44 }
0x19b0   : > { %v6258_v49 = vrot.slane %v6250_v60, %v12600_v38  ;;  %v6274_v50 = vrot.slane %v6266_v61, %v12600_v38  ;;  %v6265_v2 = vrot.slane %v6251_v62, %v12600_v38  ;;  %v6281_v19 = vrot.slane %v6267_v63, %v12600_v38 }
0x19b2   : > { %v6282_v4 = vcombine.low %v6258_v49, %v6274_v50  ;;  %v6283_v6 = vcombine.high %v6258_v49, %v6274_v50  ;;  %v13240_v1 = vcombine.low %v6265_v2, %v6281_v19  ;;  %v13242_v7 = vcombine.high %v6265_v2, %v6281_v19 }
0x19b4   : > { %v6286_v8 = vpack.c.bf16 %v6282_v4, %v6282_v4  ;;  %v6287_v9 = vpack.c.bf16 %v6283_v6, %v6283_v6  ;;  %v6288_v63 = vpack.c.bf16 %v13240_v1, %v13240_v1  ;;  %v6289_v49 = vpack.c.bf16 %v13242_v7, %v13242_v7 }
0x19b6   : > { %v6444_v12 = vsel %vm2114_vm2, %v6286_v8, 0  ;;  %v6490_v13 = vsel %vm2114_vm2, %v6287_v9, 0  ;;  %v6536_v6 = vsel %vm2114_vm2, %v6288_v63, 0  ;;  %v6582_v8 = vsel %vm2114_vm2, %v6289_v49, 0 }
0x19b7   : > { %11259 = vmatpush3.bf16.xpose.msra.mxu1 %v6444_v12  ;;  %11265 = vmatpush3.bf16.xpose.msra.mxu0 %v6490_v13 }
0x19b8   : > { %11270 = vmatprep.subr.bf16.mxu1 %v12135_v0  ;;  %11276 = vmatprep.subr.bf16.mxu0 %v12135_v0 }
0x1a5c   : > { %v5855_v15 = vpop.f32.mrb[80].mxu0 }
0x1a5d   : > { %v5856_v17 = vadd.f32 %v10561_v14, %v5855_v15  ;;  %v11240_v18 = vpop.f32.mrb[81].mxu0 }
0x1a5e   : > { %v5858_v20 = vpop.f32.mrb[82].mxu0 }
0x1a5f   : > { %5994 = vrot.lane.b32.xlu0 %v5856_v17, %s14042_s15  ;;  %5991 = vrot.lane.b32.xlu1 %v5856_v17, %s14043_s1  ;;  %v11241_v22 = vpop.f32.mrb[83].mxu0 }
0x1a63   : > { %5997 = vrot.lane.b32.xlu1 %v5856_v17, %s14044_s9 }
0x1a64   : > { %v13252_v27 = vpop.f32.mrb[84].mxu0 }
0x1a65   : > { %v11256_v28 = vpop.f32.mrb[85].mxu0 }
0x1a66   : > { %v5987_v10 = vpop.f32.mrb[86].mxu0 }
0x1a67   : > { %v11257_v11 = vpop.f32.mrb[87].mxu0 }
0x1ad1   : > { %v5995_v29 = vpop.permute.xlu0 %5994  ;;  %v5992_v33 = vpop.permute.xlu1 %5991 }
0x1ad2   : > { %v6000_v34 = vcombine.low %v5856_v17, %v5995_v29  ;;  %v6001_v35 = vcombine.high %v5856_v17, %v5995_v29 }
0x1ad4   : > { %v6008_v42 = vrot.slane %v6000_v34, %v12597_v31  ;;  %v6015_v30 = vrot.slane %v6001_v35, %v12597_v31 }
0x1ad5   : > { %v5998_v36 = vpop.permute.xlu1 %5997 }
0x1ad6   : > { %v6016_v37 = vcombine.low %v5992_v33, %v5998_v36  ;;  %v6017_v41 = vcombine.high %v5992_v33, %v5998_v36 }
0x1ad8   : > { %v6024_v32 = vrot.slane %v6016_v37, %v12597_v31  ;;  %v6031_v46 = vrot.slane %v6017_v41, %v12597_v31 }
0x1ada   : > { %v6032_v47 = vcombine.low %v6008_v42, %v6024_v32  ;;  %v6033_v23 = vcombine.high %v6008_v42, %v6024_v32  ;;  %v6048_v48 = vcombine.low %v6015_v30, %v6031_v46  ;;  %v6049_v24 = vcombine.high %v6015_v30, %v6031_v46 }
0x1adc   : > { %v6040_v16 = vrot.slane %v6032_v47, %v12600_v38  ;;  %v6047_v25 = vrot.slane %v6033_v23, %v12600_v38  ;;  %v6056_v39 = vrot.slane %v6048_v48, %v12600_v38  ;;  %v6063_v40 = vrot.slane %v6049_v24, %v12600_v38  ;;  %v10569_v24 = vld [vmem:[%s14055_s26] ss:$0 sm:$0xff] }
0x1ade   : > { %v6068_v51 = vcombine.low %v6040_v16, %v6047_v25  ;;  %v10573_v52 = vcombine.high %v6040_v16, %v6047_v25  ;;  %v6084_v53 = vcombine.low %v6056_v39, %v6063_v40  ;;  %v10574_v21 = vcombine.high %v6056_v39, %v6063_v40 }
0x1adf   : > { %v5985_v16 = vadd.f32 %v10569_v24, %v13252_v27 }
0x1ae0   : > { %v6075_v26 = vrot.slane %v6068_v51, %v12597_v31  ;;  %v6083_v54 = vrot.slane %v10573_v52, %v12597_v31  ;;  %v6091_v55 = vrot.slane %v6084_v53, %v12597_v31  ;;  %v6099_v56 = vrot.slane %v10574_v21, %v12597_v31 }
0x1ae2   : > { %v6100_v57 = vcombine.low %v6075_v26, %v6083_v54  ;;  %v6116_v58 = vcombine.low %v6091_v55, %v6099_v56  ;;  %v6101_v43 = vcombine.high %v6075_v26, %v6083_v54  ;;  %v6117_v59 = vcombine.high %v6091_v55, %v6099_v56 }
0x1ae4   : > { %v6108_v44 = vrot.slane %v6100_v57, %v12600_v38  ;;  %v6124_v60 = vrot.slane %v6116_v58, %v12600_v38  ;;  %v6115_v19 = vrot.slane %v6101_v43, %v12600_v38  ;;  %v6131_v4 = vrot.slane %v6117_v59, %v12600_v38 }
0x1ae6   : > { %v6132_v61 = vcombine.low %v6108_v44, %v6124_v60  ;;  %v6133_v62 = vcombine.high %v6108_v44, %v6124_v60  ;;  %v6134_v1 = vcombine.low %v6115_v19, %v6131_v4  ;;  %v6135_v7 = vcombine.high %v6115_v19, %v6131_v4 }
0x1ae8   : > { %v6136_v50 = vpack.c.bf16 %v6132_v61, %v6132_v61  ;;  %v6137_v2 = vpack.c.bf16 %v6133_v62, %v6133_v62  ;;  %v6138_v9 = vpack.c.bf16 %v6134_v1, %v6134_v1  ;;  %v6139_v12 = vpack.c.bf16 %v6135_v7, %v6135_v7 }
0x1aea   : > { %11261 = vmatmul.mubr.msk.bf16.vlgmr.msra.gmra.mrb[84].mxu1 %vm2114_vm2, %v6136_v50  ;;  %11267 = vmatmul.mubr.msk.bf16.vlgmr.msra.gmra.mrb[88].mxu0 %vm2114_vm2, %v6137_v2 }
0x1aeb   : > { %11271 = vmatpush3.bf16.xpose.msra.mxu1 %v6536_v6  ;;  %11277 = vmatpush3.bf16.xpose.msra.mxu0 %v6582_v8 }
0x1aec   : > { %11272 = vmatprep.mubr.msk.bf16.mxu1 %vm12136_vm0, %v12135_v0  ;;  %11278 = vmatprep.mubr.msk.bf16.mxu0 %vm12136_vm0, %v12135_v0 }
0x1aed   : > { %11282 = vmatprep.subr.bf16.mxu1 %v12135_v0  ;;  %11288 = vmatprep.subr.bf16.mxu0 %v12135_v0 }
0x1af2   : > { %11273 = vmatmul.mubr.msk.bf16.vlgmr.msra.gmra.mrb[88].mxu1 %vm2114_vm2, %v6138_v9  ;;  %11279 = vmatmul.mubr.msk.bf16.vlgmr.msra.gmra.mrb[92].mxu0 %vm2114_vm2, %v6139_v12 }
0x1af3   : > { %11284 = vmatprep.mubr.msk.bf16.mxu1 %vm12136_vm0, %v12135_v0  ;;  %11290 = vmatprep.mubr.msk.bf16.mxu0 %vm12136_vm0, %v12135_v0 }
0x1bbd   : > { %v6480_v13 = vpop.f32.mrb[84].mxu1  ;;  %v6526_v14 = vpop.f32.mrb[88].mxu0 }
0x1bbe   : > { %v6624_v15 = vmul.f32 0.35355338, %v6480_v13  ;;  %v6625_v17 = vmul.f32 0.35355338, %v6526_v14  ;;  %v11262_v18 = vpop.f32.mrb[85].mxu1  ;;  %v11268_v20 = vpop.f32.mrb[89].mxu0 }
0x1bbf   : > { %v6483_v22 = vpop.f32.mrb[86].mxu1  ;;  %v6529_v28 = vpop.f32.mrb[90].mxu0 }
0x1bc0   : > { %v11263_v10 = vpop.f32.mrb[87].mxu1  ;;  %v11269_v11 = vpop.f32.mrb[91].mxu0  ;;  %v6628_v29 = vsel %vm2114_vm2, %v6624_v15, -inf  ;;  %v6631_v33 = vsel %vm2114_vm2, %v6625_v17, -inf }
0x1bc1   : > { %6629 = vmax.xlane.f32.xlu0 %v6628_v29  ;;  %6632 = vmax.xlane.f32.xlu1 %v6631_v33 }
0x1bc5   : > { %v6572_v34 = vpop.f32.mrb[88].mxu1  ;;  %v6618_v35 = vpop.f32.mrb[92].mxu0 }
0x1bc6   : > { %v6626_v36 = vmul.f32 0.35355338, %v6572_v34  ;;  %v11274_v37 = vpop.f32.mrb[89].mxu1  ;;  %v11280_v41 = vpop.f32.mrb[93].mxu0  ;;  %v6627_v32 = vmul.f32 0.35355338, %v6618_v35 }
0x1bc7   : > { %v6575_v42 = vpop.f32.mrb[90].mxu1  ;;  %v6621_v30 = vpop.f32.mrb[94].mxu0 }
0x1bc8   : > { %v11275_v46 = vpop.f32.mrb[91].mxu1  ;;  %v11281_v47 = vpop.f32.mrb[95].mxu0  ;;  %v6634_v23 = vsel %vm2114_vm2, %v6626_v36, -inf  ;;  %v6637_v48 = vsel %vm2114_vm2, %v6627_v32, -inf }
0x1bc9   : > { %6635 = vmax.xlane.f32.xlu0 %v6634_v23 }
0x1bcd   : > { %6638 = vmax.xlane.f32.xlu0 %v6637_v48 }
0x1bd2   : > { %6291 = vrot.lane.b32.xlu1 %v5985_v16, %s14043_s1 }
0x1c4e   : > { %v6630_v25 = vpop.xlane.xlu0 %6629  ;;  %v6633_v39 = vpop.xlane.xlu1 %6632 }
0x1c4f   : > { %v6640_v40 = vsub.f32 %v6624_v15, %v6630_v25  ;;  %v6641_v51 = vsub.f32 %v6625_v17, %v6633_v39 }
0x1c51   : > { %v6644_v52 = vmul.f32 1.442695, %v6640_v40  ;;  %v6646_v53 = vmul.f32 1.442695, %v6641_v51 }
0x1c52   : > { %v6292_v63 = vpop.permute.xlu1 %6291 }
0x1c53   : > { %11803 = vpow2.f32 %v6644_v52 }
0x1c54   : > { %11805 = vpow2.f32 %v6646_v53 }
0x1c56   : > { %v6636_v55 = vpop.xlane.xlu0 %6635 }
0x1c57   : > { %v6642_v57 = vsub.f32 %v6626_v36, %v6636_v55 }
0x1c59   : > { %v6648_v43 = vmul.f32 1.442695, %v6642_v57 }
0x1c5a   : > { %v6639_v56 = vpop.xlane.xlu0 %6638 }
0x1c5b   : > { %v6643_v58 = vsub.f32 %v6627_v32, %v6639_v56  ;;  %11807 = vpow2.f32 %v6648_v43 }
0x1c5d   : > { %v13297_v21 = vpop.eup %11803  ;;  %v6650_v59 = vmul.f32 1.442695, %v6643_v58 }
0x1c5e   : > { %v13299_v26 = vpop.eup %11805  ;;  %v6652_v54 = vsel %vm2114_vm2, %v13297_v21, 0.0 }
0x1c5f   : > { %6653 = vadd.xlane.f32.xlu1 %v6652_v54  ;;  %v6655_v27 = vsel %vm2114_vm2, %v13299_v26, 0.0  ;;  %11809 = vpow2.f32 %v6650_v59 }
0x1c60   : > { %6656 = vadd.xlane.f32.xlu0 %v6655_v27 }
0x1c65   : > { %v13307_v44 = vpop.eup %11807 }
0x1c66   : > { %v6658_v61 = vsel %vm2114_vm2, %v13307_v44, 0.0 }
0x1c69   : > { %v13309_v60 = vpop.eup %11809 }
0x1c6a   : > { %v6661_v62 = vsel %vm2114_vm2, %v13309_v60, 0.0 }
0x1c70   : > { %6297 = vrot.lane.b32.xlu1 %v5985_v16, %s14044_s9 }
0x1c76   : > { %6294 = vrot.lane.b32.xlu0 %v5985_v16, %s14042_s15 }
0x1c94   : > { %6659 = vadd.xlane.f32.xlu1 %v6658_v61 }
0x1c95   : > { %6662 = vadd.xlane.f32.xlu0 %v6661_v62 }
0x1cec   : > { %v6654_v49 = vpop.xlane.xlu1 %6653 }
0x1ced   : > { %v6657_v50 = vpop.xlane.xlu0 %6656  ;;  %11811 = vrcp.f32 %v6654_v49 }
0x1cee   : > { %11813 = vrcp.f32 %v6657_v50 }
0x1cf0   : > { %v6298_v2 = vpop.permute.xlu1 %6297 }
0x1cf1   : > { %v6316_v19 = vcombine.low %v6292_v63, %v6298_v2  ;;  %v6317_v4 = vcombine.high %v6292_v63, %v6298_v2  ;;  %v6295_v6 = vpop.permute.xlu0 %6294 }
0x1cf2   : > { %v6300_v8 = vcombine.low %v5985_v16, %v6295_v6  ;;  %v6301_v1 = vcombine.high %v5985_v16, %v6295_v6 }
0x1cf3   : > { %v6324_v7 = vrot.slane %v6316_v19, %v12597_v31  ;;  %v6331_v9 = vrot.slane %v6317_v4, %v12597_v31 }
0x1cf4   : > { %v6308_v12 = vrot.slane %v6300_v8, %v12597_v31  ;;  %v6315_v13 = vrot.slane %v6301_v1, %v12597_v31 }
0x1cf6   : > { %v6332_v14 = vcombine.low %v6308_v12, %v6324_v7  ;;  %v6333_v15 = vcombine.high %v6308_v12, %v6324_v7  ;;  %v6348_v17 = vcombine.low %v6315_v13, %v6331_v9  ;;  %v6349_v18 = vcombine.high %v6315_v13, %v6331_v9 }
0x1cf7   : > { %v11812_v48 = vpop.eup %11811 }
0x1cf8   : > { %v6340_v20 = vrot.slane %v6332_v14, %v12600_v38  ;;  %v6347_v22 = vrot.slane %v6333_v15, %v12600_v38  ;;  %v6356_v28 = vrot.slane %v6348_v17, %v12600_v38  ;;  %v6363_v10 = vrot.slane %v6349_v18, %v12600_v38  ;;  %v11814_v25 = vpop.eup %11813 }
0x1cf9   : > { %v6668_v53 = vmul.f32 %v11812_v48, %v13297_v21  ;;  %v6669_v54 = vmul.f32 %v11814_v25, %v13299_v26 }
0x1cfa   : > { %v6368_v11 = vcombine.low %v6340_v20, %v6347_v22  ;;  %v10577_v29 = vcombine.high %v6340_v20, %v6347_v22  ;;  %v6384_v33 = vcombine.low %v6356_v28, %v6363_v10  ;;  %v10578_v34 = vcombine.high %v6356_v28, %v6363_v10 }
0x1cfb   : > { %v6672_v59 = vpack.c.bf16 %v6668_v53, %v6668_v53  ;;  %v6673_v61 = vpack.c.bf16 %v6669_v54, %v6669_v54 }
0x1cfc   : > { %v6375_v35 = vrot.slane %v6368_v11, %v12597_v31  ;;  %v6383_v36 = vrot.slane %v10577_v29, %v12597_v31  ;;  %v6391_v37 = vrot.slane %v6384_v33, %v12597_v31  ;;  %v6399_v41 = vrot.slane %v10578_v34, %v12597_v31 }
0x1cfe   : > { %v6400_v42 = vcombine.low %v6375_v35, %v6383_v36  ;;  %v6401_v30 = vcombine.high %v6375_v35, %v6383_v36  ;;  %v6416_v32 = vcombine.low %v6391_v37, %v6399_v41  ;;  %v6417_v46 = vcombine.high %v6391_v37, %v6399_v41 }
0x1d00   : > { %v6408_v47 = vrot.slane %v6400_v42, %v12600_v38  ;;  %v6415_v23 = vrot.slane %v6401_v30, %v12600_v38  ;;  %v6424_v24 = vrot.slane %v6416_v32, %v12600_v38  ;;  %v6431_v16 = vrot.slane %v6417_v46, %v12600_v38 }
0x1d02   : > { %v6432_v39 = vcombine.low %v6408_v47, %v6424_v24  ;;  %v6433_v40 = vcombine.high %v6408_v47, %v6424_v24  ;;  %v6434_v51 = vcombine.low %v6415_v23, %v6431_v16  ;;  %v6435_v52 = vcombine.high %v6415_v23, %v6431_v16  ;;  %v11713_v47 = vld [vmem:[%s14056_s27] sm:$0xff]  }
0x1d04   : > { %v6436_v27 = vpack.c.bf16 %v6432_v39, %v6432_v39  ;;  %v6437_v55 = vpack.c.bf16 %v6433_v40, %v6433_v40  ;;  %v6438_v58 = vpack.c.bf16 %v6434_v51, %v6434_v51  ;;  %v6439_v43 = vpack.c.bf16 %v6435_v52, %v6435_v52  ;;  %v11714_v52 = vld [vmem:[%s14056_s27 + $0x8] sm:$0xff]  }
0x1d06   : > { %v6680_v56 = vsel %vm2354_vm3, %v6436_v27, 0  ;;  %v6726_v57 = vsel %vm2354_vm3, %v6437_v55, 0  ;;  %v6772_v21 = vsel %vm2354_vm3, %v6438_v58, 0  ;;  %v6818_v26 = vsel %vm2354_vm3, %v6439_v43, 0 }
0x1d07   : > { %11283 = vmatpush3.bf16.msra.mxu1 %v6680_v56  ;;  %11289 = vmatpush3.bf16.msra.mxu0 %v6726_v57 }
0x1d08   : > { %11294 = vmatprep.subr.bf16.mxu1 %v12135_v0  ;;  %11300 = vmatprep.subr.bf16.mxu0 %v12135_v0 }
0x1d0a   : > { %11285 = vmatmul.mubr.msk.bf16.vlgmr.msra.gmra.mrb[92].mxu1 %vm2114_vm2, %v6672_v59  ;;  %11291 = vmatmul.mubr.msk.bf16.vlgmr.msra.gmra.mrb[96].mxu0 %vm2114_vm2, %v6673_v61 }
0x1d0b   : > { %11295 = vmatpush3.bf16.msra.mxu1 %v6772_v21  ;;  %11301 = vmatpush3.bf16.msra.mxu0 %v6818_v26 }
0x1d0c   : > { %11296 = vmatprep.mubr.msk.bf16.mxu1 %vm12136_vm0, %v12135_v0  ;;  %11302 = vmatprep.mubr.msk.bf16.mxu0 %vm12136_vm0, %v12135_v0 }
0x1d0d   : > { %11306 = vmatprep.subr.bf16.mxu1 %v12135_v0  ;;  %11314 = vmatprep.subr.bf16.mxu0 %v12135_v0 }
0x1d21   : > { %v6660_v62 = vpop.xlane.xlu1 %6659 }
0x1d22   : > { %11815 = vrcp.f32 %v6660_v62  ;;  %v6663_v63 = vpop.xlane.xlu0 %6662 }
0x1d23   : > { %11817 = vrcp.f32 %v6663_v63 }
0x1d2c   : > { %v11816_v49 = vpop.eup %11815 }
0x1d2d   : > { %v11818_v50 = vpop.eup %11817  ;;  %v6670_v2 = vmul.f32 %v11816_v49, %v13307_v44 }
0x1d2e   : > { %v6671_v19 = vmul.f32 %v11818_v50, %v13309_v60 }
0x1d2f   : > { %v6674_v4 = vpack.c.bf16 %v6670_v2, %v6670_v2 }
0x1d30   : > { %v6675_v6 = vpack.c.bf16 %v6671_v19, %v6671_v19 }
0x1d31   : > { %11297 = vmatmul.mubr.msk.bf16.vlgmr.msra.gmra.mrb[96].mxu1 %vm2114_vm2, %v6674_v4 }
0x1d32   : > { %11303 = vmatmul.mubr.msk.bf16.vlgmr.msra.gmra.mrb[100].mxu0 %vm2114_vm2, %v6675_v6  ;;  %11310 = vmatprep.mubr.msk.bf16.mxu1 %vm12136_vm0, %v12135_v0 }
0x1d33   : > { %11318 = vmatprep.mubr.msk.bf16.mxu0 %vm12136_vm0, %v12135_v0  ;;  %11307 = vmatpush3.bf16.msra.mxu1 %v11713_v47 }
0x1d34   : > { %11308 = vmatprep.subr.bf16.mxu1 %v12135_v0 }
0x1d37   : > { %11309 = vmatpush3.bf16.msra.mxu1 %v11714_v52 }
0x1d38   : > { %11322 = vmatprep.subr.bf16.mxu1 %v12135_v0 }
0x1ddd   : > { %v6716_v8 = vpop.f32.mrb[92].mxu1  ;;  %v6762_v1 = vpop.f32.mrb[96].mxu0 }
0x1dde   : > { %v11286_v7 = vpop.f32.mrb[93].mxu1  ;;  %v11292_v9 = vpop.f32.mrb[97].mxu0 }
0x1ddf   : > { %v6719_v12 = vpop.f32.mrb[94].mxu1  ;;  %v6765_v44 = vpop.f32.mrb[98].mxu0  ;;  %v10589_v9 = vld [vmem:[%s14057_s28] ss:$0 sm:$0xff] }
0x1de0   : > { %v11287_v13 = vpop.f32.mrb[95].mxu1  ;;  %v11293_v60 = vpop.f32.mrb[99].mxu0 }
0x1e04   : > { %v6808_v14 = vpop.f32.mrb[96].mxu1 }
0x1e05   : > { %v6860_v15 = vcombine.low %v6716_v8, %v6808_v14  ;;  %v6861_v17 = vcombine.high %v6716_v8, %v6808_v14  ;;  %v6854_v18 = vpop.f32.mrb[100].mxu0  ;;  %v11298_v20 = vpop.f32.mrb[97].mxu1 }
0x1e06   : > { %v6876_v22 = vcombine.low %v6762_v1, %v6854_v18  ;;  %v6877_v28 = vcombine.high %v6762_v1, %v6854_v18  ;;  %v11304_v10 = vpop.f32.mrb[101].mxu0  ;;  %v6811_v11 = vpop.f32.mrb[98].mxu1 }
0x1e07   : > { %v6868_v29 = vrot.slane %v6860_v15, %v12597_v31  ;;  %v6875_v33 = vrot.slane %v6861_v17, %v12597_v31  ;;  %v6857_v34 = vpop.f32.mrb[102].mxu0  ;;  %v11299_v35 = vpop.f32.mrb[99].mxu1  ;;  %v11715_v11 = vld [vmem:[%s14058_s29] sm:$0xff]  }
0x1e08   : > { %v6884_v36 = vrot.slane %v6876_v22, %v12597_v31  ;;  %v6891_v37 = vrot.slane %v6877_v28, %v12597_v31  ;;  %v11305_v41 = vpop.f32.mrb[103].mxu0  ;;  %11315 = vmatpush3.bf16.msra.mxu0 %v11715_v11 }
0x1e09   : > { %11316 = vmatprep.subr.bf16.mxu0 %v12135_v0  ;;  %v10593_v41 = vld [vmem:[#allocation2] ss:$0 sm:$0xff] }
0x1e0a   : > { %v6892_v42 = vcombine.low %v6868_v29, %v6884_v36  ;;  %v6893_v30 = vcombine.high %v6868_v29, %v6884_v36  ;;  %v6908_v32 = vcombine.low %v6875_v33, %v6891_v37  ;;  %v6909_v46 = vcombine.high %v6875_v33, %v6891_v37  ;;  %v11716_v29 = vld [vmem:[%s14058_s29 + $0x8] sm:$0xff]  }
0x1e0b   : > { %v11718_v33 = vld [vmem:[%s14059_s30 + $0x8] sm:$0xff]  }
0x1e0c   : > { %v6900_v23 = vrot.slane %v6892_v42, %v12600_v38  ;;  %v6907_v48 = vrot.slane %v6893_v30, %v12600_v38  ;;  %v6916_v24 = vrot.slane %v6908_v32, %v12600_v38  ;;  %v6923_v16 = vrot.slane %v6909_v46, %v12600_v38  ;;  %11317 = vmatpush3.bf16.msra.mxu0 %v11716_v29  ;;  %v10594_v30 = vld [vmem:[#allocation5] ss:$0 sm:$0xff] }
0x1e0d   : > { %11334 = vmatprep.subr.bf16.mxu0 %v12135_v0 }
0x1e0e   : > { %v6928_v25 = vcombine.low %v6900_v23, %v6907_v48  ;;  %v10587_v39 = vcombine.high %v6900_v23, %v6907_v48  ;;  %v6944_v40 = vcombine.low %v6916_v24, %v6923_v16  ;;  %v10588_v51 = vcombine.high %v6916_v24, %v6923_v16  ;;  %v11719_v23 = vld [vmem:[%s14059_s30 + $0x10] sm:$0xff]   ;;  %v11720_v48 = vld [vmem:[%s14059_s30 + $0x18] sm:$0xff]   ;;  %v10595_v24 = vld [vmem:[%s14060_s7] ss:$0 sm:$0xff] }
0x1e10   : > { %v6935_v53 = vrot.slane %v6928_v25, %v12597_v31  ;;  %v6943_v54 = vrot.slane %v10587_v39, %v12597_v31  ;;  %v6951_v27 = vrot.slane %v6944_v40, %v12597_v31  ;;  %v6959_v55 = vrot.slane %v10588_v51, %v12597_v31 }
0x1e12   : > { %v6961_v56 = vcombine.high %v6935_v53, %v6943_v54  ;;  %v6977_v57 = vcombine.high %v6951_v27, %v6959_v55  ;;  %v6960_v58 = vcombine.low %v6935_v53, %v6943_v54  ;;  %v6976_v43 = vcombine.low %v6951_v27, %v6959_v55  ;;  %v10599_v54 = vld [vmem:[%s14061_s19] ss:$0 sm:$0xff] }
0x1e14   : > { %v6975_v59 = vrot.slane %v6961_v56, %v12600_v38  ;;  %v6991_v61 = vrot.slane %v6977_v57, %v12600_v38  ;;  %v6968_v21 = vrot.slane %v6960_v58, %v12600_v38  ;;  %v6984_v26 = vrot.slane %v6976_v43, %v12600_v38 }
0x1e16   : > { %v6994_v62 = vcombine.low %v6975_v59, %v6991_v61  ;;  %v6993_v63 = vcombine.high %v6968_v21, %v6984_v26  ;;  %v6995_v49 = vcombine.high %v6975_v59, %v6991_v61  ;;  %v6992_v50 = vcombine.low %v6968_v21, %v6984_v26 }
0x1e18   : > { %7001 = vrot.lane.b32.xlu1 %v6994_v62, %s14032_s22  ;;  %6997 = vrot.lane.b32.xlu0 %v6993_v63, %s14033_s18 }
0x1e1c   : > { %7005 = vrot.lane.b32.xlu1 %v6995_v49, %s14034_s23  ;;  %v11721_v49 = vld [vmem:[%s14035_s2 + $0x10] sm:$0xff]  }
0x1e8a   : > { %v7002_v2 = vpop.permute.xlu1 %7001  ;;  %v6998_v19 = vpop.permute.xlu0 %6997 }
0x1e8b   : > { %v7008_v4 = vsel %vm2114_vm2, %v6992_v50, %v6998_v19  ;;  %v11722_v50 = vld [vmem:[%s14040_s8 + $0x10] sm:$0xff]   ;;  %v11724_v19 = vld [vmem:[%s14040_s8 + $0x18] sm:$0xff]  }
0x1e8c   : > { %v7009_v8 = vsel %vm2685_vm4, %v7008_v4, %v7002_v2  ;;  %v11723_v2 = vld [vmem:[%s14035_s2 + $0x18] sm:$0xff]  }
0x1e8e   : > { %v7006_v6 = vpop.permute.xlu1 %7005 }
0x1e8f   : > { %v7010_v1 = vsel %vm2687_vm5, %v7009_v8, %v7006_v6 }
0x1e90   : > { %v7011_v7 = vpack.c.bf16 %v7010_v1, %v7010_v1 }
0x1e92   : > { %11311 = vmatmul.mubr.msk.bf16.vlgmr.msra.gmra.mrb[100].mxu1 %vm1494_vm1, %v7011_v7  ;;  %v10605_v7 = vld [vmem:[#allocation7] ss:$0 sm:$0xff] }
0x1e93   : > { %11330 = vmatprep.mubr.msk.bf16.mxu1 %vm12136_vm0, %v12135_v0 }
0x1f65   : > { %v7072_v12 = vpop.f32.mrb[100].mxu1 }
0x1f66   : > { %v7073_v44 = vadd.f32 %v10589_v9, %v7072_v12  ;;  %v11312_v13 = vpop.f32.mrb[101].mxu1  ;;  %v10606_v12 = vld [vmem:[#allocation8] ss:$0 sm:$0xff] }
0x1f67   : > { %v7075_v60 = vpop.f32.mrb[102].mxu1 }
0x1f68   : > { %v11313_v14 = vpop.f32.mrb[103].mxu1  ;;  %v7078_v15 = vadd.f32 %v7073_v44, %v13209_v5  ;;  %v11717_v5 = vld [vmem:[%s14059_s30] sm:$0xff]   ;;  %v11725_v60 = vld [vmem:[%s14037_s3 + $0x10] sm:$0xff]  }
0x1f69   : > { %11323 = vmatpush3.bf16.msra.mxu1 %v11717_v5  ;;  %v10621_v5 = vld [vmem:[%s14039_s5 + $0x1] ss:$0 sm:$0xff] }
0x1f6a   : > { %v7081_v17 = vsel %vm1494_vm1, %v7078_v15, 0.0  ;;  %11324 = vmatprep.subr.bf16.mxu1 %v12135_v0 }
0x1f6b   : > { %7082 = vadd.xlane.f32.xlu0 %v7081_v17 }
0x1f6d   : > { %11325 = vmatpush3.bf16.msra.mxu1 %v11718_v33 }
0x1f6e   : > { %11326 = vmatprep.subr.bf16.mxu1 %v12135_v0 }
0x1f71   : > { %11327 = vmatpush3.bf16.msra.mxu1 %v11719_v23 }
0x1f72   : > { %11328 = vmatprep.subr.bf16.mxu1 %v12135_v0 }
0x1f75   : > { %11329 = vmatpush3.bf16.msra.mxu1 %v11720_v48 }
0x1f76   : > { %11350 = vmatprep.subr.bf16.mxu1 %v12135_v0 }
0x1ff8   : > { %v7083_v18 = vpop.xlane.xlu0 %7082 }
0x1ff9   : > { %v7084_v20 = vmul.f32 0.03125, %v7083_v18 }
0x1ffb   : > { %v7085_v22 = vsub.f32 %v7078_v15, %v7084_v20  ;;  %v11726_v15 = vld [vmem:[%s14037_s3 + $0x18] sm:$0xff]  }
0x1ffd   : > { %v7086_v28 = vmul.f32 %v7085_v22, %v7085_v22 }
0x1fff   : > { %v7087_v10 = vsel %vm1494_vm1, %v7086_v28, 0.0 }
0x2000   : > { %7088 = vadd.xlane.f32.xlu1 %v7087_v10 }
0x208d   : > { %v7089_v34 = vpop.xlane.xlu1 %7088 }
0x208e   : > { %v7090_v35 = vmul.f32 0.03125, %v7089_v34 }
0x2090   : > { %v7091_v36 = vadd.f32 1e-05, %v7090_v35 }
0x2092   : > { %11819 = vrsqrt.f32 %v7091_v36  ;;  %v10612_v36 = vld [vmem:[%s14041_s4 + $0x1] ss:$0 sm:$0xff] }
0x209c   : > { %v11820_v37 = vpop.eup %11819 }
0x209d   : > { %v7093_v42 = vmul.f32 %v11820_v37, %v7085_v22 }
0x209f   : > { %v7100_v32 = vmul.f32 %v10593_v41, %v7093_v42 }
0x20a1   : > { %v7107_v46 = vadd.f32 %v10594_v30, %v7100_v32 }
0x20a3   : > { %v7108_v47 = vpack.c.bf16 %v7107_v46, %v7107_v46 }
0x20a5   : > { %11319 = vmatmul.mubr.msk.bf16.vlgmr.msra.gmra.mrb[104].mxu0 %vm1494_vm1, %v7108_v47 }
0x20a6   : > { %11338 = vmatprep.mubr.msk.bf16.mxu0 %vm12136_vm0, %v12135_v0  ;;  %11335 = vmatpush3.bf16.msra.mxu0 %v11721_v49 }
0x20a7   : > { %11336 = vmatprep.subr.bf16.mxu0 %v12135_v0 }
0x20aa   : > { %11337 = vmatpush3.bf16.msra.mxu0 %v11723_v2 }
0x20ab   : > { %11342 = vmatprep.subr.bf16.mxu0 %v12135_v0 }
0x2178   : > { %v7169_v16 = vpop.f32.mrb[104].mxu0 }
0x2179   : > { %v7170_v25 = vadd.f32 %v10595_v24, %v7169_v16  ;;  %v11320_v39 = vpop.f32.mrb[105].mxu0 }
0x217a   : > { %v7172_v40 = vpop.f32.mrb[106].mxu0 }
0x217b   : > { %v7175_v51 = vmax.f32 %v7170_v25, 0.0  ;;  %v11321_v52 = vpop.f32.mrb[107].mxu0 }
0x217d   : > { %v7176_v53 = vpack.c.bf16 %v7175_v51, %v7175_v51 }
0x217f   : > { %11331 = vmatmul.mubr.msk.bf16.vlgmr.msra.gmra.mrb[104].mxu1 %vm2895_vm6, %v7176_v53 }
0x2180   : > { %11354 = vmatprep.mubr.msk.bf16.mxu1 %vm12136_vm0, %v12135_v0  ;;  %11351 = vmatpush3.bf16.msra.mxu1 %v11722_v50 }
0x2181   : > { %11352 = vmatprep.subr.bf16.mxu1 %v12135_v0 }
0x2184   : > { %11353 = vmatpush3.bf16.msra.mxu1 %v11724_v19 }
0x2185   : > { %11364 = vmatprep.subr.bf16.mxu1 %v12135_v0 }
0x2252   : > { %v7253_v27 = vpop.f32.mrb[104].mxu1 }
0x2253   : > { %v7254_v55 = vadd.f32 %v10599_v54, %v7253_v27  ;;  %v11332_v56 = vpop.f32.mrb[105].mxu1 }
0x2254   : > { %v7256_v57 = vpop.f32.mrb[106].mxu1 }
0x2255   : > { %v11333_v58 = vpop.f32.mrb[107].mxu1  ;;  %v7259_v43 = vadd.f32 %v7254_v55, %v7107_v46 }
0x2257   : > { %v7262_v59 = vsel %vm1494_vm1, %v7259_v43, 0.0 }
0x2258   : > { %7263 = vadd.xlane.f32.xlu0 %v7262_v59 }
0x22e5   : > { %v7264_v61 = vpop.xlane.xlu0 %7263 }
0x22e6   : > { %v7265_v21 = vmul.f32 0.03125, %v7264_v61 }
0x22e8   : > { %v7266_v26 = vsub.f32 %v7259_v43, %v7265_v21 }
0x22ea   : > { %v7267_v62 = vmul.f32 %v7266_v26, %v7266_v26 }
0x22ec   : > { %v7268_v63 = vsel %vm1494_vm1, %v7267_v62, 0.0 }
0x22ed   : > { %7269 = vadd.xlane.f32.xlu0 %v7268_v63 }
0x237a   : > { %v7270_v4 = vpop.xlane.xlu0 %7269 }
0x237b   : > { %v7271_v6 = vmul.f32 0.03125, %v7270_v4 }
0x237d   : > { %v7272_v8 = vadd.f32 1e-05, %v7271_v6 }
0x237f   : > { %11821 = vrsqrt.f32 %v7272_v8 }
0x2389   : > { %v11822_v1 = vpop.eup %11821 }
0x238a   : > { %v7274_v9 = vmul.f32 %v11822_v1, %v7266_v26 }
0x238c   : > { %v7281_v44 = vmul.f32 %v10605_v7, %v7274_v9 }
0x238e   : > { %v13418_v13 = vadd.f32 %v10606_v12, %v7281_v44 }
0x2390   : > { %v7289_v14 = vpack.c.bf16 %v13418_v13, %v13418_v13 }
0x2392   : > { %11339 = vmatmul.mubr.msk.bf16.vlgmr.msra.gmra.mrb[108].mxu0 %vm1494_vm1, %v7289_v14  ;;  %11355 = vmatmul.mubr.msk.bf16.vlgmr.msra.gmra.mrb[108].mxu1 %vm1494_vm1, %v7289_v14 }
0x2393   : > { %11343 = vmatpush3.bf16.msra.mxu0 %v11725_v60  ;;  %11346 = vmatprep.mubr.msk.bf16.mxu0 %vm12136_vm0, %v12135_v0 }
0x2394   : > { %11344 = vmatprep.subr.bf16.mxu0 %v12135_v0  ;;  %11366 = vmatprep.mubr.msk.bf16.mxu1 %vm12136_vm0, %v12135_v0 }
0x2397   : > { %11345 = vmatpush3.bf16.msra.mxu0 %v11726_v15 }
0x2398   : > { %11358 = vmatprep.subr.bf16.mxu0 %v12135_v0 }
0x239a   : > { %11347 = vmatmul.mubr.msk.bf16.vlgmr.msra.gmra.mrb[112].mxu0 %vm1494_vm1, %v7289_v14 }
0x239b   : > { %11360 = vmatprep.mubr.msk.bf16.mxu0 %vm12136_vm0, %v12135_v0 }
0x2465   : > { %v7352_v17 = vpop.f32.mrb[108].mxu0  ;;  %v13435_v18 = vpop.f32.mrb[108].mxu1 }
0x2466   : > { %v11340_v20 = vpop.f32.mrb[109].mxu0  ;;  %v11356_v22 = vpop.f32.mrb[109].mxu1  ;;  %v7353_v42 = vadd.f32 %v10612_v36, %v7352_v17 }
0x2467   : > { %v7355_v28 = vpop.f32.mrb[110].mxu0  ;;  %v7485_v10 = vpop.f32.mrb[110].mxu1 }
0x2468   : > { %v11341_v11 = vpop.f32.mrb[111].mxu0  ;;  %v11357_v29 = vpop.f32.mrb[111].mxu1 }
0x246d   : > { %v7417_v33 = vpop.f32.mrb[112].mxu0 }
0x246e   : > { %v7418_v34 = vadd.f32 %v10621_v5, %v7417_v33  ;;  %v11348_v35 = vpop.f32.mrb[113].mxu0 }
0x246f   : > { %v7420_v37 = vpop.f32.mrb[114].mxu0 }
0x2470   : > { %7642 = vrot.lane.b32.xlu0 %v7418_v34, %s14042_s15  ;;  %7639 = vrot.lane.b32.xlu1 %v7418_v34, %s14043_s1  ;;  %v11349_v41 = vpop.f32.mrb[115].mxu0 }
0x2474   : > { %7492 = vrot.lane.b32.xlu0 %v7353_v42, %s14042_s15  ;;  %7645 = vrot.lane.b32.xlu1 %v7418_v34, %s14044_s9 }
0x2478   : > { %7489 = vrot.lane.b32.xlu1 %v7353_v42, %s14043_s1 }
0x247c   : > { %7495 = vrot.lane.b32.xlu1 %v7353_v42, %s14044_s9 }
0x24e2   : > { %v7643_v30 = vpop.permute.xlu0 %7642  ;;  %v7640_v32 = vpop.permute.xlu1 %7639 }
0x24e3   : > { %v7648_v46 = vcombine.low %v7418_v34, %v7643_v30  ;;  %v7649_v47 = vcombine.high %v7418_v34, %v7643_v30 }
0x24e5   : > { %v7656_v16 = vrot.slane %v7648_v46, %v12597_v31  ;;  %v7663_v25 = vrot.slane %v7649_v47, %v12597_v31 }
0x24e6   : > { %v7646_v23 = vpop.permute.xlu1 %7645  ;;  %v7493_v52 = vpop.permute.xlu0 %7492 }
0x24e7   : > { %v7664_v48 = vcombine.low %v7640_v32, %v7646_v23  ;;  %v7665_v24 = vcombine.high %v7640_v32, %v7646_v23  ;;  %v7498_v59 = vcombine.low %v7353_v42, %v7493_v52  ;;  %v7499_v61 = vcombine.high %v7353_v42, %v7493_v52 }
0x24e9   : > { %v7672_v39 = vrot.slane %v7664_v48, %v12597_v31  ;;  %v7679_v40 = vrot.slane %v7665_v24, %v12597_v31  ;;  %v7506_v1 = vrot.slane %v7498_v59, %v12597_v31  ;;  %v7513_v7 = vrot.slane %v7499_v61, %v12597_v31 }
0x24ea   : > { %v7490_v51 = vpop.permute.xlu1 %7489 }
0x24eb   : > { %v7680_v53 = vcombine.low %v7656_v16, %v7672_v39  ;;  %v7681_v54 = vcombine.high %v7656_v16, %v7672_v39  ;;  %v7696_v27 = vcombine.low %v7663_v25, %v7679_v40  ;;  %v7697_v55 = vcombine.high %v7663_v25, %v7679_v40 }
0x24ed   : > { %v7688_v56 = vrot.slane %v7680_v53, %v12600_v38  ;;  %v7695_v57 = vrot.slane %v7681_v54, %v12600_v38  ;;  %v7704_v58 = vrot.slane %v7696_v27, %v12600_v38  ;;  %v7711_v43 = vrot.slane %v7697_v55, %v12600_v38 }
0x24ee   : > { %v7496_v21 = vpop.permute.xlu1 %7495 }
0x24ef   : > { %v7716_v26 = vcombine.low %v7688_v56, %v7695_v57  ;;  %v10636_v62 = vcombine.high %v7688_v56, %v7695_v57  ;;  %v7732_v63 = vcombine.low %v7704_v58, %v7711_v43  ;;  %v10637_v49 = vcombine.high %v7704_v58, %v7711_v43 }
0x24f0   : > { %v7514_v50 = vcombine.low %v7490_v51, %v7496_v21  ;;  %v7515_v2 = vcombine.high %v7490_v51, %v7496_v21 }
0x24f1   : > { %v7723_v19 = vrot.slane %v7716_v26, %v12597_v31  ;;  %v7731_v4 = vrot.slane %v10636_v62, %v12597_v31  ;;  %v7739_v6 = vrot.slane %v7732_v63, %v12597_v31  ;;  %v7747_v8 = vrot.slane %v10637_v49, %v12597_v31 }
0x24f2   : > { %v7522_v9 = vrot.slane %v7514_v50, %v12597_v31  ;;  %v7529_v12 = vrot.slane %v7515_v2, %v12597_v31 }
0x24f3   : > { %v7748_v44 = vcombine.low %v7723_v19, %v7731_v4  ;;  %v7764_v60 = vcombine.low %v7739_v6, %v7747_v8  ;;  %v7749_v14 = vcombine.high %v7723_v19, %v7731_v4  ;;  %v7765_v15 = vcombine.high %v7739_v6, %v7747_v8 }
0x24f4   : > { %v7530_v17 = vcombine.low %v7506_v1, %v7522_v9  ;;  %v7531_v20 = vcombine.high %v7506_v1, %v7522_v9  ;;  %v7546_v22 = vcombine.low %v7513_v7, %v7529_v12  ;;  %v7547_v28 = vcombine.high %v7513_v7, %v7529_v12 }
0x24f5   : > { %v7756_v10 = vrot.slane %v7748_v44, %v12600_v38  ;;  %v7772_v11 = vrot.slane %v7764_v60, %v12600_v38  ;;  %v7763_v37 = vrot.slane %v7749_v14, %v12600_v38  ;;  %v7779_v41 = vrot.slane %v7765_v15, %v12600_v38 }
0x24f6   : > { %v7538_v29 = vrot.slane %v7530_v17, %v12600_v38  ;;  %v7545_v5 = vrot.slane %v7531_v20, %v12600_v38  ;;  %v7554_v33 = vrot.slane %v7546_v22, %v12600_v38  ;;  %v7561_v34 = vrot.slane %v7547_v28, %v12600_v38 }
0x24f7   : > { %v7780_v35 = vcombine.low %v7756_v10, %v7772_v11  ;;  %v7781_v36 = vcombine.high %v7756_v10, %v7772_v11  ;;  %v7782_v53 = vcombine.low %v7763_v37, %v7779_v41  ;;  %v7783_v54 = vcombine.high %v7763_v37, %v7779_v41 }
0x24f8   : > { %v7566_v42 = vcombine.low %v7538_v29, %v7545_v5  ;;  %v10634_v30 = vcombine.high %v7538_v29, %v7545_v5  ;;  %v7582_v32 = vcombine.low %v7554_v33, %v7561_v34  ;;  %v10635_v46 = vcombine.high %v7554_v33, %v7561_v34 }
0x24f9   : > { %v7784_v47 = vpack.c.bf16 %v7780_v35, %v7780_v35  ;;  %v7785_v23 = vpack.c.bf16 %v7781_v36, %v7781_v36  ;;  %v7786_v59 = vpack.c.bf16 %v7782_v53, %v7782_v53  ;;  %v7787_v61 = vpack.c.bf16 %v7783_v54, %v7783_v54 }
0x24fa   : > { %v7573_v48 = vrot.slane %v7566_v42, %v12597_v31  ;;  %v7581_v24 = vrot.slane %v10634_v30, %v12597_v31  ;;  %v7589_v16 = vrot.slane %v7582_v32, %v12597_v31  ;;  %v7597_v25 = vrot.slane %v10635_v46, %v12597_v31 }
0x24fb   : > { %v7942_v39 = vsel %vm2114_vm2, %v7784_v47, 0  ;;  %v7988_v40 = vsel %vm2114_vm2, %v7785_v23, 0  ;;  %v8034_v49 = vsel %vm2114_vm2, %v7786_v59, 0  ;;  %v8080_v50 = vsel %vm2114_vm2, %v7787_v61, 0  ;;  %v10630_v23 = vld [vmem:[%s14045_s10 + $0x1] ss:$0 sm:$0xff] }
0x24fc   : > { %v7598_v51 = vcombine.low %v7573_v48, %v7581_v24  ;;  %v7614_v52 = vcombine.low %v7589_v16, %v7597_v25  ;;  %11359 = vmatpush3.bf16.xpose.msra.mxu0 %v7942_v39  ;;  %11365 = vmatpush3.bf16.xpose.msra.mxu1 %v7988_v40  ;;  %v7599_v27 = vcombine.high %v7573_v48, %v7581_v24 }
0x24fd   : > { %11370 = vmatprep.subr.bf16.mxu0 %v12135_v0  ;;  %v7615_v55 = vcombine.high %v7589_v16, %v7597_v25  ;;  %11376 = vmatprep.subr.bf16.mxu1 %v12135_v0  ;;  %v7483_v48 = vadd.f32 %v10630_v23, %v13435_v18 }
0x24fe   : > { %v7606_v56 = vrot.slane %v7598_v51, %v12600_v38  ;;  %v7622_v57 = vrot.slane %v7614_v52, %v12600_v38  ;;  %v7613_v62 = vrot.slane %v7599_v27, %v12600_v38 }
0x24ff   : > { %v7629_v63 = vrot.slane %v7615_v55, %v12600_v38 }
0x2500   : > { %v7630_v58 = vcombine.low %v7606_v56, %v7622_v57  ;;  %v7631_v43 = vcombine.high %v7606_v56, %v7622_v57 }
0x2501   : > { %v7632_v2 = vcombine.low %v7613_v62, %v7629_v63  ;;  %v7633_v19 = vcombine.high %v7613_v62, %v7629_v63 }
0x2502   : > { %v7634_v21 = vpack.c.bf16 %v7630_v58, %v7630_v58  ;;  %v7635_v26 = vpack.c.bf16 %v7631_v43, %v7631_v43 }
0x2503   : > { %v7636_v4 = vpack.c.bf16 %v7632_v2, %v7632_v2  ;;  %v7637_v6 = vpack.c.bf16 %v7633_v19, %v7633_v19 }
0x2504   : > { %11361 = vmatmul.mubr.msk.bf16.vlgmr.msra.gmra.mrb[116].mxu0 %vm2114_vm2, %v7634_v21  ;;  %11367 = vmatmul.mubr.msk.bf16.vlgmr.msra.gmra.mrb[112].mxu1 %vm2114_vm2, %v7635_v26 }
0x2505   : > { %11371 = vmatpush3.bf16.xpose.msra.mxu0 %v8034_v49  ;;  %11377 = vmatpush3.bf16.xpose.msra.mxu1 %v8080_v50 }
0x2506   : > { %11372 = vmatprep.mubr.msk.bf16.mxu0 %vm12136_vm0, %v12135_v0  ;;  %11378 = vmatprep.mubr.msk.bf16.mxu1 %vm12136_vm0, %v12135_v0 }
0x2507   : > { %11382 = vmatprep.subr.bf16.mxu0 %v12135_v0  ;;  %11388 = vmatprep.subr.bf16.mxu1 %v12135_v0 }
0x250c   : > { %11373 = vmatmul.mubr.msk.bf16.vlgmr.msra.gmra.mrb[120].mxu0 %vm2114_vm2, %v7636_v4  ;;  %11379 = vmatmul.mubr.msk.bf16.vlgmr.msra.gmra.mrb[116].mxu1 %vm2114_vm2, %v7637_v6 }
0x250d   : > { %11384 = vmatprep.mubr.msk.bf16.mxu0 %vm12136_vm0, %v12135_v0  ;;  %11390 = vmatprep.mubr.msk.bf16.mxu1 %vm12136_vm0, %v12135_v0 }
0x25d7   : > { %v7978_v8 = vpop.f32.mrb[116].mxu0  ;;  %v8024_v1 = vpop.f32.mrb[112].mxu1 }
0x25d8   : > { %v8122_v7 = vmul.f32 0.35355338, %v7978_v8  ;;  %v8123_v9 = vmul.f32 0.35355338, %v8024_v1  ;;  %v11362_v12 = vpop.f32.mrb[117].mxu0  ;;  %v11368_v44 = vpop.f32.mrb[113].mxu1 }
0x25d9   : > { %v7981_v60 = vpop.f32.mrb[118].mxu0  ;;  %v8027_v14 = vpop.f32.mrb[114].mxu1 }
0x25da   : > { %v8126_v15 = vadd.f32 %v8122_v7, %v13079_v45  ;;  %v8127_v17 = vadd.f32 %v8123_v9, %v13079_v45  ;;  %v11363_v20 = vpop.f32.mrb[119].mxu0  ;;  %v11369_v22 = vpop.f32.mrb[115].mxu1 }
0x25dc   : > { %v8133_v28 = vsel %vm2114_vm2, %v8127_v17, -inf  ;;  %v8130_v10 = vsel %vm2114_vm2, %v8126_v15, -inf }
0x25dd   : > { %8134 = vmax.xlane.f32.xlu1 %v8133_v28  ;;  %8131 = vmax.xlane.f32.xlu0 %v8130_v10 }
0x25df   : > { %v8070_v11 = vpop.f32.mrb[120].mxu0  ;;  %v8116_v29 = vpop.f32.mrb[116].mxu1 }
0x25e0   : > { %v8124_v5 = vmul.f32 0.35355338, %v8070_v11  ;;  %v8125_v33 = vmul.f32 0.35355338, %v8116_v29  ;;  %v11374_v34 = vpop.f32.mrb[121].mxu0  ;;  %v11380_v35 = vpop.f32.mrb[117].mxu1 }
0x25e1   : > { %v8073_v36 = vpop.f32.mrb[122].mxu0  ;;  %v8119_v37 = vpop.f32.mrb[118].mxu1 }
0x25e2   : > { %v8128_v41 = vadd.f32 %v8124_v5, %v13079_v45  ;;  %v11375_v42 = vpop.f32.mrb[123].mxu0  ;;  %v11381_v30 = vpop.f32.mrb[119].mxu1  ;;  %v8129_v32 = vadd.f32 %v8125_v33, %v13079_v45 }
0x25e4   : > { %v8136_v46 = vsel %vm2114_vm2, %v8128_v41, -inf  ;;  %v8139_v47 = vsel %vm2114_vm2, %v8129_v32, -inf }
0x25e5   : > { %8137 = vmax.xlane.f32.xlu0 %v8136_v46 }
0x25e9   : > { %8140 = vmax.xlane.f32.xlu0 %v8139_v47 }
0x25ee   : > { %7789 = vrot.lane.b32.xlu1 %v7483_v48, %s14043_s1 }
0x266a   : > { %v8135_v24 = vpop.xlane.xlu1 %8134  ;;  %v8132_v16 = vpop.xlane.xlu0 %8131 }
0x266b   : > { %v8143_v25 = vsub.f32 %v8127_v17, %v8135_v24  ;;  %v8142_v39 = vsub.f32 %v8126_v15, %v8132_v16 }
0x266d   : > { %v8148_v40 = vmul.f32 1.442695, %v8143_v25  ;;  %v8146_v51 = vmul.f32 1.442695, %v8142_v39 }
0x266e   : > { %v7790_v26 = vpop.permute.xlu1 %7789 }
0x266f   : > { %11823 = vpow2.f32 %v8148_v40 }
0x2670   : > { %11825 = vpow2.f32 %v8146_v51 }
0x2672   : > { %v8138_v54 = vpop.xlane.xlu0 %8137 }
0x2673   : > { %v8144_v56 = vsub.f32 %v8128_v41, %v8138_v54 }
0x2675   : > { %v8150_v58 = vmul.f32 1.442695, %v8144_v56 }
0x2676   : > { %v8141_v27 = vpop.xlane.xlu0 %8140 }
0x2677   : > { %v8145_v55 = vsub.f32 %v8129_v32, %v8141_v27 }
0x2679   : > { %v13508_v45 = vpop.eup %11823  ;;  %v8152_v57 = vmul.f32 1.442695, %v8145_v55 }
0x267a   : > { %v13510_v52 = vpop.eup %11825  ;;  %v8157_v53 = vsel %vm2114_vm2, %v13508_v45, 0.0 }
0x267b   : > { %v8154_v18 = vsel %vm2114_vm2, %v13510_v52, 0.0  ;;  %8158 = vadd.xlane.f32.xlu0 %v8157_v53  ;;  %11827 = vpow2.f32 %v8152_v57 }
0x267c   : > { %8155 = vadd.xlane.f32.xlu1 %v8154_v18  ;;  %11829 = vpow2.f32 %v8150_v58 }
0x2685   : > { %v13518_v43 = vpop.eup %11827 }
0x2686   : > { %v13520_v59 = vpop.eup %11829  ;;  %v8163_v61 = vsel %vm2114_vm2, %v13518_v43, 0.0 }
0x2687   : > { %v8160_v21 = vsel %vm2114_vm2, %v13520_v59, 0.0 }
0x268d   : > { %7795 = vrot.lane.b32.xlu1 %v7483_v48, %s14044_s9 }
0x2691   : > { %7792 = vrot.lane.b32.xlu0 %v7483_v48, %s14042_s15 }
0x26b0   : > { %8164 = vadd.xlane.f32.xlu0 %v8163_v61 }
0x26b1   : > { %8161 = vadd.xlane.f32.xlu1 %v8160_v21 }
0x2708   : > { %v8159_v62 = vpop.xlane.xlu0 %8158 }
0x2709   : > { %v8156_v63 = vpop.xlane.xlu1 %8155  ;;  %11831 = vrcp.f32 %v8159_v62 }
0x270a   : > { %11833 = vrcp.f32 %v8156_v63 }
0x270c   : > { %v7793_v49 = vpop.permute.xlu0 %7792 }
0x270d   : > { %v7796_v50 = vpop.permute.xlu1 %7795  ;;  %v7798_v2 = vcombine.low %v7483_v48, %v7793_v49  ;;  %v7799_v19 = vcombine.high %v7483_v48, %v7793_v49 }
0x270e   : > { %v7814_v4 = vcombine.low %v7790_v26, %v7796_v50  ;;  %v7815_v6 = vcombine.high %v7790_v26, %v7796_v50 }
0x270f   : > { %v7806_v8 = vrot.slane %v7798_v2, %v12597_v31  ;;  %v7813_v1 = vrot.slane %v7799_v19, %v12597_v31 }
0x2710   : > { %v7822_v7 = vrot.slane %v7814_v4, %v12597_v31  ;;  %v7829_v9 = vrot.slane %v7815_v6, %v12597_v31 }
0x2712   : > { %v7830_v12 = vcombine.low %v7806_v8, %v7822_v7  ;;  %v7831_v44 = vcombine.high %v7806_v8, %v7822_v7  ;;  %v7846_v60 = vcombine.low %v7813_v1, %v7829_v9  ;;  %v7847_v14 = vcombine.high %v7813_v1, %v7829_v9 }
0x2713   : > { %v11832_v46 = vpop.eup %11831 }
0x2714   : > { %v7838_v15 = vrot.slane %v7830_v12, %v12600_v38  ;;  %v7845_v17 = vrot.slane %v7831_v44, %v12600_v38  ;;  %v7854_v20 = vrot.slane %v7846_v60, %v12600_v38  ;;  %v7861_v22 = vrot.slane %v7847_v14, %v12600_v38  ;;  %v11834_v48 = vpop.eup %11833 }
0x2715   : > { %v8170_v40 = vmul.f32 %v11834_v48, %v13510_v52  ;;  %v8171_v51 = vmul.f32 %v11832_v46, %v13508_v45 }
0x2716   : > { %v7866_v28 = vcombine.low %v7838_v15, %v7845_v17  ;;  %v10638_v10 = vcombine.high %v7838_v15, %v7845_v17  ;;  %v7882_v11 = vcombine.low %v7854_v20, %v7861_v22  ;;  %v10639_v29 = vcombine.high %v7854_v20, %v7861_v22 }
0x2717   : > { %v8174_v57 = vpack.c.bf16 %v8170_v40, %v8170_v40  ;;  %v8175_v58 = vpack.c.bf16 %v8171_v51, %v8171_v51 }
0x2718   : > { %v7873_v5 = vrot.slane %v7866_v28, %v12597_v31  ;;  %v7881_v33 = vrot.slane %v10638_v10, %v12597_v31  ;;  %v7889_v34 = vrot.slane %v7882_v11, %v12597_v31  ;;  %v7897_v35 = vrot.slane %v10639_v29, %v12597_v31 }
0x271a   : > { %v7898_v36 = vcombine.low %v7873_v5, %v7881_v33  ;;  %v7899_v37 = vcombine.high %v7873_v5, %v7881_v33  ;;  %v7914_v41 = vcombine.low %v7889_v34, %v7897_v35  ;;  %v7915_v42 = vcombine.high %v7889_v34, %v7897_v35 }
0x271c   : > { %v7906_v30 = vrot.slane %v7898_v36, %v12600_v38  ;;  %v7913_v32 = vrot.slane %v7899_v37, %v12600_v38  ;;  %v7922_v47 = vrot.slane %v7914_v41, %v12600_v38  ;;  %v7929_v23 = vrot.slane %v7915_v42, %v12600_v38  ;;  %v11727_v42 = vld [vmem:[%s14046_s12 + $0x10] sm:$0xff]  }
0x271e   : > { %v7930_v24 = vcombine.low %v7906_v30, %v7922_v47  ;;  %v7931_v16 = vcombine.high %v7906_v30, %v7922_v47  ;;  %v7932_v25 = vcombine.low %v7913_v32, %v7929_v23  ;;  %v7933_v39 = vcombine.high %v7913_v32, %v7929_v23 }
0x2720   : > { %v7934_v53 = vpack.c.bf16 %v7930_v24, %v7930_v24  ;;  %v7935_v18 = vpack.c.bf16 %v7931_v16, %v7931_v16  ;;  %v7936_v55 = vpack.c.bf16 %v7932_v25, %v7932_v25  ;;  %v7937_v56 = vpack.c.bf16 %v7933_v39, %v7933_v39  ;;  %v11728_v25 = vld [vmem:[%s14046_s12 + $0x18] sm:$0xff]  }
0x2722   : > { %v8182_v54 = vsel %vm2354_vm3, %v7934_v53, 0  ;;  %v8228_v27 = vsel %vm2354_vm3, %v7935_v18, 0  ;;  %v8274_v45 = vsel %vm2354_vm3, %v7936_v55, 0  ;;  %v8320_v52 = vsel %vm2354_vm3, %v7937_v56, 0 }
0x2723   : > { %11383 = vmatpush3.bf16.msra.mxu0 %v8182_v54  ;;  %11389 = vmatpush3.bf16.msra.mxu1 %v8228_v27 }
0x2724   : > { %11394 = vmatprep.subr.bf16.mxu0 %v12135_v0  ;;  %11400 = vmatprep.subr.bf16.mxu1 %v12135_v0 }
0x2726   : > { %11385 = vmatmul.mubr.msk.bf16.vlgmr.msra.gmra.mrb[124].mxu0 %vm2114_vm2, %v8174_v57  ;;  %11391 = vmatmul.mubr.msk.bf16.vlgmr.msra.gmra.mrb[120].mxu1 %vm2114_vm2, %v8175_v58 }
0x2727   : > { %11395 = vmatpush3.bf16.msra.mxu0 %v8274_v45  ;;  %11401 = vmatpush3.bf16.msra.mxu1 %v8320_v52 }
0x2728   : > { %11396 = vmatprep.mubr.msk.bf16.mxu0 %vm12136_vm0, %v12135_v0  ;;  %11402 = vmatprep.mubr.msk.bf16.mxu1 %vm12136_vm0, %v12135_v0 }
0x2729   : > { %11406 = vmatprep.subr.bf16.mxu0 %v12135_v0  ;;  %11414 = vmatprep.subr.bf16.mxu1 %v12135_v0 }
0x273d   : > { %v8165_v61 = vpop.xlane.xlu0 %8164 }
0x273e   : > { %v8162_v21 = vpop.xlane.xlu1 %8161  ;;  %11835 = vrcp.f32 %v8165_v61 }
0x273f   : > { %11837 = vrcp.f32 %v8162_v21 }
0x2748   : > { %v11836_v26 = vpop.eup %11835 }
0x2749   : > { %v11838_v62 = vpop.eup %11837  ;;  %v8173_v63 = vmul.f32 %v11836_v26, %v13518_v43 }
0x274a   : > { %v8172_v49 = vmul.f32 %v11838_v62, %v13520_v59 }
0x274b   : > { %v8177_v50 = vpack.c.bf16 %v8173_v63, %v8173_v63 }
0x274c   : > { %v8176_v2 = vpack.c.bf16 %v8172_v49, %v8172_v49 }
0x274d   : > { %11403 = vmatmul.mubr.msk.bf16.vlgmr.msra.gmra.mrb[124].mxu1 %vm2114_vm2, %v8177_v50 }
0x274e   : > { %11397 = vmatmul.mubr.msk.bf16.vlgmr.msra.gmra.mrb[128].mxu0 %vm2114_vm2, %v8176_v2  ;;  %11418 = vmatprep.mubr.msk.bf16.mxu1 %vm12136_vm0, %v12135_v0 }
0x274f   : > { %11410 = vmatprep.mubr.msk.bf16.mxu0 %vm12136_vm0, %v12135_v0  ;;  %11407 = vmatpush3.bf16.msra.mxu0 %v11727_v42 }
0x2750   : > { %11408 = vmatprep.subr.bf16.mxu0 %v12135_v0 }
0x2753   : > { %11409 = vmatpush3.bf16.msra.mxu0 %v11728_v25 }
0x2754   : > { %11422 = vmatprep.subr.bf16.mxu0 %v12135_v0 }
0x27f9   : > { %v8218_v19 = vpop.f32.mrb[124].mxu0  ;;  %v8264_v4 = vpop.f32.mrb[120].mxu1 }
0x27fa   : > { %v11386_v6 = vpop.f32.mrb[125].mxu0  ;;  %v11392_v8 = vpop.f32.mrb[121].mxu1 }
0x27fb   : > { %v8221_v1 = vpop.f32.mrb[126].mxu0  ;;  %v8267_v43 = vpop.f32.mrb[122].mxu1  ;;  %v11730_v8 = vld [vmem:[%s14047_s13 + $0x18] sm:$0xff]  }
0x27fc   : > { %v11387_v7 = vpop.f32.mrb[127].mxu0  ;;  %v11393_v59 = vpop.f32.mrb[123].mxu1  ;;  %v10655_v1 = vld [vmem:[%s14048_s11 + $0x1] ss:$0 sm:$0xff] }
0x2820   : > { %v8356_v9 = vpop.f32.mrb[124].mxu1 }
0x2821   : > { %v8310_v12 = vpop.f32.mrb[128].mxu0  ;;  %v8378_v44 = vcombine.low %v8264_v4, %v8356_v9  ;;  %v8379_v60 = vcombine.high %v8264_v4, %v8356_v9  ;;  %v11404_v14 = vpop.f32.mrb[125].mxu1  ;;  %v11729_v4 = vld [vmem:[%s14047_s13 + $0x10] sm:$0xff]  }
0x2822   : > { %v8362_v15 = vcombine.low %v8218_v19, %v8310_v12  ;;  %v8363_v17 = vcombine.high %v8218_v19, %v8310_v12  ;;  %v11398_v20 = vpop.f32.mrb[129].mxu0  ;;  %v8359_v22 = vpop.f32.mrb[126].mxu1 }
0x2823   : > { %v8386_v28 = vrot.slane %v8378_v44, %v12597_v31  ;;  %v8393_v10 = vrot.slane %v8379_v60, %v12597_v31  ;;  %v8313_v11 = vpop.f32.mrb[130].mxu0  ;;  %v11405_v29 = vpop.f32.mrb[127].mxu1  ;;  %v10677_v22 = vld [vmem:[%s14050_s17 + $0x1] ss:$0 sm:$0xff] }
0x2824   : > { %v8370_v5 = vrot.slane %v8362_v15, %v12597_v31  ;;  %v8377_v33 = vrot.slane %v8363_v17, %v12597_v31  ;;  %v11399_v34 = vpop.f32.mrb[131].mxu0 }
0x2825   : > { %v11732_v34 = vld [vmem:[%s14049_s14 + $0x18] sm:$0xff]  }
0x2826   : > { %v8394_v35 = vcombine.low %v8370_v5, %v8386_v28  ;;  %v8395_v36 = vcombine.high %v8370_v5, %v8386_v28  ;;  %v8410_v37 = vcombine.low %v8377_v33, %v8393_v10  ;;  %v8411_v41 = vcombine.high %v8377_v33, %v8393_v10  ;;  %v11731_v33 = vld [vmem:[%s14049_s14 + $0x10] sm:$0xff]  }
0x2827   : > { %11415 = vmatpush3.bf16.msra.mxu1 %v11731_v33 }
0x2828   : > { %v8402_v30 = vrot.slane %v8394_v35, %v12600_v38  ;;  %v8409_v32 = vrot.slane %v8395_v36, %v12600_v38  ;;  %v8418_v46 = vrot.slane %v8410_v37, %v12600_v38  ;;  %v8425_v47 = vrot.slane %v8411_v41, %v12600_v38  ;;  %11416 = vmatprep.subr.bf16.mxu1 %v12135_v0 }
0x282a   : > { %v8430_v23 = vcombine.low %v8402_v30, %v8409_v32  ;;  %v10648_v48 = vcombine.high %v8402_v30, %v8409_v32  ;;  %v8446_v24 = vcombine.low %v8418_v46, %v8425_v47  ;;  %v10649_v16 = vcombine.high %v8418_v46, %v8425_v47 }
0x282b   : > { %11417 = vmatpush3.bf16.msra.mxu1 %v11732_v34 }
0x282c   : > { %v8437_v39 = vrot.slane %v8430_v23, %v12597_v31  ;;  %v8445_v40 = vrot.slane %v10648_v48, %v12597_v31  ;;  %v8453_v51 = vrot.slane %v8446_v24, %v12597_v31  ;;  %v8461_v53 = vrot.slane %v10649_v16, %v12597_v31  ;;  %11430 = vmatprep.subr.bf16.mxu1 %v12135_v0 }
0x282e   : > { %v8463_v18 = vcombine.high %v8437_v39, %v8445_v40  ;;  %v8479_v54 = vcombine.high %v8453_v51, %v8461_v53  ;;  %v8462_v27 = vcombine.low %v8437_v39, %v8445_v40  ;;  %v8478_v55 = vcombine.low %v8453_v51, %v8461_v53 }
0x2830   : > { %v8477_v56 = vrot.slane %v8463_v18, %v12600_v38  ;;  %v8493_v57 = vrot.slane %v8479_v54, %v12600_v38  ;;  %v8470_v58 = vrot.slane %v8462_v27, %v12600_v38  ;;  %v8486_v45 = vrot.slane %v8478_v55, %v12600_v38 }
0x2832   : > { %v8496_v52 = vcombine.low %v8477_v56, %v8493_v57  ;;  %v8495_v61 = vcombine.high %v8470_v58, %v8486_v45  ;;  %v8497_v21 = vcombine.high %v8477_v56, %v8493_v57  ;;  %v8494_v26 = vcombine.low %v8470_v58, %v8486_v45 }
0x2834   : > { %8503 = vrot.lane.b32.xlu1 %v8496_v52, %s14032_s22  ;;  %8499 = vrot.lane.b32.xlu0 %v8495_v61, %s14033_s18  ;;  %v10661_v61 = vld [vmem:[%s14051_s20 + $0x1] ss:$0 sm:$0xff] }
0x2838   : > { %8507 = vrot.lane.b32.xlu1 %v8497_v21, %s14034_s23 }
0x28a6   : > { %v8504_v62 = vpop.permute.xlu1 %8503  ;;  %v8500_v63 = vpop.permute.xlu0 %8499 }
0x28a7   : > { %v8510_v49 = vsel %vm2114_vm2, %v8494_v26, %v8500_v63 }
0x28a8   : > { %v8511_v2 = vsel %vm2685_vm4, %v8510_v49, %v8504_v62 }
0x28aa   : > { %v8508_v50 = vpop.permute.xlu1 %8507 }
0x28ab   : > { %v8512_v19 = vsel %vm2687_vm5, %v8511_v2, %v8508_v50  ;;  %v10662_v50 = vld [vmem:[%s14052_s21 + $0x1] ss:$0 sm:$0xff] }
0x28ac   : > { %v8513_v6 = vpack.c.bf16 %v8512_v19, %v8512_v19 }
0x28ae   : > { %11411 = vmatmul.mubr.msk.bf16.vlgmr.msra.gmra.mrb[132].mxu0 %vm1494_vm1, %v8513_v6 }
0x28af   : > { %11423 = vmatpush3.bf16.msra.mxu0 %v11729_v4  ;;  %11426 = vmatprep.mubr.msk.bf16.mxu0 %vm12136_vm0, %v12135_v0 }
0x28b0   : > { %11424 = vmatprep.subr.bf16.mxu0 %v12135_v0 }
0x28b3   : > { %11425 = vmatpush3.bf16.msra.mxu0 %v11730_v8 }
0x28b4   : > { %11438 = vmatprep.subr.bf16.mxu0 %v12135_v0 }
0x28b6   : > { %11427 = vmatmul.mubr.msk.bf16.vlgmr.msra.gmra.mrb[136].mxu0 %vm1494_vm1, %v13192_v3 }
0x28b7   : > { %11440 = vmatprep.mubr.msk.bf16.mxu0 %vm12136_vm0, %v12135_v0 }
0x2981   : > { %v8576_v43 = vpop.f32.mrb[132].mxu0 }
0x2982   : > { %v8577_v7 = vadd.f32 %v10655_v1, %v8576_v43  ;;  %v11412_v59 = vpop.f32.mrb[133].mxu0 }
0x2983   : > { %v8579_v9 = vpop.f32.mrb[134].mxu0 }
0x2984   : > { %v8582_v12 = vadd.f32 %v8577_v7, %v13418_v13  ;;  %v11413_v44 = vpop.f32.mrb[135].mxu0 }
0x2986   : > { %v8587_v60 = vsel %vm1494_vm1, %v8582_v12, 0.0 }
0x2987   : > { %8588 = vadd.xlane.f32.xlu0 %v8587_v60 }
0x2989   : > { %v8742_v14 = vpop.f32.mrb[136].mxu0 }
0x298a   : > { %v11428_v15 = vpop.f32.mrb[137].mxu0  ;;  %v8743_v28 = vadd.f32 %v10677_v22, %v8742_v14  ;;  %v11734_v22 = vld [vmem:[%s14053_s24 + $0x18] sm:$0xff]  }
0x298b   : > { %v8745_v17 = vpop.f32.mrb[138].mxu0 }
0x298c   : > { %v11429_v20 = vpop.f32.mrb[139].mxu0 }
0x299d   : > { %8964 = vrot.lane.b32.xlu0 %v8743_v28, %s14043_s1 }
0x29a1   : > { %8970 = vrot.lane.b32.xlu0 %v8743_v28, %s14044_s9 }
0x2a14   : > { %v8589_v10 = vpop.xlane.xlu0 %8588 }
0x2a15   : > { %v8590_v11 = vmul.f32 0.03125, %v8589_v10 }
0x2a17   : > { %v8591_v29 = vsub.f32 %v8582_v12, %v8590_v11  ;;  %v11733_v12 = vld [vmem:[%s14053_s24 + $0x10] sm:$0xff]  }
0x2a18   : > { %v8965_v35 = vpop.permute.xlu0 %8964 }
0x2a19   : > { %v8592_v13 = vmul.f32 %v8591_v29, %v8591_v29 }
0x2a1b   : > { %v8593_v5 = vsel %vm1494_vm1, %v8592_v13, 0.0 }
0x2a1c   : > { %8594 = vadd.xlane.f32.xlu1 %v8593_v5  ;;  %v8971_v36 = vpop.permute.xlu0 %8970 }
0x2a1d   : > { %v8989_v42 = vcombine.low %v8965_v35, %v8971_v36  ;;  %v8990_v30 = vcombine.high %v8965_v35, %v8971_v36 }
0x2a1f   : > { %v8997_v48 = vrot.slane %v8989_v42, %v12597_v31  ;;  %v9004_v24 = vrot.slane %v8990_v30, %v12597_v31 }
0x2a2d   : > { %8967 = vrot.lane.b32.xlu1 %v8743_v28, %s14042_s15 }
0x2aa9   : > { %v8595_v37 = vpop.xlane.xlu1 %8594 }
0x2aaa   : > { %v8596_v41 = vmul.f32 0.03125, %v8595_v37 }
0x2aac   : > { %v8597_v32 = vadd.f32 1e-05, %v8596_v41 }
0x2aad   : > { %v8968_v46 = vpop.permute.xlu1 %8967 }
0x2aae   : > { %11839 = vrsqrt.f32 %v8597_v32  ;;  %v8973_v47 = vcombine.low %v8743_v28, %v8968_v46  ;;  %v8974_v23 = vcombine.high %v8743_v28, %v8968_v46 }
0x2ab0   : > { %v8981_v16 = vrot.slane %v8973_v47, %v12597_v31  ;;  %v8988_v25 = vrot.slane %v8974_v23, %v12597_v31 }
0x2ab2   : > { %v9005_v39 = vcombine.low %v8981_v16, %v8997_v48  ;;  %v9006_v40 = vcombine.high %v8981_v16, %v8997_v48  ;;  %v9021_v51 = vcombine.low %v8988_v25, %v9004_v24  ;;  %v9022_v53 = vcombine.high %v8988_v25, %v9004_v24 }
0x2ab4   : > { %v9013_v18 = vrot.slane %v9005_v39, %v12600_v38  ;;  %v9020_v54 = vrot.slane %v9006_v40, %v12600_v38  ;;  %v9029_v27 = vrot.slane %v9021_v51, %v12600_v38  ;;  %v9036_v55 = vrot.slane %v9022_v53, %v12600_v38 }
0x2ab6   : > { %v9041_v56 = vcombine.low %v9013_v18, %v9020_v54  ;;  %v10692_v57 = vcombine.high %v9013_v18, %v9020_v54  ;;  %v9057_v58 = vcombine.low %v9029_v27, %v9036_v55  ;;  %v10693_v45 = vcombine.high %v9029_v27, %v9036_v55 }
0x2ab8   : > { %v11840_v52 = vpop.eup %11839  ;;  %v9048_v21 = vrot.slane %v9041_v56, %v12597_v31  ;;  %v9056_v26 = vrot.slane %v10692_v57, %v12597_v31  ;;  %v9064_v62 = vrot.slane %v9057_v58, %v12597_v31  ;;  %v9072_v63 = vrot.slane %v10693_v45, %v12597_v31 }
0x2ab9   : > { %v8599_v49 = vmul.f32 %v11840_v52, %v8591_v29  ;;  %v10668_v29 = vld [vmem:[%s14054_s25 + $0x1] ss:$0 sm:$0xff] }
0x2aba   : > { %v9073_v2 = vcombine.low %v9048_v21, %v9056_v26  ;;  %v9089_v19 = vcombine.low %v9064_v62, %v9072_v63  ;;  %v9074_v4 = vcombine.high %v9048_v21, %v9056_v26  ;;  %v9090_v6 = vcombine.high %v9064_v62, %v9072_v63 }
0x2abb   : > { %v8606_v8 = vmul.f32 %v10661_v61, %v8599_v49 }
0x2abc   : > { %v9081_v1 = vrot.slane %v9073_v2, %v12600_v38  ;;  %v9097_v43 = vrot.slane %v9089_v19, %v12600_v38  ;;  %v9088_v7 = vrot.slane %v9074_v4, %v12600_v38  ;;  %v9104_v59 = vrot.slane %v9090_v6, %v12600_v38 }
0x2abd   : > { %v13633_v9 = vadd.f32 %v10662_v50, %v8606_v8 }
0x2abe   : > { %v9105_v44 = vcombine.low %v9081_v1, %v9097_v43  ;;  %v13636_v60 = vcombine.low %v9088_v7, %v9104_v59  ;;  %v13638_v14 = vcombine.high %v9088_v7, %v9104_v59  ;;  %v9106_v28 = vcombine.high %v9081_v1, %v9097_v43 }
0x2abf   : > { %v8614_v15 = vpack.c.bf16 %v13633_v9, %v13633_v9 }
0x2ac0   : > { %v9109_v17 = vpack.c.bf16 %v9105_v44, %v9105_v44  ;;  %v9110_v10 = vpack.c.bf16 %v9106_v28, %v9106_v28  ;;  %v9111_v1 = vpack.c.bf16 %v13636_v60, %v13636_v60  ;;  %v9112_v43 = vpack.c.bf16 %v13638_v14, %v13638_v14 }
0x2ac1   : > { %11419 = vmatmul.mubr.msk.bf16.vlgmr.msra.gmra.mrb[128].mxu1 %vm1494_vm1, %v8614_v15 }
0x2ac2   : > { %11431 = vmatpush3.bf16.msra.mxu1 %v11733_v12  ;;  %v9267_v20 = vsel %vm2114_vm2, %v9109_v17, 0  ;;  %11434 = vmatprep.mubr.msk.bf16.mxu1 %vm12136_vm0, %v12135_v0  ;;  %v9313_v11 = vsel %vm2114_vm2, %v9110_v10, 0  ;;  %v9359_v15 = vsel %vm2114_vm2, %v9111_v1, 0  ;;  %v9405_v17 = vsel %vm2114_vm2, %v9112_v43, 0 }
0x2ac3   : > { %11439 = vmatpush3.bf16.xpose.msra.mxu0 %v9267_v20  ;;  %11432 = vmatprep.subr.bf16.mxu1 %v12135_v0 }
0x2ac4   : > { %11450 = vmatprep.subr.bf16.mxu0 %v12135_v0 }
0x2ac6   : > { %11433 = vmatpush3.bf16.msra.mxu1 %v11734_v22 }
0x2ac7   : > { %11444 = vmatprep.subr.bf16.mxu1 %v12135_v0 }
0x2ac9   : > { %11435 = vmatmul.mubr.msk.bf16.vlgmr.msra.gmra.mrb[132].mxu1 %vm1494_vm1, %v13192_v3 }
0x2aca   : > { %11446 = vmatprep.mubr.msk.bf16.mxu1 %vm12136_vm0, %v12135_v0 }
0x2acf   : > { %11445 = vmatpush3.bf16.xpose.msra.mxu1 %v9313_v11 }
0x2ad0   : > { %11456 = vmatprep.subr.bf16.mxu1 %v12135_v0 }
0x2b94   : > { %v8677_v13 = vpop.f32.mrb[128].mxu1 }
0x2b95   : > { %v8678_v5 = vadd.f32 %v10668_v29, %v8677_v13  ;;  %v11420_v33 = vpop.f32.mrb[129].mxu1 }
0x2b96   : > { %v8680_v34 = vpop.f32.mrb[130].mxu1 }
0x2b97   : > { %v11421_v35 = vpop.f32.mrb[131].mxu1  ;;  %8814 = vrot.lane.b32.xlu1 %v8678_v5, %s14043_s1  ;;  %8817 = vrot.lane.b32.xlu0 %v8678_v5, %s14042_s15 }
0x2b9b   : > { %8820 = vrot.lane.b32.xlu1 %v8678_v5, %s14044_s9 }
0x2b9c   : > { %v13660_v3 = vpop.f32.mrb[132].mxu1 }
0x2b9d   : > { %v11436_v36 = vpop.f32.mrb[133].mxu1 }
0x2b9e   : > { %v8810_v37 = vpop.f32.mrb[134].mxu1 }
0x2b9f   : > { %v11437_v41 = vpop.f32.mrb[135].mxu1 }
0x2c09   : > { %v8815_v42 = vpop.permute.xlu1 %8814  ;;  %v8818_v30 = vpop.permute.xlu0 %8817 }
0x2c0a   : > { %v8823_v32 = vcombine.low %v8678_v5, %v8818_v30  ;;  %v8824_v46 = vcombine.high %v8678_v5, %v8818_v30 }
0x2c0c   : > { %v8831_v24 = vrot.slane %v8823_v32, %v12597_v31  ;;  %v8838_v16 = vrot.slane %v8824_v46, %v12597_v31 }
0x2c0d   : > { %v8821_v47 = vpop.permute.xlu1 %8820 }
0x2c0e   : > { %v8839_v23 = vcombine.low %v8815_v42, %v8821_v47  ;;  %v8840_v48 = vcombine.high %v8815_v42, %v8821_v47 }
0x2c10   : > { %v8847_v25 = vrot.slane %v8839_v23, %v12597_v31  ;;  %v8854_v39 = vrot.slane %v8840_v48, %v12597_v31 }
0x2c12   : > { %v8855_v40 = vcombine.low %v8831_v24, %v8847_v25  ;;  %v8856_v51 = vcombine.high %v8831_v24, %v8847_v25  ;;  %v8871_v53 = vcombine.low %v8838_v16, %v8854_v39  ;;  %v8872_v18 = vcombine.high %v8838_v16, %v8854_v39 }
0x2c14   : > { %v8863_v54 = vrot.slane %v8855_v40, %v12600_v38  ;;  %v8870_v27 = vrot.slane %v8856_v51, %v12600_v38  ;;  %v8879_v55 = vrot.slane %v8871_v53, %v12600_v38  ;;  %v8886_v56 = vrot.slane %v8872_v18, %v12600_v38  ;;  %v10686_v51 = vld [vmem:[%s14055_s26 + $0x1] ss:$0 sm:$0xff] }
0x2c15   : > { %v8808_v53 = vadd.f32 %v10686_v51, %v13660_v3 }
0x2c16   : > { %v8891_v57 = vcombine.low %v8863_v54, %v8870_v27  ;;  %v10690_v58 = vcombine.high %v8863_v54, %v8870_v27  ;;  %v8907_v45 = vcombine.low %v8879_v55, %v8886_v56  ;;  %v10691_v52 = vcombine.high %v8879_v55, %v8886_v56 }
0x2c18   : > { %v8898_v61 = vrot.slane %v8891_v57, %v12597_v31  ;;  %v8906_v21 = vrot.slane %v10690_v58, %v12597_v31  ;;  %v8914_v26 = vrot.slane %v8907_v45, %v12597_v31  ;;  %v8922_v62 = vrot.slane %v10691_v52, %v12597_v31 }
0x2c1a   : > { %v8923_v63 = vcombine.low %v8898_v61, %v8906_v21  ;;  %v8939_v49 = vcombine.low %v8914_v26, %v8922_v62  ;;  %v8924_v50 = vcombine.high %v8898_v61, %v8906_v21  ;;  %v8940_v2 = vcombine.high %v8914_v26, %v8922_v62 }
0x2c1c   : > { %v8931_v19 = vrot.slane %v8923_v63, %v12600_v38  ;;  %v8947_v4 = vrot.slane %v8939_v49, %v12600_v38  ;;  %v8938_v12 = vrot.slane %v8924_v50, %v12600_v38  ;;  %v8954_v44 = vrot.slane %v8940_v2, %v12600_v38 }
0x2c1e   : > { %v8955_v6 = vcombine.low %v8931_v19, %v8947_v4  ;;  %v8956_v8 = vcombine.high %v8931_v19, %v8947_v4  ;;  %v8957_v60 = vcombine.low %v8938_v12, %v8954_v44  ;;  %v8958_v14 = vcombine.high %v8938_v12, %v8954_v44 }
0x2c20   : > { %v8959_v7 = vpack.c.bf16 %v8955_v6, %v8955_v6  ;;  %v8960_v59 = vpack.c.bf16 %v8956_v8, %v8956_v8  ;;  %v8961_v20 = vpack.c.bf16 %v8957_v60, %v8957_v60  ;;  %v8962_v22 = vpack.c.bf16 %v8958_v14, %v8958_v14 }
0x2c22   : > { %11441 = vmatmul.mubr.msk.bf16.vlgmr.msra.gmra.mrb[140].mxu0 %vm2114_vm2, %v8959_v7  ;;  %11447 = vmatmul.mubr.msk.bf16.vlgmr.msra.gmra.mrb[136].mxu1 %vm2114_vm2, %v8960_v59 }
0x2c23   : > { %11451 = vmatpush3.bf16.xpose.msra.mxu0 %v9359_v15  ;;  %11457 = vmatpush3.bf16.xpose.msra.mxu1 %v9405_v17 }
0x2c24   : > { %11452 = vmatprep.mubr.msk.bf16.mxu0 %vm12136_vm0, %v12135_v0  ;;  %11458 = vmatprep.mubr.msk.bf16.mxu1 %vm12136_vm0, %v12135_v0 }
0x2c25   : > { %11462 = vmatprep.subr.bf16.mxu0 %v12135_v0  ;;  %11468 = vmatprep.subr.bf16.mxu1 %v12135_v0 }
0x2c2a   : > { %11453 = vmatmul.mubr.msk.bf16.vlgmr.msra.gmra.mrb[144].mxu0 %vm2114_vm2, %v8961_v20  ;;  %11459 = vmatmul.mubr.msk.bf16.vlgmr.msra.gmra.mrb[140].mxu1 %vm2114_vm2, %v8962_v22 }
0x2c2b   : > { %11464 = vmatprep.mubr.msk.bf16.mxu0 %vm12136_vm0, %v12135_v0  ;;  %11470 = vmatprep.mubr.msk.bf16.mxu1 %vm12136_vm0, %v12135_v0 }
0x2cf5   : > { %v9303_v28 = vpop.f32.mrb[140].mxu0  ;;  %v9349_v10 = vpop.f32.mrb[136].mxu1 }
0x2cf6   : > { %v9447_v11 = vmul.f32 0.35355338, %v9303_v28  ;;  %v9448_v29 = vmul.f32 0.35355338, %v9349_v10  ;;  %v11442_v13 = vpop.f32.mrb[141].mxu0  ;;  %v11448_v5 = vpop.f32.mrb[137].mxu1 }
0x2cf7   : > { %v9306_v33 = vpop.f32.mrb[142].mxu0  ;;  %v9352_v34 = vpop.f32.mrb[138].mxu1 }
0x2cf8   : > { %v11443_v35 = vpop.f32.mrb[143].mxu0  ;;  %v11449_v36 = vpop.f32.mrb[139].mxu1  ;;  %v9454_v37 = vsel %vm2114_vm2, %v9448_v29, -inf  ;;  %v9451_v41 = vsel %vm2114_vm2, %v9447_v11, -inf }
0x2cf9   : > { %9455 = vmax.xlane.f32.xlu1 %v9454_v37  ;;  %9452 = vmax.xlane.f32.xlu0 %v9451_v41 }
0x2cfd   : > { %v9395_v42 = vpop.f32.mrb[144].mxu0  ;;  %v9441_v30 = vpop.f32.mrb[140].mxu1 }
0x2cfe   : > { %v9449_v32 = vmul.f32 0.35355338, %v9395_v42  ;;  %v11454_v46 = vpop.f32.mrb[145].mxu0  ;;  %v11460_v47 = vpop.f32.mrb[141].mxu1  ;;  %v9450_v24 = vmul.f32 0.35355338, %v9441_v30 }
0x2cff   : > { %v9398_v23 = vpop.f32.mrb[146].mxu0  ;;  %v9444_v48 = vpop.f32.mrb[142].mxu1 }
0x2d00   : > { %v11455_v16 = vpop.f32.mrb[147].mxu0  ;;  %v11461_v25 = vpop.f32.mrb[143].mxu1  ;;  %v9457_v39 = vsel %vm2114_vm2, %v9449_v32, -inf  ;;  %v9460_v40 = vsel %vm2114_vm2, %v9450_v24, -inf }
0x2d01   : > { %9458 = vmax.xlane.f32.xlu0 %v9457_v39 }
0x2d05   : > { %9461 = vmax.xlane.f32.xlu0 %v9460_v40 }
0x2d0a   : > { %9114 = vrot.lane.b32.xlu1 %v8808_v53, %s14043_s1  ;;  %s1451_s1 = sand.u32 1, %s12072_s16  }
0x2d0b   : > { %s10200_s4 = scalar_lea.sflag [#allocation4], %s1451_s1 }
0x2d86   : > { %v9456_v18 = vpop.xlane.xlu1 %9455  ;;  %v9453_v54 = vpop.xlane.xlu0 %9452 }
0x2d87   : > { %v9464_v27 = vsub.f32 %v9448_v29, %v9456_v18  ;;  %v9463_v55 = vsub.f32 %v9447_v11, %v9453_v54 }
0x2d89   : > { %v9469_v56 = vmul.f32 1.442695, %v9464_v27  ;;  %v9467_v57 = vmul.f32 1.442695, %v9463_v55 }
0x2d8a   : > { %v9115_v6 = vpop.permute.xlu1 %9114 }
0x2d8b   : > { %11841 = vpow2.f32 %v9469_v56 }
0x2d8c   : > { %11843 = vpow2.f32 %v9467_v57 }
0x2d8e   : > { %v9459_v61 = vpop.xlane.xlu0 %9458 }
0x2d8f   : > { %v9465_v62 = vsub.f32 %v9449_v32, %v9459_v61 }
0x2d91   : > { %v9471_v49 = vmul.f32 1.442695, %v9465_v62 }
0x2d92   : > { %v9462_v21 = vpop.xlane.xlu0 %9461 }
0x2d93   : > { %v9466_v26 = vsub.f32 %v9450_v24, %v9462_v21 }
0x2d95   : > { %v13705_v58 = vpop.eup %11841  ;;  %v9473_v63 = vmul.f32 1.442695, %v9466_v26 }
0x2d96   : > { %v13707_v45 = vpop.eup %11843  ;;  %v9478_v52 = vsel %vm2114_vm2, %v13705_v58, 0.0 }
0x2d97   : > { %v9475_v3 = vsel %vm2114_vm2, %v13707_v45, 0.0  ;;  %9479 = vadd.xlane.f32.xlu0 %v9478_v52  ;;  %11845 = vpow2.f32 %v9473_v63 }
0x2d98   : > { %9476 = vadd.xlane.f32.xlu1 %v9475_v3  ;;  %11847 = vpow2.f32 %v9471_v49 }
0x2da1   : > { %v13715_v50 = vpop.eup %11845 }
0x2da2   : > { %v13717_v2 = vpop.eup %11847  ;;  %v9484_v19 = vsel %vm2114_vm2, %v13715_v50, 0.0 }
0x2da3   : > { %v9481_v4 = vsel %vm2114_vm2, %v13717_v2, 0.0 }
0x2da9   : > { %9120 = vrot.lane.b32.xlu1 %v8808_v53, %s14044_s9  ;;  %s14062_s9 = sld [smem:[#allocation62_spill]] }
0x2dad   : > { %9117 = vrot.lane.b32.xlu0 %v8808_v53, %s14042_s15 }
0x2dcc   : > { %9485 = vadd.xlane.f32.xlu0 %v9484_v19 }
0x2dcd   : > { %9482 = vadd.xlane.f32.xlu1 %v9481_v4 }
0x2e24   : > { %v9480_v8 = vpop.xlane.xlu0 %9479 }
0x2e25   : > { %v9477_v1 = vpop.xlane.xlu1 %9476  ;;  %11849 = vrcp.f32 %v9480_v8 }
0x2e26   : > { %11851 = vrcp.f32 %v9477_v1 }
0x2e28   : > { %v9118_v43 = vpop.permute.xlu0 %9117 }
0x2e29   : > { %v9121_v7 = vpop.permute.xlu1 %9120  ;;  %v9123_v59 = vcombine.low %v8808_v53, %v9118_v43  ;;  %v9124_v12 = vcombine.high %v8808_v53, %v9118_v43 }
0x2e2a   : > { %v9139_v44 = vcombine.low %v9115_v6, %v9121_v7  ;;  %v9140_v15 = vcombine.high %v9115_v6, %v9121_v7 }
0x2e2b   : > { %v9131_v17 = vrot.slane %v9123_v59, %v12597_v31  ;;  %v9138_v60 = vrot.slane %v9124_v12, %v12597_v31 }
0x2e2c   : > { %v9147_v14 = vrot.slane %v9139_v44, %v12597_v31  ;;  %v9154_v20 = vrot.slane %v9140_v15, %v12597_v31 }
0x2e2e   : > { %v9155_v22 = vcombine.low %v9131_v17, %v9147_v14  ;;  %v9156_v28 = vcombine.high %v9131_v17, %v9147_v14  ;;  %v9171_v10 = vcombine.low %v9138_v60, %v9154_v20  ;;  %v9172_v11 = vcombine.high %v9138_v60, %v9154_v20 }
0x2e2f   : > { %v11850_v25 = vpop.eup %11849 }
0x2e30   : > { %v9163_v29 = vrot.slane %v9155_v22, %v12600_v38  ;;  %v9170_v13 = vrot.slane %v9156_v28, %v12600_v38  ;;  %v9179_v5 = vrot.slane %v9171_v10, %v12600_v38  ;;  %v9186_v33 = vrot.slane %v9172_v11, %v12600_v38  ;;  %v11852_v51 = vpop.eup %11851 }
0x2e31   : > { %v9491_v55 = vmul.f32 %v11852_v51, %v13707_v45  ;;  %v9492_v56 = vmul.f32 %v11850_v25, %v13705_v58 }
0x2e32   : > { %v9191_v34 = vcombine.low %v9163_v29, %v9170_v13  ;;  %v10694_v35 = vcombine.high %v9163_v29, %v9170_v13  ;;  %v9207_v36 = vcombine.low %v9179_v5, %v9186_v33  ;;  %v10695_v37 = vcombine.high %v9179_v5, %v9186_v33 }
0x2e33   : > { %v9495_v62 = vpack.c.bf16 %v9491_v55, %v9491_v55  ;;  %v9496_v63 = vpack.c.bf16 %v9492_v56, %v9492_v56 }
0x2e34   : > { %v9198_v41 = vrot.slane %v9191_v34, %v12597_v31  ;;  %v9206_v42 = vrot.slane %v10694_v35, %v12597_v31  ;;  %v9214_v30 = vrot.slane %v9207_v36, %v12597_v31  ;;  %v9222_v32 = vrot.slane %v10695_v37, %v12597_v31 }
0x2e36   : > { %v9223_v46 = vcombine.low %v9198_v41, %v9206_v42  ;;  %v9224_v47 = vcombine.high %v9198_v41, %v9206_v42  ;;  %v9239_v23 = vcombine.low %v9214_v30, %v9222_v32  ;;  %v9240_v48 = vcombine.high %v9214_v30, %v9222_v32 }
0x2e38   : > { %v9231_v24 = vrot.slane %v9223_v46, %v12600_v38  ;;  %v9238_v16 = vrot.slane %v9224_v47, %v12600_v38  ;;  %v9247_v39 = vrot.slane %v9239_v23, %v12600_v38  ;;  %v9254_v40 = vrot.slane %v9240_v48, %v12600_v38  ;;  %v11735_v23 = vld [vmem:[%s14056_s27 + $0x10] sm:$0xff]  }
0x2e3a   : > { %v9255_v53 = vcombine.low %v9231_v24, %v9247_v39  ;;  %v9256_v18 = vcombine.high %v9231_v24, %v9247_v39  ;;  %v9257_v54 = vcombine.low %v9238_v16, %v9254_v40  ;;  %v9258_v27 = vcombine.high %v9238_v16, %v9254_v40 }
0x2e3c   : > { %v9259_v57 = vpack.c.bf16 %v9255_v53, %v9255_v53  ;;  %v9260_v52 = vpack.c.bf16 %v9256_v18, %v9256_v18  ;;  %v9261_v21 = vpack.c.bf16 %v9257_v54, %v9257_v54  ;;  %v9262_v26 = vpack.c.bf16 %v9258_v27, %v9258_v27  ;;  %v11736_v18 = vld [vmem:[%s14056_s27 + $0x18] sm:$0xff]  }
0x2e3e   : > { %v9503_v3 = vsel %vm2354_vm3, %v9259_v57, 0  ;;  %v9549_v61 = vsel %vm2354_vm3, %v9260_v52, 0  ;;  %v9595_v58 = vsel %vm2354_vm3, %v9261_v21, 0  ;;  %v9641_v45 = vsel %vm2354_vm3, %v9262_v26, 0 }
0x2e3f   : > { %11463 = vmatpush3.bf16.msra.mxu0 %v9503_v3  ;;  %11469 = vmatpush3.bf16.msra.mxu1 %v9549_v61 }
0x2e40   : > { %11474 = vmatprep.subr.bf16.mxu0 %v12135_v0  ;;  %11480 = vmatprep.subr.bf16.mxu1 %v12135_v0 }
0x2e42   : > { %11465 = vmatmul.mubr.msk.bf16.vlgmr.msra.gmra.mrb[148].mxu0 %vm2114_vm2, %v9495_v62  ;;  %11471 = vmatmul.mubr.msk.bf16.vlgmr.msra.gmra.mrb[144].mxu1 %vm2114_vm2, %v9496_v63 }
0x2e43   : > { %11475 = vmatpush3.bf16.msra.mxu0 %v9595_v58  ;;  %11481 = vmatpush3.bf16.msra.mxu1 %v9641_v45 }
0x2e44   : > { %11476 = vmatprep.mubr.msk.bf16.mxu0 %vm12136_vm0, %v12135_v0  ;;  %11482 = vmatprep.mubr.msk.bf16.mxu1 %vm12136_vm0, %v12135_v0 }
0x2e45   : > { %11486 = vmatprep.subr.bf16.mxu0 %v12135_v0  ;;  %11494 = vmatprep.subr.bf16.mxu1 %v12135_v0 }
0x2e59   : > { %v9486_v49 = vpop.xlane.xlu0 %9485 }
0x2e5a   : > { %v9483_v19 = vpop.xlane.xlu1 %9482  ;;  %11853 = vrcp.f32 %v9486_v49 }
0x2e5b   : > { %11855 = vrcp.f32 %v9483_v19 }
0x2e64   : > { %v11854_v4 = vpop.eup %11853 }
0x2e65   : > { %v11856_v6 = vpop.eup %11855  ;;  %v9494_v8 = vmul.f32 %v11854_v4, %v13715_v50 }
0x2e66   : > { %v9493_v1 = vmul.f32 %v11856_v6, %v13717_v2 }
0x2e67   : > { %v9498_v43 = vpack.c.bf16 %v9494_v8, %v9494_v8 }
0x2e68   : > { %v9497_v7 = vpack.c.bf16 %v9493_v1, %v9493_v1 }
0x2e69   : > { %11483 = vmatmul.mubr.msk.bf16.vlgmr.msra.gmra.mrb[148].mxu1 %vm2114_vm2, %v9498_v43 }
0x2e6a   : > { %11477 = vmatmul.mubr.msk.bf16.vlgmr.msra.gmra.mrb[152].mxu0 %vm2114_vm2, %v9497_v7  ;;  %11498 = vmatprep.mubr.msk.bf16.mxu1 %vm12136_vm0, %v12135_v0  ;;  %v10711_v7 = vld [vmem:[%s14057_s28 + $0x1] ss:$0 sm:$0xff] }
0x2e6b   : > { %11490 = vmatprep.mubr.msk.bf16.mxu0 %vm12136_vm0, %v12135_v0  ;;  %11487 = vmatpush3.bf16.msra.mxu0 %v11735_v23 }
0x2e6c   : > { %11488 = vmatprep.subr.bf16.mxu0 %v12135_v0 }
0x2e6f   : > { %11489 = vmatpush3.bf16.msra.mxu0 %v11736_v18 }
0x2e70   : > { %11502 = vmatprep.subr.bf16.mxu0 %v12135_v0 }
0x2f15   : > { %v9539_v59 = vpop.f32.mrb[148].mxu0  ;;  %v9585_v12 = vpop.f32.mrb[144].mxu1 }
0x2f16   : > { %v11466_v44 = vpop.f32.mrb[149].mxu0  ;;  %v11472_v15 = vpop.f32.mrb[145].mxu1 }
0x2f17   : > { %v9542_v17 = vpop.f32.mrb[150].mxu0  ;;  %v9588_v50 = vpop.f32.mrb[146].mxu1 }
0x2f18   : > { %v11467_v60 = vpop.f32.mrb[151].mxu0  ;;  %v11473_v2 = vpop.f32.mrb[147].mxu1 }
0x2f3c   : > { %v9677_v14 = vpop.f32.mrb[148].mxu1 }
0x2f3d   : > { %v9631_v20 = vpop.f32.mrb[152].mxu0  ;;  %v9699_v22 = vcombine.low %v9585_v12, %v9677_v14  ;;  %v9700_v28 = vcombine.high %v9585_v12, %v9677_v14  ;;  %v11484_v10 = vpop.f32.mrb[149].mxu1 }
0x2f3e   : > { %v9683_v11 = vcombine.low %v9539_v59, %v9631_v20  ;;  %v9684_v29 = vcombine.high %v9539_v59, %v9631_v20  ;;  %v11478_v13 = vpop.f32.mrb[153].mxu0  ;;  %v9680_v5 = vpop.f32.mrb[150].mxu1  ;;  %v11737_v10 = vld [vmem:[%s14058_s29 + $0x10] sm:$0xff]  }
0x2f3f   : > { %v9707_v33 = vrot.slane %v9699_v22, %v12597_v31  ;;  %v9714_v34 = vrot.slane %v9700_v28, %v12597_v31  ;;  %v9634_v35 = vpop.f32.mrb[154].mxu0  ;;  %v11485_v36 = vpop.f32.mrb[151].mxu1  ;;  %11495 = vmatpush3.bf16.msra.mxu1 %v11737_v10 }
0x2f40   : > { %v9691_v37 = vrot.slane %v9683_v11, %v12597_v31  ;;  %v9698_v41 = vrot.slane %v9684_v29, %v12597_v31  ;;  %v11479_v42 = vpop.f32.mrb[155].mxu0  ;;  %v11738_v11 = vld [vmem:[%s14058_s29 + $0x18] sm:$0xff]   ;;  %11496 = vmatprep.subr.bf16.mxu1 %v12135_v0  ;;  %v11740_v29 = vld [vmem:[%s14059_s30 + $0x28] sm:$0xff]   ;;  %v10715_v35 = vld [vmem:[#allocation2 + $0x1] ss:$0 sm:$0xff] }
0x2f42   : > { %v9715_v30 = vcombine.low %v9691_v37, %v9707_v33  ;;  %v9716_v32 = vcombine.high %v9691_v37, %v9707_v33  ;;  %v9731_v46 = vcombine.low %v9698_v41, %v9714_v34  ;;  %v9732_v47 = vcombine.high %v9698_v41, %v9714_v34  ;;  %v10716_v37 = vld [vmem:[#allocation5 + $0x1] ss:$0 sm:$0xff] }
0x2f43   : > { %11497 = vmatpush3.bf16.msra.mxu1 %v11738_v11 }
0x2f44   : > { %v9723_v48 = vrot.slane %v9715_v30, %v12600_v38  ;;  %v9730_v24 = vrot.slane %v9716_v32, %v12600_v38  ;;  %v9739_v16 = vrot.slane %v9731_v46, %v12600_v38  ;;  %v9746_v25 = vrot.slane %v9732_v47, %v12600_v38  ;;  %11514 = vmatprep.subr.bf16.mxu1 %v12135_v0  ;;  %v11741_v32 = vld [vmem:[%s14059_s30 + $0x30] sm:$0xff]   ;;  %v11742_v46 = vld [vmem:[%s14059_s30 + $0x38] sm:$0xff]   ;;  %v10722_v47 = vld [vmem:[%s14060_s7 + $0x1] ss:$0 sm:$0xff] }
0x2f46   : > { %v9751_v39 = vcombine.low %v9723_v48, %v9730_v24  ;;  %v10704_v40 = vcombine.high %v9723_v48, %v9730_v24  ;;  %v9767_v51 = vcombine.low %v9739_v16, %v9746_v25  ;;  %v10705_v53 = vcombine.high %v9739_v16, %v9746_v25 }
0x2f48   : > { %v9758_v54 = vrot.slane %v9751_v39, %v12597_v31  ;;  %v9766_v27 = vrot.slane %v10704_v40, %v12597_v31  ;;  %v9774_v55 = vrot.slane %v9767_v51, %v12597_v31  ;;  %v9782_v56 = vrot.slane %v10705_v53, %v12597_v31  ;;  %v10735_v51 = vld [vmem:[%s14061_s19 + $0x1] ss:$0 sm:$0xff] }
0x2f4a   : > { %v9784_v57 = vcombine.high %v9758_v54, %v9766_v27  ;;  %v9800_v52 = vcombine.high %v9774_v55, %v9782_v56  ;;  %v9783_v3 = vcombine.low %v9758_v54, %v9766_v27  ;;  %v9799_v61 = vcombine.low %v9774_v55, %v9782_v56 }
0x2f4c   : > { %v9798_v21 = vrot.slane %v9784_v57, %v12600_v38  ;;  %v9814_v26 = vrot.slane %v9800_v52, %v12600_v38  ;;  %v9791_v62 = vrot.slane %v9783_v3, %v12600_v38  ;;  %v9807_v63 = vrot.slane %v9799_v61, %v12600_v38 }
0x2f4e   : > { %v9817_v58 = vcombine.low %v9798_v21, %v9814_v26  ;;  %v9816_v45 = vcombine.high %v9791_v62, %v9807_v63  ;;  %v9818_v49 = vcombine.high %v9798_v21, %v9814_v26  ;;  %v9815_v31 = vcombine.low %v9791_v62, %v9807_v63  ;;  %v11743_v62 = vld [vmem:[%s13987_s6] sm:$0xff]   ;;  %v11744_v63 = vld [vmem:[%s13987_s6 + $0x8] sm:$0xff]   ;;  %s12146_s6 = smov [#allocation11]  }
0x2f50   : > { %9824 = vrot.lane.b32.xlu1 %v9817_v58, %s14032_s22  ;;  %9820 = vrot.lane.b32.xlu0 %v9816_v45, %s14033_s18  ;;  %s10394_s22 = sshll.u32 %s1451_s1, 3  ;;  %s10748_s18 = sshll.u32 %s12408_s0, 7 }
0x2f51   : > { %s1453_s15 = scalar_lea.vmem [#allocation11], %s10394_s22  ;;  %s13822_s3 = scalar_lea.hbm %s14062_s9, %s10748_s18 }
0x2f52   : > { %s10213_s2 = sshll.u32 %s1453_s15, 4  ;;  %s12010_s0 = sshll.u32 %s12146_s6, 4  ;;  %s13824_s2 = int_to_ptr.vmem [resolvable:$true] %s10213_s2  ;;  %s12011_s0 = int_to_ptr.vmem [resolvable:$false] %s12010_s0 }
0x2f53   : > { %s12006_s5 = scalar_lea.vmem %s13824_s2, 128  ;;  %s12012_s22 = scalar_lea.vmem %s12011_s0, 256 }
0x2f54   : > { %9828 = vrot.lane.b32.xlu1 %v9818_v49, %s14034_s23  ;;  %s14063_s23 = sld [smem:[#allocation68_spill]]  ;;  %p12007_p2 = scmp.ne.s32.totalorder %s13824_s2, %s12006_s5 }
0x2f55   : > { %p12013_p8 = scmp.lt.s32.totalorder %s13824_s2, %s12011_s0  ;;  %p12014_p11 = scmp.lt.s32.totalorder %s12012_s22, %s12006_s5 }
0x2f57   : > { %p12015_p13 = por %p12014_p11, %p12013_p8 }
0x2f5a   : > { %p14064_p3 = scmp.ne.s32.totalorder %s14063_s23, 0 }
0x2f5c   : > { %p12008_p4 = pnand %p12007_p2, %p14064_p3 }
0x2f5e   : > { %p12009_p7 = pneg %p12008_p4 }
0x2f60   : > { %p12016_p6 = pnand %p12015_p13, %p12009_p7 }
0x2fc2   : > { %v9825_v19 = vpop.permute.xlu1 %9824  ;;  %v9821_v4 = vpop.permute.xlu0 %9820 }
0x2fc3   : > { %v9831_v6 = vsel %vm2114_vm2, %v9815_v31, %v9821_v4 }
0x2fc4   : > { %v9832_v1 = vsel %vm2685_vm4, %v9831_v6, %v9825_v19  ;;  %v10741_v19 = vld [vmem:[#allocation7 + $0x1] ss:$0 sm:$0xff]  ;;  %v10742_v6 = vld [vmem:[#allocation8 + $0x1] ss:$0 sm:$0xff] }
0x2fc6   : > { %v9829_v8 = vpop.permute.xlu1 %9828 }
0x2fc7   : > { %v9833_v38 = vsel %vm2687_vm5, %v9832_v1, %v9829_v8 }
0x2fc8   : > { %v9834_v43 = vpack.c.bf16 %v9833_v38, %v9833_v38 }
0x2fca   : > { %11491 = vmatmul.mubr.msk.bf16.vlgmr.msra.gmra.mrb[156].mxu0 %vm1494_vm1, %v9834_v43  ;;  %v10743_v43 = vld [vmem:[#allocation10] ss:$0 sm:$0xff] }
0x2fcb   : > { %11510 = vmatprep.mubr.msk.bf16.mxu0 %vm12136_vm0, %v12135_v0 }
0x309d   : > { %v9897_v59 = vpop.f32.mrb[156].mxu0 }
0x309e   : > { %v9898_v12 = vadd.f32 %v10711_v7, %v9897_v59  ;;  %v11492_v44 = vpop.f32.mrb[157].mxu0 }
0x309f   : > { %v9900_v15 = vpop.f32.mrb[158].mxu0 }
0x30a0   : > { %v9903_v17 = vadd.f32 %v9898_v12, %v13633_v9  ;;  %v11493_v50 = vpop.f32.mrb[159].mxu0  ;;  %v11739_v9 = vld [vmem:[%s14059_s30 + $0x20] sm:$0xff]  }
0x30a1   : > { %11503 = vmatpush3.bf16.msra.mxu0 %v11739_v9 }
0x30a2   : > { %v9908_v60 = vsel %vm1494_vm1, %v9903_v17, 0.0  ;;  %11504 = vmatprep.subr.bf16.mxu0 %v12135_v0 }
0x30a3   : > { %9909 = vadd.xlane.f32.xlu0 %v9908_v60 }
0x30a5   : > { %11505 = vmatpush3.bf16.msra.mxu0 %v11740_v29 }
0x30a6   : > { %11506 = vmatprep.subr.bf16.mxu0 %v12135_v0 }
0x30a9   : > { %11507 = vmatpush3.bf16.msra.mxu0 %v11741_v32 }
0x30aa   : > { %11508 = vmatprep.subr.bf16.mxu0 %v12135_v0 }
0x30ad   : > { %11509 = vmatpush3.bf16.msra.mxu0 %v11742_v46 }
0x3130   : > { %v9910_v2 = vpop.xlane.xlu0 %9909 }
0x3131   : > { %v9911_v14 = vmul.f32 0.03125, %v9910_v2 }
0x3133   : > { %v9912_v20 = vsub.f32 %v9903_v17, %v9911_v14 }
0x3135   : > { %v9913_v22 = vmul.f32 %v9912_v20, %v9912_v20 }
0x3137   : > { %v9914_v28 = vsel %vm1494_vm1, %v9913_v22, 0.0 }
0x3138   : > { %9915 = vadd.xlane.f32.xlu1 %v9914_v28 }
0x31c5   : > { %v9916_v13 = vpop.xlane.xlu1 %9915 }
0x31c6   : > { %v9917_v5 = vmul.f32 0.03125, %v9916_v13 }
0x31c8   : > { %v9918_v33 = vadd.f32 1e-05, %v9917_v5 }
0x31ca   : > { %11857 = vrsqrt.f32 %v9918_v33 }
0x31d4   : > { %v11858_v34 = vpop.eup %11857 }
0x31d5   : > { %v9920_v36 = vmul.f32 %v11858_v34, %v9912_v20 }
0x31d7   : > { %v9927_v41 = vmul.f32 %v10715_v35, %v9920_v36 }
0x31d9   : > { %v9934_v42 = vadd.f32 %v10716_v37, %v9927_v41 }
0x31db   : > { %v9935_v30 = vpack.c.bf16 %v9934_v42, %v9934_v42 }
0x31dd   : > { %11499 = vmatmul.mubr.msk.bf16.vlgmr.msra.gmra.mrb[152].mxu1 %vm1494_vm1, %v9935_v30 }
0x31de   : > { %11518 = vmatprep.mubr.msk.bf16.mxu1 %vm12136_vm0, %v12135_v0  ;;  %11515 = vmatpush3.bf16.msra.mxu1 %v11743_v62 }
0x31df   : > { %11516 = vmatprep.subr.bf16.mxu1 %v12135_v0 }
0x31e2   : > { %11517 = vmatpush3.bf16.msra.mxu1 %v11744_v63 }
0x32b0   : > { %v9998_v23 = vpop.f32.mrb[152].mxu1 }
0x32b1   : > { %v9999_v48 = vadd.f32 %v10722_v47, %v9998_v23  ;;  %v11500_v24 = vpop.f32.mrb[153].mxu1 }
0x32b2   : > { %v10001_v16 = vpop.f32.mrb[154].mxu1 }
0x32b3   : > { %v10004_v25 = vmax.f32 %v9999_v48, 0.0  ;;  %v11501_v39 = vpop.f32.mrb[155].mxu1 }
0x32b5   : > { %v10005_v40 = vpack.c.bf16 %v10004_v25, %v10004_v25 }
0x32b7   : > { %11511 = vmatmul.mubr.msk.bf16.vlgmr.msra.gmra.mrb[160].mxu0 %vm2895_vm6, %v10005_v40 }
0x338a   : > { %v10084_v53 = vpop.f32.mrb[160].mxu0 }
0x338b   : > { %v10085_v18 = vadd.f32 %v10735_v51, %v10084_v53  ;;  %v11512_v54 = vpop.f32.mrb[161].mxu0 }
0x338c   : > { %v10087_v27 = vpop.f32.mrb[162].mxu0 }
0x338d   : > { %v10090_v55 = vadd.f32 %v10085_v18, %v9934_v42  ;;  %v11513_v56 = vpop.f32.mrb[163].mxu0 }
0x338f   : > { %v10095_v57 = vsel %vm1494_vm1, %v10090_v55, 0.0 }
0x3390   : > { %10096 = vadd.xlane.f32.xlu0 %v10095_v57 }
0x341d   : > { %v10097_v52 = vpop.xlane.xlu0 %10096 }
0x341e   : > { %v10098_v3 = vmul.f32 0.03125, %v10097_v52 }
0x3420   : > { %v10099_v61 = vsub.f32 %v10090_v55, %v10098_v3 }
0x3422   : > { %v10100_v21 = vmul.f32 %v10099_v61, %v10099_v61 }
0x3424   : > { %v10101_v26 = vsel %vm1494_vm1, %v10100_v21, 0.0 }
0x3425   : > { %10102 = vadd.xlane.f32.xlu0 %v10101_v26 }
0x34b2   : > { %v10103_v58 = vpop.xlane.xlu0 %10102 }
0x34b3   : > { %v10104_v45 = vmul.f32 0.03125, %v10103_v58 }
0x34b5   : > { %v10105_v49 = vadd.f32 1e-05, %v10104_v45 }
0x34b7   : > { %11859 = vrsqrt.f32 %v10105_v49 }
0x34c1   : > { %v11860_v31 = vpop.eup %11859 }
0x34c2   : > { %v10107_v4 = vmul.f32 %v11860_v31, %v10099_v61 }
0x34c4   : > { %v10114_v8 = vmul.f32 %v10741_v19, %v10107_v4 }
0x34c6   : > { %v10121_v1 = vadd.f32 %v10742_v6, %v10114_v8 }
0x34c8   : > { %v10122_v38 = vpack.c.bf16 %v10121_v1, %v10121_v1 }
0x34ca   : > { %11519 = vmatmul.mubr.msk.bf16.vlgmr.msra.gmra.mrb[156].mxu1 %vm1494_vm1, %v10122_v38 }
0x359d   : > { %v10183_v7 = vpop.f32.mrb[156].mxu1 }
0x359e   : > { %v10184_v59 = vadd.f32 %v10743_v43, %v10183_v7  ;;  %v11520_v0 = vpop.f32.mrb[157].mxu1 }
0x359f   : > { %v10186_v12 = vpop.f32.mrb[158].mxu1 }
0x35a0   : > { %10189 = vmax.xlane.f32.xlu1 %v10184_v59  ;;  %v11521_v44 = vpop.f32.mrb[159].mxu1 }
0x362d   : > { %v10190_v15 = vpop.xlane.xlu1 %10189 }
0x362e   : > { %v10191_v17 = vsub.f32 %v10184_v59, %v10190_v15 }
0x3630   : > { %v10192_v50 = vmul.f32 1.442695, %v10191_v17 }
0x3632   : > { %11861 = vpow2.f32 %v10192_v50 }
0x363c   : > { %v11862_v60 = vpop.eup %11861 }
0x363d   : > { %10194 = vadd.xlane.f32.xlu0 %v11862_v60 }
0x36ca   : > { %v10195_v2 = vpop.xlane.xlu0 %10194 }
0x36cb   : > { %11863 = vrcp.f32 %v10195_v2 }
0x36d5   : > { %v11864_v14 = vpop.eup %11863 }
0x36d6   : > { %v10197_v20 = vmul.f32 %v11864_v14, %v11862_v60 }
0x36d8   : > { %10198 = vst [vmem:[%s1453_s15] sm:$0xff] %v10197_v20 }
0x36d9   : > { %12019 = shalt.err (!%p12016_p6)
}
0x36da   : > { %s12020_s1 = scalar_lea.hbm %s13822_s3, 128  ;;  %s12024_s6 = scalar_lea.hbm %s14062_s9, 256 }
0x36db   : > { %p12021_p5 = scmp.ne.s32.totalorder %s13822_s3, %s12020_s1  ;;  %p12025_p10 = scmp.lt.u32.totalorder %s13822_s3, %s14062_s9 }
0x36dc   : > { %p12026_p12 = scmp.lt.u32.totalorder %s12024_s6, %s12020_s1  ;;  %p12028_p2 = scmp.lt.u32.totalorder %s12020_s1, %s13822_s3 }
0x36dd   : > { %p12022_p0 = pnand %p12021_p5, %p14064_p3 }
0x36de   : > { %p12027_p1 = por %p12026_p12, %p12025_p10 }
0x36df   : > { %p12023_p9 = pneg %p12022_p0 }
0x36e0   : > { %p12029_p4 = por %p12028_p2, %p12027_p1 }
0x36e2   : > { %p12030_p7 = pnand %p12029_p4, %p12023_p9 }
0x36e4   : > { %12033 = shalt.err (!%p12030_p7)
}
0x36e5   : > { %11542 = dma.vmem_to_hbm [thread:$0]  (%p14064_p3), %s13824_s2, 128, %s13822_s3, %s10200_s4  }
0x36e6 PF: > { %s14065_s5 = sld [smem:[#allocation65_spill]]  ;;  %s14066_s18 = sld [smem:[#allocation63_spill]] }
0x36e7   : > { %s14067_s15 = sld [smem:[#allocation69_spill]] }
0x36ec   : > { %p11574_p8 = scmp.ge.s32.totalorder %s14065_s5, 2  ;;  %s10225_s0 = sand.u32 1, %s14066_s18  }
0x36ed   : > { %p14068_p11 = scmp.ne.s32.totalorder %s14067_s15, 0  ;;  %s10226_s22 = scalar_lea.sflag [#allocation4], %s10225_s0 }
0x36ef   : > { %p11561_p13 = pnand %p11574_p8, %p14068_p11 }
0x36f1   : > { %12063 = dma.done.wait (!%p11561_p13), %s10226_s22, 128  }
0x36f2   : > { %12065 = vsyncadd (!%p11561_p13), %s10226_s22, 4294967168  ;;  %s14069_s22 = sld [smem:[#allocation66_spill]]  ;;  %s14070_s1 = sld [smem:[#allocation64_spill]] }
0x36f3   : > { %s14071_s18 = sld [smem:[#allocation67_spill]]  ;;  %s14072_s15 = smov %s12072_s16 }
0x36f8   : > { %p106_p6 = scmp.ge.s32.totalorder %s14069_s22, 4   ;;  %s14073_s16 = smov %s14070_s1 }
0x36fa   :  { %108 = sbr.rel (!%p106_p6) target bundleno = 114 (0x72), region = 351 }
0x3701   :  { %10231 = vsyncpa [#allocation3], 1 }
0x3702   :  { %10233 = vsyncpa [#allocation3 + $0x1], 1 }
0x3703   :  { %10234 = vsyncpa [#allocation6], 1 }
0x3704   :  { %10235 = vsyncpa [#allocation9], 1 }
0x3705   :  { %10236 = vsyncpa [#allocation4], 1 }
0x3706   :  { %10238 = vsyncpa [#allocation4 + $0x1], 1 }

</bundles_post_ra>
